<compile_context>
chip_gen: v5e
topology: v5e:2x2
jax: 0.10.0
libtpu: 0.0.40
codegen_flags: <defaults>
</compile_context>

<pallas_src>
import functools

import jax
import jax.numpy as jnp
from jax.experimental import pallas as pl
from jax.experimental.pallas import tpu as pltpu


def _layer_norm(x, g, b, eps=1e-5):
  mu = jnp.mean(x, axis=-1, keepdims=True)
  var = jnp.mean((x - mu) ** 2, axis=-1, keepdims=True)
  return (x - mu) * jax.lax.rsqrt(var + eps) * g + b


def _encoder_kernel(
    x_ref, mask_ref,
    wq_ref, bq_ref, wk_ref, bk_ref, wv_ref, bv_ref,
    wo_ref, bo_ref, ln1_g_ref, ln1_b_ref,
    w1_ref, b1_ref, w2_ref, b2_ref, ln2_g_ref, ln2_b_ref,
    out_ref, *att_refs, n_heads, d_k, d_v):
  """One or two branches (leading block axis) of the encoder layer, full batch."""
  nb, B, S1, D = x_ref.shape
  N = B * S1
  H = n_heads

  mask_add = mask_ref[...]                                # [B,S1,S1] 0 / -1e9

  for r in range(nb):                                     # nb==1 (v7x grid) or 2 (collapsed)
    x = x_ref[r]                                          # [B,S1,D] f32, cls already prepended
    xf = x.reshape(N, D)                                  # leading reshape: free
    xb = xf.astype(jnp.bfloat16)

    # Fused multi-head projections: three lane-dense [N,D] @ [D,H*dk] GEMMs.
    # (1/sqrt(d_k) is folded into wq/bq on the host.)
    q_all = jnp.dot(xb, wq_ref[r], preferred_element_type=jnp.float32) + bq_ref[r]
    k_all = jnp.dot(xb, wk_ref[r], preferred_element_type=jnp.float32) + bk_ref[r]
    v_all = jnp.dot(xb, wv_ref[r], preferred_element_type=jnp.float32) + bv_ref[r]

    # Split heads; K is produced pre-transposed so scores is a plain batched A@B.
    q = (q_all.reshape(B, S1, H, d_k).transpose(0, 2, 1, 3)
         .reshape(B * H, S1, d_k).astype(jnp.bfloat16))
    kT = (k_all.reshape(B, S1, H, d_k).transpose(0, 2, 3, 1)
          .reshape(B * H, d_k, S1).astype(jnp.bfloat16))
    v = (v_all.reshape(B, S1, H, d_v).transpose(0, 2, 1, 3)
         .reshape(B * H, S1, d_v).astype(jnp.bfloat16))

    scores = jnp.einsum('bqd,bds->bqs', q, kT,
                        preferred_element_type=jnp.float32)      # [B*H,S1,S1]
    scores = scores.reshape(B, H, S1, S1) + mask_add[:, None]

    # Numerically stable softmax with EXACT division (fixes row-sum assert).
    scores = scores - jnp.max(scores, axis=-1, keepdims=True)
    p = jnp.exp(scores)
    attn = p / jnp.sum(p, axis=-1, keepdims=True)                # [B,H,S1,S1] f32

    if att_refs:
      att_refs[0][r] = attn

    # Context + fused output projection (lane-dense [N, H*dv] @ [H*dv, D]).
    ctx = jnp.einsum('bqs,bsd->bqd',
                     attn.reshape(B * H, S1, S1).astype(jnp.bfloat16), v,
                     preferred_element_type=jnp.float32)         # [B*H,S1,dv]
    ctx_flat = (ctx.reshape(B, H, S1, d_v).transpose(0, 2, 1, 3)
                .reshape(N, H * d_v).astype(jnp.bfloat16))
    mha = jnp.dot(ctx_flat, wo_ref[r],
                  preferred_element_type=jnp.float32) + bo_ref[r]

    # Residual + LayerNorm 1.
    y = _layer_norm(mha + xf, ln1_g_ref[r], ln1_b_ref[r])

    # Position-wise FFN (Conv1d kernel=1 == Linear) + residual + LayerNorm 2.
    h1 = jnp.dot(y.astype(jnp.bfloat16), w1_ref[r],
                 preferred_element_type=jnp.float32) + b1_ref[r]
    h1 = jnp.maximum(h1, 0.0)
    f = jnp.dot(h1.astype(jnp.bfloat16), w2_ref[r],
                preferred_element_type=jnp.float32) + b2_ref[r]
    z = _layer_norm(f + y, ln2_g_ref[r], ln2_b_ref[r])

    out_ref[r] = z.reshape(B, S1, D)


_WEIGHT_NAMES = ("wq", "bq", "wk", "bk", "wv", "bv", "wo", "bo",
                 "ln1_g", "ln1_b", "w1", "b1", "w2", "b2", "ln2_g", "ln2_b")


def _prepare_branch(p, *, d_k):
  """Host-side weight prep: natural 2-D layouts, bf16 matmul operands, folded scale."""
  inv = 1.0 / jnp.sqrt(jnp.float32(d_k))
  return dict(
      wq=(p["wq"] * inv).astype(jnp.bfloat16),   # [D, H*dk]
      bq=(p["bq"] * inv).astype(jnp.float32),    # [1, H*dk]
      wk=p["wk"].astype(jnp.bfloat16),
      bk=p["bk"].astype(jnp.float32),
      wv=p["wv"].astype(jnp.bfloat16),
      bv=p["bv"].astype(jnp.float32),
      wo=p["wo"].astype(jnp.bfloat16),           # [H*dv, D]
      bo=p["bo"].astype(jnp.float32),
      ln1_g=p["ln1_g"].astype(jnp.float32),
      ln1_b=p["ln1_b"].astype(jnp.float32),
      w1=p["w1"].astype(jnp.bfloat16),
      b1=p["b1"].astype(jnp.float32),
      w2=p["w2"].astype(jnp.bfloat16),
      b2=p["b2"].astype(jnp.float32),
      ln2_g=p["ln2_g"].astype(jnp.float32),
      ln2_b=p["ln2_b"].astype(jnp.float32),
  )


def _v7x_core_parallel():
  """True only on multi-TC (v7x) chips, where the branch axis can split across cores."""
  try:
    kind = jax.devices()[0].device_kind.lower()
  except Exception:
    return False
  return "v7" in kind


def encoder_layer1(enc_inputs, self_attn_mask, params, *, d_k, d_v, n_heads,
                   return_attn=True):
  """enc_inputs: [B,S,D]; self_attn_mask: [B,S+1,S+1] (nonzero = masked)."""
  B, S, D = enc_inputs.shape
  S1 = S + 1
  assert self_attn_mask.shape == (B, S1, S1), self_attn_mask.shape

  # cls prepend done ONCE on host (no in-kernel sublane concat).
  def with_cls(cls):
    cls_b = jnp.broadcast_to(cls.reshape(1, 1, D), (B, 1, D)).astype(jnp.float32)
    return jnp.concatenate([cls_b, enc_inputs.astype(jnp.float32)], axis=1)

  x_stacked = jnp.stack([with_cls(params["local"]["cls"]),
                         with_cls(params["global"]["cls"])], axis=0)   # [2,B,S1,D]

  prep = [_prepare_branch(params["local"], d_k=d_k),
          _prepare_branch(params["global"], d_k=d_k)]
  stacked = [jnp.stack([prep[0][n], prep[1][n]], axis=0) for n in _WEIGHT_NAMES]

  # Additive mask: nonzero => masked (-1e9); shared by both branches.
  add_mask = jnp.where(self_attn_mask != 0, jnp.float32(-1e9), jnp.float32(0.0))

  if _v7x_core_parallel():
    grid, bb = (2,), 1                      # one branch per grid step, split across TCs
    sems = (pltpu.CORE_PARALLEL,)
  else:
    grid, bb = (1,), 2                      # single-TC: collapse grid, both branches in-kernel
    sems = ("arbitrary",)

  def branch_spec(arr):
    shape = tuple(arr.shape)
    nd = len(shape)
    if bb == 1:
      idx = lambda r, _nd=nd: (r,) + (0,) * (_nd - 1)
    else:
      idx = lambda r, _nd=nd: (0,) * _nd
    return pl.BlockSpec((bb,) + shape[1:], idx)

  in_specs = ([branch_spec(x_stacked),
               pl.BlockSpec((B, S1, S1), lambda r: (0, 0, 0))]
              + [branch_spec(w) for w in stacked])

  out_main = jax.ShapeDtypeStruct((2, B, S1, D), jnp.float32)
  if return_attn:
    out_att = jax.ShapeDtypeStruct((2, B, n_heads, S1, S1), jnp.float32)
    out_shape = (out_main, out_att)
    out_specs = (branch_spec(out_main), branch_spec(out_att))
  else:
    out_shape = out_main
    out_specs = branch_spec(out_main)

  kernel = functools.partial(_encoder_kernel, n_heads=n_heads, d_k=d_k, d_v=d_v)

  results = pl.pallas_call(
      kernel,
      grid=grid,
      in_specs=in_specs,
      out_specs=out_specs,
      out_shape=out_shape,
      compiler_params=pltpu.CompilerParams(dimension_semantics=sems),
  )(x_stacked, add_mask, *stacked)

  if return_attn:
    out, att = results
  else:
    out, att = results, None

  # torch.cat([local_ff, global_ff], dim=-1)
  enc_outputs = jnp.concatenate([out[0], out[1]], axis=-1)   # [B, S1, 2*D]
  return enc_outputs, att                                    # att: [2,B,H,S1,S1]


def _reference(enc_inputs, self_attn_mask, params, *, d_k, d_v, n_heads):
  """Pure-JAX f32 reference of the same forward pass (for tolerance check)."""
  B, S, D = enc_inputs.shape
  S1 = S + 1
  mask = self_attn_mask != 0
  outs, atts = [], []
  for name in ("local", "global"):
    p = params[name]
    cls = jnp.broadcast_to(p["cls"].reshape(1, 1, D), (B, 1, D))
    x = jnp.concatenate([cls, enc_inputs], axis=1)
    q = (x @ p["wq"] + p["bq"]).reshape(B, S1, n_heads, d_k).transpose(0, 2, 1, 3)
    k = (x @ p["wk"] + p["bk"]).reshape(B, S1, n_heads, d_k).transpose(0, 2, 1, 3)
    v = (x @ p["wv"] + p["bv"]).reshape(B, S1, n_heads, d_v).transpose(0, 2, 1, 3)
    scores = jnp.einsum('bhqd,bhkd->bhqk', q, k) / jnp.sqrt(jnp.float32(d_k))
    scores = jnp.where(mask[:, None], jnp.float32(-1e9), scores)
    attn = jax.nn.softmax(scores, axis=-1)
    ctx = (jnp.einsum('bhqk,bhkd->bhqd', attn, v)
           .transpose(0, 2, 1, 3).reshape(B, S1, n_heads * d_v))
    y = _layer_norm(ctx @ p["wo"] + p["bo"] + x, p["ln1_g"], p["ln1_b"])
    h = jnp.maximum(y @ p["w1"] + p["b1"], 0.0)
    f = h @ p["w2"] + p["b2"]
    z = _layer_norm(f + y, p["ln2_g"], p["ln2_b"])
    outs.append(z)
    atts.append(attn)
  return jnp.concatenate(outs, axis=-1), jnp.stack(atts, axis=0)


def init_params(key, d_model, d_k, d_v, d_ff, n_heads):
  """Deterministic synthetic parameters for both branches."""
  def branch(key):
    ks = jax.random.split(key, 8)
    s = 0.02
    return dict(
        cls=jax.random.normal(ks[0], (1, 1, d_model), jnp.float32),
        wq=s * jax.random.normal(ks[1], (d_model, n_heads * d_k), jnp.float32),
        bq=jnp.zeros((1, n_heads * d_k), jnp.float32),
        wk=s * jax.random.normal(ks[2], (d_model, n_heads * d_k), jnp.float32),
        bk=jnp.zeros((1, n_heads * d_k), jnp.float32),
        wv=s * jax.random.normal(ks[3], (d_model, n_heads * d_v), jnp.float32),
        bv=jnp.zeros((1, n_heads * d_v), jnp.float32),
        wo=s * jax.random.normal(ks[4], (n_heads * d_v, d_model), jnp.float32),
        bo=jnp.zeros((1, d_model), jnp.float32),
        ln1_g=jnp.ones((1, d_model), jnp.float32),
        ln1_b=jnp.zeros((1, d_model), jnp.float32),
        w1=s * jax.random.normal(ks[5], (d_model, d_ff), jnp.float32),
        b1=jnp.zeros((1, d_ff), jnp.float32),
        w2=s * jax.random.normal(ks[6], (d_ff, d_model), jnp.float32),
        b2=jnp.zeros((1, d_model), jnp.float32),
        ln2_g=jnp.ones((1, d_model), jnp.float32),
        ln2_b=jnp.zeros((1, d_model), jnp.float32),
    )
  k_local, k_global = jax.random.split(key)
  return {"local": branch(k_local), "global": branch(k_global)}


if __name__ == "__main__":
  d_model, d_k, d_v, d_ff, n_heads = 32, 8, 8, 64, 4
  B, S = 2, 8
  S1 = S + 1  # +1 for cls token

  key = jax.random.PRNGKey(0)
  k_params, k_x = jax.random.split(key)
  params = init_params(k_params, d_model, d_k, d_v, d_ff, n_heads)

  enc_inputs = jax.random.normal(k_x, (B, S, d_model), jnp.float32)
  # No masked positions (all zeros); shape matches the cls-extended sequence.
  self_attn_mask = jnp.zeros((B, S1, S1), jnp.float32)

  enc_outputs, att = encoder_layer1(
      enc_inputs, self_attn_mask, params, d_k=d_k, d_v=d_v, n_heads=n_heads)
  jax.block_until_ready((enc_outputs, att))

  assert enc_outputs.shape == (B, S1, 2 * d_model), enc_outputs.shape
  assert att.shape == (2, B, n_heads, S1, S1), att.shape
  assert bool(jnp.all(jnp.isfinite(enc_outputs)))
  # Exact-division softmax: rows sum to 1 within f32 precision.
  assert bool(jnp.allclose(jnp.sum(att, axis=-1), 1.0, atol=1e-5))

  # Tolerance check against a pure-JAX f32 reference (kernel uses bf16 matmuls).
  ref_out, ref_att = _reference(enc_inputs, self_attn_mask, params,
                                d_k=d_k, d_v=d_v, n_heads=n_heads)
  assert bool(jnp.allclose(enc_outputs, ref_out, atol=1e-1)), \
      float(jnp.max(jnp.abs(enc_outputs - ref_out)))
  assert bool(jnp.allclose(att, ref_att, atol=3e-2)), \
      float(jnp.max(jnp.abs(att - ref_att)))

  print("KERNEL_OK")
</pallas_src>

<mosaic_0001>
module attributes {stable_mosaic.version = 11 : i64} {
  func.func @_encoder_kernel(%arg0: i32, %arg1: memref<2x2x9x32xf32, #tpu.memory_space<vmem>>, %arg2: memref<2x9x9xf32, #tpu.memory_space<vmem>>, %arg3: memref<2x32x32xbf16, #tpu.memory_space<vmem>>, %arg4: memref<2x1x32xf32, #tpu.memory_space<vmem>>, %arg5: memref<2x32x32xbf16, #tpu.memory_space<vmem>>, %arg6: memref<2x1x32xf32, #tpu.memory_space<vmem>>, %arg7: memref<2x32x32xbf16, #tpu.memory_space<vmem>>, %arg8: memref<2x1x32xf32, #tpu.memory_space<vmem>>, %arg9: memref<2x32x32xbf16, #tpu.memory_space<vmem>>, %arg10: memref<2x1x32xf32, #tpu.memory_space<vmem>>, %arg11: memref<2x1x32xf32, #tpu.memory_space<vmem>>, %arg12: memref<2x1x32xf32, #tpu.memory_space<vmem>>, %arg13: memref<2x32x64xbf16, #tpu.memory_space<vmem>>, %arg14: memref<2x1x64xf32, #tpu.memory_space<vmem>>, %arg15: memref<2x64x32xbf16, #tpu.memory_space<vmem>>, %arg16: memref<2x1x32xf32, #tpu.memory_space<vmem>>, %arg17: memref<2x1x32xf32, #tpu.memory_space<vmem>>, %arg18: memref<2x1x32xf32, #tpu.memory_space<vmem>>, %arg19: memref<2x2x9x32xf32, #tpu.memory_space<vmem>>, %arg20: memref<2x2x4x9x9xf32, #tpu.memory_space<vmem>>) attributes {dimension_semantics = [#tpu.dimension_semantics<arbitrary>], iteration_bounds = array<i64: 1>, scalar_prefetch = 0 : i64, scratch_operands = 0 : i64, tpu.core_type = #tpu.core_type<tc>, window_params = [{pipeline_mode = #tpu.pipeline_mode<synchronous>, transform_indices = @transform_0, window_bounds = array<i64: 2, 2, 9, 32>}, {pipeline_mode = #tpu.pipeline_mode<synchronous>, transform_indices = @transform_1, window_bounds = array<i64: 2, 9, 9>}, {pipeline_mode = #tpu.pipeline_mode<synchronous>, transform_indices = @transform_2, window_bounds = array<i64: 2, 32, 32>}, {pipeline_mode = #tpu.pipeline_mode<synchronous>, transform_indices = @transform_3, window_bounds = array<i64: 2, 1, 32>}, {pipeline_mode = #tpu.pipeline_mode<synchronous>, transform_indices = @transform_4, window_bounds = array<i64: 2, 32, 32>}, {pipeline_mode = #tpu.pipeline_mode<synchronous>, transform_indices = @transform_5, window_bounds = array<i64: 2, 1, 32>}, {pipeline_mode = #tpu.pipeline_mode<synchronous>, transform_indices = @transform_6, window_bounds = array<i64: 2, 32, 32>}, {pipeline_mode = #tpu.pipeline_mode<synchronous>, transform_indices = @transform_7, window_bounds = array<i64: 2, 1, 32>}, {pipeline_mode = #tpu.pipeline_mode<synchronous>, transform_indices = @transform_8, window_bounds = array<i64: 2, 32, 32>}, {pipeline_mode = #tpu.pipeline_mode<synchronous>, transform_indices = @transform_9, window_bounds = array<i64: 2, 1, 32>}, {pipeline_mode = #tpu.pipeline_mode<synchronous>, transform_indices = @transform_10, window_bounds = array<i64: 2, 1, 32>}, {pipeline_mode = #tpu.pipeline_mode<synchronous>, transform_indices = @transform_11, window_bounds = array<i64: 2, 1, 32>}, {pipeline_mode = #tpu.pipeline_mode<synchronous>, transform_indices = @transform_12, window_bounds = array<i64: 2, 32, 64>}, {pipeline_mode = #tpu.pipeline_mode<synchronous>, transform_indices = @transform_13, window_bounds = array<i64: 2, 1, 64>}, {pipeline_mode = #tpu.pipeline_mode<synchronous>, transform_indices = @transform_14, window_bounds = array<i64: 2, 64, 32>}, {pipeline_mode = #tpu.pipeline_mode<synchronous>, transform_indices = @transform_15, window_bounds = array<i64: 2, 1, 32>}, {pipeline_mode = #tpu.pipeline_mode<synchronous>, transform_indices = @transform_16, window_bounds = array<i64: 2, 1, 32>}, {pipeline_mode = #tpu.pipeline_mode<synchronous>, transform_indices = @transform_17, window_bounds = array<i64: 2, 1, 32>}, {pipeline_mode = #tpu.pipeline_mode<synchronous>, transform_indices = @transform_18, window_bounds = array<i64: 2, 2, 9, 32>}, {pipeline_mode = #tpu.pipeline_mode<synchronous>, transform_indices = @transform_19, window_bounds = array<i64: 2, 2, 4, 9, 9>}]} {
    %c0 = arith.constant 0 : index
    %c0_0 = arith.constant 0 : index
    %c0_1 = arith.constant 0 : index
    %0 = vector.load %arg2[%c0, %c0_0, %c0_1] : memref<2x9x9xf32, #tpu.memory_space<vmem>>, vector<2x9x9xf32>
    %c0_2 = arith.constant 0 : index
    %c0_3 = arith.constant 0 : index
    %c0_4 = arith.constant 0 : index
    %c0_5 = arith.constant 0 : index
    %1 = vector.load %arg1[%c0_2, %c0_3, %c0_4, %c0_5] : memref<2x2x9x32xf32, #tpu.memory_space<vmem>>, vector<1x2x9x32xf32>
    %2 = vector.shape_cast %1 : vector<1x2x9x32xf32> to vector<2x9x32xf32>
    %3 = vector.shape_cast %2 : vector<2x9x32xf32> to vector<18x32xf32>
    %4 = arith.truncf %3 : vector<18x32xf32> to vector<18x32xbf16>
    %c0_6 = arith.constant 0 : index
    %c0_7 = arith.constant 0 : index
    %c0_8 = arith.constant 0 : index
    %5 = vector.load %arg3[%c0_6, %c0_7, %c0_8] : memref<2x32x32xbf16, #tpu.memory_space<vmem>>, vector<1x32x32xbf16>
    %6 = vector.shape_cast %5 : vector<1x32x32xbf16> to vector<32x32xbf16>
    %cst = arith.constant dense<0.000000e+00> : vector<18x32xf32>
    %7 = tpu.matmul %4, %6, %cst {dimension_numbers = #tpu.dot_dimension_numbers<[1], [0], [0], [1], [0, 0, 1, 1], [], []>} : vector<18x32xbf16>, vector<32x32xbf16>, vector<18x32xf32> -> vector<18x32xf32>
    %c0_9 = arith.constant 0 : index
    %c0_10 = arith.constant 0 : index
    %c0_11 = arith.constant 0 : index
    %8 = vector.load %arg4[%c0_9, %c0_10, %c0_11] : memref<2x1x32xf32, #tpu.memory_space<vmem>>, vector<1x1x32xf32>
    %9 = vector.shape_cast %8 : vector<1x1x32xf32> to vector<1x32xf32>
    %10 = vector.broadcast %9 : vector<1x32xf32> to vector<18x32xf32>
    %11 = arith.addf %7, %10 : vector<18x32xf32>
    %c0_12 = arith.constant 0 : index
    %c0_13 = arith.constant 0 : index
    %c0_14 = arith.constant 0 : index
    %12 = vector.load %arg5[%c0_12, %c0_13, %c0_14] : memref<2x32x32xbf16, #tpu.memory_space<vmem>>, vector<1x32x32xbf16>
    %13 = vector.shape_cast %12 : vector<1x32x32xbf16> to vector<32x32xbf16>
    %cst_15 = arith.constant dense<0.000000e+00> : vector<18x32xf32>
    %14 = tpu.matmul %4, %13, %cst_15 {dimension_numbers = #tpu.dot_dimension_numbers<[1], [0], [0], [1], [0, 0, 1, 1], [], []>} : vector<18x32xbf16>, vector<32x32xbf16>, vector<18x32xf32> -> vector<18x32xf32>
    %c0_16 = arith.constant 0 : index
    %c0_17 = arith.constant 0 : index
    %c0_18 = arith.constant 0 : index
    %15 = vector.load %arg6[%c0_16, %c0_17, %c0_18] : memref<2x1x32xf32, #tpu.memory_space<vmem>>, vector<1x1x32xf32>
    %16 = vector.shape_cast %15 : vector<1x1x32xf32> to vector<1x32xf32>
    %17 = vector.broadcast %16 : vector<1x32xf32> to vector<18x32xf32>
    %18 = arith.addf %14, %17 : vector<18x32xf32>
    %c0_19 = arith.constant 0 : index
    %c0_20 = arith.constant 0 : index
    %c0_21 = arith.constant 0 : index
    %19 = vector.load %arg7[%c0_19, %c0_20, %c0_21] : memref<2x32x32xbf16, #tpu.memory_space<vmem>>, vector<1x32x32xbf16>
    %20 = vector.shape_cast %19 : vector<1x32x32xbf16> to vector<32x32xbf16>
    %cst_22 = arith.constant dense<0.000000e+00> : vector<18x32xf32>
    %21 = tpu.matmul %4, %20, %cst_22 {dimension_numbers = #tpu.dot_dimension_numbers<[1], [0], [0], [1], [0, 0, 1, 1], [], []>} : vector<18x32xbf16>, vector<32x32xbf16>, vector<18x32xf32> -> vector<18x32xf32>
    %c0_23 = arith.constant 0 : index
    %c0_24 = arith.constant 0 : index
    %c0_25 = arith.constant 0 : index
    %22 = vector.load %arg8[%c0_23, %c0_24, %c0_25] : memref<2x1x32xf32, #tpu.memory_space<vmem>>, vector<1x1x32xf32>
    %23 = vector.shape_cast %22 : vector<1x1x32xf32> to vector<1x32xf32>
    %24 = vector.broadcast %23 : vector<1x32xf32> to vector<18x32xf32>
    %25 = arith.addf %21, %24 : vector<18x32xf32>
    %26 = vector.shape_cast %11 : vector<18x32xf32> to vector<2x9x4x8xf32>
    %27 = tpu.transpose %26, [0, 2, 1, 3] : vector<2x9x4x8xf32> -> vector<2x4x9x8xf32>
    %28 = vector.shape_cast %27 : vector<2x4x9x8xf32> to vector<8x9x8xf32>
    %29 = arith.truncf %28 : vector<8x9x8xf32> to vector<8x9x8xbf16>
    %30 = vector.shape_cast %18 : vector<18x32xf32> to vector<2x9x4x8xf32>
    %31 = tpu.transpose %30, [0, 2, 3, 1] : vector<2x9x4x8xf32> -> vector<2x4x8x9xf32>
    %32 = vector.shape_cast %31 : vector<2x4x8x9xf32> to vector<8x8x9xf32>
    %33 = arith.truncf %32 : vector<8x8x9xf32> to vector<8x8x9xbf16>
    %34 = vector.shape_cast %25 : vector<18x32xf32> to vector<2x9x4x8xf32>
    %35 = tpu.transpose %34, [0, 2, 1, 3] : vector<2x9x4x8xf32> -> vector<2x4x9x8xf32>
    %36 = vector.shape_cast %35 : vector<2x4x9x8xf32> to vector<8x9x8xf32>
    %37 = arith.truncf %36 : vector<8x9x8xf32> to vector<8x9x8xbf16>
    "tpu.trace_start"() <{level = 10 : i32, message = "bqd,bds->bqs"}> : () -> ()
    %cst_26 = arith.constant dense<0.000000e+00> : vector<8x9x9xf32>
    %38 = tpu.matmul %29, %33, %cst_26 {dimension_numbers = #tpu.dot_dimension_numbers<[2], [1], [1], [2], [0, 0, 0, 1, 1, 2], [0], [0]>} : vector<8x9x8xbf16>, vector<8x8x9xbf16>, vector<8x9x9xf32> -> vector<8x9x9xf32>
    "tpu.trace_stop"() : () -> ()
    %39 = vector.shape_cast %38 : vector<8x9x9xf32> to vector<2x4x9x9xf32>
    %40 = vector.shape_cast %0 : vector<2x9x9xf32> to vector<2x1x9x9xf32>
    %41 = vector.broadcast %40 : vector<2x1x9x9xf32> to vector<2x4x9x9xf32>
    %42 = arith.addf %39, %41 : vector<2x4x9x9xf32>
    %cst_27 = arith.constant dense<0xFF800000> : vector<2x4x9xf32>
    %43 = vector.multi_reduction <maximumf>, %42, %cst_27 [3] : vector<2x4x9x9xf32> to vector<2x4x9xf32>
    %44 = vector.shape_cast %43 : vector<2x4x9xf32> to vector<2x4x9x1xf32>
    %45 = vector.broadcast %44 : vector<2x4x9x1xf32> to vector<2x4x9x9xf32>
    %46 = arith.subf %42, %45 : vector<2x4x9x9xf32>
    %47 = math.exp %46 : vector<2x4x9x9xf32>
    %cst_28 = arith.constant dense<0.000000e+00> : vector<2x4x9xf32>
    %48 = vector.multi_reduction <add>, %47, %cst_28 [3] : vector<2x4x9x9xf32> to vector<2x4x9xf32>
    %49 = vector.shape_cast %48 : vector<2x4x9xf32> to vector<2x4x9x1xf32>
    %50 = vector.broadcast %49 : vector<2x4x9x1xf32> to vector<2x4x9x9xf32>
    %51 = arith.divf %47, %50 : vector<2x4x9x9xf32>
    %c0_29 = arith.constant 0 : index
    %c0_30 = arith.constant 0 : index
    %c0_31 = arith.constant 0 : index
    %c0_32 = arith.constant 0 : index
    %c0_33 = arith.constant 0 : index
    %52 = vector.load %arg20[%c0_29, %c0_30, %c0_31, %c0_32, %c0_33] : memref<2x2x4x9x9xf32, #tpu.memory_space<vmem>>, vector<1x2x4x9x9xf32>
    %53 = vector.shape_cast %52 : vector<1x2x4x9x9xf32> to vector<2x4x9x9xf32>
    %54 = vector.shape_cast %51 : vector<2x4x9x9xf32> to vector<1x2x4x9x9xf32>
    tpu.vector_store %arg20[%c0_29, %c0_30, %c0_31, %c0_32, %c0_33], %54 {strides = array<i32>} : memref<2x2x4x9x9xf32, #tpu.memory_space<vmem>>, vector<1x2x4x9x9xf32>,
    %55 = vector.shape_cast %51 : vector<2x4x9x9xf32> to vector<8x9x9xf32>
    %56 = arith.truncf %55 : vector<8x9x9xf32> to vector<8x9x9xbf16>
    "tpu.trace_start"() <{level = 10 : i32, message = "bqs,bsd->bqd"}> : () -> ()
    %cst_34 = arith.constant dense<0.000000e+00> : vector<8x9x8xf32>
    %57 = tpu.matmul %56, %37, %cst_34 {dimension_numbers = #tpu.dot_dimension_numbers<[2], [1], [1], [2], [0, 0, 0, 1, 1, 2], [0], [0]>} : vector<8x9x9xbf16>, vector<8x9x8xbf16>, vector<8x9x8xf32> -> vector<8x9x8xf32>
    "tpu.trace_stop"() : () -> ()
    %58 = vector.shape_cast %57 : vector<8x9x8xf32> to vector<2x4x9x8xf32>
    %59 = tpu.transpose %58, [0, 2, 1, 3] : vector<2x4x9x8xf32> -> vector<2x9x4x8xf32>
    %60 = vector.shape_cast %59 : vector<2x9x4x8xf32> to vector<18x32xf32>
    %61 = arith.truncf %60 : vector<18x32xf32> to vector<18x32xbf16>
    %c0_35 = arith.constant 0 : index
    %c0_36 = arith.constant 0 : index
    %c0_37 = arith.constant 0 : index
    %62 = vector.load %arg9[%c0_35, %c0_36, %c0_37] : memref<2x32x32xbf16, #tpu.memory_space<vmem>>, vector<1x32x32xbf16>
    %63 = vector.shape_cast %62 : vector<1x32x32xbf16> to vector<32x32xbf16>
    %cst_38 = arith.constant dense<0.000000e+00> : vector<18x32xf32>
    %64 = tpu.matmul %61, %63, %cst_38 {dimension_numbers = #tpu.dot_dimension_numbers<[1], [0], [0], [1], [0, 0, 1, 1], [], []>} : vector<18x32xbf16>, vector<32x32xbf16>, vector<18x32xf32> -> vector<18x32xf32>
    %c0_39 = arith.constant 0 : index
    %c0_40 = arith.constant 0 : index
    %c0_41 = arith.constant 0 : index
    %65 = vector.load %arg10[%c0_39, %c0_40, %c0_41] : memref<2x1x32xf32, #tpu.memory_space<vmem>>, vector<1x1x32xf32>
    %66 = vector.shape_cast %65 : vector<1x1x32xf32> to vector<1x32xf32>
    %67 = vector.broadcast %66 : vector<1x32xf32> to vector<18x32xf32>
    %68 = arith.addf %64, %67 : vector<18x32xf32>
    %69 = arith.addf %68, %3 : vector<18x32xf32>
    %c0_42 = arith.constant 0 : index
    %c0_43 = arith.constant 0 : index
    %c0_44 = arith.constant 0 : index
    %70 = vector.load %arg11[%c0_42, %c0_43, %c0_44] : memref<2x1x32xf32, #tpu.memory_space<vmem>>, vector<1x1x32xf32>
    %71 = vector.shape_cast %70 : vector<1x1x32xf32> to vector<1x32xf32>
    %c0_45 = arith.constant 0 : index
    %c0_46 = arith.constant 0 : index
    %c0_47 = arith.constant 0 : index
    %72 = vector.load %arg12[%c0_45, %c0_46, %c0_47] : memref<2x1x32xf32, #tpu.memory_space<vmem>>, vector<1x1x32xf32>
    %73 = vector.shape_cast %72 : vector<1x1x32xf32> to vector<1x32xf32>
    %cst_48 = arith.constant dense<0.000000e+00> : vector<18xf32>
    %74 = vector.multi_reduction <add>, %69, %cst_48 [1] : vector<18x32xf32> to vector<18xf32>
    %75 = vector.shape_cast %74 : vector<18xf32> to vector<18x1xf32>
    %cst_49 = arith.constant 3.200000e+01 : f32
    %76 = vector.broadcast %cst_49 : f32 to vector<18x1xf32>
    %77 = arith.divf %75, %76 : vector<18x1xf32>
    %78 = vector.broadcast %77 : vector<18x1xf32> to vector<18x32xf32>
    %79 = arith.subf %69, %78 : vector<18x32xf32>
    %80 = arith.mulf %79, %79 : vector<18x32xf32>
    %cst_50 = arith.constant dense<0.000000e+00> : vector<18xf32>
    %81 = vector.multi_reduction <add>, %80, %cst_50 [1] : vector<18x32xf32> to vector<18xf32>
    %82 = vector.shape_cast %81 : vector<18xf32> to vector<18x1xf32>
    %cst_51 = arith.constant 3.200000e+01 : f32
    %83 = vector.broadcast %cst_51 : f32 to vector<18x1xf32>
    %84 = arith.divf %82, %83 : vector<18x1xf32>
    %85 = vector.broadcast %77 : vector<18x1xf32> to vector<18x32xf32>
    %86 = arith.subf %69, %85 : vector<18x32xf32>
    %cst_52 = arith.constant 9.99999974E-6 : f32
    %87 = vector.broadcast %cst_52 : f32 to vector<18x1xf32>
    %88 = arith.addf %84, %87 : vector<18x1xf32>
    %89 = math.rsqrt %88 : vector<18x1xf32>
    %90 = vector.broadcast %89 : vector<18x1xf32> to vector<18x32xf32>
    %91 = arith.mulf %86, %90 : vector<18x32xf32>
    %92 = vector.broadcast %71 : vector<1x32xf32> to vector<18x32xf32>
    %93 = arith.mulf %91, %92 : vector<18x32xf32>
    %94 = vector.broadcast %73 : vector<1x32xf32> to vector<18x32xf32>
    %95 = arith.addf %93, %94 : vector<18x32xf32>
    %96 = arith.truncf %95 : vector<18x32xf32> to vector<18x32xbf16>
    %c0_53 = arith.constant 0 : index
    %c0_54 = arith.constant 0 : index
    %c0_55 = arith.constant 0 : index
    %97 = vector.load %arg13[%c0_53, %c0_54, %c0_55] : memref<2x32x64xbf16, #tpu.memory_space<vmem>>, vector<1x32x64xbf16>
    %98 = vector.shape_cast %97 : vector<1x32x64xbf16> to vector<32x64xbf16>
    %cst_56 = arith.constant dense<0.000000e+00> : vector<18x64xf32>
    %99 = tpu.matmul %96, %98, %cst_56 {dimension_numbers = #tpu.dot_dimension_numbers<[1], [0], [0], [1], [0, 0, 1, 1], [], []>} : vector<18x32xbf16>, vector<32x64xbf16>, vector<18x64xf32> -> vector<18x64xf32>
    %c0_57 = arith.constant 0 : index
    %c0_58 = arith.constant 0 : index
    %c0_59 = arith.constant 0 : index
    %100 = vector.load %arg14[%c0_57, %c0_58, %c0_59] : memref<2x1x64xf32, #tpu.memory_space<vmem>>, vector<1x1x64xf32>
    %101 = vector.shape_cast %100 : vector<1x1x64xf32> to vector<1x64xf32>
    %102 = vector.broadcast %101 : vector<1x64xf32> to vector<18x64xf32>
    %103 = arith.addf %99, %102 : vector<18x64xf32>
    %cst_60 = arith.constant 0.000000e+00 : f32
    %104 = vector.broadcast %cst_60 : f32 to vector<18x64xf32>
    %105 = arith.maximumf %103, %104 : vector<18x64xf32>
    %106 = arith.truncf %105 : vector<18x64xf32> to vector<18x64xbf16>
    %c0_61 = arith.constant 0 : index
    %c0_62 = arith.constant 0 : index
    %c0_63 = arith.constant 0 : index
    %107 = vector.load %arg15[%c0_61, %c0_62, %c0_63] : memref<2x64x32xbf16, #tpu.memory_space<vmem>>, vector<1x64x32xbf16>
    %108 = vector.shape_cast %107 : vector<1x64x32xbf16> to vector<64x32xbf16>
    %cst_64 = arith.constant dense<0.000000e+00> : vector<18x32xf32>
    %109 = tpu.matmul %106, %108, %cst_64 {dimension_numbers = #tpu.dot_dimension_numbers<[1], [0], [0], [1], [0, 0, 1, 1], [], []>} : vector<18x64xbf16>, vector<64x32xbf16>, vector<18x32xf32> -> vector<18x32xf32>
    %c0_65 = arith.constant 0 : index
    %c0_66 = arith.constant 0 : index
    %c0_67 = arith.constant 0 : index
    %110 = vector.load %arg16[%c0_65, %c0_66, %c0_67] : memref<2x1x32xf32, #tpu.memory_space<vmem>>, vector<1x1x32xf32>
    %111 = vector.shape_cast %110 : vector<1x1x32xf32> to vector<1x32xf32>
    %112 = vector.broadcast %111 : vector<1x32xf32> to vector<18x32xf32>
    %113 = arith.addf %109, %112 : vector<18x32xf32>
    %114 = arith.addf %113, %95 : vector<18x32xf32>
    %c0_68 = arith.constant 0 : index
    %c0_69 = arith.constant 0 : index
    %c0_70 = arith.constant 0 : index
    %115 = vector.load %arg17[%c0_68, %c0_69, %c0_70] : memref<2x1x32xf32, #tpu.memory_space<vmem>>, vector<1x1x32xf32>
    %116 = vector.shape_cast %115 : vector<1x1x32xf32> to vector<1x32xf32>
    %c0_71 = arith.constant 0 : index
    %c0_72 = arith.constant 0 : index
    %c0_73 = arith.constant 0 : index
    %117 = vector.load %arg18[%c0_71, %c0_72, %c0_73] : memref<2x1x32xf32, #tpu.memory_space<vmem>>, vector<1x1x32xf32>
    %118 = vector.shape_cast %117 : vector<1x1x32xf32> to vector<1x32xf32>
    %cst_74 = arith.constant dense<0.000000e+00> : vector<18xf32>
    %119 = vector.multi_reduction <add>, %114, %cst_74 [1] : vector<18x32xf32> to vector<18xf32>
    %120 = vector.shape_cast %119 : vector<18xf32> to vector<18x1xf32>
    %cst_75 = arith.constant 3.200000e+01 : f32
    %121 = vector.broadcast %cst_75 : f32 to vector<18x1xf32>
    %122 = arith.divf %120, %121 : vector<18x1xf32>
    %123 = vector.broadcast %122 : vector<18x1xf32> to vector<18x32xf32>
    %124 = arith.subf %114, %123 : vector<18x32xf32>
    %125 = arith.mulf %124, %124 : vector<18x32xf32>
    %cst_76 = arith.constant dense<0.000000e+00> : vector<18xf32>
    %126 = vector.multi_reduction <add>, %125, %cst_76 [1] : vector<18x32xf32> to vector<18xf32>
    %127 = vector.shape_cast %126 : vector<18xf32> to vector<18x1xf32>
    %cst_77 = arith.constant 3.200000e+01 : f32
    %128 = vector.broadcast %cst_77 : f32 to vector<18x1xf32>
    %129 = arith.divf %127, %128 : vector<18x1xf32>
    %130 = vector.broadcast %122 : vector<18x1xf32> to vector<18x32xf32>
    %131 = arith.subf %114, %130 : vector<18x32xf32>
    %cst_78 = arith.constant 9.99999974E-6 : f32
    %132 = vector.broadcast %cst_78 : f32 to vector<18x1xf32>
    %133 = arith.addf %129, %132 : vector<18x1xf32>
    %134 = math.rsqrt %133 : vector<18x1xf32>
    %135 = vector.broadcast %134 : vector<18x1xf32> to vector<18x32xf32>
    %136 = arith.mulf %131, %135 : vector<18x32xf32>
    %137 = vector.broadcast %116 : vector<1x32xf32> to vector<18x32xf32>
    %138 = arith.mulf %136, %137 : vector<18x32xf32>
    %139 = vector.broadcast %118 : vector<1x32xf32> to vector<18x32xf32>
    %140 = arith.addf %138, %139 : vector<18x32xf32>
    %141 = vector.shape_cast %140 : vector<18x32xf32> to vector<2x9x32xf32>
    %c0_79 = arith.constant 0 : index
    %c0_80 = arith.constant 0 : index
    %c0_81 = arith.constant 0 : index
    %c0_82 = arith.constant 0 : index
    %142 = vector.load %arg19[%c0_79, %c0_80, %c0_81, %c0_82] : memref<2x2x9x32xf32, #tpu.memory_space<vmem>>, vector<1x2x9x32xf32>
    %143 = vector.shape_cast %142 : vector<1x2x9x32xf32> to vector<2x9x32xf32>
    %144 = vector.shape_cast %141 : vector<2x9x32xf32> to vector<1x2x9x32xf32>
    tpu.vector_store %arg19[%c0_79, %c0_80, %c0_81, %c0_82], %144 {strides = array<i32>} : memref<2x2x9x32xf32, #tpu.memory_space<vmem>>, vector<1x2x9x32xf32>,
    %c1 = arith.constant 1 : index
    %c0_83 = arith.constant 0 : index
    %c0_84 = arith.constant 0 : index
    %c0_85 = arith.constant 0 : index
    %145 = vector.load %arg1[%c1, %c0_83, %c0_84, %c0_85] : memref<2x2x9x32xf32, #tpu.memory_space<vmem>>, vector<1x2x9x32xf32>
    %146 = vector.shape_cast %145 : vector<1x2x9x32xf32> to vector<2x9x32xf32>
    %147 = vector.shape_cast %146 : vector<2x9x32xf32> to vector<18x32xf32>
    %148 = arith.truncf %147 : vector<18x32xf32> to vector<18x32xbf16>
    %c1_86 = arith.constant 1 : index
    %c0_87 = arith.constant 0 : index
    %c0_88 = arith.constant 0 : index
    %149 = vector.load %arg3[%c1_86, %c0_87, %c0_88] : memref<2x32x32xbf16, #tpu.memory_space<vmem>>, vector<1x32x32xbf16>
    %150 = vector.shape_cast %149 : vector<1x32x32xbf16> to vector<32x32xbf16>
    %cst_89 = arith.constant dense<0.000000e+00> : vector<18x32xf32>
    %151 = tpu.matmul %148, %150, %cst_89 {dimension_numbers = #tpu.dot_dimension_numbers<[1], [0], [0], [1], [0, 0, 1, 1], [], []>} : vector<18x32xbf16>, vector<32x32xbf16>, vector<18x32xf32> -> vector<18x32xf32>
    %c1_90 = arith.constant 1 : index
    %c0_91 = arith.constant 0 : index
    %c0_92 = arith.constant 0 : index
    %152 = vector.load %arg4[%c1_90, %c0_91, %c0_92] : memref<2x1x32xf32, #tpu.memory_space<vmem>>, vector<1x1x32xf32>
    %153 = vector.shape_cast %152 : vector<1x1x32xf32> to vector<1x32xf32>
    %154 = vector.broadcast %153 : vector<1x32xf32> to vector<18x32xf32>
    %155 = arith.addf %151, %154 : vector<18x32xf32>
    %c1_93 = arith.constant 1 : index
    %c0_94 = arith.constant 0 : index
    %c0_95 = arith.constant 0 : index
    %156 = vector.load %arg5[%c1_93, %c0_94, %c0_95] : memref<2x32x32xbf16, #tpu.memory_space<vmem>>, vector<1x32x32xbf16>
    %157 = vector.shape_cast %156 : vector<1x32x32xbf16> to vector<32x32xbf16>
    %cst_96 = arith.constant dense<0.000000e+00> : vector<18x32xf32>
    %158 = tpu.matmul %148, %157, %cst_96 {dimension_numbers = #tpu.dot_dimension_numbers<[1], [0], [0], [1], [0, 0, 1, 1], [], []>} : vector<18x32xbf16>, vector<32x32xbf16>, vector<18x32xf32> -> vector<18x32xf32>
    %c1_97 = arith.constant 1 : index
    %c0_98 = arith.constant 0 : index
    %c0_99 = arith.constant 0 : index
    %159 = vector.load %arg6[%c1_97, %c0_98, %c0_99] : memref<2x1x32xf32, #tpu.memory_space<vmem>>, vector<1x1x32xf32>
    %160 = vector.shape_cast %159 : vector<1x1x32xf32> to vector<1x32xf32>
    %161 = vector.broadcast %160 : vector<1x32xf32> to vector<18x32xf32>
    %162 = arith.addf %158, %161 : vector<18x32xf32>
    %c1_100 = arith.constant 1 : index
    %c0_101 = arith.constant 0 : index
    %c0_102 = arith.constant 0 : index
    %163 = vector.load %arg7[%c1_100, %c0_101, %c0_102] : memref<2x32x32xbf16, #tpu.memory_space<vmem>>, vector<1x32x32xbf16>
    %164 = vector.shape_cast %163 : vector<1x32x32xbf16> to vector<32x32xbf16>
    %cst_103 = arith.constant dense<0.000000e+00> : vector<18x32xf32>
    %165 = tpu.matmul %148, %164, %cst_103 {dimension_numbers = #tpu.dot_dimension_numbers<[1], [0], [0], [1], [0, 0, 1, 1], [], []>} : vector<18x32xbf16>, vector<32x32xbf16>, vector<18x32xf32> -> vector<18x32xf32>
    %c1_104 = arith.constant 1 : index
    %c0_105 = arith.constant 0 : index
    %c0_106 = arith.constant 0 : index
    %166 = vector.load %arg8[%c1_104, %c0_105, %c0_106] : memref<2x1x32xf32, #tpu.memory_space<vmem>>, vector<1x1x32xf32>
    %167 = vector.shape_cast %166 : vector<1x1x32xf32> to vector<1x32xf32>
    %168 = vector.broadcast %167 : vector<1x32xf32> to vector<18x32xf32>
    %169 = arith.addf %165, %168 : vector<18x32xf32>
    %170 = vector.shape_cast %155 : vector<18x32xf32> to vector<2x9x4x8xf32>
    %171 = tpu.transpose %170, [0, 2, 1, 3] : vector<2x9x4x8xf32> -> vector<2x4x9x8xf32>
    %172 = vector.shape_cast %171 : vector<2x4x9x8xf32> to vector<8x9x8xf32>
    %173 = arith.truncf %172 : vector<8x9x8xf32> to vector<8x9x8xbf16>
    %174 = vector.shape_cast %162 : vector<18x32xf32> to vector<2x9x4x8xf32>
    %175 = tpu.transpose %174, [0, 2, 3, 1] : vector<2x9x4x8xf32> -> vector<2x4x8x9xf32>
    %176 = vector.shape_cast %175 : vector<2x4x8x9xf32> to vector<8x8x9xf32>
    %177 = arith.truncf %176 : vector<8x8x9xf32> to vector<8x8x9xbf16>
    %178 = vector.shape_cast %169 : vector<18x32xf32> to vector<2x9x4x8xf32>
    %179 = tpu.transpose %178, [0, 2, 1, 3] : vector<2x9x4x8xf32> -> vector<2x4x9x8xf32>
    %180 = vector.shape_cast %179 : vector<2x4x9x8xf32> to vector<8x9x8xf32>
    %181 = arith.truncf %180 : vector<8x9x8xf32> to vector<8x9x8xbf16>
    "tpu.trace_start"() <{level = 10 : i32, message = "bqd,bds->bqs"}> : () -> ()
    %cst_107 = arith.constant dense<0.000000e+00> : vector<8x9x9xf32>
    %182 = tpu.matmul %173, %177, %cst_107 {dimension_numbers = #tpu.dot_dimension_numbers<[2], [1], [1], [2], [0, 0, 0, 1, 1, 2], [0], [0]>} : vector<8x9x8xbf16>, vector<8x8x9xbf16>, vector<8x9x9xf32> -> vector<8x9x9xf32>
    "tpu.trace_stop"() : () -> ()
    %183 = vector.shape_cast %182 : vector<8x9x9xf32> to vector<2x4x9x9xf32>
    %184 = vector.shape_cast %0 : vector<2x9x9xf32> to vector<2x1x9x9xf32>
    %185 = vector.broadcast %184 : vector<2x1x9x9xf32> to vector<2x4x9x9xf32>
    %186 = arith.addf %183, %185 : vector<2x4x9x9xf32>
    %cst_108 = arith.constant dense<0xFF800000> : vector<2x4x9xf32>
    %187 = vector.multi_reduction <maximumf>, %186, %cst_108 [3] : vector<2x4x9x9xf32> to vector<2x4x9xf32>
    %188 = vector.shape_cast %187 : vector<2x4x9xf32> to vector<2x4x9x1xf32>
    %189 = vector.broadcast %188 : vector<2x4x9x1xf32> to vector<2x4x9x9xf32>
    %190 = arith.subf %186, %189 : vector<2x4x9x9xf32>
    %191 = math.exp %190 : vector<2x4x9x9xf32>
    %cst_109 = arith.constant dense<0.000000e+00> : vector<2x4x9xf32>
    %192 = vector.multi_reduction <add>, %191, %cst_109 [3] : vector<2x4x9x9xf32> to vector<2x4x9xf32>
    %193 = vector.shape_cast %192 : vector<2x4x9xf32> to vector<2x4x9x1xf32>
    %194 = vector.broadcast %193 : vector<2x4x9x1xf32> to vector<2x4x9x9xf32>
    %195 = arith.divf %191, %194 : vector<2x4x9x9xf32>
    %c1_110 = arith.constant 1 : index
    %c0_111 = arith.constant 0 : index
    %c0_112 = arith.constant 0 : index
    %c0_113 = arith.constant 0 : index
    %c0_114 = arith.constant 0 : index
    %196 = vector.load %arg20[%c1_110, %c0_111, %c0_112, %c0_113, %c0_114] : memref<2x2x4x9x9xf32, #tpu.memory_space<vmem>>, vector<1x2x4x9x9xf32>
    %197 = vector.shape_cast %196 : vector<1x2x4x9x9xf32> to vector<2x4x9x9xf32>
    %198 = vector.shape_cast %195 : vector<2x4x9x9xf32> to vector<1x2x4x9x9xf32>
    tpu.vector_store %arg20[%c1_110, %c0_111, %c0_112, %c0_113, %c0_114], %198 {strides = array<i32>} : memref<2x2x4x9x9xf32, #tpu.memory_space<vmem>>, vector<1x2x4x9x9xf32>,
    %199 = vector.shape_cast %195 : vector<2x4x9x9xf32> to vector<8x9x9xf32>
    %200 = arith.truncf %199 : vector<8x9x9xf32> to vector<8x9x9xbf16>
    "tpu.trace_start"() <{level = 10 : i32, message = "bqs,bsd->bqd"}> : () -> ()
    %cst_115 = arith.constant dense<0.000000e+00> : vector<8x9x8xf32>
    %201 = tpu.matmul %200, %181, %cst_115 {dimension_numbers = #tpu.dot_dimension_numbers<[2], [1], [1], [2], [0, 0, 0, 1, 1, 2], [0], [0]>} : vector<8x9x9xbf16>, vector<8x9x8xbf16>, vector<8x9x8xf32> -> vector<8x9x8xf32>
    "tpu.trace_stop"() : () -> ()
    %202 = vector.shape_cast %201 : vector<8x9x8xf32> to vector<2x4x9x8xf32>
    %203 = tpu.transpose %202, [0, 2, 1, 3] : vector<2x4x9x8xf32> -> vector<2x9x4x8xf32>
    %204 = vector.shape_cast %203 : vector<2x9x4x8xf32> to vector<18x32xf32>
    %205 = arith.truncf %204 : vector<18x32xf32> to vector<18x32xbf16>
    %c1_116 = arith.constant 1 : index
    %c0_117 = arith.constant 0 : index
    %c0_118 = arith.constant 0 : index
    %206 = vector.load %arg9[%c1_116, %c0_117, %c0_118] : memref<2x32x32xbf16, #tpu.memory_space<vmem>>, vector<1x32x32xbf16>
    %207 = vector.shape_cast %206 : vector<1x32x32xbf16> to vector<32x32xbf16>
    %cst_119 = arith.constant dense<0.000000e+00> : vector<18x32xf32>
    %208 = tpu.matmul %205, %207, %cst_119 {dimension_numbers = #tpu.dot_dimension_numbers<[1], [0], [0], [1], [0, 0, 1, 1], [], []>} : vector<18x32xbf16>, vector<32x32xbf16>, vector<18x32xf32> -> vector<18x32xf32>
    %c1_120 = arith.constant 1 : index
    %c0_121 = arith.constant 0 : index
    %c0_122 = arith.constant 0 : index
    %209 = vector.load %arg10[%c1_120, %c0_121, %c0_122] : memref<2x1x32xf32, #tpu.memory_space<vmem>>, vector<1x1x32xf32>
    %210 = vector.shape_cast %209 : vector<1x1x32xf32> to vector<1x32xf32>
    %211 = vector.broadcast %210 : vector<1x32xf32> to vector<18x32xf32>
    %212 = arith.addf %208, %211 : vector<18x32xf32>
    %213 = arith.addf %212, %147 : vector<18x32xf32>
    %c1_123 = arith.constant 1 : index
    %c0_124 = arith.constant 0 : index
    %c0_125 = arith.constant 0 : index
    %214 = vector.load %arg11[%c1_123, %c0_124, %c0_125] : memref<2x1x32xf32, #tpu.memory_space<vmem>>, vector<1x1x32xf32>
    %215 = vector.shape_cast %214 : vector<1x1x32xf32> to vector<1x32xf32>
    %c1_126 = arith.constant 1 : index
    %c0_127 = arith.constant 0 : index
    %c0_128 = arith.constant 0 : index
    %216 = vector.load %arg12[%c1_126, %c0_127, %c0_128] : memref<2x1x32xf32, #tpu.memory_space<vmem>>, vector<1x1x32xf32>
    %217 = vector.shape_cast %216 : vector<1x1x32xf32> to vector<1x32xf32>
    %cst_129 = arith.constant dense<0.000000e+00> : vector<18xf32>
    %218 = vector.multi_reduction <add>, %213, %cst_129 [1] : vector<18x32xf32> to vector<18xf32>
    %219 = vector.shape_cast %218 : vector<18xf32> to vector<18x1xf32>
    %cst_130 = arith.constant 3.200000e+01 : f32
    %220 = vector.broadcast %cst_130 : f32 to vector<18x1xf32>
    %221 = arith.divf %219, %220 : vector<18x1xf32>
    %222 = vector.broadcast %221 : vector<18x1xf32> to vector<18x32xf32>
    %223 = arith.subf %213, %222 : vector<18x32xf32>
    %224 = arith.mulf %223, %223 : vector<18x32xf32>
    %cst_131 = arith.constant dense<0.000000e+00> : vector<18xf32>
    %225 = vector.multi_reduction <add>, %224, %cst_131 [1] : vector<18x32xf32> to vector<18xf32>
    %226 = vector.shape_cast %225 : vector<18xf32> to vector<18x1xf32>
    %cst_132 = arith.constant 3.200000e+01 : f32
    %227 = vector.broadcast %cst_132 : f32 to vector<18x1xf32>
    %228 = arith.divf %226, %227 : vector<18x1xf32>
    %229 = vector.broadcast %221 : vector<18x1xf32> to vector<18x32xf32>
    %230 = arith.subf %213, %229 : vector<18x32xf32>
    %cst_133 = arith.constant 9.99999974E-6 : f32
    %231 = vector.broadcast %cst_133 : f32 to vector<18x1xf32>
    %232 = arith.addf %228, %231 : vector<18x1xf32>
    %233 = math.rsqrt %232 : vector<18x1xf32>
    %234 = vector.broadcast %233 : vector<18x1xf32> to vector<18x32xf32>
    %235 = arith.mulf %230, %234 : vector<18x32xf32>
    %236 = vector.broadcast %215 : vector<1x32xf32> to vector<18x32xf32>
    %237 = arith.mulf %235, %236 : vector<18x32xf32>
    %238 = vector.broadcast %217 : vector<1x32xf32> to vector<18x32xf32>
    %239 = arith.addf %237, %238 : vector<18x32xf32>
    %240 = arith.truncf %239 : vector<18x32xf32> to vector<18x32xbf16>
    %c1_134 = arith.constant 1 : index
    %c0_135 = arith.constant 0 : index
    %c0_136 = arith.constant 0 : index
    %241 = vector.load %arg13[%c1_134, %c0_135, %c0_136] : memref<2x32x64xbf16, #tpu.memory_space<vmem>>, vector<1x32x64xbf16>
    %242 = vector.shape_cast %241 : vector<1x32x64xbf16> to vector<32x64xbf16>
    %cst_137 = arith.constant dense<0.000000e+00> : vector<18x64xf32>
    %243 = tpu.matmul %240, %242, %cst_137 {dimension_numbers = #tpu.dot_dimension_numbers<[1], [0], [0], [1], [0, 0, 1, 1], [], []>} : vector<18x32xbf16>, vector<32x64xbf16>, vector<18x64xf32> -> vector<18x64xf32>
    %c1_138 = arith.constant 1 : index
    %c0_139 = arith.constant 0 : index
    %c0_140 = arith.constant 0 : index
    %244 = vector.load %arg14[%c1_138, %c0_139, %c0_140] : memref<2x1x64xf32, #tpu.memory_space<vmem>>, vector<1x1x64xf32>
    %245 = vector.shape_cast %244 : vector<1x1x64xf32> to vector<1x64xf32>
    %246 = vector.broadcast %245 : vector<1x64xf32> to vector<18x64xf32>
    %247 = arith.addf %243, %246 : vector<18x64xf32>
    %cst_141 = arith.constant 0.000000e+00 : f32
    %248 = vector.broadcast %cst_141 : f32 to vector<18x64xf32>
    %249 = arith.maximumf %247, %248 : vector<18x64xf32>
    %250 = arith.truncf %249 : vector<18x64xf32> to vector<18x64xbf16>
    %c1_142 = arith.constant 1 : index
    %c0_143 = arith.constant 0 : index
    %c0_144 = arith.constant 0 : index
    %251 = vector.load %arg15[%c1_142, %c0_143, %c0_144] : memref<2x64x32xbf16, #tpu.memory_space<vmem>>, vector<1x64x32xbf16>
    %252 = vector.shape_cast %251 : vector<1x64x32xbf16> to vector<64x32xbf16>
    %cst_145 = arith.constant dense<0.000000e+00> : vector<18x32xf32>
    %253 = tpu.matmul %250, %252, %cst_145 {dimension_numbers = #tpu.dot_dimension_numbers<[1], [0], [0], [1], [0, 0, 1, 1], [], []>} : vector<18x64xbf16>, vector<64x32xbf16>, vector<18x32xf32> -> vector<18x32xf32>
    %c1_146 = arith.constant 1 : index
    %c0_147 = arith.constant 0 : index
    %c0_148 = arith.constant 0 : index
    %254 = vector.load %arg16[%c1_146, %c0_147, %c0_148] : memref<2x1x32xf32, #tpu.memory_space<vmem>>, vector<1x1x32xf32>
    %255 = vector.shape_cast %254 : vector<1x1x32xf32> to vector<1x32xf32>
    %256 = vector.broadcast %255 : vector<1x32xf32> to vector<18x32xf32>
    %257 = arith.addf %253, %256 : vector<18x32xf32>
    %258 = arith.addf %257, %239 : vector<18x32xf32>
    %c1_149 = arith.constant 1 : index
    %c0_150 = arith.constant 0 : index
    %c0_151 = arith.constant 0 : index
    %259 = vector.load %arg17[%c1_149, %c0_150, %c0_151] : memref<2x1x32xf32, #tpu.memory_space<vmem>>, vector<1x1x32xf32>
    %260 = vector.shape_cast %259 : vector<1x1x32xf32> to vector<1x32xf32>
    %c1_152 = arith.constant 1 : index
    %c0_153 = arith.constant 0 : index
    %c0_154 = arith.constant 0 : index
    %261 = vector.load %arg18[%c1_152, %c0_153, %c0_154] : memref<2x1x32xf32, #tpu.memory_space<vmem>>, vector<1x1x32xf32>
    %262 = vector.shape_cast %261 : vector<1x1x32xf32> to vector<1x32xf32>
    %cst_155 = arith.constant dense<0.000000e+00> : vector<18xf32>
    %263 = vector.multi_reduction <add>, %258, %cst_155 [1] : vector<18x32xf32> to vector<18xf32>
    %264 = vector.shape_cast %263 : vector<18xf32> to vector<18x1xf32>
    %cst_156 = arith.constant 3.200000e+01 : f32
    %265 = vector.broadcast %cst_156 : f32 to vector<18x1xf32>
    %266 = arith.divf %264, %265 : vector<18x1xf32>
    %267 = vector.broadcast %266 : vector<18x1xf32> to vector<18x32xf32>
    %268 = arith.subf %258, %267 : vector<18x32xf32>
    %269 = arith.mulf %268, %268 : vector<18x32xf32>
    %cst_157 = arith.constant dense<0.000000e+00> : vector<18xf32>
    %270 = vector.multi_reduction <add>, %269, %cst_157 [1] : vector<18x32xf32> to vector<18xf32>
    %271 = vector.shape_cast %270 : vector<18xf32> to vector<18x1xf32>
    %cst_158 = arith.constant 3.200000e+01 : f32
    %272 = vector.broadcast %cst_158 : f32 to vector<18x1xf32>
    %273 = arith.divf %271, %272 : vector<18x1xf32>
    %274 = vector.broadcast %266 : vector<18x1xf32> to vector<18x32xf32>
    %275 = arith.subf %258, %274 : vector<18x32xf32>
    %cst_159 = arith.constant 9.99999974E-6 : f32
    %276 = vector.broadcast %cst_159 : f32 to vector<18x1xf32>
    %277 = arith.addf %273, %276 : vector<18x1xf32>
    %278 = math.rsqrt %277 : vector<18x1xf32>
    %279 = vector.broadcast %278 : vector<18x1xf32> to vector<18x32xf32>
    %280 = arith.mulf %275, %279 : vector<18x32xf32>
    %281 = vector.broadcast %260 : vector<1x32xf32> to vector<18x32xf32>
    %282 = arith.mulf %280, %281 : vector<18x32xf32>
    %283 = vector.broadcast %262 : vector<1x32xf32> to vector<18x32xf32>
    %284 = arith.addf %282, %283 : vector<18x32xf32>
    %285 = vector.shape_cast %284 : vector<18x32xf32> to vector<2x9x32xf32>
    %c1_160 = arith.constant 1 : index
    %c0_161 = arith.constant 0 : index
    %c0_162 = arith.constant 0 : index
    %c0_163 = arith.constant 0 : index
    %286 = vector.load %arg19[%c1_160, %c0_161, %c0_162, %c0_163] : memref<2x2x9x32xf32, #tpu.memory_space<vmem>>, vector<1x2x9x32xf32>
    %287 = vector.shape_cast %286 : vector<1x2x9x32xf32> to vector<2x9x32xf32>
    %288 = vector.shape_cast %285 : vector<2x9x32xf32> to vector<1x2x9x32xf32>
    tpu.vector_store %arg19[%c1_160, %c0_161, %c0_162, %c0_163], %288 {strides = array<i32>} : memref<2x2x9x32xf32, #tpu.memory_space<vmem>>, vector<1x2x9x32xf32>,
    return
  }
  func.func @transform_0(%arg0: i32) -> (i32, i32, i32, i32) {
    %c0_i32 = arith.constant 0 : i32
    %c0_i32_0 = arith.constant 0 : i32
    %c0_i32_1 = arith.constant 0 : i32
    %c0_i32_2 = arith.constant 0 : i32
    %c0_i32_3 = arith.constant 0 : i32
    return %c0_i32, %c0_i32_0, %c0_i32_1, %c0_i32_2 : i32, i32, i32, i32
  }
  func.func @transform_1(%arg0: i32) -> (i32, i32, i32) {
    %c0_i32 = arith.constant 0 : i32
    %c0_i32_0 = arith.constant 0 : i32
    %c0_i32_1 = arith.constant 0 : i32
    %c0_i32_2 = arith.constant 0 : i32
    return %c0_i32, %c0_i32_0, %c0_i32_1 : i32, i32, i32
  }
  func.func @transform_2(%arg0: i32) -> (i32, i32, i32) {
    %c0_i32 = arith.constant 0 : i32
    %c0_i32_0 = arith.constant 0 : i32
    %c0_i32_1 = arith.constant 0 : i32
    %c0_i32_2 = arith.constant 0 : i32
    return %c0_i32, %c0_i32_0, %c0_i32_1 : i32, i32, i32
  }
  func.func @transform_3(%arg0: i32) -> (i32, i32, i32) {
    %c0_i32 = arith.constant 0 : i32
    %c0_i32_0 = arith.constant 0 : i32
    %c0_i32_1 = arith.constant 0 : i32
    %c0_i32_2 = arith.constant 0 : i32
    return %c0_i32, %c0_i32_0, %c0_i32_1 : i32, i32, i32
  }
  func.func @transform_4(%arg0: i32) -> (i32, i32, i32) {
    %c0_i32 = arith.constant 0 : i32
    %c0_i32_0 = arith.constant 0 : i32
    %c0_i32_1 = arith.constant 0 : i32
    %c0_i32_2 = arith.constant 0 : i32
    return %c0_i32, %c0_i32_0, %c0_i32_1 : i32, i32, i32
  }
  func.func @transform_5(%arg0: i32) -> (i32, i32, i32) {
    %c0_i32 = arith.constant 0 : i32
    %c0_i32_0 = arith.constant 0 : i32
    %c0_i32_1 = arith.constant 0 : i32
    %c0_i32_2 = arith.constant 0 : i32
    return %c0_i32, %c0_i32_0, %c0_i32_1 : i32, i32, i32
  }
  func.func @transform_6(%arg0: i32) -> (i32, i32, i32) {
    %c0_i32 = arith.constant 0 : i32
    %c0_i32_0 = arith.constant 0 : i32
    %c0_i32_1 = arith.constant 0 : i32
    %c0_i32_2 = arith.constant 0 : i32
    return %c0_i32, %c0_i32_0, %c0_i32_1 : i32, i32, i32
  }
  func.func @transform_7(%arg0: i32) -> (i32, i32, i32) {
    %c0_i32 = arith.constant 0 : i32
    %c0_i32_0 = arith.constant 0 : i32
    %c0_i32_1 = arith.constant 0 : i32
    %c0_i32_2 = arith.constant 0 : i32
    return %c0_i32, %c0_i32_0, %c0_i32_1 : i32, i32, i32
  }
  func.func @transform_8(%arg0: i32) -> (i32, i32, i32) {
    %c0_i32 = arith.constant 0 : i32
    %c0_i32_0 = arith.constant 0 : i32
    %c0_i32_1 = arith.constant 0 : i32
    %c0_i32_2 = arith.constant 0 : i32
    return %c0_i32, %c0_i32_0, %c0_i32_1 : i32, i32, i32
  }
  func.func @transform_9(%arg0: i32) -> (i32, i32, i32) {
    %c0_i32 = arith.constant 0 : i32
    %c0_i32_0 = arith.constant 0 : i32
    %c0_i32_1 = arith.constant 0 : i32
    %c0_i32_2 = arith.constant 0 : i32
    return %c0_i32, %c0_i32_0, %c0_i32_1 : i32, i32, i32
  }
  func.func @transform_10(%arg0: i32) -> (i32, i32, i32) {
    %c0_i32 = arith.constant 0 : i32
    %c0_i32_0 = arith.constant 0 : i32
    %c0_i32_1 = arith.constant 0 : i32
    %c0_i32_2 = arith.constant 0 : i32
    return %c0_i32, %c0_i32_0, %c0_i32_1 : i32, i32, i32
  }
  func.func @transform_11(%arg0: i32) -> (i32, i32, i32) {
    %c0_i32 = arith.constant 0 : i32
    %c0_i32_0 = arith.constant 0 : i32
    %c0_i32_1 = arith.constant 0 : i32
    %c0_i32_2 = arith.constant 0 : i32
    return %c0_i32, %c0_i32_0, %c0_i32_1 : i32, i32, i32
  }
  func.func @transform_12(%arg0: i32) -> (i32, i32, i32) {
    %c0_i32 = arith.constant 0 : i32
    %c0_i32_0 = arith.constant 0 : i32
    %c0_i32_1 = arith.constant 0 : i32
    %c0_i32_2 = arith.constant 0 : i32
    return %c0_i32, %c0_i32_0, %c0_i32_1 : i32, i32, i32
  }
  func.func @transform_13(%arg0: i32) -> (i32, i32, i32) {
    %c0_i32 = arith.constant 0 : i32
    %c0_i32_0 = arith.constant 0 : i32
    %c0_i32_1 = arith.constant 0 : i32
    %c0_i32_2 = arith.constant 0 : i32
    return %c0_i32, %c0_i32_0, %c0_i32_1 : i32, i32, i32
  }
  func.func @transform_14(%arg0: i32) -> (i32, i32, i32) {
    %c0_i32 = arith.constant 0 : i32
    %c0_i32_0 = arith.constant 0 : i32
    %c0_i32_1 = arith.constant 0 : i32
    %c0_i32_2 = arith.constant 0 : i32
    return %c0_i32, %c0_i32_0, %c0_i32_1 : i32, i32, i32
  }
  func.func @transform_15(%arg0: i32) -> (i32, i32, i32) {
    %c0_i32 = arith.constant 0 : i32
    %c0_i32_0 = arith.constant 0 : i32
    %c0_i32_1 = arith.constant 0 : i32
    %c0_i32_2 = arith.constant 0 : i32
    return %c0_i32, %c0_i32_0, %c0_i32_1 : i32, i32, i32
  }
  func.func @transform_16(%arg0: i32) -> (i32, i32, i32) {
    %c0_i32 = arith.constant 0 : i32
    %c0_i32_0 = arith.constant 0 : i32
    %c0_i32_1 = arith.constant 0 : i32
    %c0_i32_2 = arith.constant 0 : i32
    return %c0_i32, %c0_i32_0, %c0_i32_1 : i32, i32, i32
  }
  func.func @transform_17(%arg0: i32) -> (i32, i32, i32) {
    %c0_i32 = arith.constant 0 : i32
    %c0_i32_0 = arith.constant 0 : i32
    %c0_i32_1 = arith.constant 0 : i32
    %c0_i32_2 = arith.constant 0 : i32
    return %c0_i32, %c0_i32_0, %c0_i32_1 : i32, i32, i32
  }
  func.func @transform_18(%arg0: i32) -> (i32, i32, i32, i32) {
    %c0_i32 = arith.constant 0 : i32
    %c0_i32_0 = arith.constant 0 : i32
    %c0_i32_1 = arith.constant 0 : i32
    %c0_i32_2 = arith.constant 0 : i32
    %c0_i32_3 = arith.constant 0 : i32
    return %c0_i32, %c0_i32_0, %c0_i32_1, %c0_i32_2 : i32, i32, i32, i32
  }
  func.func @transform_19(%arg0: i32) -> (i32, i32, i32, i32, i32) {
    %c0_i32 = arith.constant 0 : i32
    %c0_i32_0 = arith.constant 0 : i32
    %c0_i32_1 = arith.constant 0 : i32
    %c0_i32_2 = arith.constant 0 : i32
    %c0_i32_3 = arith.constant 0 : i32
    %c0_i32_4 = arith.constant 0 : i32
    return %c0_i32, %c0_i32_0, %c0_i32_1, %c0_i32_2, %c0_i32_3 : i32, i32, i32, i32, i32
  }
}

</mosaic_0001>

<bundles_post_ra>
// kernel: tpu_custom_call.1
= control target key start
LH: loop header
LB: loop body
LE: loop exit
PB: predicated region body
PF: predicated region fallthrough
CT: control target
= control target key end

     0   :  { %vm141_vm0 = vcmask 261120   ;;  %s9172_s21 = smov 120   ;;  %s9174_s22 = smov 104   ;;  %v9175_v63 = vmov 1983009808   ;;  %vm273_vm1 = vcmask 1047556   ;;  %s12168_s4 = inlined_call_operand.vmem [shape: bf16[2,32,32], index: 4, kind: input, shape index: {}]   ;;  %s12169_s6 = inlined_call_operand.vmem [shape: bf16[2,32,32], index: 6, kind: input, shape index: {}]   ;;  %s12170_s0 = inlined_call_operand.vmem [shape: f32[2,2,9,32], index: 0, kind: input, shape index: {}]   ;;  %s12171_s2 = inlined_call_operand.vmem [shape: bf16[2,32,32], index: 2, kind: input, shape index: {}]   ;;  %s12172_s5 = inlined_call_operand.vmem [shape: f32[2,1,32], index: 5, kind: input, shape index: {}]   ;;  %s12173_s7 = inlined_call_operand.vmem [shape: f32[2,1,32], index: 7, kind: input, shape index: {}]   ;;  %s12174_s3 = inlined_call_operand.vmem [shape: f32[2,1,32], index: 3, kind: input, shape index: {}]   ;;  %s12175_s1 = inlined_call_operand.vmem [shape: f32[2,9,9], index: 1, kind: input, shape index: {}]   ;;  %s12176_s19 = inlined_call_operand.vmem [shape: f32[2,2,4,9,9], index: 19, kind: output, shape index: {1}]   ;;  %s12177_s9 = inlined_call_operand.vmem [shape: f32[2,1,32], index: 9, kind: input, shape index: {}]   ;;  %s12178_s8 = inlined_call_operand.vmem [shape: bf16[2,32,32], index: 8, kind: input, shape index: {}]   ;;  %s12179_s10 = inlined_call_operand.vmem [shape: f32[2,1,32], index: 10, kind: input, shape index: {}]   ;;  %s12180_s11 = inlined_call_operand.vmem [shape: f32[2,1,32], index: 11, kind: input, shape index: {}]   ;;  %s12181_s13 = inlined_call_operand.vmem [shape: f32[2,1,64], index: 13, kind: input, shape index: {}]   ;;  %s12182_s12 = inlined_call_operand.vmem [shape: bf16[2,32,64], index: 12, kind: input, shape index: {}]   ;;  %s12183_s15 = inlined_call_operand.vmem [shape: f32[2,1,32], index: 15, kind: input, shape index: {}]   ;;  %s12184_s14 = inlined_call_operand.vmem [shape: bf16[2,64,32], index: 14, kind: input, shape index: {}]   ;;  %s12185_s16 = inlined_call_operand.vmem [shape: f32[2,1,32], index: 16, kind: input, shape index: {}]   ;;  %s12186_s17 = inlined_call_operand.vmem [shape: f32[2,1,32], index: 17, kind: input, shape index: {}]   ;;  %s12187_s18 = inlined_call_operand.vmem [shape: f32[2,2,9,32], index: 18, kind: output, shape index: {0}]  }
   0x1   :  { %12203 = sst [smem:[#allocation2_spill]] %s12168_s4  ;;  %v8993_v31 = vld [vmem:[%s12172_s5] ss:$0 sm:$0xff]  ;;  %vm2566_vm2 = vcmask 1043456   ;;  %vm2562_vm3 = vcmask 64512   ;;  %vm2775_vm4 = vcmask 72704  }
   0x2   :  { %12204 = sst [smem:[#allocation3_spill]] %s12169_s6  ;;  %v8994_v35 = vld [vmem:[%s12173_s7] ss:$0 sm:$0xff]  ;;  %s9173_s6 = smov 112   ;;  %vm3206_vm5 = vcmask 1044480   ;;  %vm2779_vm6 = vcmask 65536  }
   0x3   :  { %12205 = sst [smem:[#allocation4_spill]] %s12170_s0  ;;  %v8995_v38 = vld [vmem:[%s12174_s3] ss:$0 sm:$0xff]  ;;  %s12196_s28 = smov 8  }
   0x4   :  { %12206 = sst [smem:[#allocation5_spill]] %s12171_s2  ;;  %s12194_s4 = smov 24  }
   0x5   :  { %12207 = sst [smem:[#allocation6_spill]] %s12181_s13  ;;  %s12198_s30 = smov 16  }
   0x6   :  { %s12208_s20 = sld [smem:[#allocation2_spill]] }
   0x7   :  { %s12209_s13 = sld [smem:[#allocation3_spill]] }
   0x8   :  { %s12210_s23 = sld [smem:[#allocation4_spill]] }
   0x9   :  { %s12211_s29 = sld [smem:[#allocation5_spill]] }
   0xa   :  { %s12231_s2 = sld [smem:[#allocation6_spill]] }
   0xc   :  { %v8537_v0 = vld [vmem:[%s12208_s20 + $0x8] sm:$0xff]  ;;  %v8536_v3 = vld [vmem:[%s12208_s20] sm:$0xff] }
   0xd   :  { %v8539_v1 = vld [vmem:[%s12209_s13 + $0x8] sm:$0xff]  ;;  %192 = vmatpush.bf16.msra.mxu1 %v8537_v0  ;;  %v8538_v4 = vld [vmem:[%s12209_s13] sm:$0xff]  ;;  %v278_v0 = vunpack.c.l.s4 %v9175_v63 }
   0xe   :  { %v9291_v2 = vld [vmem:[%s12210_s23] sm:$0xff]  ;;  %230 = vmatpush.bf16.msra.mxu2 %v8539_v1  ;;  %v9316_v14 = vld [vmem:[%s12210_s23 + $0x10] sm:$0xff]  ;;  %v9321_v15 = vld [vmem:[%s12210_s23 + $0x8] sm:$0x1] }
   0xf   :  { %v74_v5 = vrot.slane %v9291_v2, 1  ;;  %v75_v6 = vrot.slane %v9291_v2, 2  ;;  %v76_v7 = vrot.slane %v9291_v2, 3  ;;  %v8535_v8 = vld [vmem:[%s12211_s29 + $0x8] sm:$0xff]  ;;  %v77_v9 = vrot.slane %v9291_v2, 4  ;;  %v8534_v12 = vld [vmem:[%s12211_s29] sm:$0xff] }
  0x10   :  { %88 = vst [vmem:[#allocation1] ss:$9 sm:$0xff] %v9291_v2  ;;  %v78_v10 = vrot.slane %v9291_v2, 5  ;;  %154 = vmatpush.bf16.msra.mxu0 %v8535_v8  ;;  %v79_v11 = vrot.slane %v9291_v2, 6  ;;  %v80_v13 = vrot.slane %v9291_v2, 7  ;;  %v81_v16 = vrot.slane %v9316_v14, 1 }
  0x11   :  { %90 = vst [vmem:[#allocation1 + $0x1] ss:$9 sm:$0xff] %v74_v5  ;;  %193 = vmatpush.bf16.msra.mxu1 %v8536_v3  ;;  %v82_v17 = vrot.slane %v9316_v14, 2  ;;  %v83_v19 = vrot.slane %v9316_v14, 3  ;;  %v84_v20 = vrot.slane %v9316_v14, 4  ;;  %v85_v21 = vrot.slane %v9316_v14, 5 }
  0x12   :  { %92 = vst [vmem:[#allocation1 + $0x2] ss:$9 sm:$0xff] %v75_v6  ;;  %231 = vmatpush.bf16.msra.mxu2 %v8538_v4  ;;  %v86_v22 = vrot.slane %v9316_v14, 6  ;;  %v12193_v23 = vrot.slane %v9316_v14, 7  ;;  %v9347_v24 = vld [vmem:[%s12210_s23 + $0x18] sm:$0x1] }
  0x13   :  { %94 = vst [vmem:[#allocation1 + $0x3] ss:$9 sm:$0xff] %v76_v7 }
  0x14   :  { %96 = vst [vmem:[#allocation1 + $0x4] ss:$9 sm:$0xff] %v77_v9  ;;  %155 = vmatpush.bf16.msra.mxu0 %v8534_v12 }
  0x15   :  { %98 = vst [vmem:[#allocation1 + $0x5] ss:$9 sm:$0xff] %v78_v10 }
  0x16   :  { %100 = vst [vmem:[#allocation1 + $0x6] ss:$9 sm:$0xff] %v79_v11 }
  0x17   :  { %102 = vst [vmem:[#allocation1 + $0x7] ss:$9 sm:$0xff] %v80_v13 }
  0x1e   :  { %v103_v18 = vld [vmem:[#allocation1] sm:$0xff] }
  0x1f   :  { %104 = vst [vmem:[#allocation1] ss:$9 sm:$0xff] %v9321_v15 }
  0x20   :  { %105 = vst [vmem:[#allocation1 + $0x1] ss:$9 sm:$0xff] %v9316_v14 }
  0x21   :  { %106 = vst [vmem:[#allocation1 + $0x2] ss:$9 sm:$0xff] %v81_v16 }
  0x22   :  { %107 = vst [vmem:[#allocation1 + $0x3] ss:$9 sm:$0xff] %v82_v17 }
  0x23   :  { %108 = vst [vmem:[#allocation1 + $0x4] ss:$9 sm:$0xff] %v83_v19 }
  0x24   :  { %109 = vst [vmem:[#allocation1 + $0x5] ss:$9 sm:$0xff] %v84_v20 }
  0x25   :  { %110 = vst [vmem:[#allocation1 + $0x6] ss:$9 sm:$0xff] %v85_v21 }
  0x26   :  { %111 = vst [vmem:[#allocation1 + $0x7] ss:$9 sm:$0xff] %v86_v22 }
  0x2d   :  { %v112_v25 = vld [vmem:[#allocation1] sm:$0xff] }
  0x2e   :  { %v119_v26 = vpack.c.bf16 %v112_v25, %v103_v18  ;;  %113 = vst [vmem:[#allocation1] ss:$9 sm:$0xff] %v12193_v23 }
  0x2f   :  { %114 = vst [vmem:[#allocation1 + $0x1] ss:$9 sm:$0xff] %v9347_v24 }
  0x30   :  { %8322 = vmatmul.msk.bf16.vlgmr.msra.gmra.mxu1 %vm141_vm0, %v119_v26  ;;  %8332 = vmatmul.msk.bf16.vlgmr.msra.gmra.mxu2 %vm141_vm0, %v119_v26 }
  0x31   :  { %8312 = vmatmul.msk.bf16.vlgmr.msra.gmra.mxu0 %vm141_vm0, %v119_v26 }
  0x36   :  { %v115_v27 = vld [vmem:[#allocation1] sm:$0xff] }
  0x37   :  { %3809 = vst [vmem:[#allocation1] ss:$9 sm:$0xff] %v9291_v2  ;;  %v120_v28 = vpack.c.bf16 %v115_v27, %v115_v27 }
  0x38   :  { %3811 = vst [vmem:[#allocation1 + $0x1] ss:$9 sm:$0xff] %v74_v5 }
  0x39   :  { %3813 = vst [vmem:[#allocation1 + $0x2] ss:$9 sm:$0xff] %v75_v6 }
  0x3a   :  { %3815 = vst [vmem:[#allocation1 + $0x3] ss:$9 sm:$0xff] %v76_v7 }
  0x3b   :  { %3817 = vst [vmem:[#allocation1 + $0x4] ss:$9 sm:$0xff] %v77_v9 }
  0x3c   :  { %3819 = vst [vmem:[#allocation1 + $0x5] ss:$9 sm:$0xff] %v78_v10  ;;  %v9418_v10 = vunpack.c.0.s8 %v278_v0 }
  0x3d   :  { %3821 = vst [vmem:[#allocation1 + $0x6] ss:$9 sm:$0xff] %v79_v11  ;;  %v9176_v11 = vmov 1934713408  }
  0x3e   :  { %3823 = vst [vmem:[#allocation1 + $0x7] ss:$9 sm:$0xff] %v80_v13  ;;  %v302_v12 = vunpack.c.l.s4 %v9176_v11 }
  0x40   :  { %8323 = vmatmul.msk.bf16.gmra.mxu1 %vm141_vm0, %v120_v28  ;;  %8333 = vmatmul.msk.bf16.gmra.mxu2 %vm141_vm0, %v120_v28 }
  0x41   :  { %8313 = vmatmul.msk.bf16.gmra.mxu0 %vm141_vm0, %v120_v28 }
  0xad   :  { %v195_v29 = vpop.f32.mrf.mxu1 }
  0xae   :  { %v157_v30 = vpop.f32.mrf.mxu0  ;;  %v196_v34 = vadd.f32 %v8993_v31, %v195_v29 }
  0xaf   :  { %v9375_v42 = vadd.f32 %v8995_v38, %v157_v30 }
  0xb0   :  { %v597_v4 = vrot.slane %v196_v34, 4 }
  0xb3   :  { %v233_v32 = vpop.f32.mrf.mxu2 }
  0xb4   :  { %v9371_v40 = vadd.f32 %v8994_v35, %v233_v32 }
  0xb5   :  { %v197_v33 = vpop.f32.mrf.mxu1 }
  0xb6   :  { %v9365_v36 = vadd.f32 %v8993_v31, %v197_v33  ;;  %v159_v37 = vpop.f32.mrf.mxu0 }
  0xb7   :  { %v9389_v49 = vadd.f32 %v8995_v38, %v159_v37  ;;  %v9430_v37 = vunpack.c.0.s8 %v302_v12 }
  0xb8   :  { %v8583_v39 = vpack.i.bf16 %v9365_v36, %v196_v34  ;;  %v653_v27 = vrot.slane %v9365_v36, 4 }
  0xba   :  { %8584 = vrot.lane.b32.xlu1 %v8583_v39, %s9172_s21  ;;  %8574 = vrot.lane.b32.xlu0 %v8583_v39, %s9173_s6 }
  0xbb   :  { %v235_v41 = vpop.f32.mrf.mxu2 }
  0xbc   :  { %v9377_v43 = vadd.f32 %v8994_v35, %v235_v41 }
  0xbd   :  { %v200_v44 = vpop.f32.mrf.mxu1 }
  0xbe   :  { %v9379_v45 = vadd.f32 %v8993_v31, %v200_v44  ;;  %v9383_v46 = vpack.i.bf16 %v9377_v43, %v9371_v40  ;;  %v162_v47 = vpop.f32.mrf.mxu0 }
  0xbf   :  { %v9393_v50 = vadd.f32 %v8995_v38, %v162_v47  ;;  %v331_v38 = vrot.slane %v9389_v49, 4 }
  0xc0   :  { %8589 = vrot.lane.b32.xlu2 %v9383_v46, %s9173_s6  ;;  %v8593_v48 = vpack.i.bf16 %v9375_v42, %v9379_v45 }
  0xc1   :  { %v8618_v52 = vpack.i.bf16 %v9393_v50, %v9389_v49 }
  0xc2   :  { %8579 = vrot.lane.b32.xlu0 %v8583_v39, %s9174_s22  ;;  %8594 = vrot.lane.b32.xlu1 %v8593_v48, %s9174_s22 }
  0xc5   :  { %v202_v51 = vpop.f32.mrf.mxu1 }
  0xc6   :  { %v164_v53 = vpop.f32.mrf.mxu0 }
  0xc8   :  { %8599 = vrot.lane.b32.xlu2 %v8593_v48, %s9172_s21 }
  0xca   :  { %8619 = vrot.lane.b32.xlu1 %v8618_v52, %s9173_s6  ;;  %8614 = vrot.lane.b32.xlu0 %v8618_v52, %s9172_s21 }
  0xd0   :  { %8604 = vrot.lane.b32.xlu2 %v8593_v48, %s9173_s6 }
  0xd8   :  { %8609 = vrot.lane.b32.xlu2 %v8618_v52, %s9174_s22 }
 0x11a   :  { %v9402_v54 = vpop.permute.xlu2 %8589 }
 0x122   :  { %v9404_v55 = vpop.permute.xlu2 %8599 }
 0x123   :  { %v8601_v44 = vunpack.i.l.bf16 %v9404_v55 }
 0x12a   :  { %v9408_v58 = vpop.permute.xlu2 %8604 }
 0x12b   :  { %v8606_v6 = vunpack.i.l.bf16 %v9408_v58 }
 0x12c   :  { %v9406_v56 = vpop.permute.xlu1 %8584  ;;  %v8575_v57 = vpop.permute.xlu0 %8574 }
 0x12d   :  { %v8576_v59 = vunpack.i.l.bf16 %v8575_v57  ;;  %v8586_v60 = vunpack.i.l.bf16 %v9406_v56  ;;  %v8577_v3 = vunpack.i.h.bf16 %v8575_v57  ;;  %v707_v30 = vrot.slane %v8606_v6, 4 }
 0x12e   :  { %v8587_v31 = vunpack.i.h.bf16 %v9406_v56 }
 0x12f   :  { %v595_v1 = vrot.slane %v8576_v59, 4  ;;  %v609_v7 = vrot.slane %v8586_v60, 4  ;;  %v598_v8 = vsel %vm273_vm1, %v8576_v59, %v597_v4  ;;  %v651_v18 = vrot.slane %v8577_v3, 4 }
 0x130   :  { %v9425_v28 = vperm.slane %v598_v8, %v9418_v10  ;;  %v654_v47 = vsel %vm273_vm1, %v8577_v3, %v653_v27  ;;  %v9442_v59 = vsel %vm273_vm1, %v707_v30, %v9379_v45 }
 0x131   :  { %v596_v13 = vsel %vm273_vm1, %v595_v1, %v196_v34  ;;  %v652_v51 = vsel %vm273_vm1, %v651_v18, %v9365_v36  ;;  %v9452_v6 = vperm.slane %v654_v47, %v9418_v10 }
 0x132   :  { %v8610_v9 = vpop.permute.xlu2 %8609  ;;  %v602_v34 = vperm.slane %v596_v13, %v9418_v10  ;;  %v633_v57 = vrot.slane %v9425_v28, 4 }
 0x133   :  { %v8611_v29 = vunpack.i.l.bf16 %v8610_v9  ;;  %v8612_v52 = vunpack.i.h.bf16 %v8610_v9 }
 0x134   :  { %v9411_v61 = vpop.permute.xlu0 %8579  ;;  %v9413_v62 = vpop.permute.xlu1 %8594  ;;  %v621_v63 = vrot.slane %v602_v34, 4 }
 0x135   :  { %v8581_v2 = vunpack.i.l.bf16 %v9411_v61  ;;  %v8582_v32 = vunpack.i.h.bf16 %v9411_v61  ;;  %v341_v53 = vrot.slane %v8611_v29, 4  ;;  %v8596_v36 = vunpack.i.l.bf16 %v9413_v62 }
 0x136   :  { %v391_v45 = vrot.slane %v8612_v52, 4 }
 0x137   :  { %v607_v5 = vrot.slane %v8581_v2, 4  ;;  %v610_v25 = vsel %vm273_vm1, %v8581_v2, %v609_v7  ;;  %v663_v61 = vrot.slane %v8582_v32, 4 }
 0x138   :  { %v618_v41 = vperm.slane %v610_v25, %v9418_v10 }
 0x139   :  { %v608_v26 = vsel %vm273_vm1, %v607_v5, %v8586_v60  ;;  %v665_v60 = vrot.slane %v8587_v31, 4  ;;  %v9449_v5 = vperm.slane %v652_v51, %v9418_v10  ;;  %v664_v11 = vsel %vm273_vm1, %v663_v61, %v8587_v31 }
 0x13a   :  { %v614_v39 = vperm.slane %v608_v26, %v9418_v10  ;;  %v634_v3 = vsel %vm273_vm1, %v618_v41, %v633_v57  ;;  %v631_v52 = vrot.slane %v618_v41, 4 }
 0x13b   :  { %v642_v18 = vperm.slane %v634_v3, %v9430_v37 }
 0x13c   :  { %v8620_v33 = vpop.permute.xlu1 %8619  ;;  %v8615_v35 = vpop.permute.xlu0 %8614  ;;  %v619_v2 = vrot.slane %v614_v39, 4  ;;  %v622_v4 = vsel %vm273_vm1, %v614_v39, %v621_v63  ;;  %v713_v63 = vrot.slane %v8596_v36, 4  ;;  %v632_v41 = vsel %vm273_vm1, %v631_v52, %v9425_v28 }
 0x13d   :  { %v8621_v48 = vunpack.i.l.bf16 %v8620_v33  ;;  %v8616_v56 = vunpack.i.l.bf16 %v8615_v35  ;;  %v8622_v25 = vunpack.i.h.bf16 %v8620_v33  ;;  %v630_v30 = vperm.slane %v622_v4, %v9430_v37 }
 0x13e   :  { %v620_v27 = vsel %vm273_vm1, %v619_v2, %v602_v34  ;;  %v8617_v39 = vunpack.i.h.bf16 %v8615_v35  ;;  %v670_v34 = vperm.slane %v664_v11, %v9418_v10  ;;  %v649_v3 = vrot.slane %v642_v18, 4 }
 0x13f   :  { %v329_v0 = vrot.slane %v8621_v48, 4  ;;  %v332_v1 = vsel %vm273_vm1, %v8621_v48, %v331_v38  ;;  %v342_v9 = vsel %vm273_vm1, %v341_v53, %v8616_v56  ;;  %v343_v13 = vrot.slane %v8616_v56, 4 }
 0x140   :  { %v340_v8 = vperm.slane %v332_v1, %v9418_v10  ;;  %v348_v47 = vperm.slane %v342_v9, %v9418_v10  ;;  %v626_v31 = vperm.slane %v620_v27, %v9430_v37  ;;  %v645_v51 = vrot.slane %v630_v30, 4 }
 0x141   :  { %v330_v7 = vsel %vm273_vm1, %v329_v0, %v9389_v49  ;;  %v344_v49 = vsel %vm273_vm1, %v8611_v29, %v343_v13  ;;  %v666_v53 = vsel %vm273_vm1, %v8582_v32, %v665_v60  ;;  %v689_v56 = vrot.slane %v9452_v6, 4 }
 0x142   :  { %v336_v12 = vperm.slane %v330_v7, %v9418_v10  ;;  %v367_v26 = vrot.slane %v340_v8, 4  ;;  %v352_v48 = vperm.slane %v344_v49, %v9418_v10  ;;  %v385_v57 = vrot.slane %v8622_v25, 4 }
 0x143   :  { %v8623_v61 = vpack.i.bf16 %v626_v31, %v630_v30  ;;  %v392_v0 = vsel %vm273_vm1, %v391_v45, %v8617_v39  ;;  %v646_v1 = vsel %vm273_vm1, 0.0, %v645_v51  ;;  %v674_v4 = vperm.slane %v666_v53, %v9418_v10 }
 0x144   :  { %v355_v38 = vrot.slane %v336_v12, 4  ;;  %v365_v35 = vrot.slane %v352_v48, 4  ;;  %v368_v29 = vsel %vm273_vm1, %v352_v48, %v367_v26  ;;  %v8630_v2 = vpack.i.bf16 %v642_v18, %v646_v1 }
 0x145   :  { %8624 = vxpose.xlu0.b32.start.end [1/1] (short) (narrow) %v8623_v61, 8  ;;  %v353_v7 = vrot.slane %v348_v47, 4  ;;  %v643_v36 = vrot.slane %v626_v31, 4  ;;  %v386_v45 = vsel %vm273_vm1, %v385_v57, %v9393_v50  ;;  %v396_v11 = vperm.slane %v392_v0, %v9418_v10 }
 0x146   :  { %v356_v33 = vsel %vm273_vm1, %v348_v47, %v355_v38  ;;  %v366_v60 = vsel %vm273_vm1, %v365_v35, %v340_v8  ;;  %8631 = vxpose.xlu1.b32.start.end [1/1] (short) (narrow) %v8630_v2, 8  ;;  %v638_v28 = vperm.slane %v632_v41, %v9430_v37  ;;  %v675_v13 = vrot.slane %v670_v34, 4 }
 0x147   :  { %v364_v32 = vperm.slane %v356_v33, %v9430_v37  ;;  %v372_v9 = vperm.slane %v366_v60, %v9430_v37  ;;  %v714_v8 = vsel %vm273_vm1, %v713_v63, %v8601_v44  ;;  %v644_v25 = vsel %vm273_vm1, 0.0, %v643_v36 }
 0x148   :  { %v677_v26 = vrot.slane %v9449_v5, 4  ;;  %v8637_v30 = vpack.i.bf16 %v638_v28, %v644_v25  ;;  %v650_v38 = vsel %vm273_vm1, 0.0, %v649_v3  ;;  %v676_v50 = vsel %vm273_vm1, %v675_v13, %v9449_v5 }
 0x149   :  { %v381_v18 = vrot.slane %v372_v9, 4  ;;  %v379_v27 = vrot.slane %v364_v32, 4  ;;  %v390_v39 = vperm.slane %v386_v45, %v9418_v10  ;;  %v354_v49 = vsel %vm273_vm1, %v353_v7, %v336_v12 }
 0x14a   :  { %v682_v44 = vperm.slane %v676_v50, %v9430_v37  ;;  %v376_v48 = vperm.slane %v368_v29, %v9430_v37  ;;  %v397_v31 = vrot.slane %v396_v11, 4  ;;  %8638 = vxpose.xlu2.b32.start.end [1/1] (short) (narrow) %v8637_v30, 8  ;;  %v687_v51 = vrot.slane %v674_v4, 4 }
 0x14b   :  { %v481_v47 = vsel %vm273_vm1, %v381_v18, %v364_v32  ;;  %v678_v52 = vsel %vm273_vm1, %v670_v34, %v677_v26  ;;  %v690_v5 = vsel %vm273_vm1, %v674_v4, %v689_v56  ;;  %v380_v35 = vsel %vm273_vm1, 0.0, %v379_v27 }
 0x14c   :  { %v8644_v53 = vpack.i.bf16 %v682_v44, %v650_v38  ;;  %v699_v33 = vrot.slane %v682_v44, 4  ;;  %v686_v57 = vperm.slane %v678_v52, %v9430_v37  ;;  %v688_v12 = vsel %vm273_vm1, %v687_v51, %v9452_v6 }
 0x14d   :  { %v647_v61 = vrot.slane %v638_v28, 4  ;;  %v718_v63 = vperm.slane %v714_v8, %v9418_v10  ;;  %v694_v29 = vperm.slane %v688_v12, %v9430_v37  ;;  %v698_v1 = vperm.slane %v690_v5, %v9430_v37 }
 0x14e   :  { %8645 = vxpose.xlu0.b32.start.end [1/1] (short) (narrow) %v8644_v53, 8  ;;  %v700_v0 = vsel %vm273_vm1, 0.0, %v699_v33  ;;  %v701_v34 = vrot.slane %v686_v57, 4  ;;  %v712_v41 = vperm.slane %v9442_v59, %v9418_v10  ;;  %v9510_v32 = vperm.slane %v354_v49, %v9430_v37 }
 0x14f   :  { %v719_v56 = vrot.slane %v718_v63, 4  ;;  %v383_v60 = vrot.slane %v376_v48, 4  ;;  %v398_v6 = vsel %vm273_vm1, %v397_v31, %v390_v39  ;;  %v475_v2 = vrot.slane %v380_v35, 4 }
 0x150   :  { %v8665_v3 = vpack.i.bf16 %v694_v29, %v700_v0  ;;  %v8651_v4 = vpack.i.bf16 %v698_v1, %v686_v57  ;;  %v648_v7 = vsel %vm273_vm1, 0.0, %v647_v61  ;;  %v702_v9 = vsel %vm273_vm1, 0.0, %v701_v34 }
 0x151   :  { %v377_v36 = vrot.slane %v9510_v32, 4  ;;  %v703_v45 = vrot.slane %v694_v29, 4  ;;  %v402_v59 = vperm.slane %v398_v6, %v9430_v37  ;;  %v720_v11 = vsel %vm273_vm1, %v719_v56, %v712_v41 }
 0x152   :  { %8666 = vxpose.xlu1.b32.start.end [1/1] (short) (narrow) %v8665_v3, 8  ;;  %8652 = vxpose.xlu2.b32.start.end [1/1] (short) (narrow) %v8651_v4, 8  ;;  %v8658_v28 = vpack.i.bf16 %v702_v9, %v648_v7  ;;  %v705_v13 = vrot.slane %v698_v1, 4  ;;  %v384_v25 = vsel %vm273_vm1, 0.0, %v383_v60  ;;  %v724_v30 = vperm.slane %v720_v11, %v9430_v37 }
 0x153   :  { %v378_v8 = vsel %vm273_vm1, 0.0, %v377_v36  ;;  %v704_v27 = vsel %vm273_vm1, 0.0, %v703_v45  ;;  %v9523_v38 = vrot.slane %v402_v59, 4  ;;  %v486_v50 = vrot.slane %v384_v25, 4 }
 0x154   :  { %v476_v26 = vsel %vm273_vm1, %v475_v2, %v378_v8  ;;  %v706_v39 = vsel %vm273_vm1, 0.0, %v705_v13  ;;  %v382_v49 = vsel %vm273_vm1, 0.0, %v381_v18  ;;  %v485_v44 = vperm.slane %v481_v47, %v9418_v10 }
 0x155   :  { %v8672_v31 = vpack.i.bf16 %v706_v39, %v704_v27  ;;  %v725_v51 = vrot.slane %v724_v30, 4  ;;  %v493_v52 = vsel %vm273_vm1, %v9523_v38, %v376_v48  ;;  %v480_v53 = vperm.slane %v476_v26, %v9418_v10 }
 0x156   :  { %8659 = vxpose.xlu0.b32.start.end [1/1] (short) (narrow) %v8658_v28, 8  ;;  %v487_v33 = vsel %vm273_vm1, %v486_v50, %v382_v49  ;;  %v498_v57 = vrot.slane %v485_v44, 4  ;;  %v497_v5 = vperm.slane %v493_v52, %v9418_v10 }
 0x157   :  { %v726_v35 = vsel %vm273_vm1, 0.0, %v725_v51  ;;  %v500_v12 = vrot.slane %v480_v53, 4  ;;  %v491_v18 = vperm.slane %v487_v33, %v9418_v10 }
 0x158   :  { %v8679_v61 = vpack.i.bf16 %v726_v35, %v724_v30  ;;  %v499_v47 = vsel %vm273_vm1, %v498_v57, %v480_v53  ;;  %v510_v29 = vrot.slane %v497_v5, 4 }
 0x159   :  { %v505_v63 = vperm.slane %v499_v47, %v9430_v37  ;;  %v512_v48 = vrot.slane %v491_v18, 4  ;;  %v501_v0 = vsel %vm273_vm1, %v485_v44, %v500_v12 }
 0x15a   :  { %8673 = vxpose.xlu2.b32.start.end [1/1] (short) (narrow) %v8672_v31, 8  ;;  %v511_v34 = vsel %vm273_vm1, %v510_v29, %v491_v18  ;;  %v509_v56 = vperm.slane %v501_v0, %v9430_v37 }
 0x15b   :  { %v524_v1 = vrot.slane %v505_v63, 4  ;;  %v517_v41 = vperm.slane %v511_v34, %v9430_v37  ;;  %v513_v60 = vsel %vm273_vm1, %v497_v5, %v512_v48 }
 0x15c   :  { %v521_v6 = vperm.slane %v513_v60, %v9430_v37  ;;  %v528_v3 = vrot.slane %v509_v56, 4 }
 0x15d   :  { %v9544_v2 = vsel %vm273_vm1, %v517_v41, %v524_v1  ;;  %v522_v4 = vrot.slane %v517_v41, 4 }
 0x15e   :  { %v526_v7 = vrot.slane %v521_v6, 4  ;;  %v9547_v9 = vsel %vm273_vm1, %v521_v6, %v528_v3 }
 0x15f   :  { %v9550_v36 = vsel %vm273_vm1, %v522_v4, %v505_v63 }
 0x160   :  { %v9553_v45 = vsel %vm273_vm1, %v526_v7, %v509_v56 }
 0x162   :  { %8680 = vxpose.xlu2.b32.start.end [1/1] (short) (narrow) %v8679_v61, 8 }
 0x1e3   :  { %v8639_v59 = vpop.trf.xlu2 }
 0x1e4   :  { %v8643_v11 = vunpack.i.h.bf16 %v8639_v59  ;;  %v8640_v28 = vunpack.i.l.bf16 %v8639_v59 }
 0x1e6   :  { %v1329_v26 = vrot.slane %v8643_v11, 4  ;;  %v1317_v44 = vrot.slane %v8640_v28, 4 }
 0x1e9   :  { %v8625_v13 = vpop.trf.xlu0 }
 0x1ea   :  { %v8629_v8 = vunpack.i.h.bf16 %v8625_v13  ;;  %v8626_v25 = vunpack.i.l.bf16 %v8625_v13  ;;  %v8632_v27 = vpop.trf.xlu1 }
 0x1eb   :  { %v9555_v39 = vpop.trf.xlu2  ;;  %v8636_v49 = vunpack.i.h.bf16 %v8632_v27  ;;  %v8633_v35 = vunpack.i.l.bf16 %v8632_v27 }
 0x1ec   :  { %v1305_v30 = vrot.slane %v8629_v8, 4  ;;  %v1303_v50 = vrot.slane %v8626_v25, 4  ;;  %v8657_v31 = vunpack.i.h.bf16 %v9555_v39  ;;  %v8654_v57 = vunpack.i.l.bf16 %v9555_v39 }
 0x1ed   :  { %v1327_v53 = vrot.slane %v8636_v49, 4  ;;  %v1330_v18 = vsel %vm273_vm1, %v8636_v49, %v1329_v26  ;;  %v1315_v47 = vrot.slane %v8633_v35, 4  ;;  %v1318_v63 = vsel %vm273_vm1, %v8633_v35, %v1317_v44 }
 0x1ee   :  { %v1304_v51 = vsel %vm273_vm1, %v1303_v50, %v8629_v8  ;;  %v1306_v52 = vsel %vm273_vm1, %v8626_v25, %v1305_v30  ;;  %v9571_v61 = vrot.slane %v8657_v31, 4  ;;  %v9578_v0 = vperm.slane %v1330_v18, %v9418_v10 }
 0x1ef   :  { %v9561_v33 = vperm.slane %v1304_v51, %v9418_v10  ;;  %v9565_v5 = vperm.slane %v1306_v52, %v9418_v10  ;;  %v1328_v12 = vsel %vm273_vm1, %v1327_v53, %v8643_v11  ;;  %v1467_v1 = vrot.slane %v8654_v57, 4 }
 0x1f0   :  { %v9575_v29 = vperm.slane %v1328_v12, %v9418_v10  ;;  %v9581_v41 = vperm.slane %v1318_v63, %v9418_v10  ;;  %v1316_v3 = vsel %vm273_vm1, %v1315_v47, %v8640_v28  ;;  %v1389_v27 = vrot.slane %v9578_v0, 4 }
 0x1f1   :  { %v1353_v60 = vrot.slane %v9561_v33, 4  ;;  %v1365_v6 = vrot.slane %v9565_v5, 4  ;;  %v1322_v52 = vperm.slane %v1316_v3, %v9418_v10 }
 0x1f2   :  { %v8646_v48 = vpop.trf.xlu0  ;;  %v1377_v8 = vrot.slane %v9575_v29, 4  ;;  %v1363_v30 = vrot.slane %v9581_v41, 4 }
 0x1f3   :  { %v8650_v34 = vunpack.i.h.bf16 %v8646_v48  ;;  %v8674_v56 = vpop.trf.xlu2  ;;  %v8647_v7 = vunpack.i.l.bf16 %v8646_v48 }
 0x1f4   :  { %v8678_v59 = vunpack.i.h.bf16 %v8674_v56  ;;  %v8675_v11 = vunpack.i.l.bf16 %v8674_v56 }
 0x1f5   :  { %v1415_v4 = vrot.slane %v8650_v34, 4  ;;  %v9591_v51 = vperm.slane %v8650_v34, %v9418_v10  ;;  %v1339_v63 = vrot.slane %v8647_v7, 4 }
 0x1f6   :  { %v8667_v13 = vpop.trf.xlu1  ;;  %v1477_v25 = vrot.slane %v8678_v59, 4  ;;  %v1479_v50 = vrot.slane %v8675_v11, 4 }
 0x1f7   :  { %v8671_v26 = vunpack.i.h.bf16 %v8667_v13  ;;  %v8668_v49 = vunpack.i.l.bf16 %v8667_v13  ;;  %v1416_v44 = vsel %vm273_vm1, 0.0, %v1415_v4 }
 0x1f8   :  { %v1478_v53 = vsel %vm273_vm1, %v1477_v25, %v8675_v11  ;;  %v1480_v35 = vsel %vm273_vm1, %v8678_v59, %v1479_v50  ;;  %v9601_v4 = vperm.slane %v1416_v44, %v9418_v10  ;;  %v1354_v25 = vsel %vm273_vm1, %v1322_v52, %v1353_v60 }
 0x1f9   :  { %v1465_v28 = vrot.slane %v8671_v26, 4  ;;  %v1455_v12 = vrot.slane %v8668_v49, 4  ;;  %v1468_v18 = vsel %vm273_vm1, %v8671_v26, %v1467_v1  ;;  %v9598_v48 = vperm.slane %v1480_v35, %v9418_v10 }
 0x1fa   :  { %v8660_v47 = vpop.trf.xlu0  ;;  %v9605_v3 = vperm.slane %v1478_v53, %v9418_v10  ;;  %v9608_v59 = vperm.slane %v1468_v18, %v9418_v10 }
 0x1fb   :  { %v8664_v56 = vunpack.i.h.bf16 %v8660_v47  ;;  %v1466_v34 = vsel %vm273_vm1, %v1465_v28, %v8654_v57  ;;  %v8661_v13 = vunpack.i.l.bf16 %v8660_v47  ;;  %v9611_v11 = vpop.trf.xlu2  ;;  %v1539_v35 = vrot.slane %v9598_v48, 4 }
 0x1fc   :  { %v9617_v57 = vperm.slane %v1466_v34, %v9418_v10  ;;  %v8685_v53 = vunpack.i.h.bf16 %v9611_v11 }
 0x1fd   :  { %v1456_v1 = vsel %vm273_vm1, %v8664_v56, %v1455_v12  ;;  %v1453_v26 = vrot.slane %v8664_v56, 4  ;;  %v1340_v50 = vsel %vm273_vm1, %v1339_v63, %v8661_v13  ;;  %v1341_v44 = vrot.slane %v8661_v13, 4 }
 0x1fe   :  { %v1346_v28 = vperm.slane %v1340_v50, %v9418_v10  ;;  %v9622_v18 = vperm.slane %v1456_v1, %v9418_v10  ;;  %v8682_v12 = vunpack.i.l.bf16 %v9611_v11  ;;  %v1362_v63 = vperm.slane %v1354_v25, %v9430_v37 }
 0x1ff   :  { %v1342_v60 = vsel %vm273_vm1, %v8647_v7, %v1341_v44  ;;  %v1366_v56 = vsel %vm273_vm1, %v9581_v41, %v1365_v6  ;;  %v1454_v13 = vsel %vm273_vm1, %v1453_v26, %v8668_v49  ;;  %v9639_v7 = vperm.slane %v8685_v53, %v9418_v10 }
 0x200   :  { %v1350_v47 = vperm.slane %v1342_v60, %v9418_v10  ;;  %v1378_v34 = vsel %vm273_vm1, %v1346_v28, %v1377_v8  ;;  %v1489_v50 = vrot.slane %v8682_v12, 4  ;;  %v9633_v23 = vperm.slane %v1366_v56, %v9430_v37 }
 0x201   :  { %v1386_v1 = vperm.slane %v1378_v34, %v9430_v37  ;;  %v1351_v44 = vrot.slane %v1322_v52, 4  ;;  %v1375_v60 = vrot.slane %v1346_v28, 4  ;;  %v1405_v34 = vrot.slane %v1362_v63, 4 }
 0x202   :  { %v1390_v25 = vsel %vm273_vm1, %v1350_v47, %v1389_v27  ;;  %v1490_v41 = vsel %vm273_vm1, %v1489_v50, %v8657_v31  ;;  %v1413_v49 = vrot.slane %v9633_v23, 4  ;;  %v1364_v27 = vsel %vm273_vm1, %v1363_v30, %v9565_v5 }
 0x203   :  { %v9646_v6 = vperm.slane %v1390_v25, %v9430_v37  ;;  %v1403_v8 = vrot.slane %v1386_v1, 4  ;;  %v1352_v26 = vsel %vm273_vm1, %v1351_v44, %v9561_v33  ;;  %v1376_v56 = vsel %vm273_vm1, %v1375_v60, %v9575_v29 }
 0x204   :  { %v1358_v52 = vperm.slane %v1352_v26, %v9430_v37  ;;  %v1382_v28 = vperm.slane %v1376_v56, %v9430_v37  ;;  %v1406_v25 = vsel %vm273_vm1, %v1386_v1, %v1405_v34  ;;  %v9662_v33 = vperm.slane %v1364_v27, %v9430_v37 }
 0x205   :  { %v1404_v39 = vsel %vm273_vm1, %v1403_v8, %v1362_v63  ;;  %v1414_v31 = vsel %vm273_vm1, %v9646_v6, %v1413_v49  ;;  %v1387_v29 = vrot.slane %v1350_v47, 4  ;;  %v1425_v5 = vrot.slane %v9591_v51, 4 }
 0x206   :  { %v8686_v50 = vpack.i.bf16 %v1414_v31, %v1404_v39  ;;  %v1401_v44 = vrot.slane %v1358_v52, 4  ;;  %v1399_v60 = vrot.slane %v1382_v28, 4  ;;  %v1435_v30 = vrot.slane %v9601_v4, 4 }
 0x207   :  { %v1388_v63 = vsel %vm273_vm1, %v1387_v29, %v9578_v0  ;;  %v1409_v8 = vrot.slane %v9662_v33, 4  ;;  %v1430_v49 = vperm.slane %v9591_v51, %v9430_v37  ;;  %v9673_v1 = vperm.slane %v9601_v4, %v9430_v37 }
 0x208   :  { %8687 = vxpose.xlu1.b32.start [1/2] (short) (narrow) %v8686_v50, 8  ;;  %v1402_v47 = vsel %vm273_vm1, %v1382_v28, %v1401_v44  ;;  %v1394_v26 = vperm.slane %v1388_v63, %v9430_v37  ;;  %v1400_v56 = vsel %vm273_vm1, %v1399_v60, %v1358_v52  ;;  %v1426_v34 = vsel %vm273_vm1, 0.0, %v1425_v5 }
 0x209   :  { %v1492_v0 = vsel %vm273_vm1, %v8682_v12, %v9571_v61  ;;  %v8695_v27 = vpack.i.bf16 %v1402_v47, %v1406_v25  ;;  %v1434_v39 = vperm.slane %v1426_v34, %v9430_v37  ;;  %v1436_v51 = vsel %vm273_vm1, 0.0, %v1435_v30 }
 0x20a   :  { %v1410_v31 = vsel %vm273_vm1, %v1394_v26, %v1409_v8  ;;  %v9685_v4 = vperm.slane %v1436_v51, %v9430_v37  ;;  %v1445_v28 = vrot.slane %v1430_v49, 4  ;;  %v1460_v50 = vperm.slane %v1454_v13, %v9418_v10 }
 0x20b   :  { %v1575_v52 = vrot.slane %v9639_v7, 4  ;;  %8696 = vxpose.xlu0.b32.start [1/2] (short) (narrow) %v8695_v27, 8  ;;  %v8704_v29 = vpack.i.bf16 %v1410_v31, %v1400_v56  ;;  %v1447_v44 = vrot.slane %v1434_v39, 4  ;;  %v1496_v61 = vperm.slane %v1490_v41, %v9418_v10 }
 0x20c   :  { %v1451_v12 = vrot.slane %v9685_v4, 4  ;;  %v1449_v25 = vrot.slane %v9673_v1, 4  ;;  %v1501_v60 = vrot.slane %v9617_v57, 4  ;;  %v1503_v5 = vrot.slane %v1460_v50, 4 }
 0x20d   :  { %v1500_v30 = vperm.slane %v1492_v0, %v9418_v10  ;;  %8705 = vxpose.xlu2.b32.start [1/2] (short) (narrow) %v8704_v29, 8  ;;  %v1448_v63 = vsel %vm273_vm1, 0.0, %v1447_v44  ;;  %v1525_v13 = vrot.slane %v1496_v61, 4  ;;  %v1527_v8 = vrot.slane %v9605_v3, 4 }
 0x20e   :  { %v1452_v47 = vsel %vm273_vm1, 0.0, %v1451_v12  ;;  %v1446_v56 = vsel %vm273_vm1, 0.0, %v1445_v28  ;;  %v1502_v41 = vsel %vm273_vm1, %v1501_v60, %v1460_v50  ;;  %v1504_v34 = vsel %vm273_vm1, %v9617_v57, %v1503_v5 }
 0x20f   :  { %v8688_v27 = vpack.i.bf16 %v1452_v47, %v1434_v39  ;;  %v1508_v51 = vperm.slane %v1502_v41, %v9430_v37  ;;  %v1512_v0 = vperm.slane %v1504_v34, %v9430_v37  ;;  %v1526_v31 = vsel %vm273_vm1, %v1525_v13, %v9605_v3 }
 0x210   :  { %v8697_v29 = vpack.i.bf16 %v1446_v56, %v1448_v63  ;;  %v1450_v44 = vsel %vm273_vm1, 0.0, %v1449_v25  ;;  %v1528_v12 = vsel %vm273_vm1, %v1496_v61, %v1527_v8  ;;  %v1532_v28 = vperm.slane %v1526_v31, %v9430_v37 }
 0x211   :  { %8689 = vxpose.xlu1.b32.end [2/2] (short) (narrow) %v8688_v27, 8  ;;  %v1536_v50 = vperm.slane %v1528_v12, %v9430_v37  ;;  %v1551_v60 = vrot.slane %v1508_v51, 4  ;;  %v1555_v57 = vrot.slane %v1512_v0, 4  ;;  %v1515_v39 = vrot.slane %v9622_v18, 4 }
 0x212   :  { %v1407_v5 = vrot.slane %v1394_v26, 4  ;;  %v1540_v47 = vsel %vm273_vm1, %v1500_v30, %v1539_v35  ;;  %v1565_v3 = vrot.slane %v8685_v53, 4  ;;  %v8706_v25 = vpack.i.bf16 %v1450_v44, %v1430_v49 }
 0x213   :  { %8698 = vxpose.xlu0.b32.end [2/2] (short) (narrow) %v8697_v29, 8  ;;  %v1556_v61 = vsel %vm273_vm1, %v1536_v50, %v1555_v57  ;;  %v1516_v63 = vsel %vm273_vm1, %v9608_v59, %v1515_v39  ;;  %v1411_v13 = vrot.slane %v9646_v6, 4  ;;  %v1548_v26 = vperm.slane %v1540_v47, %v9430_v37 }
 0x214   :  { %v1524_v8 = vperm.slane %v1516_v63, %v9430_v37  ;;  %v1553_v56 = vrot.slane %v1536_v50, 4  ;;  %v1549_v41 = vrot.slane %v1532_v28, 4  ;;  %v1552_v35 = vsel %vm273_vm1, %v1532_v28, %v1551_v60 }
 0x215   :  { %8707 = vxpose.xlu2.b32.end [2/2] (short) (narrow) %v8706_v25, 8  ;;  %v1576_v11 = vsel %vm273_vm1, 0.0, %v1575_v52  ;;  %v9725_v53 = vperm.slane %v9639_v7, %v9430_v37  ;;  %v8727_v49 = vpack.i.bf16 %v1552_v35, %v1556_v61  ;;  %v1408_v34 = vsel %vm273_vm1, %v1407_v5, %v9662_v33 }
 0x216   :  { %v1561_v6 = vrot.slane %v1548_v26, 4  ;;  %v1584_v27 = vperm.slane %v1576_v11, %v9430_v37  ;;  %v1563_v31 = vrot.slane %v1524_v8, 4  ;;  %v1513_v44 = vrot.slane %v9608_v59, 4 }
 0x217   :  { %v1595_v29 = vrot.slane %v9725_v53, 4  ;;  %v1537_v12 = vrot.slane %v1500_v30, 4  ;;  %v1412_v52 = vsel %vm273_vm1, %v1411_v13, %v9633_v23  ;;  %v1554_v28 = vsel %vm273_vm1, %v1553_v56, %v1512_v0 }
 0x218   :  { %v1597_v7 = vrot.slane %v1584_v27, 4  ;;  %v8713_v50 = vpack.i.bf16 %v1408_v34, %v1412_v52  ;;  %v9738_v60 = vsel %vm273_vm1, %v1549_v41, %v1508_v51  ;;  %v1562_v57 = vsel %vm273_vm1, %v1561_v6, %v1524_v8 }
 0x219   :  { %8728 = vxpose.xlu1.b32.start [1/2] (short) (narrow) %v8727_v49, 8  ;;  %v1538_v33 = vsel %vm273_vm1, %v1537_v12, %v9598_v48  ;;  %v1596_v39 = vsel %vm273_vm1, 0.0, %v1595_v29  ;;  %v8736_v30 = vpack.i.bf16 %v1562_v57, %v1554_v28  ;;  %v1514_v23 = vsel %vm273_vm1, %v1513_v44, %v9622_v18 }
 0x21a   :  { %v1598_v59 = vsel %vm273_vm1, 0.0, %v1597_v7  ;;  %v1566_v0 = vsel %vm273_vm1, 0.0, %v1565_v3  ;;  %v9747_v5 = vsel %vm273_vm1, %v1548_v26, %v1563_v31  ;;  %v1544_v48 = vperm.slane %v1538_v33, %v9430_v37 }
 0x21b   :  { %8714 = vxpose.xlu0.b32.start [1/2] (short) (narrow) %v8713_v50, 8  ;;  %v8759_v51 = vpack.i.bf16 %v9738_v60, %v9747_v5  ;;  %v8729_v47 = vpack.i.bf16 %v1596_v39, %v1598_v59  ;;  %v1520_v25 = vperm.slane %v1514_v23, %v9430_v37  ;;  %v1574_v61 = vperm.slane %v1566_v0, %v9418_v10 }
 0x21c   :  { %v1557_v63 = vrot.slane %v1544_v48, 4  ;;  %v8715_v18 = vpack.i.bf16 %v9673_v1, %v9685_v4  ;;  %v8607_v6 = vunpack.i.h.bf16 %v9408_v58  ;;  %v8597_v31 = vunpack.i.h.bf16 %v9413_v62 }
 0x21d   :  { %8737 = vxpose.xlu2.b32.start [1/2] (short) (narrow) %v8736_v30, 8  ;;  %v1559_v3 = vrot.slane %v1520_v25, 4  ;;  %v1590_v13 = vperm.slane %v1574_v61, %v9430_v37  ;;  %v1585_v49 = vrot.slane %v1574_v61, 4  ;;  %v8602_v44 = vunpack.i.h.bf16 %v9404_v55 }
 0x21e   :  { %v1558_v8 = vsel %vm273_vm1, %v1557_v63, %v1520_v25  ;;  %v272_v29 = vrot.slane %v8607_v6, 4  ;;  %v285_v12 = vrot.slane %v8597_v31, 4  ;;  %v460_v60 = vperm.slane %v9510_v32, %v9418_v10 }
 0x21f   :  { %v1560_v26 = vsel %vm273_vm1, %v1544_v48, %v1559_v3  ;;  %v1599_v56 = vrot.slane %v1590_v13, 4  ;;  %v1586_v34 = vsel %vm273_vm1, 0.0, %v1585_v49  ;;  %v287_v28 = vrot.slane %v8602_v44, 4 }
 0x220   :  { %v8745_v41 = vpack.i.bf16 %v1560_v26, %v1558_v8  ;;  %v1594_v1 = vperm.slane %v1586_v34, %v9430_v37  ;;  %v274_v52 = vsel %vm273_vm1, %v272_v29, %v9375_v42  ;;  %v286_v58 = vsel %vm273_vm1, %v285_v12, %v8602_v44 }
 0x221   :  { %8730 = vxpose.xlu1.b32.end [2/2] (short) (narrow) %v8729_v47, 8  ;;  %v1600_v35 = vsel %vm273_vm1, 0.0, %v1599_v56  ;;  %v280_v7 = vperm.slane %v274_v52, %v9418_v10  ;;  %v288_v50 = vsel %vm273_vm1, %v8597_v31, %v287_v28  ;;  %v292_v55 = vperm.slane %v286_v58, %v9418_v10 }
 0x222   :  { %v8747_v11 = vpack.i.bf16 %v1600_v35, %v1590_v13  ;;  %v8738_v4 = vpack.i.bf16 %v1594_v1, %v1584_v27  ;;  %v275_v27 = vrot.slane %v9375_v42, 4  ;;  %v296_v39 = vperm.slane %v288_v50, %v9418_v10 }
 0x223   :  { %8716 = vxpose.xlu0.b32.end [2/2] (short) (narrow) %v8715_v18, 8  ;;  %v299_v57 = vrot.slane %v280_v7, 4  ;;  %v297_v59 = vrot.slane %v292_v55, 4 }
 0x224   :  { %v276_v62 = vsel %vm273_vm1, %v8607_v6, %v275_v27  ;;  %v309_v23 = vrot.slane %v296_v39, 4  ;;  %v1601_v27 = vrot.slane %v1594_v1, 4 }
 0x225   :  { %8739 = vxpose.xlu2.b32.end [2/2] (short) (narrow) %v8738_v4, 8  ;;  %v284_v33 = vperm.slane %v276_v62, %v9418_v10  ;;  %v298_v48 = vsel %vm273_vm1, %v297_v59, %v280_v7 }
 0x226   :  { %v304_v25 = vperm.slane %v298_v48, %v9430_v37  ;;  %v1602_v59 = vsel %vm273_vm1, 0.0, %v1601_v27 }
 0x227   :  { %v311_v30 = vrot.slane %v284_v33, 4  ;;  %v310_v61 = vsel %vm273_vm1, %v309_v23, %v284_v33  ;;  %v8761_v48 = vpack.i.bf16 %v9725_v53, %v1602_v59 }
 0x228   :  { %v316_v18 = vperm.slane %v310_v61, %v9430_v37  ;;  %v321_v13 = vrot.slane %v304_v25, 4 }
 0x229   :  { %8746 = vxpose.xlu1.b32.start [1/2] (short) (narrow) %v8745_v41, 8  ;;  %v312_v0 = vsel %vm273_vm1, %v296_v39, %v311_v30 }
 0x22a   :  { %v320_v47 = vperm.slane %v312_v0, %v9430_v37  ;;  %v325_v56 = vrot.slane %v316_v18, 4 }
 0x22c   :  { %v327_v3 = vrot.slane %v320_v47, 4  ;;  %v326_v34 = vsel %vm273_vm1, 0.0, %v325_v56 }
 0x22e   :  { %v328_v41 = vsel %vm273_vm1, 0.0, %v327_v3 }
 0x22f   :  { %v419_v49 = vrot.slane %v328_v41, 4 }
 0x231   :  { %8748 = vxpose.xlu1.b32.end [2/2] (short) (narrow) %v8747_v11, 8  ;;  %v322_v11 = vsel %vm273_vm1, 0.0, %v321_v13  ;;  %v420_v12 = vsel %vm273_vm1, %v419_v49, %v326_v34 }
 0x232   :  { %v424_v7 = vperm.slane %v420_v12, %v9418_v10 }
 0x28b   :  { %8755 = vrot.lane.b32.xlu1 %v9383_v46, %s9172_s21 }
 0x291   :  { %8723 = vrot.lane.b32.xlu0 %v9383_v46, %s9174_s22  ;;  %v300_v46 = vsel %vm273_vm1, %v292_v55, %v299_v57 }
 0x292   :  { %v308_v42 = vperm.slane %v300_v46, %v9430_v37  ;;  %v414_v46 = vsel %vm273_vm1, %v327_v3, %v316_v18 }
 0x293   :  { %v418_v47 = vperm.slane %v414_v46, %v9418_v10 }
 0x294   :  { %v323_v63 = vrot.slane %v308_v42, 4 }
 0x296   :  { %v324_v8 = vsel %vm273_vm1, 0.0, %v323_v63  ;;  %v403_v62 = vsel %vm273_vm1, %v323_v63, %v304_v25  ;;  %v466_v25 = vperm.slane %v460_v60, %v9430_v37 }
 0x297   :  { %v408_v35 = vrot.slane %v324_v8, 4  ;;  %v407_v1 = vperm.slane %v403_v62, %v9418_v10 }
 0x299   :  { %v409_v4 = vsel %vm273_vm1, %v408_v35, %v322_v11  ;;  %v471_v35 = vrot.slane %v466_v25, 4 }
 0x29a   :  { %v9793_v44 = vperm.slane %v409_v4, %v9418_v10 }
 0x29b   :  { %v472_v27 = vsel %vm273_vm1, 0.0, %v471_v35 }
 0x29c   :  { %v425_v50 = vrot.slane %v9793_v44, 4 }
 0x29e   :  { %v426_v0 = vsel %vm273_vm1, %v425_v50, %v407_v1 }
 0x29f   :  { %v432_v32 = vperm.slane %v426_v0, %v9430_v37 }
 0x2a1   :  { %v451_v41 = vrot.slane %v432_v32, 4 }
 0x2a6   :  { %v8708_v26 = vpop.trf.xlu2 }
 0x2a7   :  { %v8709_v39 = vunpack.i.l.bf16 %v8708_v26  ;;  %v8712_v42 = vunpack.i.h.bf16 %v8708_v26 }
 0x2ad   :  { %v8690_v6 = vpop.trf.xlu1 }
 0x2ae   :  { %v8691_v29 = vunpack.i.l.bf16 %v8690_v6  ;;  %v8694_v33 = vunpack.i.h.bf16 %v8690_v6 }
 0x2af   :  { %v8699_v31 = vpop.trf.xlu0 }
 0x2b0   :  { %v8703_v52 = vunpack.i.h.bf16 %v8699_v31  ;;  %v8700_v28 = vunpack.i.l.bf16 %v8699_v31  ;;  %v2115_v57 = vrot.slane %v8691_v29, 4  ;;  %v2133_v30 = vrot.slane %v8694_v33, 4 }
 0x2b1   :  { %v427_v29 = vrot.slane %v407_v1, 4  ;;  %v461_v33 = vrot.slane %v460_v60, 4 }
 0x2b2   :  { %v2121_v58 = vrot.slane %v8700_v28, 4  ;;  %v2116_v23 = vsel %vm273_vm1, %v2115_v57, %v8709_v39  ;;  %v2134_v3 = vsel %vm273_vm1, %v2133_v30, %v8712_v42  ;;  %v550_v57 = vpack.c.bf16 %v466_v25, %v466_v25 }
 0x2b3   :  { %8760 = vxpose.xlu0.b32.start [1/2] (short) (narrow) %v8759_v51, 8  ;;  %v437_v51 = vrot.slane %v424_v7, 4  ;;  %v2120_v61 = vperm.slane %v2116_v23, %v9418_v10  ;;  %v2138_v53 = vperm.slane %v2134_v3, %v9418_v10  ;;  %v428_v23 = vsel %vm273_vm1, %v9793_v44, %v427_v29 }
 0x2b4   :  { %v2122_v55 = vsel %vm273_vm1, %v2121_v58, %v8703_v52  ;;  %v439_v52 = vrot.slane %v418_v47, 4  ;;  %v462_v25 = vsel %vm273_vm1, 0.0, %v461_v33 }
 0x2b5   :  { %v2126_v5 = vperm.slane %v2122_v55, %v9418_v10  ;;  %v438_v18 = vsel %vm273_vm1, %v437_v51, %v418_v47  ;;  %v2141_v13 = vrot.slane %v2120_v61, 4  ;;  %v2151_v12 = vrot.slane %v2138_v53, 4 }
 0x2b6   :  { %v444_v8 = vperm.slane %v438_v18, %v9430_v37  ;;  %v552_v51 = vpack.c.bf16 %v472_v27, %v472_v27  ;;  %v440_v0 = vsel %vm273_vm1, %v424_v7, %v439_v52  ;;  %v2560_v47 = vunpack.c.l.b16 %v550_v57 }
 0x2b7   :  { %v2139_v63 = vrot.slane %v2126_v5, 4  ;;  %v2142_v34 = vsel %vm273_vm1, %v2126_v5, %v2141_v13 }
 0x2b8   :  { %v449_v31 = vrot.slane %v444_v8, 4  ;;  %v452_v28 = vsel %vm273_vm1, %v444_v8, %v451_v41  ;;  %v2150_v50 = vperm.slane %v2142_v34, %v9430_v37  ;;  %v2587_v13 = vunpack.c.l.b16 %v552_v51 }
 0x2b9   :  { %v2140_v56 = vsel %vm273_vm1, %v2139_v63, %v2120_v61  ;;  %v551_v5 = vpack.c.bf16 %v452_v28, %v452_v28  ;;  %v448_v8 = vperm.slane %v440_v0, %v9430_v37 }
 0x2ba   :  { %v2146_v6 = vperm.slane %v2140_v56, %v9430_v37  ;;  %v450_v59 = vsel %vm273_vm1, %v449_v31, %v432_v32  ;;  %v2169_v42 = vrot.slane %v2150_v50, 4 }
 0x2bb   :  { %8762 = vxpose.xlu0.b32.end [2/2] (short) (narrow) %v8761_v48, 8  ;;  %v549_v48 = vpack.c.bf16 %v450_v59, %v450_v59  ;;  %v2586_v3 = vunpack.c.l.b16 %v551_v5  ;;  %v453_v27 = vrot.slane %v448_v8, 4 }
 0x2bc   :  { %v2165_v39 = vrot.slane %v2146_v6, 4 }
 0x2bd   :  { %v9825_v58 = vpop.trf.xlu1  ;;  %v2559_v35 = vunpack.c.l.b16 %v549_v48  ;;  %v2588_v31 = vpack.c.b16 %v2587_v13, %v2586_v3  ;;  %v8592_v48 = vunpack.i.h.bf16 %v9402_v54 }
 0x2bf   :  { %v8717_v26 = vpop.trf.xlu0  ;;  %v2561_v52 = vpack.c.b16 %v2560_v47, %v2559_v35 }
 0x2c0   :  { %v8721_v11 = vunpack.i.h.bf16 %v8717_v26  ;;  %v8718_v49 = vunpack.i.l.bf16 %v8717_v26 }
 0x2c2   :  { %v2127_v4 = vrot.slane %v8718_v49, 4 }
 0x2c4   :  { %v2128_v62 = vsel %vm273_vm1, %v2127_v4, %v8721_v11 }
 0x2c5   :  { %v2132_v55 = vperm.slane %v2128_v62, %v9418_v10 }
 0x2c7   :  { %v2152_v1 = vsel %vm273_vm1, %v2151_v12, %v2132_v55  ;;  %v2153_v46 = vrot.slane %v2132_v55, 4  ;;  %v436_v12 = vperm.slane %v428_v23, %v9430_v37 }
 0x2c8   :  { %v2158_v30 = vperm.slane %v2152_v1, %v9430_v37 }
 0x2c9   :  { %v2154_v60 = vsel %vm273_vm1, %v2138_v53, %v2153_v46  ;;  %v470_v53 = vperm.slane %v462_v25, %v9430_v37  ;;  %v454_v55 = vsel %vm273_vm1, %v453_v27, %v436_v12  ;;  %v2321_v25 = vrot.slane %v8592_v48, 4 }
 0x2ca   :  { %v2166_v61 = vsel %vm273_vm1, %v2158_v30, %v2165_v39  ;;  %v2163_v63 = vrot.slane %v2158_v30, 4  ;;  %v2162_v32 = vperm.slane %v2154_v60, %v9430_v37  ;;  %v553_v59 = vpack.c.bf16 %v454_v55, %v454_v55 }
 0x2cb   :  { %v2228_v18 = vpack.c.bf16 %v2166_v61, %v2166_v61  ;;  %v473_v62 = vrot.slane %v470_v53, 4  ;;  %v554_v57 = vpack.c.bf16 %v470_v53, %v470_v53  ;;  %v2323_v60 = vrot.slane %v9377_v43, 4 }
 0x2cc   :  { %v2164_v44 = vsel %vm273_vm1, %v2163_v63, %v2146_v6  ;;  %v2167_v7 = vrot.slane %v2162_v32, 4  ;;  %v2170_v26 = vsel %vm273_vm1, %v2162_v32, %v2169_v42  ;;  %v2611_v51 = vunpack.c.l.b16 %v553_v59 }
 0x2cd   :  { %v2593_v56 = vsel %vm2566_vm2, %v2228_v18, 0  ;;  %v2227_v41 = vpack.c.bf16 %v2164_v44, %v2164_v44  ;;  %v2230_v11 = vpack.c.bf16 %v2170_v26, %v2170_v26  ;;  %v9845_v49 = vpop.trf.xlu1  ;;  %v474_v33 = vsel %vm273_vm1, 0.0, %v473_v62 }
 0x2ce   :  { %2602 = vmatpush.bf16.msra.mxu3 %v2593_v56  ;;  %v2168_v34 = vsel %vm273_vm1, %v2167_v7, %v2150_v50  ;;  %v455_v50 = vrot.slane %v436_v12, 4  ;;  %v556_v1 = vpack.c.bf16 %v474_v33, %v474_v33  ;;  %v2612_v46 = vunpack.c.l.b16 %v554_v57 }
 0x2cf   :  { %v2568_v4 = vsel %vm2566_vm2, %v2227_v41, 0  ;;  %v2229_v6 = vpack.c.bf16 %v2168_v34, %v2168_v34  ;;  %v2643_v29 = vsel %vm2566_vm2, %v2230_v11, 0  ;;  %v2324_v61 = vsel %vm273_vm1, %v8592_v48, %v2323_v60 }
 0x2d0   :  { %2577 = vmatpush.bf16.msrb.mxu0 %v2568_v4  ;;  %v456_v39 = vsel %vm273_vm1, %v448_v8, %v455_v50  ;;  %v2637_v30 = vunpack.c.l.b16 %v556_v1  ;;  %v2613_v42 = vpack.c.b16 %v2612_v46, %v2611_v51  ;;  %v2322_v32 = vsel %vm273_vm1, %v2321_v25, %v9377_v43 }
 0x2d1   :  { %8335 = vmatmul.msk.bf16.vlgmr.msra.gmra.mxu3 %vm2562_vm3, %v2588_v31  ;;  %v2618_v28 = vsel %vm2566_vm2, %v2229_v6, 0  ;;  %v555_v5 = vpack.c.bf16 %v456_v39, %v456_v39  ;;  %v2332_v18 = vperm.slane %v2324_v61, %v9418_v10  ;;  %v2328_v44 = vperm.slane %v2322_v32, %v9418_v10 }
 0x2d2   :  { %2627 = vmatpush.bf16.msrb.mxu3 %v2618_v28  ;;  %v8591_v25 = vunpack.i.l.bf16 %v9402_v54 }
 0x2d3   :  { %8334 = vmatmul.msk.bf16.vlgmr.msrb.gmra.mxu0 %vm2562_vm3, %v2561_v52  ;;  %v2636_v23 = vunpack.c.l.b16 %v555_v5  ;;  %v2359_v53 = vrot.slane %v2332_v18, 4  ;;  %v2347_v35 = vrot.slane %v2328_v44, 4 }
 0x2d4   :  { %2652 = vmatpush.bf16.msra.mxu0 %v2643_v29 }
 0x2d5   :  { %v2638_v0 = vpack.c.b16 %v2637_v30, %v2636_v23 }
 0x2e1   :  { %8336 = vmatmul.msk.bf16.vlgmr.msrb.gmra.mxu3 %vm2562_vm3, %v2613_v42 }
 0x2e3   :  { %8337 = vmatmul.msk.bf16.vlgmr.msra.gmra.mxu0 %vm2562_vm3, %v2638_v0 }
 0x2fd   :  { %v8756_v47 = vpop.permute.xlu1 %8755 }
 0x2fe   :  { %v8758_v63 = vunpack.i.h.bf16 %v8756_v47 }
 0x300   :  { %v2335_v13 = vrot.slane %v8758_v63, 4 }
 0x303   :  { %v8724_v3 = vpop.permute.xlu0 %8723 }
 0x304   :  { %v8726_v8 = vunpack.i.h.bf16 %v8724_v3  ;;  %v8725_v61 = vunpack.i.l.bf16 %v8724_v3 }
 0x306   :  { %v2333_v7 = vrot.slane %v8726_v8, 4  ;;  %v2336_v26 = vsel %vm273_vm1, %v8726_v8, %v2335_v13  ;;  %v2277_v13 = vrot.slane %v8725_v61, 4 }
 0x307   :  { %v2344_v56 = vperm.slane %v2336_v26, %v9418_v10 }
 0x308   :  { %v2334_v41 = vsel %vm273_vm1, %v2333_v7, %v8758_v63  ;;  %v2265_v63 = vrot.slane %v8591_v25, 4  ;;  %v2267_v7 = vrot.slane %v9371_v40, 4 }
 0x309   :  { %v2340_v11 = vperm.slane %v2334_v41, %v9418_v10  ;;  %v2357_v34 = vrot.slane %v2344_v56, 4  ;;  %v2360_v43 = vsel %vm273_vm1, %v2344_v56, %v2359_v53 }
 0x30a   :  { %v9872_v4 = vperm.slane %v2360_v43, %v9430_v37  ;;  %v2268_v56 = vsel %vm273_vm1, %v8591_v25, %v2267_v7 }
 0x30b   :  { %v2345_v31 = vrot.slane %v2340_v11, 4  ;;  %v2348_v6 = vsel %vm273_vm1, %v2340_v11, %v2347_v35  ;;  %v2358_v29 = vsel %vm273_vm1, %v2357_v34, %v2332_v18  ;;  %v8757_v18 = vunpack.i.l.bf16 %v8756_v47 }
 0x30c   :  { %v2356_v12 = vperm.slane %v2348_v6, %v9430_v37  ;;  %v2364_v52 = vperm.slane %v2358_v29, %v9430_v37  ;;  %v2375_v28 = vrot.slane %v9872_v4, 4  ;;  %v2276_v41 = vperm.slane %v2268_v56, %v9418_v10 }
 0x30d   :  { %v2346_v27 = vsel %vm273_vm1, %v2345_v31, %v2328_v44  ;;  %v2266_v44 = vsel %vm273_vm1, %v2265_v63, %v9371_v40  ;;  %v2279_v26 = vrot.slane %v8757_v18, 4  ;;  %v2278_v53 = vsel %vm273_vm1, %v2277_v13, %v8757_v18 }
 0x30e   :  { %v9881_v62 = vperm.slane %v2346_v27, %v9430_v37  ;;  %v2371_v50 = vrot.slane %v2356_v12, 4  ;;  %v2373_v55 = vrot.slane %v2364_v52, 4  ;;  %v2376_v33 = vsel %vm273_vm1, 0.0, %v2375_v28  ;;  %v9918_v27 = vpop.trf.xlu2 }
 0x30f   :  { %v2478_v57 = vrot.slane %v2376_v33, 4  ;;  %v2272_v54 = vperm.slane %v2266_v44, %v9418_v10  ;;  %v2280_v3 = vsel %vm273_vm1, %v8725_v61, %v2279_v26  ;;  %v2284_v47 = vperm.slane %v2278_v53, %v9418_v10 }
 0x310   :  { %v2369_v39 = vrot.slane %v9881_v62, 4  ;;  %v2372_v59 = vsel %vm273_vm1, 0.0, %v2371_v50  ;;  %v2374_v1 = vsel %vm273_vm1, 0.0, %v2373_v55  ;;  %v2473_v46 = vsel %vm273_vm1, %v2373_v55, %v2356_v12 }
 0x311   :  { %v2467_v5 = vrot.slane %v2372_v59, 4  ;;  %v2477_v51 = vperm.slane %v2473_v46, %v9418_v10  ;;  %v9890_v30 = vsel %vm273_vm1, %v2478_v57, %v2374_v1  ;;  %v2291_v35 = vrot.slane %v2272_v54, 4 }
 0x312   :  { %v2370_v42 = vsel %vm273_vm1, 0.0, %v2369_v39  ;;  %v2288_v11 = vperm.slane %v2280_v3, %v9418_v10  ;;  %v2289_v34 = vrot.slane %v2284_v47, 4  ;;  %v2303_v40 = vrot.slane %v2276_v41, 4 }
 0x313   :  { %v2468_v23 = vsel %vm273_vm1, %v2467_v5, %v2370_v42  ;;  %v2490_v0 = vrot.slane %v2477_v51, 4  ;;  %v2292_v43 = vsel %vm273_vm1, %v2284_v47, %v2291_v35  ;;  %v530_v39 = vsel %vm273_vm1, 0.0, %v9523_v38 }
 0x314   :  { %v2472_v48 = vperm.slane %v2468_v23, %v9418_v10  ;;  %v2301_v31 = vrot.slane %v2288_v11, 4  ;;  %v2300_v6 = vperm.slane %v2292_v43, %v9430_v37  ;;  %v2304_v29 = vsel %vm273_vm1, %v2288_v11, %v2303_v40 }
 0x315   :  { %v2290_v12 = vsel %vm273_vm1, %v2289_v34, %v2272_v54  ;;  %v2312_v28 = vperm.slane %v2304_v29, %v9430_v37  ;;  %v534_v46 = vperm.slane %v530_v39, %v9418_v10  ;;  %v8732_v13 = vunpack.i.l.bf16 %v9825_v58 }
 0x316   :  { %v9896_v60 = vsel %vm273_vm1, %v2490_v0, %v2472_v48  ;;  %v2492_v32 = vrot.slane %v2472_v48, 4  ;;  %v2302_v52 = vsel %vm273_vm1, %v2301_v31, %v2276_v41  ;;  %v2296_v50 = vperm.slane %v2290_v12, %v9430_v37 }
 0x317   :  { %v2315_v55 = vrot.slane %v2300_v6, 4  ;;  %v2308_v33 = vperm.slane %v2302_v52, %v9430_v37  ;;  %v2319_v57 = vrot.slane %v2312_v28, 4  ;;  %v535_v25 = vrot.slane %v534_v46, 4 }
 0x318   :  { %v9900_v8 = vsel %vm273_vm1, %v2477_v51, %v2492_v32  ;;  %v2313_v59 = vrot.slane %v2296_v50, 4  ;;  %v9932_v38 = vperm.slane %v534_v46, %v9430_v37  ;;  %v559_v47 = vpack.c.bf16 %v9544_v2, %v9544_v2 }
 0x319   :  { %v2316_v1 = vsel %vm273_vm1, 0.0, %v2315_v55  ;;  %v2317_v5 = vrot.slane %v2308_v33, 4  ;;  %v2320_v51 = vsel %vm273_vm1, 0.0, %v2319_v57  ;;  %v2406_v0 = vsel %vm273_vm1, %v2319_v57, %v2308_v33 }
 0x31a   :  { %v2400_v42 = vrot.slane %v2316_v1, 4  ;;  %v2314_v23 = vsel %vm273_vm1, 0.0, %v2313_v59  ;;  %v2411_v48 = vrot.slane %v2320_v51, 4  ;;  %v2395_v32 = vsel %vm273_vm1, %v2315_v55, %v2296_v50  ;;  %v9972_v59 = vld [vmem:[%s12175_s1] sm:$0xff] }
 0x31b   :  { %v2318_v61 = vsel %vm273_vm1, 0.0, %v2317_v5  ;;  %v2410_v18 = vperm.slane %v2406_v0, %v9418_v10  ;;  %v536_v26 = vsel %vm273_vm1, 0.0, %v535_v25  ;;  %v2399_v53 = vperm.slane %v2395_v32, %v9418_v10 }
 0x31c   :  { %v2401_v63 = vsel %vm273_vm1, %v2400_v42, %v2314_v23  ;;  %v2412_v7 = vsel %vm273_vm1, %v2411_v48, %v2318_v61  ;;  %v545_v56 = vrot.slane %v9932_v38, 4  ;;  %v9946_v41 = vperm.slane %v536_v26, %v9430_v37 }
 0x31d   :  { %v2405_v44 = vperm.slane %v2401_v63, %v9418_v10  ;;  %v2416_v54 = vperm.slane %v2412_v7, %v9418_v10  ;;  %v2431_v3 = vrot.slane %v2410_v18, 4  ;;  %v8735_v35 = vunpack.i.h.bf16 %v9825_v58 }
 0x31e   :  { %v2177_v11 = vrot.slane %v8732_v13, 4  ;;  %v2452_v43 = vperm.slane %v9881_v62, %v9418_v10  ;;  %v563_v40 = vpack.c.bf16 %v9547_v9, %v9547_v9  ;;  %v2419_v31 = vrot.slane %v2399_v53, 4 }
 0x31f   :  { %v2417_v34 = vrot.slane %v2405_v44, 4  ;;  %v546_v6 = vsel %vm273_vm1, 0.0, %v545_v56  ;;  %v558_v29 = vpack.c.bf16 %v9932_v38, %v9932_v38  ;;  %v2429_v2 = vrot.slane %v2416_v54, 4 }
 0x320   :  { %v2432_v12 = vsel %vm273_vm1, %v2416_v54, %v2431_v3  ;;  %v9957_v52 = vunpack.c.l.b16 %v559_v47  ;;  %v547_v58 = vrot.slane %v9946_v41, 4  ;;  %v2178_v28 = vsel %vm273_vm1, %v2177_v11, %v8735_v35 }
 0x321   :  { %v8744_v62 = vunpack.i.h.bf16 %v9918_v27  ;;  %v2418_v50 = vsel %vm273_vm1, %v2417_v34, %v2399_v53  ;;  %v2453_v9 = vrot.slane %v2452_v43, 4  ;;  %v560_v55 = vpack.c.bf16 %v546_v6, %v546_v6 }
 0x322   :  { %v561_v33 = vpack.c.bf16 %v9553_v45, %v9553_v45  ;;  %v562_v57 = vpack.c.bf16 %v9946_v41, %v9946_v41  ;;  %v9967_v39 = vunpack.c.l.b16 %v563_v40  ;;  %v9975_v1 = vperm.slane %v2452_v43, %v9430_v37 }
 0x323   :  { %v2420_v46 = vsel %vm273_vm1, %v2405_v44, %v2419_v31  ;;  %v2440_v5 = vperm.slane %v2432_v12, %v9430_v37  ;;  %v9980_v51 = vperm.slane %v2178_v28, %v9418_v10  ;;  %v2424_v42 = vperm.slane %v2418_v50, %v9430_v37 }
 0x324   :  { %v2430_v23 = vsel %vm273_vm1, %v2429_v2, %v2410_v18  ;;  %v9985_v0 = vsel %vm273_vm1, 0.0, %v547_v58  ;;  %v8750_v48 = vunpack.i.l.bf16 %v9845_v49  ;;  %v2183_v61 = vrot.slane %v8744_v62, 4 }
 0x325   :  { %v2454_v63 = vsel %vm273_vm1, 0.0, %v2453_v9  ;;  %v9177_v13 = vmov 65535   ;;  %v2428_v7 = vperm.slane %v2420_v46, %v9430_v37  ;;  %v8741_v18 = vunpack.i.l.bf16 %v9918_v27 }
 0x326   :  { %v3207_v44 = vsel %vm2566_vm2, 4294967295, %v9177_v13  ;;  %v2436_v26 = vperm.slane %v2430_v23, %v9430_v37  ;;  %v2463_v53 = vrot.slane %v9975_v1, 4  ;;  %v2445_v56 = vrot.slane %v2440_v5, 4 }
 0x327   :  { %v2443_v3 = vrot.slane %v2424_v42, 4  ;;  %v2462_v47 = vperm.slane %v2454_v63, %v9430_v37  ;;  %v557_v35 = vpack.c.bf16 %v9550_v36, %v9550_v36  ;;  %v2195_v11 = vrot.slane %v9980_v51, 4 }
 0x328   :  { %v2184_v27 = vsel %vm273_vm1, %v2183_v61, %v8750_v48  ;;  %v10004_v43 = vunpack.c.l.b16 %v560_v55  ;;  %v564_v40 = vpack.c.bf16 %v9985_v0, %v9985_v0  ;;  %v8753_v31 = vunpack.i.h.bf16 %v9845_v49  ;;  %v10024_v61 = vld [vmem:[%s12175_s1 + $0x8] sm:$0x1] }
 0x329   :  { %v10013_v2 = vsel %vm3206_vm5, %v3207_v44, 0  ;;  %v2447_v12 = vrot.slane %v2428_v7, 4  ;;  %v2171_v58 = vrot.slane %v8741_v18, 4  ;;  %v2464_v28 = vsel %vm273_vm1, 0.0, %v2463_v53 }
 0x32a   :  { %v2446_v62 = vsel %vm273_vm1, %v2445_v56, %v2428_v7  ;;  %v2441_v50 = vrot.slane %v2436_v26, 4  ;;  %v2188_v9 = vperm.slane %v2184_v27, %v9418_v10  ;;  %v2444_v49 = vsel %vm273_vm1, %v2436_v26, %v2443_v3 }
 0x32b   :  { %v2465_v23 = vrot.slane %v2462_v47, 4  ;;  %v2544_v13 = vpack.c.bf16 %v2464_v28, %v2464_v28  ;;  %v2545_v44 = vpack.c.bf16 %v2446_v62, %v2446_v62  ;;  %v2448_v7 = vsel %vm273_vm1, %v2440_v5, %v2447_v12 }
 0x32c   :  { %v2542_v18 = vpack.c.bf16 %v9975_v1, %v9975_v1  ;;  %v2543_v56 = vpack.c.bf16 %v2444_v49, %v2444_v49  ;;  %v2209_v3 = vrot.slane %v2188_v9, 4  ;;  %v2546_v5 = vpack.c.bf16 %v2462_v47, %v2462_v47 }
 0x32d   :  { %v2466_v28 = vsel %vm273_vm1, 0.0, %v2465_v23  ;;  %v2547_v12 = vpack.c.bf16 %v2448_v7, %v2448_v7  ;;  %v3263_v49 = vunpack.c.l.b16 %v2545_v44  ;;  %v2661_v41 = vunpack.c.l.b16 %v557_v35 }
 0x32e   :  { %v2662_v36 = vunpack.c.l.b16 %v558_v29 }
 0x330   :  { %v2663_v0 = vpack.c.b16 %v2662_v36, %v2661_v41 }
 0x350   :  { %v2579_v25 = vpop.f32.mrf.mxu0 }
 0x351   :  { %v9990_v32 = vadd.f32 %v2579_v25, %v9972_v59 }
 0x353   :  { %v2776_v54 = vsel %vm2775_vm4, %v9990_v32, -inf }
 0x354   :  { %2777 = vmax.xlane.f32.xlu1 %v2776_v54  ;;  %v2604_v34 = vpop.f32.mrf.mxu3  ;;  %v2442_v54 = vsel %vm273_vm1, %v2441_v50, %v2424_v42  ;;  %v3233_v50 = vunpack.c.l.b16 %v2543_v56  ;;  %v3264_v56 = vunpack.c.l.b16 %v2546_v5 }
 0x355   :  { %v10010_v6 = vadd.f32 %v2604_v34, %v9972_v59 }
 0x357   :  { %v8763_v55 = vpop.trf.xlu0  ;;  %v2783_v46 = vsel %vm2775_vm4, %v10010_v6, -inf }
 0x358   :  { %v8767_v48 = vunpack.i.h.bf16 %v8763_v55  ;;  %v8764_v25 = vunpack.i.l.bf16 %v8763_v55  ;;  %v2581_v63 = vpop.f32.mrf.mxu0  ;;  %2784 = vmax.xlane.f32.xlu2 %v2783_v46  ;;  %v2541_v46 = vpack.c.bf16 %v2442_v54, %v2442_v54  ;;  %v3293_v54 = vunpack.c.l.b16 %v2547_v12 }
 0x359   :  { %v10033_v27 = vadd.f32 %v2581_v63, %v10024_v61 }
 0x35a   :  { %v2172_v53 = vsel %vm273_vm1, %v2171_v58, %v8767_v48  ;;  %v2189_v26 = vrot.slane %v8764_v25, 4  ;;  %v2548_v48 = vpack.c.bf16 %v2466_v28, %v2466_v28 }
 0x35b   :  { %v2176_v34 = vperm.slane %v2172_v53, %v9418_v10  ;;  %v2780_v25 = vsel %vm2779_vm6, %v10033_v27, -inf  ;;  %v3234_v53 = vunpack.c.l.b16 %v2544_v13 }
 0x35c   :  { %v2190_v62 = vsel %vm273_vm1, %v2189_v26, %v8753_v31  ;;  %v3201_v26 = vunpack.c.l.b16 %v2542_v18  ;;  %v2606_v38 = vpop.f32.mrf.mxu3 }
 0x35d   :  { %v2194_v1 = vperm.slane %v2190_v62, %v9418_v10  ;;  %v2197_v58 = vrot.slane %v2176_v34, 4  ;;  %v2196_v55 = vsel %vm273_vm1, %v2195_v11, %v2176_v34  ;;  %v3200_v34 = vunpack.c.l.b16 %v2541_v46 }
 0x35e   :  { %v2202_v42 = vperm.slane %v2196_v55, %v9430_v37 }
 0x35f   :  { %v2207_v23 = vrot.slane %v2194_v1, 4  ;;  %v2198_v31 = vsel %vm273_vm1, %v9980_v51, %v2197_v58  ;;  %v2210_v47 = vsel %vm273_vm1, %v2194_v1, %v2209_v3  ;;  %v3235_v1 = vpack.c.b16 %v3234_v53, %v3233_v50 }
 0x360   :  { %2781 = vmax.xlane.f32.xlu2 %v2780_v25  ;;  %v2654_v63 = vpop.f32.mrf.mxu0  ;;  %v2206_v7 = vperm.slane %v2198_v31, %v9430_v37  ;;  %v2218_v11 = vperm.slane %v2210_v47, %v9430_v37  ;;  %v2221_v62 = vrot.slane %v2202_v42, 4  ;;  %v3265_v58 = vpack.c.b16 %v3264_v56, %v3263_v49 }
 0x361   :  { %v2208_v44 = vsel %vm273_vm1, %v2207_v23, %v2188_v9  ;;  %v10050_v3 = vadd.f32 %v2654_v63, %v9972_v59  ;;  %v3294_v25 = vunpack.c.l.b16 %v2548_v48  ;;  %v2711_v63 = vunpack.c.l.b16 %v561_v33 }
 0x362   :  { %v2214_v28 = vperm.slane %v2208_v44, %v9430_v37  ;;  %v2223_v55 = vrot.slane %v2218_v11, 4  ;;  %v2225_v51 = vrot.slane %v2206_v7, 4  ;;  %v2712_v50 = vunpack.c.l.b16 %v562_v57 }
 0x363   :  { %v3295_v23 = vpack.c.b16 %v3294_v25, %v3293_v54  ;;  %v3202_v49 = vpack.c.b16 %v3201_v26, %v3200_v34  ;;  %v3240_v45 = vand.u32 %v3235_v1, %v10013_v2  ;;  %v3270_v33 = vand.u32 %v3265_v58, %v10013_v2 }
 0x364   :  { %v2222_v31 = vsel %vm273_vm1, %v2214_v28, %v2221_v62  ;;  %v2224_v13 = vsel %vm273_vm1, %v2223_v55, %v2206_v7  ;;  %v2226_v9 = vsel %vm273_vm1, %v2218_v11, %v2225_v51  ;;  %v2219_v18 = vrot.slane %v2214_v28, 4  ;;  %v2629_v29 = vpop.f32.mrf.mxu3 }
 0x365   :  { %v2232_v5 = vpack.c.bf16 %v2222_v31, %v2222_v31  ;;  %v2233_v12 = vpack.c.bf16 %v2224_v13, %v2224_v13  ;;  %v2234_v46 = vpack.c.bf16 %v2226_v9, %v2226_v9  ;;  %v3300_v57 = vand.u32 %v3295_v23, %v10013_v2  ;;  %v65_v9 = vld [vmem:[%s12175_s1 + $0x18] sm:$0x1] }
 0x366   :  { %v2220_v47 = vsel %vm273_vm1, %v2219_v18, %v2202_v42  ;;  %v2795_v42 = vsel %vm2775_vm4, %v10050_v3, -inf  ;;  %v2737_v44 = vunpack.c.l.b16 %v564_v40  ;;  %v2688_v56 = vpack.c.b16 %v10004_v43, %v9957_v52  ;;  %v238_v52 = vpop.f32.mrf.mxu2 }
 0x367   :  { %v2693_v48 = vsel %vm2566_vm2, %v2232_v5, 0  ;;  %v2718_v7 = vsel %vm2566_vm2, %v2233_v12, 0  ;;  %v2743_v11 = vsel %vm2566_vm2, %v2234_v46, 0  ;;  %v2231_v53 = vpack.c.bf16 %v2220_v47, %v2220_v47 }
 0x368   :  { %2702 = vmatpush.bf16.msrb.mxu2 %v2693_v48  ;;  %2727 = vmatpush.bf16.msra.mxu3 %v2718_v7  ;;  %v2713_v54 = vpack.c.b16 %v2712_v50, %v2711_v63  ;;  %v2738_v35 = vpack.c.b16 %v2737_v44, %v9967_v39  ;;  %v3210_v34 = vand.u32 %v10013_v2, %v3202_v49  ;;  %v2656_v40 = vpop.f32.mrf.mxu0  ;;  %v64_v39 = vld [vmem:[%s12175_s1 + $0x10] sm:$0xff] }
 0x369   :  { %2752 = vmatpush.bf16.msrb.mxu0 %v2743_v11  ;;  %2796 = vmax.xlane.f32.xlu2 %v2795_v42  ;;  %v2668_v26 = vsel %vm2566_vm2, %v2231_v53, 0  ;;  %v10098_v31 = vadd.f32 %v2606_v38, %v10024_v61  ;;  %v10114_v50 = vadd.f32 %v2629_v29, %v9972_v59  ;;  %v10125_v42 = vadd.f32 %v2656_v40, %v10024_v61 }
 0x36a   :  { %2677 = vmatpush.bf16.msrb.mxu1 %v2668_v26 }
 0x36b   :  { %8339 = vmatmul.msk.bf16.vlgmr.msrb.gmra.mxu2 %vm2562_vm3, %v2688_v56  ;;  %8340 = vmatmul.msk.bf16.vlgmr.msra.gmra.mxu3 %vm2562_vm3, %v2713_v54  ;;  %v2786_v47 = vsel %vm2779_vm6, %v10098_v31, -inf  ;;  %v2789_v11 = vsel %vm2775_vm4, %v10114_v50, -inf  ;;  %v9167_v54 = vld [vmem:[%s12173_s7] ss:$0 sm:$0xff] }
 0x36c   :  { %3249 = vmatpush.bf16.msra.mxu2 %v3240_v45  ;;  %3279 = vmatpush.bf16.msrb.mxu3 %v3270_v33  ;;  %v2631_v28 = vpop.f32.mrf.mxu3  ;;  %v2798_v45 = vsel %vm2779_vm6, %v10125_v42, -inf  ;;  %v10145_v36 = vadd.f32 %v9167_v54, %v238_v52 }
 0x36d   :  { %3309 = vmatpush.bf16.msra.mxu0 %v3300_v57  ;;  %8338 = vmatmul.msk.bf16.vlgmr.msrb.gmra.mxu1 %vm2562_vm3, %v2663_v0  ;;  %v10134_v57 = vadd.f32 %v2631_v28, %v10024_v61 }
 0x36e   :  { %8341 = vmatmul.msk.bf16.vlgmr.msrb.gmra.mxu0 %vm2562_vm3, %v2738_v35  ;;  %3219 = vmatpush.bf16.msra.mxu1 %v3210_v34  ;;  %v240_v43 = vpop.f32.mrf.mxu2 }
 0x36f   :  { %v2792_v56 = vsel %vm2779_vm6, %v10134_v57, -inf }
 0x3c7   :  { %v2778_v34 = vpop.xlane.xlu1 %2777 }
 0x3c8   :  { %v2825_v0 = vsub.f32 %v9990_v32, %v2778_v34 }
 0x3ca   :  { %v2841_v43 = vmul.f32 1.442695, %v2825_v0 }
 0x3cb   :  { %v2785_v38 = vpop.xlane.xlu2 %2784 }
 0x3cc   :  { %9013 = vpow2.f32 %v2841_v43  ;;  %v2827_v52 = vsub.f32 %v10010_v6, %v2785_v38 }
 0x3ce   :  { %v2845_v29 = vmul.f32 1.442695, %v2827_v52 }
 0x3d0   :  { %9015 = vpow2.f32 %v2845_v29 }
 0x3d2   :  { %v10159_v40 = vpop.eup %9013 }
 0x3d3   :  { %v2782_v28 = vpop.xlane.xlu2 %2781 }
 0x3ea   :  { %v2679_v55 = vpop.f32.mrf.mxu1 }
 0x3eb   :  { %v2754_v62 = vpop.f32.mrf.mxu0  ;;  %v10091_v51 = vadd.f32 %v2679_v55, %v64_v39  ;;  %v10164_v55 = vpop.eup %9015 }
 0x3ec   :  { %v10147_v35 = vadd.f32 %v2754_v62, %v64_v39  ;;  %v2826_v62 = vsub.f32 %v10033_v27, %v2782_v28  ;;  %v2797_v27 = vpop.xlane.xlu2 %2796 }
 0x3ed   :  { %v2801_v1 = vsel %vm2775_vm4, %v10091_v51, -inf }
 0x3ee   :  { %v2729_v58 = vpop.f32.mrf.mxu3  ;;  %2802 = vmax.xlane.f32.xlu0 %v2801_v1  ;;  %v2704_v46 = vpop.f32.mrf.mxu2  ;;  %v2819_v61 = vsel %vm2775_vm4, %v10147_v35, -inf  ;;  %v2843_v32 = vmul.f32 1.442695, %v2826_v62  ;;  %v2879_v1 = vsel %vm2775_vm4, %v10164_v55, 0.0 }
 0x3ef   :  { %v10095_v25 = vadd.f32 %v2729_v58, %v64_v39  ;;  %v10116_v49 = vadd.f32 %v2704_v46, %v64_v39  ;;  %v2873_v39 = vsel %vm2775_vm4, %v10159_v40, 0.0  ;;  %v2831_v46 = vsub.f32 %v10050_v3, %v2797_v27 }
 0x3f0   :  { %9017 = vpow2.f32 %v2843_v32 }
 0x3f1   :  { %v2813_v13 = vsel %vm2775_vm4, %v10095_v25, -inf  ;;  %v2807_v7 = vsel %vm2775_vm4, %v10116_v49, -inf }
 0x3f2   :  { %2814 = vmax.xlane.f32.xlu2 %v2813_v13  ;;  %v2681_v5 = vpop.f32.mrf.mxu1 }
 0x3f3   :  { %v2756_v18 = vpop.f32.mrf.mxu0  ;;  %v10105_v12 = vadd.f32 %v2681_v5, %v65_v9 }
 0x3f4   :  { %v10107_v23 = vadd.f32 %v2756_v18, %v65_v9 }
 0x3f5   :  { %v2804_v63 = vsel %vm2779_vm6, %v10105_v12, -inf }
 0x3f6   :  { %2787 = vmax.xlane.f32.xlu0 %v2786_v47  ;;  %2805 = vmax.xlane.f32.xlu1 %v2804_v63  ;;  %v2822_v48 = vsel %vm2779_vm6, %v10107_v23, -inf  ;;  %v2706_v53 = vpop.f32.mrf.mxu2  ;;  %v2731_v41 = vpop.f32.mrf.mxu3  ;;  %v2853_v63 = vmul.f32 1.442695, %v2831_v46 }
 0x3f7   :  { %v10127_v59 = vadd.f32 %v2706_v53, %v65_v9  ;;  %v10136_v26 = vadd.f32 %v2731_v41, %v65_v9  ;;  %v10168_v6 = vpop.eup %9017 }
 0x3f8   :  { %v2876_v58 = vsel %vm2779_vm6, %v10168_v6, 0.0 }
 0x3f9   :  { %v2810_v33 = vsel %vm2779_vm6, %v10127_v59, -inf  ;;  %v2816_v44 = vsel %vm2779_vm6, %v10136_v26, -inf }
 0x3fa   :  { %2823 = vmax.xlane.f32.xlu2 %v2822_v48 }
 0x3fe   :  { %2808 = vmax.xlane.f32.xlu0 %v2807_v7  ;;  %2790 = vmax.xlane.f32.xlu1 %v2789_v11 }
 0x406   :  { %2799 = vmax.xlane.f32.xlu0 %v2798_v45  ;;  %2811 = vmax.xlane.f32.xlu1 %v2810_v33 }
 0x40e   :  { %2817 = vmax.xlane.f32.xlu0 %v2816_v44  ;;  %2793 = vmax.xlane.f32.xlu1 %v2792_v56 }
 0x412   :  { %2242 = vrot.lane.b32.xlu2 %v10145_v36, %s9172_s21 }
 0x416   :  { %2820 = vmax.xlane.f32.xlu1 %v2819_v61 }
 0x422   :  { %2251 = vrot.lane.b32.xlu0 %v10145_v36, %s9173_s6 }
 0x42f   :  { %2260 = vrot.lane.b32.xlu1 %v10145_v36, %s9174_s22 }
 0x43b   :  { %2874 = vadd.xlane.f32.xlu2 %v2873_v39 }
 0x443   :  { %2880 = vadd.xlane.f32.xlu2 %v2879_v1 }
 0x44c   :  { %2877 = vadd.xlane.f32.xlu0 %v2876_v58 }
 0x461   :  { %v2803_v13 = vpop.xlane.xlu0 %2802 }
 0x465   :  { %v2815_v44 = vpop.xlane.xlu2 %2814 }
 0x469   :  { %v2788_v9 = vpop.xlane.xlu0 %2787  ;;  %v10172_v18 = vpop.xlane.xlu1 %2805 }
 0x46a   :  { %v2828_v5 = vsub.f32 %v10098_v31, %v2788_v9 }
 0x46c   :  { %v2847_v47 = vmul.f32 1.442695, %v2828_v5 }
 0x46d   :  { %v2824_v38 = vpop.xlane.xlu2 %2823 }
 0x46e   :  { %9019 = vpow2.f32 %v2847_v47  ;;  %v2840_v1 = vsub.f32 %v10107_v23, %v2824_v38 }
 0x46f   :  { %9021 = vpow2.f32 %v2853_v63 }
 0x471   :  { %v2809_v48 = vpop.xlane.xlu0 %2808  ;;  %v2791_v7 = vpop.xlane.xlu1 %2790 }
 0x472   :  { %v2829_v11 = vsub.f32 %v10114_v50, %v2791_v7  ;;  %v2835_v45 = vsub.f32 %v10116_v49, %v2809_v48  ;;  %v2837_v49 = vsub.f32 %v10095_v25, %v2815_v44  ;;  %v2833_v25 = vsub.f32 %v10091_v51, %v2803_v13 }
 0x473   :  { %v2871_v51 = vmul.f32 1.442695, %v2840_v1 }
 0x474   :  { %v10177_v53 = vpop.eup %9019  ;;  %v2849_v33 = vmul.f32 1.442695, %v2829_v11  ;;  %v2861_v3 = vmul.f32 1.442695, %v2835_v45  ;;  %v2865_v52 = vmul.f32 1.442695, %v2837_v49 }
 0x475   :  { %v2882_v41 = vsel %vm2779_vm6, %v10177_v53, 0.0  ;;  %v10182_v54 = vpop.eup %9021 }
 0x476   :  { %2883 = vadd.xlane.f32.xlu0 %v2882_v41  ;;  %9023 = vpow2.f32 %v2849_v33  ;;  %v2891_v0 = vsel %vm2775_vm4, %v10182_v54, 0.0 }
 0x477   :  { %9025 = vpow2.f32 %v2861_v3 }
 0x479   :  { %v2800_v31 = vpop.xlane.xlu0 %2799  ;;  %v2812_v56 = vpop.xlane.xlu1 %2811 }
 0x47a   :  { %v2832_v61 = vsub.f32 %v10125_v42, %v2800_v31  ;;  %v2836_v9 = vsub.f32 %v10127_v59, %v2812_v56 }
 0x47c   :  { %v2855_v50 = vmul.f32 1.442695, %v2832_v61  ;;  %v10185_v34 = vpop.eup %9023 }
 0x47d   :  { %v2885_v43 = vsel %vm2775_vm4, %v10185_v34, 0.0  ;;  %v10192_v42 = vpop.eup %9025 }
 0x47e   :  { %9027 = vpow2.f32 %v2855_v50  ;;  %2892 = vadd.xlane.f32.xlu0 %v2891_v0  ;;  %2886 = vadd.xlane.f32.xlu1 %v2885_v43  ;;  %v2903_v5 = vsel %vm2775_vm4, %v10192_v42, 0.0 }
 0x47f   :  { %9029 = vpow2.f32 %v2865_v52  ;;  %v2243_v52 = vpop.permute.xlu2 %2242 }
 0x481   :  { %v2818_v29 = vpop.xlane.xlu0 %2817  ;;  %v2794_v28 = vpop.xlane.xlu1 %2793 }
 0x482   :  { %v2838_v62 = vsub.f32 %v10136_v26, %v2818_v29  ;;  %v2830_v39 = vsub.f32 %v10134_v57, %v2794_v28  ;;  %v2857_v57 = vmul.f32 1.442695, %v2833_v25  ;;  %v2863_v26 = vmul.f32 1.442695, %v2836_v9 }
 0x483   :  { %v2483_v9 = vperm.slane %v9890_v30, %v9418_v10 }
 0x484   :  { %v10197_v32 = vpop.eup %9027  ;;  %v2867_v58 = vmul.f32 1.442695, %v2838_v62  ;;  %v2851_v27 = vmul.f32 1.442695, %v2830_v39 }
 0x485   :  { %v2894_v46 = vsel %vm2779_vm6, %v10197_v32, 0.0  ;;  %v10205_v23 = vpop.eup %9029 }
 0x486   :  { %9031 = vpow2.f32 %v2867_v58  ;;  %2904 = vadd.xlane.f32.xlu0 %v2903_v5  ;;  %2895 = vadd.xlane.f32.xlu1 %v2894_v46  ;;  %v2909_v7 = vsel %vm2775_vm4, %v10205_v23, 0.0 }
 0x487   :  { %9033 = vpow2.f32 %v2851_v27 }
 0x488   :  { %9035 = vpow2.f32 %v2857_v57 }
 0x489   :  { %v2821_v13 = vpop.xlane.xlu1 %2820  ;;  %9037 = vpow2.f32 %v2871_v51  ;;  %v2501_v51 = vperm.slane %v9900_v8, %v9430_v37 }
 0x48a   :  { %9039 = vpow2.f32 %v2863_v26  ;;  %v2839_v63 = vsub.f32 %v10147_v35, %v2821_v13  ;;  %v2834_v35 = vsub.f32 %v10105_v12, %v10172_v18  ;;  %v2504_v26 = vrot.slane %v2483_v9, 4 }
 0x48c   :  { %v10207_v47 = vpop.eup %9031  ;;  %v2869_v33 = vmul.f32 1.442695, %v2839_v63  ;;  %v2859_v61 = vmul.f32 1.442695, %v2834_v35  ;;  %v2520_v35 = vrot.slane %v2501_v51, 4 }
 0x48d   :  { %v10209_v59 = vpop.eup %9033  ;;  %v2912_v48 = vsel %vm2779_vm6, %v10207_v47, 0.0 }
 0x48e   :  { %2913 = vadd.xlane.f32.xlu0 %v2912_v48  ;;  %v2888_v11 = vsel %vm2779_vm6, %v10209_v59, 0.0  ;;  %2910 = vadd.xlane.f32.xlu1 %v2909_v7  ;;  %v10218_v45 = vpop.eup %9035  ;;  %9041 = vpow2.f32 %v2869_v33  ;;  %v2497_v48 = vperm.slane %v9896_v60, %v9430_v37 }
 0x48f   :  { %2889 = vadd.xlane.f32.xlu2 %v2888_v11  ;;  %v10220_v41 = vpop.eup %9037  ;;  %v2897_v3 = vsel %vm2775_vm4, %v10218_v45, 0.0  ;;  %9043 = vpow2.f32 %v2859_v61 }
 0x490   :  { %v10222_v44 = vpop.eup %9039  ;;  %v2918_v31 = vsel %vm2779_vm6, %v10220_v41, 0.0  ;;  %v2516_v61 = vrot.slane %v2497_v48, 4 }
 0x491   :  { %v2906_v56 = vsel %vm2779_vm6, %v10222_v44, 0.0 }
 0x494   :  { %v10232_v50 = vpop.eup %9041  ;;  %v2252_v49 = vpop.permute.xlu0 %2251 }
 0x495   :  { %v2915_v12 = vsel %vm2775_vm4, %v10232_v50, 0.0  ;;  %v2377_v18 = vrot.slane %v2252_v49, 4  ;;  %v10236_v38 = vpop.eup %9043 }
 0x496   :  { %2898 = vadd.xlane.f32.xlu0 %v2897_v3  ;;  %2919 = vadd.xlane.f32.xlu1 %v2918_v31  ;;  %v2900_v39 = vsel %vm2779_vm6, %v10236_v38, 0.0 }
 0x497   :  { %2907 = vadd.xlane.f32.xlu2 %v2906_v56  ;;  %v2378_v29 = vsel %vm273_vm1, %v2377_v18, %v10145_v36 }
 0x498   :  { %v2382_v25 = vperm.slane %v2378_v29, %v9418_v10 }
 0x49f   :  { %2916 = vadd.xlane.f32.xlu2 %v2915_v12 }
 0x4a1   :  { %v2261_v0 = vpop.permute.xlu1 %2260 }
 0x4a2   :  { %v2383_v43 = vrot.slane %v2261_v0, 4 }
 0x4a4   :  { %v2384_v28 = vsel %vm273_vm1, %v2383_v43, %v2243_v52 }
 0x4a5   :  { %v2388_v62 = vperm.slane %v2384_v28, %v9418_v10 }
 0x4a7   :  { %v2389_v1 = vrot.slane %v2388_v62, 4  ;;  %2901 = vadd.xlane.f32.xlu2 %v2900_v39 }
 0x4a9   :  { %v2390_v58 = vsel %vm273_vm1, %v2389_v1, %v2382_v25 }
 0x4aa   :  { %v2394_v27 = vperm.slane %v2390_v58, %v9430_v37 }
 0x4ac   :  { %v2484_v5 = vrot.slane %v2394_v27, 4 }
 0x4ae   :  { %v2485_v36 = vsel %vm273_vm1, %v2484_v5, %v9872_v4  ;;  %v2522_v46 = vsel %vm273_vm1, 0.0, %v2484_v5  ;;  %v2875_v57 = vpop.xlane.xlu2 %2874 }
 0x4af   :  { %v2489_v13 = vperm.slane %v2485_v36, %v9418_v10  ;;  %v2526_v63 = vperm.slane %v2522_v46, %v9418_v10  ;;  %9045 = vrcp.f32 %v2875_v57  ;;  %vm2926_vm7 = vweird.f32 %v2875_v57 }
 0x4b0   :  { %v2930_v62 = vand.u32 2147483647, %v2875_v57  ;;  %v2932_v39 = vand.u32 2147483648, %v2875_v57 }
 0x4b1   :  { %v2502_v30 = vrot.slane %v2489_v13, 4  ;;  %v2532_v7 = vperm.slane %v2526_v63, %v9430_v37  ;;  %v2505_v4 = vsel %vm273_vm1, %v2489_v13, %v2504_v26  ;;  %v2527_v11 = vrot.slane %v2526_v63, 4 }
 0x4b2   :  { %v2513_v33 = vperm.slane %v2505_v4, %v9430_v37  ;;  %vm10272_vm9 = vcmp.eq.f32.partialorder %v2930_v62, 8.507059e+37 }
 0x4b3   :  { %v2503_v8 = vsel %vm273_vm1, %v2502_v30, %v2483_v9  ;;  %v2537_v3 = vrot.slane %v2532_v7, 4  ;;  %v2528_v31 = vsel %vm273_vm1, 0.0, %v2527_v11  ;;  %v2550_v25 = vpack.c.bf16 %v2532_v7, %v2532_v7 }
 0x4b4   :  { %v2509_v56 = vperm.slane %v2503_v8, %v9430_v37  ;;  %v2518_v49 = vrot.slane %v2513_v33, 4  ;;  %v2521_v60 = vsel %vm273_vm1, %v2513_v33, %v2520_v35  ;;  %v2536_v0 = vperm.slane %v2528_v31, %v9430_v37 }
 0x4b5   :  { %v9046_v12 = vpop.eup %9045  ;;  %v2538_v18 = vsel %vm273_vm1, 0.0, %v2537_v3  ;;  %v2555_v46 = vpack.c.bf16 %v2521_v60, %v2521_v60  ;;  %v2933_v11 = vor.u32 1.1754944e-38, %v2932_v39 }
 0x4b6   :  { %v2922_v43 = vmul.f32 %v9046_v12, %v2875_v57  ;;  %v10267_v52 = vpop.xlane.xlu2 %2880  ;;  %v2517_v29 = vsel %vm273_vm1, %v2509_v56, %v2516_v61  ;;  %v2552_v28 = vpack.c.bf16 %v2538_v18, %v2538_v18  ;;  %v2519_v9 = vsel %vm273_vm1, %v2518_v49, %v2501_v51 }
 0x4b7   :  { %9047 = vrcp.f32 %v10267_v52  ;;  %v2551_v58 = vpack.c.bf16 %v2517_v29, %v2517_v29  ;;  %vm2927_vm8 = vweird.f32 %v9046_v12  ;;  %v2553_v5 = vpack.c.bf16 %v2519_v9, %v2519_v9 }
 0x4b8   :  { %v2923_v1 = vsub.f32 1.0, %v2922_v43  ;;  %v3354_v27 = vunpack.c.l.b16 %v2552_v28  ;;  %v2554_v36 = vpack.c.bf16 %v2536_v0, %v2536_v0  ;;  %v2514_v63 = vrot.slane %v2509_v56, 4  ;;  %vm2928_vm10 = vmor %vm2926_vm7, %vm2927_vm8 }
 0x4b9   :  { %v3353_v13 = vunpack.c.l.b16 %v2551_v58  ;;  %v2539_v30 = vrot.slane %v2536_v0, 4  ;;  %v3383_v33 = vunpack.c.l.b16 %v2553_v5  ;;  %v3324_v49 = vunpack.c.l.b16 %v2550_v25 }
 0x4ba   :  { %v2924_v26 = vmul.f32 %v9046_v12, %v2923_v1  ;;  %v3384_v7 = vunpack.c.l.b16 %v2554_v36  ;;  %v2515_v3 = vsel %vm273_vm1, %v2514_v63, %v2497_v48  ;;  %v3413_v29 = vunpack.c.l.b16 %v2555_v46 }
 0x4bb   :  { %v3355_v8 = vpack.c.b16 %v3354_v27, %v3353_v13  ;;  %v2540_v51 = vsel %vm273_vm1, 0.0, %v2539_v30  ;;  %v2549_v56 = vpack.c.bf16 %v2515_v3, %v2515_v3  ;;  %v2960_v5 = vand.u32 2147483647, %v10267_v52 }
 0x4bc   :  { %v2925_v35 = vadd.f32 %v9046_v12, %v2924_v26  ;;  %v3385_v61 = vpack.c.b16 %v3384_v7, %v3383_v33  ;;  %v2556_v60 = vpack.c.bf16 %v2540_v51, %v2540_v51  ;;  %vm2956_vm12 = vweird.f32 %v10267_v52 }
 0x4bd   :  { %v9048_v31 = vpop.eup %9047  ;;  %v3360_v43 = vand.u32 %v3355_v8, %v10013_v2  ;;  %v3323_v39 = vunpack.c.l.b16 %v2549_v56  ;;  %vm2961_vm14 = vcmp.eq.f32.partialorder %v2960_v5, 8.507059e+37 }
 0x4be   :  { %v2929_v18 = vsel %vm2928_vm10, %v9046_v12, %v2925_v35  ;;  %v2952_v0 = vmul.f32 %v9048_v31, %v10267_v52  ;;  %v3390_v62 = vand.u32 %v3385_v61, %v10013_v2  ;;  %v3414_v1 = vunpack.c.l.b16 %v2556_v60 }
 0x4bf   :  { %v2934_v28 = vsel %vm10272_vm9, %v2933_v11, %v2929_v18  ;;  %v2878_v48 = vpop.xlane.xlu0 %2877  ;;  %3369 = vmatpush.bf16.msrb.mxu2 %v3360_v43  ;;  %v2962_v12 = vand.u32 2147483648, %v10267_v52  ;;  %v3325_v25 = vpack.c.b16 %v3324_v49, %v3323_v39  ;;  %vm2957_vm11 = vweird.f32 %v9048_v31 }
 0x4c0   :  { %v2935_v57 = vmul.f32 %v10159_v40, %v2934_v28  ;;  %v2953_v58 = vsub.f32 1.0, %v2952_v0  ;;  %9049 = vrcp.f32 %v2878_v48  ;;  %3399 = vmatpush.bf16.msra.mxu3 %v3390_v62  ;;  %v3415_v27 = vpack.c.b16 %v3414_v1, %v3413_v29  ;;  %vm2958_vm13 = vmor %vm2956_vm12, %vm2957_vm11 }
 0x4c1   :  { %v3330_v36 = vand.u32 %v3325_v25, %v10013_v2  ;;  %v2963_v26 = vor.u32 1.1754944e-38, %v2962_v12  ;;  %v2947_v7 = vand.u32 2147483648, %v2878_v48  ;;  %v2945_v52 = vand.u32 2147483647, %v2878_v48 }
 0x4c2   :  { %3161 = vst.msk [vmem:[%s12176_s19] sm:$0xff] %vm2775_vm4, %v2935_v57  ;;  %v2954_v9 = vmul.f32 %v9048_v31, %v2953_v58  ;;  %v3420_v40 = vand.u32 %v3415_v27, %v10013_v2  ;;  %vm2941_vm5 = vweird.f32 %v2878_v48  ;;  %v3177_v61 = vpack.c.bf16 %v2935_v57, %v2935_v57 }
 0x4c3   :  { %3339 = vmatpush.bf16.msrb.mxu1 %v3330_v36  ;;  %v2948_v3 = vor.u32 1.1754944e-38, %v2947_v7  ;;  %vm2946_vm8 = vcmp.eq.f32.partialorder %v2945_v52, 8.507059e+37 }
 0x4c4   :  { %v2955_v46 = vadd.f32 %v9048_v31, %v2954_v9  ;;  %3429 = vmatpush.bf16.msrb.mxu0 %v3420_v40  ;;  %v3195_v49 = vunpack.c.l.b16 %v3177_v61 }
 0x4c6   :  { %v9050_v13 = vpop.eup %9049  ;;  %v2959_v63 = vsel %vm2958_vm13, %v9048_v31, %v2955_v46 }
 0x4c7   :  { %v2964_v30 = vsel %vm2961_vm14, %v2963_v26, %v2959_v63  ;;  %v2937_v4 = vmul.f32 %v9050_v13, %v2878_v48  ;;  %vm2942_vm15 = vweird.f32 %v9050_v13 }
 0x4c8   :  { %v2965_v11 = vmul.f32 %v10164_v55, %v2964_v30  ;;  %vm2943_vm7 = vmor %vm2941_vm5, %vm2942_vm15 }
 0x4c9   :  { %v2938_v33 = vsub.f32 1.0, %v2937_v4 }
 0x4ca   :  { %3163 = vst.msk [vmem:[%s12176_s19 + $0x10] sm:$0xff] %vm2775_vm4, %v2965_v11  ;;  %v3179_v27 = vpack.c.bf16 %v2965_v11, %v2965_v11 }
 0x4cb   :  { %v2939_v35 = vmul.f32 %v9050_v13, %v2938_v33 }
 0x4cd   :  { %v2940_v8 = vadd.f32 %v9050_v13, %v2939_v35 }
 0x4cf   :  { %v2944_v51 = vsel %vm2943_vm7, %v9050_v13, %v2940_v8  ;;  %v3228_v8 = vunpack.c.l.b16 %v3179_v27 }
 0x4d0   :  { %v2949_v31 = vsel %vm2946_vm8, %v2948_v3, %v2944_v51 }
 0x4d1   :  { %v2950_v55 = vmul.f32 %v10168_v6, %v2949_v31 }
 0x4d3   :  { %3162 = vst.msk [vmem:[%s12176_s19 + $0x8] sm:$0x1] %vm2779_vm6, %v2950_v55  ;;  %v3178_v56 = vpack.c.bf16 %v2950_v55, %v2950_v55 }
 0x4d5   :  { %v3196_v60 = vunpack.c.l.b16 %v3178_v56 }
 0x4d7   :  { %v3197_v18 = vpack.c.b16 %v3196_v60, %v3195_v49 }
 0x4d9   :  { %8342 = vmatmul.msk.bf16.vlgmr.msra.gmra.mxu1 %vm2775_vm4, %v3197_v18 }
 0x4e9   :  { %v2884_v0 = vpop.xlane.xlu0 %2883 }
 0x4ea   :  { %9051 = vrcp.f32 %v2884_v0  ;;  %v2977_v6 = vand.u32 2147483648, %v2884_v0  ;;  %v2975_v1 = vand.u32 2147483647, %v2884_v0  ;;  %vm2971_vm10 = vweird.f32 %v2884_v0 }
 0x4ec   :  { %v2978_v12 = vor.u32 1.1754944e-38, %v2977_v6  ;;  %vm2976_vm12 = vcmp.eq.f32.partialorder %v2975_v1, 8.507059e+37 }
 0x4f0   :  { %v9052_v43 = vpop.eup %9051 }
 0x4f1   :  { %v2967_v29 = vmul.f32 %v9052_v43, %v2884_v0  ;;  %v2893_v28 = vpop.xlane.xlu0 %2892  ;;  %v2887_v48 = vpop.xlane.xlu1 %2886  ;;  %vm2972_vm9 = vweird.f32 %v9052_v43 }
 0x4f2   :  { %9053 = vrcp.f32 %v2893_v28  ;;  %vm2973_vm11 = vmor %vm2971_vm10, %vm2972_vm9  ;;  %v3020_v30 = vand.u32 2147483647, %v2893_v28  ;;  %v3022_v4 = vand.u32 2147483648, %v2893_v28  ;;  %v2990_v7 = vand.u32 2147483647, %v2887_v48 }
 0x4f3   :  { %v2968_v62 = vsub.f32 1.0, %v2967_v29  ;;  %9055 = vrcp.f32 %v2887_v48  ;;  %v2992_v35 = vand.u32 2147483648, %v2887_v48  ;;  %vm3016_vm14 = vweird.f32 %v2893_v28 }
 0x4f4   :  { %vm2986_vm15 = vweird.f32 %v2887_v48  ;;  %vm10317_vm7 = vcmp.eq.f32.partialorder %v3020_v30, 8.507059e+37  ;;  %v3023_v31 = vor.u32 1.1754944e-38, %v3022_v4  ;;  %vm10321_vm9 = vcmp.eq.f32.partialorder %v2990_v7, 8.507059e+37 }
 0x4f5   :  { %v2969_v39 = vmul.f32 %v9052_v43, %v2968_v62  ;;  %v2993_v60 = vor.u32 1.1754944e-38, %v2992_v35 }
 0x4f7   :  { %v2970_v57 = vadd.f32 %v9052_v43, %v2969_v39 }
 0x4f8   :  { %v9054_v58 = vpop.eup %9053 }
 0x4f9   :  { %v9056_v25 = vpop.eup %9055  ;;  %v2974_v9 = vsel %vm2973_vm11, %v9052_v43, %v2970_v57  ;;  %v3012_v5 = vmul.f32 %v9054_v58, %v2893_v28  ;;  %v10306_v36 = vpop.xlane.xlu0 %2904  ;;  %vm3017_vm13 = vweird.f32 %v9054_v58 }
 0x4fa   :  { %v2979_v40 = vsel %vm2976_vm12, %v2978_v12, %v2974_v9  ;;  %v2982_v46 = vmul.f32 %v9056_v25, %v2887_v48  ;;  %9057 = vrcp.f32 %v10306_v36  ;;  %v10309_v26 = vpop.xlane.xlu1 %2895  ;;  %vm2987_vm5 = vweird.f32 %v9056_v25  ;;  %vm3018_vm8 = vmor %vm3016_vm14, %vm3017_vm13 }
 0x4fb   :  { %v2980_v13 = vmul.f32 %v10177_v53, %v2979_v40  ;;  %v3013_v63 = vsub.f32 1.0, %v3012_v5  ;;  %9059 = vrcp.f32 %v10309_v26  ;;  %v3080_v18 = vand.u32 2147483647, %v10306_v36  ;;  %vm2988_vm10 = vmor %vm2986_vm15, %vm2987_vm5 }
 0x4fc   :  { %v2983_v33 = vsub.f32 1.0, %v2982_v46  ;;  %v3082_v29 = vand.u32 2147483648, %v10306_v36  ;;  %v3035_v1 = vand.u32 2147483647, %v10309_v26  ;;  %vm3076_vm12 = vweird.f32 %v10306_v36 }
 0x4fd   :  { %3164 = vst.msk [vmem:[%s12176_s19 + $0x18] sm:$0x1] %vm2779_vm6, %v2980_v13  ;;  %v3180_v11 = vpack.c.bf16 %v2980_v13, %v2980_v13  ;;  %v3014_v52 = vmul.f32 %v9054_v58, %v3013_v63  ;;  %vm10361_vm13 = vcmp.eq.f32.partialorder %v3080_v18, 8.507059e+37  ;;  %vm3031_vm14 = vweird.f32 %v10309_v26 }
 0x4fe   :  { %v2984_v3 = vmul.f32 %v9056_v25, %v2983_v33  ;;  %v3083_v13 = vor.u32 1.1754944e-38, %v3082_v29  ;;  %vm10366_vm5 = vcmp.eq.f32.partialorder %v3035_v1, 8.507059e+37 }
 0x4ff   :  { %v3015_v53 = vadd.f32 %v9054_v58, %v3014_v52  ;;  %v3229_v61 = vunpack.c.l.b16 %v3180_v11 }
 0x500   :  { %v9058_v55 = vpop.eup %9057  ;;  %v2985_v56 = vadd.f32 %v9056_v25, %v2984_v3 }
 0x501   :  { %v3019_v0 = vsel %vm3018_vm8, %v9054_v58, %v3015_v53  ;;  %v3072_v43 = vmul.f32 %v9058_v55, %v10306_v36  ;;  %v10328_v28 = vpop.xlane.xlu0 %2913  ;;  %v3230_v48 = vpack.c.b16 %v3229_v61, %v3228_v8  ;;  %v9060_v62 = vpop.eup %9059  ;;  %vm3077_vm11 = vweird.f32 %v9058_v55 }
 0x502   :  { %v3024_v6 = vsel %vm10317_vm7, %v3023_v31, %v3019_v0  ;;  %v2989_v39 = vsel %vm2988_vm10, %v9056_v25, %v2985_v56  ;;  %9061 = vrcp.f32 %v10328_v28  ;;  %v10334_v57 = vpop.xlane.xlu2 %2889  ;;  %v3027_v9 = vmul.f32 %v9060_v62, %v10309_v26  ;;  %v10353_v46 = vpop.xlane.xlu1 %2910  ;;  %vm3078_vm7 = vmor %vm3076_vm12, %vm3077_vm11 }
 0x503   :  { %v10337_v58 = vmul.f32 %v10182_v54, %v3024_v6  ;;  %v2994_v12 = vsel %vm10321_vm9, %v2993_v60, %v2989_v39  ;;  %v3073_v27 = vsub.f32 1.0, %v3072_v43  ;;  %8343 = vmatmul.msk.bf16.vlgmr.msra.gmra.mxu2 %vm2775_vm4, %v3230_v48  ;;  %v3037_v25 = vand.u32 2147483648, %v10309_v26 }
 0x504   :  { %v10344_v5 = vmul.f32 %v10185_v34, %v2994_v12  ;;  %v3028_v40 = vsub.f32 1.0, %v3027_v9  ;;  %9063 = vrcp.f32 %v10334_v57  ;;  %vm3032_vm15 = vweird.f32 %v9060_v62 }
 0x505   :  { %3167 = vst.msk [vmem:[%s12176_s19 + $0x30] sm:$0xff] %vm2775_vm4, %v10337_v58  ;;  %v3074_v54 = vmul.f32 %v9058_v55, %v3073_v27  ;;  %v3038_v7 = vor.u32 1.1754944e-38, %v3037_v25  ;;  %vm3121_vm8 = vweird.f32 %v10328_v28  ;;  %v3125_v36 = vand.u32 2147483647, %v10328_v28  ;;  %vm3033_vm9 = vmor %vm3031_vm14, %vm3032_vm15 }
 0x506   :  { %3165 = vst.msk [vmem:[%s12176_s19 + $0x20] sm:$0xff] %vm2775_vm4, %v10344_v5  ;;  %v3029_v30 = vmul.f32 %v9060_v62, %v3028_v40  ;;  %9065 = vrcp.f32 %v10353_v46  ;;  %v3127_v8 = vand.u32 2147483648, %v10328_v28  ;;  %v3183_v53 = vpack.c.bf16 %v10337_v58, %v10337_v58 }
 0x507   :  { %v3075_v63 = vadd.f32 %v9058_v55, %v3074_v54  ;;  %v3181_v51 = vpack.c.bf16 %v10344_v5, %v10344_v5  ;;  %v3005_v61 = vand.u32 2147483647, %v10334_v57  ;;  %v3007_v0 = vand.u32 2147483648, %v10334_v57 }
 0x508   :  { %v9062_v33 = vpop.eup %9061  ;;  %v3030_v11 = vadd.f32 %v9060_v62, %v3029_v30  ;;  %v3110_v26 = vand.u32 2147483647, %v10353_v46  ;;  %vm10407_vm11 = vcmp.eq.f32.partialorder %v3125_v36, 8.507059e+37  ;;  %v3128_v1 = vor.u32 1.1754944e-38, %v3127_v8 }
 0x509   :  { %v3079_v35 = vsel %vm3078_vm7, %v9058_v55, %v3075_v63  ;;  %v3117_v52 = vmul.f32 %v9062_v33, %v10328_v28  ;;  %v10375_v3 = vpop.xlane.xlu0 %2898  ;;  %vm3122_vm10 = vweird.f32 %v9062_v33  ;;  %vm3001_vm12 = vweird.f32 %v10334_v57 }
 0x50a   :  { %v3084_v31 = vsel %vm10361_vm13, %v3083_v13, %v3079_v35  ;;  %v10387_v55 = vpop.xlane.xlu2 %2907  ;;  %v9064_v56 = vpop.eup %9063  ;;  %v3034_v60 = vsel %vm3033_vm9, %v9060_v62, %v3030_v11  ;;  %9067 = vrcp.f32 %v10375_v3  ;;  %v3112_v62 = vand.u32 2147483648, %v10353_v46  ;;  %vm3123_vm14 = vmor %vm3121_vm8, %vm3122_vm10 }
 0x50b   :  { %v10390_v49 = vmul.f32 %v10192_v42, %v3084_v31  ;;  %v3118_v18 = vsub.f32 1.0, %v3117_v52  ;;  %v3039_v43 = vsel %vm10366_vm5, %v3038_v7, %v3034_v60  ;;  %v2997_v29 = vmul.f32 %v9064_v56, %v10334_v57  ;;  %v10420_v9 = vpop.xlane.xlu1 %2919 }
 0x50c   :  { %v10404_v42 = vmul.f32 %v10197_v32, %v3039_v43  ;;  %v9066_v6 = vpop.eup %9065  ;;  %9069 = vrcp.f32 %v10387_v55  ;;  %vm3106_vm13 = vweird.f32 %v10353_v46  ;;  %vm3002_vm15 = vweird.f32 %v9064_v56 }
 0x50d   :  { %3171 = vst.msk [vmem:[%s12176_s19 + $0x50] sm:$0xff] %vm2775_vm4, %v10390_v49  ;;  %v3119_v48 = vmul.f32 %v9062_v33, %v3118_v18  ;;  %v2998_v12 = vsub.f32 1.0, %v2997_v29  ;;  %v3102_v27 = vmul.f32 %v9066_v6, %v10353_v46  ;;  %vm10424_vm5 = vcmp.eq.f32.partialorder %v3005_v61, 8.507059e+37  ;;  %vm3003_vm8 = vmor %vm3001_vm12, %vm3002_vm15 }
 0x50e   :  { %3168 = vst.msk [vmem:[%s12176_s19 + $0x38] sm:$0x1] %vm2779_vm6, %v10404_v42  ;;  %v3008_v40 = vor.u32 1.1754944e-38, %v3007_v0  ;;  %vm10428_vm7 = vcmp.eq.f32.partialorder %v3110_v26, 8.507059e+37  ;;  %v3113_v30 = vor.u32 1.1754944e-38, %v3112_v62  ;;  %9071 = vrcp.f32 %v10420_v9 }
 0x50f   :  { %v3120_v32 = vadd.f32 %v9062_v33, %v3119_v48  ;;  %v2999_v25 = vmul.f32 %v9064_v56, %v2998_v12  ;;  %v3103_v13 = vsub.f32 1.0, %v3102_v27  ;;  %v3050_v36 = vand.u32 2147483647, %v10375_v3 }
 0x510   :  { %v9068_v4 = vpop.eup %9067  ;;  %vm3107_vm9 = vweird.f32 %v9066_v6  ;;  %v3187_v31 = vpack.c.bf16 %v10390_v49, %v10390_v49  ;;  %vm3046_vm10 = vweird.f32 %v10375_v3  ;;  %v3052_v60 = vand.u32 2147483648, %v10375_v3 }
 0x511   :  { %v3124_v34 = vsel %vm3123_vm14, %v9062_v33, %v3120_v32  ;;  %v3000_v28 = vadd.f32 %v9064_v56, %v2999_v25  ;;  %v3104_v33 = vmul.f32 %v9066_v6, %v3103_v13  ;;  %v3042_v52 = vmul.f32 %v9068_v4, %v10375_v3 }
 0x512   :  { %v3129_v7 = vsel %vm10407_vm11, %v3128_v1, %v3124_v34  ;;  %v10436_v35 = vpop.xlane.xlu2 %2916  ;;  %v9070_v8 = vpop.eup %9069  ;;  %vm3108_vm11 = vmor %vm3106_vm13, %vm3107_vm9  ;;  %vm10460_vm12 = vcmp.eq.f32.partialorder %v3050_v36, 8.507059e+37  ;;  %v3097_v26 = vand.u32 2147483648, %v10387_v55  ;;  %vm3047_vm14 = vweird.f32 %v9068_v4 }
 0x513   :  { %v10439_v11 = vmul.f32 %v10207_v47, %v3129_v7  ;;  %v3004_v61 = vsel %vm3003_vm8, %v9064_v56, %v3000_v28  ;;  %v3184_v47 = vpack.c.bf16 %v10404_v42, %v10404_v42  ;;  %v3105_v18 = vadd.f32 %v9066_v6, %v3104_v33  ;;  %vm3048_vm15 = vmor %vm3046_vm10, %vm3047_vm14 }
 0x514   :  { %v3009_v57 = vsel %vm10424_vm5, %v3008_v40, %v3004_v61  ;;  %v3043_v0 = vsub.f32 1.0, %v3042_v52  ;;  %v3087_v29 = vmul.f32 %v9070_v8, %v10387_v55  ;;  %9073 = vrcp.f32 %v10436_v35  ;;  %v9072_v62 = vpop.eup %9071 }
 0x515   :  { %3174 = vst.msk [vmem:[%s12176_s19 + $0x68] sm:$0x1] %vm2779_vm6, %v10439_v11  ;;  %v3010_v56 = vmul.f32 %v10209_v59, %v3009_v57  ;;  %v3109_v42 = vsel %vm3108_vm11, %v9066_v6, %v3105_v18  ;;  %v3053_v46 = vor.u32 1.1754944e-38, %v3052_v60  ;;  %vm3091_vm13 = vweird.f32 %v10387_v55 }
 0x516   :  { %v3044_v48 = vmul.f32 %v9068_v4, %v3043_v0  ;;  %v3114_v59 = vsel %vm10428_vm7, %v3113_v30, %v3109_v42  ;;  %v3088_v39 = vsub.f32 1.0, %v3087_v29  ;;  %v3095_v12 = vand.u32 2147483647, %v10387_v55 }
 0x517   :  { %3166 = vst.msk [vmem:[%s12176_s19 + $0x28] sm:$0x1] %vm2779_vm6, %v3010_v56  ;;  %v10475_v1 = vmul.f32 %v10205_v23, %v3114_v59  ;;  %v3147_v32 = vmul.f32 %v9072_v62, %v10420_v9  ;;  %vm3092_vm5 = vweird.f32 %v9070_v8  ;;  %v3098_v25 = vor.u32 1.1754944e-38, %v3097_v26 }
 0x518   :  { %v3045_v6 = vadd.f32 %v9068_v4, %v3044_v48  ;;  %v3089_v27 = vmul.f32 %v9070_v8, %v3088_v39  ;;  %v3155_v54 = vand.u32 2147483647, %v10420_v9  ;;  %v3182_v34 = vpack.c.bf16 %v3010_v56, %v3010_v56  ;;  %vm3093_vm8 = vmor %vm3091_vm13, %vm3092_vm5 }
 0x519   :  { %3173 = vst.msk [vmem:[%s12176_s19 + $0x60] sm:$0xff] %vm2775_vm4, %v10475_v1  ;;  %v3148_v13 = vsub.f32 1.0, %v3147_v32  ;;  %v3157_v63 = vand.u32 2147483648, %v10420_v9  ;;  %vm3152_vm7 = vweird.f32 %v9072_v62  ;;  %v3288_v7 = vunpack.c.l.b16 %v3183_v53 }
 0x51a   :  { %v10482_v40 = vpop.xlane.xlu2 %2901  ;;  %v3049_v23 = vsel %vm3048_vm15, %v9068_v4, %v3045_v6  ;;  %v3090_v30 = vadd.f32 %v9070_v8, %v3089_v27  ;;  %v9074_v28 = vpop.eup %9073  ;;  %v3289_v33 = vunpack.c.l.b16 %v3184_v47  ;;  %vm3096_vm9 = vcmp.eq.f32.partialorder %v3095_v12, 8.507059e+37 }
 0x51b   :  { %v3054_v3 = vsel %vm10460_vm12, %v3053_v46, %v3049_v23  ;;  %v3149_v4 = vmul.f32 %v9072_v62, %v3148_v13  ;;  %9075 = vrcp.f32 %v10482_v40  ;;  %vm3151_vm10 = vweird.f32 %v10420_v9 }
 0x51c   :  { %v10496_v36 = vmul.f32 %v10218_v45, %v3054_v3  ;;  %v3094_v52 = vsel %vm3093_vm8, %v9070_v8, %v3090_v30  ;;  %v3132_v61 = vmul.f32 %v9074_v28, %v10436_v35  ;;  %vm3156_vm11 = vcmp.eq.f32.partialorder %v3155_v54, 8.507059e+37  ;;  %vm3153_vm12 = vmor %vm3151_vm10, %vm3152_vm7 }
 0x51d   :  { %v3099_v45 = vsel %vm3096_vm9, %v3098_v25, %v3094_v52  ;;  %v3150_v58 = vadd.f32 %v9072_v62, %v3149_v4  ;;  %v3290_v53 = vpack.c.b16 %v3289_v33, %v3288_v7  ;;  %v3158_v8 = vor.u32 1.1754944e-38, %v3157_v63 }
 0x51e   :  { %3169 = vst.msk [vmem:[%s12176_s19 + $0x40] sm:$0xff] %vm2775_vm4, %v10496_v36  ;;  %v3100_v55 = vmul.f32 %v10222_v44, %v3099_v45  ;;  %v3133_v60 = vsub.f32 1.0, %v3132_v61  ;;  %v3140_v9 = vand.u32 2147483647, %v10436_v35  ;;  %v3142_v57 = vand.u32 2147483648, %v10436_v35 }
 0x51f   :  { %v3154_v47 = vsel %vm3153_vm12, %v9072_v62, %v3150_v58  ;;  %8345 = vmatmul.msk.bf16.vlgmr.msra.gmra.mxu0 %vm2775_vm4, %v3290_v53  ;;  %v3258_v18 = vunpack.c.l.b16 %v3181_v51  ;;  %v3259_v0 = vunpack.c.l.b16 %v3182_v34  ;;  %vm3137_vm14 = vweird.f32 %v9074_v28 }
 0x520   :  { %3172 = vst.msk [vmem:[%s12176_s19 + $0x58] sm:$0x1] %vm2779_vm6, %v3100_v55  ;;  %v3188_v44 = vpack.c.bf16 %v3100_v55, %v3100_v55  ;;  %v3159_v56 = vsel %vm3156_vm11, %v3158_v8, %v3154_v47  ;;  %v3134_v43 = vmul.f32 %v9074_v28, %v3133_v60  ;;  %vm3136_vm13 = vweird.f32 %v10436_v35 }
 0x521   :  { %v9076_v29 = vpop.eup %9075  ;;  %v3160_v26 = vmul.f32 %v10220_v41, %v3159_v56  ;;  %v3260_v42 = vpack.c.b16 %v3259_v0, %v3258_v18  ;;  %v3348_v51 = vunpack.c.l.b16 %v3187_v31  ;;  %vm3138_vm15 = vmor %vm3136_vm13, %vm3137_vm14  ;;  %v3143_v59 = vor.u32 1.1754944e-38, %v3142_v57 }
 0x522   :  { %v3135_v48 = vadd.f32 %v9074_v28, %v3134_v43  ;;  %v3057_v5 = vmul.f32 %v9076_v29, %v10482_v40  ;;  %v3349_v62 = vunpack.c.l.b16 %v3188_v44  ;;  %vm3141_vm5 = vcmp.eq.f32.partialorder %v3140_v9, 8.507059e+37 }
 0x523   :  { %3176 = vst.msk [vmem:[%s12176_s19 + $0x78] sm:$0x1] %vm2779_vm6, %v3160_v26  ;;  %8344 = vmatmul.msk.bf16.vlgmr.msrb.gmra.mxu3 %vm2775_vm4, %v3260_v42  ;;  %v3065_v6 = vand.u32 2147483647, %v10482_v40  ;;  %v3067_v49 = vand.u32 2147483648, %v10482_v40  ;;  %v3192_v31 = vpack.c.bf16 %v3160_v26, %v3160_v26  ;;  %vm3062_vm7 = vweird.f32 %v9076_v29 }
 0x524   :  { %v3139_v41 = vsel %vm3138_vm15, %v9074_v28, %v3135_v48  ;;  %v3058_v35 = vsub.f32 1.0, %v3057_v5  ;;  %v3350_v46 = vpack.c.b16 %v3349_v62, %v3348_v51  ;;  %vm3061_vm8 = vweird.f32 %v10482_v40 }
 0x525   :  { %v3144_v39 = vsel %vm3141_vm5, %v3143_v59, %v3139_v41  ;;  %v3190_v54 = vpack.c.bf16 %v10439_v11, %v10439_v11  ;;  %v3189_v34 = vpack.c.bf16 %v10475_v1, %v10475_v1  ;;  %vm3063_vm9 = vmor %vm3061_vm8, %vm3062_vm7  ;;  %vm3066_vm10 = vcmp.eq.f32.partialorder %v3065_v6, 8.507059e+37 }
 0x526   :  { %v3145_v12 = vmul.f32 %v10232_v50, %v3144_v39  ;;  %v3059_v32 = vmul.f32 %v9076_v29, %v3058_v35  ;;  %8347 = vmatmul.msk.bf16.vlgmr.msrb.gmra.mxu2 %vm2775_vm4, %v3350_v46  ;;  %v3068_v50 = vor.u32 1.1754944e-38, %v3067_v49  ;;  %v3409_v63 = vunpack.c.l.b16 %v3192_v31 }
 0x527   :  { %v3185_v30 = vpack.c.bf16 %v10496_v36, %v10496_v36  ;;  %v3378_v40 = vunpack.c.l.b16 %v3189_v34  ;;  %v3379_v4 = vunpack.c.l.b16 %v3190_v54  ;;  %vm3755_vm11 = vcmask 130048  }
 0x528   :  { %3175 = vst.msk [vmem:[%s12176_s19 + $0x70] sm:$0xff] %vm2775_vm4, %v3145_v12  ;;  %v3191_v27 = vpack.c.bf16 %v3145_v12, %v3145_v12  ;;  %v3060_v25 = vadd.f32 %v9076_v29, %v3059_v32  ;;  %vm3759_vm12 = vcmask 195584   ;;  %vm3851_vm14 = vcmask 254976  }
 0x529   :  { %v3318_v1 = vunpack.c.l.b16 %v3185_v30  ;;  %v3380_v52 = vpack.c.b16 %v3379_v4, %v3378_v40 }
 0x52a   :  { %v3064_v23 = vsel %vm3063_vm9, %v9076_v29, %v3060_v25  ;;  %v3408_v13 = vunpack.c.l.b16 %v3191_v27 }
 0x52b   :  { %v3069_v3 = vsel %vm3066_vm10, %v3068_v50, %v3064_v23 }
 0x52c   :  { %v3070_v7 = vmul.f32 %v10236_v38, %v3069_v3  ;;  %v3410_v28 = vpack.c.b16 %v3409_v63, %v3408_v13 }
 0x52e   :  { %3170 = vst.msk [vmem:[%s12176_s19 + $0x48] sm:$0x1] %vm2779_vm6, %v3070_v7  ;;  %v3186_v11 = vpack.c.bf16 %v3070_v7, %v3070_v7 }
 0x52f   :  { %8349 = vmatmul.msk.bf16.vlgmr.msrb.gmra.mxu0 %vm2775_vm4, %v3410_v28 }
 0x530   :  { %v3319_v33 = vunpack.c.l.b16 %v3186_v11 }
 0x532   :  { %v3320_v61 = vpack.c.b16 %v3319_v33, %v3318_v1 }
 0x533   :  { %8348 = vmatmul.msk.bf16.vlgmr.msra.gmra.mxu3 %vm2775_vm4, %v3380_v52 }
 0x534   :  { %8346 = vmatmul.msk.bf16.vlgmr.msrb.gmra.mxu1 %vm2775_vm4, %v3320_v61 }
 0x556   :  { %v3221_v58 = vpop.f32.mrf.mxu1 }
 0x557   :  { %v3438_v57 = vrot.slane %v3221_v58, 4 }
 0x55e   :  { %v3223_v26 = vpop.f32.mrf.mxu1 }
 0x586   :  { %v3251_v38 = vpop.f32.mrf.mxu2 }
 0x587   :  { %v3450_v53 = vrot.slane %v3251_v38, 4 }
 0x58e   :  { %v3253_v55 = vpop.f32.mrf.mxu2 }
 0x59c   :  { %v3311_v36 = vpop.f32.mrf.mxu0 }
 0x59d   :  { %v3448_v45 = vrot.slane %v3311_v36, 4  ;;  %v3451_v8 = vsel %vm273_vm1, %v3311_v36, %v3450_v53 }
 0x59e   :  { %v3459_v9 = vperm.slane %v3451_v8, %v9418_v10 }
 0x59f   :  { %v3449_v60 = vsel %vm273_vm1, %v3448_v45, %v3251_v38 }
 0x5a0   :  { %v3455_v18 = vperm.slane %v3449_v60, %v9418_v10  ;;  %v3472_v43 = vrot.slane %v3459_v9, 4 }
 0x5a2   :  { %v3460_v42 = vrot.slane %v3455_v18, 4 }
 0x5a4   :  { %v3313_v47 = vpop.f32.mrf.mxu0 }
 0x5a5   :  { %v3498_v51 = vrot.slane %v3313_v47, 4 }
 0x5a6   :  { %v3281_v0 = vpop.f32.mrf.mxu3 }
 0x5a7   :  { %v3436_v44 = vrot.slane %v3281_v0, 4  ;;  %v3439_v56 = vsel %vm273_vm1, %v3281_v0, %v3438_v57  ;;  %v3499_v25 = vsel %vm273_vm1, %v3498_v51, %v3253_v55 }
 0x5a8   :  { %v3447_v29 = vperm.slane %v3439_v56, %v9418_v10  ;;  %v3503_v7 = vperm.slane %v3499_v25, %v9418_v10 }
 0x5a9   :  { %v3437_v48 = vsel %vm273_vm1, %v3436_v44, %v3221_v58  ;;  %v3371_v5 = vpop.f32.mrf.mxu2 }
 0x5aa   :  { %v3443_v62 = vperm.slane %v3437_v48, %v9418_v10  ;;  %v3473_v59 = vsel %vm273_vm1, %v3472_v43, %v3447_v29  ;;  %v3474_v41 = vrot.slane %v3447_v29, 4  ;;  %v3524_v49 = vrot.slane %v3371_v5, 4 }
 0x5ab   :  { %v3479_v35 = vperm.slane %v3473_v59, %v9430_v37  ;;  %v3504_v44 = vrot.slane %v3503_v7, 4 }
 0x5ac   :  { %v3461_v46 = vsel %vm273_vm1, %v3460_v42, %v3443_v62  ;;  %v3462_v39 = vrot.slane %v3443_v62, 4  ;;  %v3475_v6 = vsel %vm273_vm1, %v3459_v9, %v3474_v41  ;;  %v3431_v31 = vpop.f32.mrf.mxu0 }
 0x5ad   :  { %v3467_v12 = vperm.slane %v3461_v46, %v9430_v37  ;;  %v3483_v32 = vperm.slane %v3475_v6, %v9430_v37  ;;  %v3522_v27 = vrot.slane %v3431_v31, 4  ;;  %v3488_v34 = vrot.slane %v3479_v35, 4 }
 0x5ae   :  { %v3463_v54 = vsel %vm273_vm1, %v3455_v18, %v3462_v39  ;;  %v3283_v50 = vpop.f32.mrf.mxu3  ;;  %v3525_v30 = vsel %vm273_vm1, %v3431_v31, %v3524_v49 }
 0x5af   :  { %v3471_v23 = vperm.slane %v3463_v54, %v9430_v37  ;;  %v3484_v13 = vrot.slane %v3467_v12, 4  ;;  %v3490_v63 = vrot.slane %v3483_v32, 4  ;;  %v3492_v3 = vrot.slane %v3283_v50, 4 }
 0x5b0   :  { %v3523_v4 = vsel %vm273_vm1, %v3522_v27, %v3371_v5  ;;  %v3489_v1 = vsel %vm273_vm1, 0.0, %v3488_v34  ;;  %v3533_v58 = vperm.slane %v3525_v30, %v9418_v10 }
 0x5b1   :  { %v3486_v28 = vrot.slane %v3471_v23, 4  ;;  %v3491_v40 = vsel %vm273_vm1, 0.0, %v3490_v63  ;;  %v3341_v11 = vpop.f32.mrf.mxu1  ;;  %v3589_v33 = vsel %vm273_vm1, %v3490_v63, %v3479_v35  ;;  %v3493_v61 = vsel %vm273_vm1, %v3492_v3, %v3223_v26  ;;  %v3373_v42 = vpop.f32.mrf.mxu2 }
 0x5b2   :  { %v3594_v52 = vrot.slane %v3491_v40, 4  ;;  %v3485_v38 = vsel %vm273_vm1, 0.0, %v3484_v13  ;;  %v3529_v8 = vperm.slane %v3523_v4, %v9418_v10  ;;  %v3512_v60 = vrot.slane %v3341_v11, 4 }
 0x5b3   :  { %v3487_v36 = vsel %vm273_vm1, 0.0, %v3486_v28  ;;  %v3578_v45 = vsel %vm273_vm1, %v3486_v28, %v3467_v12  ;;  %v3593_v47 = vperm.slane %v3589_v33, %v9418_v10  ;;  %v3497_v18 = vperm.slane %v3493_v61, %v9418_v10 }
 0x5b4   :  { %v3583_v53 = vrot.slane %v3487_v36, 4  ;;  %v3595_v55 = vsel %vm273_vm1, %v3594_v52, %v3489_v1  ;;  %v3433_v9 = vpop.f32.mrf.mxu0  ;;  %v3582_v29 = vperm.slane %v3578_v45, %v9418_v10  ;;  %v3546_v26 = vrot.slane %v3533_v58, 4 }
 0x5b5   :  { %v3599_v57 = vperm.slane %v3595_v55, %v9418_v10  ;;  %v3570_v0 = vrot.slane %v3433_v9, 4  ;;  %v3534_v62 = vrot.slane %v3529_v8, 4  ;;  %v3505_v46 = vsel %vm273_vm1, %v3504_v44, %v3497_v18 }
 0x5b6   :  { %v3584_v56 = vsel %vm273_vm1, %v3583_v53, %v3485_v38  ;;  %v3401_v43 = vpop.f32.mrf.mxu3  ;;  %v3614_v49 = vrot.slane %v3593_v47, 4  ;;  %v3602_v27 = vrot.slane %v3582_v29, 4  ;;  %v3509_v30 = vperm.slane %v3505_v46, %v9430_v37 }
 0x5b7   :  { %v3510_v48 = vrot.slane %v3401_v43, 4  ;;  %v3513_v5 = vsel %vm273_vm1, %v3401_v43, %v3512_v60  ;;  %v3588_v51 = vperm.slane %v3584_v56, %v9418_v10  ;;  %v3571_v41 = vsel %vm273_vm1, %v3570_v0, %v3373_v42 }
 0x5b8   :  { %v3521_v59 = vperm.slane %v3513_v5, %v9418_v10  ;;  %v3612_v35 = vrot.slane %v3599_v57, 4  ;;  %v3575_v54 = vperm.slane %v3571_v41, %v9418_v10  ;;  %v3615_v52 = vsel %vm273_vm1, %v3599_v57, %v3614_v49 }
 0x5b9   :  { %v3511_v39 = vsel %vm273_vm1, %v3510_v48, %v3341_v11  ;;  %v3600_v6 = vrot.slane %v3588_v51, 4  ;;  %v3603_v33 = vsel %vm273_vm1, %v3588_v51, %v3602_v27  ;;  %v3623_v48 = vperm.slane %v3615_v52, %v9430_v37 }
 0x5ba   :  { %v3517_v31 = vperm.slane %v3511_v39, %v9418_v10  ;;  %v3547_v12 = vsel %vm273_vm1, %v3546_v26, %v3521_v59  ;;  %v3548_v32 = vrot.slane %v3521_v59, 4  ;;  %v3613_v50 = vsel %vm273_vm1, %v3612_v35, %v3593_v47 }
 0x5bb   :  { %v3553_v25 = vperm.slane %v3547_v12, %v9430_v37  ;;  %v3601_v34 = vsel %vm273_vm1, %v3600_v6, %v3582_v29  ;;  %v3619_v1 = vperm.slane %v3613_v50, %v9430_v37  ;;  %v3576_v55 = vrot.slane %v3575_v54, 4 }
 0x5bc   :  { %v3535_v23 = vsel %vm273_vm1, %v3534_v62, %v3517_v31  ;;  %v3536_v13 = vrot.slane %v3517_v31, 4  ;;  %v3549_v63 = vsel %vm273_vm1, %v3533_v58, %v3548_v32  ;;  %v3607_v3 = vperm.slane %v3601_v34, %v9430_v37  ;;  %v3343_v58 = vpop.f32.mrf.mxu1 }
 0x5bd   :  { %v3541_v7 = vperm.slane %v3535_v23, %v9430_v37  ;;  %v3557_v28 = vperm.slane %v3549_v63, %v9430_v37  ;;  %v3562_v40 = vrot.slane %v3553_v25, 4  ;;  %v3611_v0 = vperm.slane %v3603_v33, %v9430_v37 }
 0x5be   :  { %v3537_v4 = vsel %vm273_vm1, %v3529_v8, %v3536_v13  ;;  %v3403_v11 = vpop.f32.mrf.mxu3  ;;  %v3626_v9 = vrot.slane %v3607_v3, 4  ;;  %v3624_v56 = vrot.slane %v3619_v1, 4  ;;  %v3628_v23 = vrot.slane %v3623_v48, 4 }
 0x5bf   :  { %v3545_v61 = vperm.slane %v3537_v4, %v9430_v37  ;;  %v3558_v38 = vrot.slane %v3541_v7, 4  ;;  %v3563_v36 = vsel %vm273_vm1, 0.0, %v3562_v40  ;;  %v3649_v45 = vrot.slane %v3557_v28, 4 }
 0x5c0   :  { %v3643_v53 = vrot.slane %v3563_v36, 4  ;;  %v3564_v60 = vrot.slane %v3403_v11, 4  ;;  %v3630_v39 = vrot.slane %v3611_v0, 4  ;;  %v10632_v12 = vsel %vm273_vm1, %v3624_v56, %v3607_v3 }
 0x5c1   :  { %v3559_v8 = vsel %vm273_vm1, 0.0, %v3558_v38  ;;  %v3560_v47 = vrot.slane %v3545_v61, 4  ;;  %v3650_v18 = vsel %vm273_vm1, %v3649_v45, %v3553_v25  ;;  %v3687_v31 = vsel %vm273_vm1, 0.0, %v3649_v45 }
 0x5c2   :  { %v3632_v44 = vrot.slane %v3559_v8, 4  ;;  %v3565_v57 = vsel %vm273_vm1, %v3564_v60, %v3343_v58  ;;  %v3654_v43 = vperm.slane %v3650_v18, %v9418_v10  ;;  %v3691_v54 = vperm.slane %v3687_v31, %v9418_v10 }
 0x5c3   :  { %v3561_v29 = vsel %vm273_vm1, 0.0, %v3560_v47  ;;  %v3638_v26 = vsel %vm273_vm1, %v3560_v47, %v3541_v7  ;;  %v3569_v42 = vperm.slane %v3565_v57, %v9418_v10  ;;  %v3627_v52 = vsel %vm273_vm1, %v3619_v1, %v3626_v9 }
 0x5c4   :  { %v3633_v5 = vsel %vm273_vm1, %v3632_v44, %v3509_v30  ;;  %v3642_v51 = vperm.slane %v3638_v26, %v9418_v10  ;;  %v3644_v62 = vsel %vm273_vm1, %v3643_v53, %v3561_v29  ;;  %v3667_v59 = vrot.slane %v3654_v43, 4  ;;  %v8541_v26 = vld [vmem:[%s12178_s8 + $0x8] sm:$0xff] }
 0x5c5   :  { %v3577_v41 = vsel %vm273_vm1, %v3576_v55, %v3569_v42  ;;  %v3637_v35 = vperm.slane %v3633_v5, %v9418_v10  ;;  %v3648_v46 = vperm.slane %v3644_v62, %v9418_v10  ;;  %v3702_v7 = vrot.slane %v3691_v54, 4  ;;  %3797 = vmatpush.bf16.msra.mxu1 %v8541_v26  ;;  %v8540_v42 = vld [vmem:[%s12178_s8] sm:$0xff] }
 0x5c6   :  { %v3655_v6 = vrot.slane %v3642_v51, 4  ;;  %v3695_v49 = vperm.slane %v3577_v41, %v9430_v37  ;;  %v3631_v61 = vsel %vm273_vm1, %v3623_v48, %v3630_v39  ;;  %v3629_v47 = vsel %vm273_vm1, %v3628_v23, %v3611_v0 }
 0x5c7   :  { %v3668_v32 = vsel %vm273_vm1, %v3667_v59, %v3648_v46  ;;  %v3657_v27 = vrot.slane %v3637_v35, 4  ;;  %v3669_v25 = vrot.slane %v3648_v46, 4 }
 0x5c8   :  { %v3656_v34 = vsel %vm273_vm1, %v3655_v6, %v3637_v35  ;;  %v3674_v50 = vperm.slane %v3668_v32, %v9430_v37  ;;  %v3699_v13 = vperm.slane %v3695_v49, %v9418_v10 }
 0x5c9   :  { %v3662_v63 = vperm.slane %v3656_v34, %v9430_v37  ;;  %v3658_v30 = vsel %vm273_vm1, %v3642_v51, %v3657_v27  ;;  %v3670_v3 = vsel %vm273_vm1, %v3654_v43, %v3669_v25  ;;  %3798 = vmatpush.bf16.msra.mxu1 %v8540_v42 }
 0x5ca   :  { %v3679_v28 = vrot.slane %v3674_v50, 4  ;;  %v3666_v40 = vperm.slane %v3658_v30, %v9430_v37  ;;  %v3678_v4 = vperm.slane %v3670_v3, %v9430_v37  ;;  %v3700_v11 = vrot.slane %v3699_v13, 4  ;;  %v3824_v3 = vld [vmem:[#allocation1] sm:$0xff] }
 0x5cb   :  { %v3681_v33 = vrot.slane %v3662_v63, 4  ;;  %v3703_v58 = vsel %vm273_vm1, %v3699_v13, %v3702_v7  ;;  %3825 = vst [vmem:[#allocation1] ss:$9 sm:$0xff] %v9321_v15  ;;  %v12230_v7 = vrot.slane %v9316_v14, 7 }
 0x5cc   :  { %v3685_v38 = vrot.slane %v3666_v40, 4  ;;  %v3683_v36 = vrot.slane %v3678_v4, 4  ;;  %v3701_v53 = vsel %vm273_vm1, %v3700_v11, %v3691_v54  ;;  %v3680_v55 = vsel %vm273_vm1, %v3679_v28, %v3662_v63  ;;  %3826 = vst [vmem:[#allocation1 + $0x1] ss:$9 sm:$0xff] %v9316_v14 }
 0x5cd   :  { %v3682_v45 = vsel %vm273_vm1, %v3674_v50, %v3681_v33  ;;  %v3711_v44 = vperm.slane %v3703_v58, %v9430_v37  ;;  %v3707_v57 = vperm.slane %v3701_v53, %v9430_v37  ;;  %3827 = vst [vmem:[#allocation1 + $0x2] ss:$9 sm:$0xff] %v81_v16  ;;  %v8996_v16 = vld [vmem:[%s12177_s9] ss:$0 sm:$0xff] }
 0x5ce   :  { %v8768_v60 = vpack.i.bf16 %v3682_v45, %v3627_v52  ;;  %v3686_v8 = vsel %vm273_vm1, %v3678_v4, %v3685_v38  ;;  %v3684_v18 = vsel %vm273_vm1, %v3683_v36, %v3666_v40  ;;  %3828 = vst [vmem:[#allocation1 + $0x3] ss:$9 sm:$0xff] %v82_v17  ;;  %v9181_v38 = vmov 32.0  }
 0x5cf   :  { %v8778_v1 = vpack.i.bf16 %v3686_v8, %v3631_v61  ;;  %v8773_v9 = vpack.i.bf16 %v3684_v18, %v3629_v47  ;;  %v3714_v56 = vrot.slane %v3711_v44, 4  ;;  %v3712_v43 = vrot.slane %v3707_v57, 4  ;;  %3829 = vst [vmem:[#allocation1 + $0x4] ss:$9 sm:$0xff] %v83_v19 }
 0x5d0   :  { %8769 = vrot.lane.b32.xlu1 %v8768_v60, %s12196_s28  ;;  %3830 = vst [vmem:[#allocation1 + $0x5] ss:$9 sm:$0xff] %v84_v20  ;;  %9077 = vrcp.f32 %v9181_v38 }
 0x5d1   :  { %8779 = vrot.lane.b32.xlu2 %v8778_v1, %s12194_s4  ;;  %8774 = vrot.lane.b32.xlu0 %v8773_v9, %s12198_s30  ;;  %v3715_v0 = vsel %vm273_vm1, 0.0, %v3714_v56  ;;  %v3713_v29 = vsel %vm273_vm1, 0.0, %v3712_v43  ;;  %3831 = vst [vmem:[#allocation1 + $0x6] ss:$9 sm:$0xff] %v85_v21 }
 0x5d2   :  { %3832 = vst [vmem:[#allocation1 + $0x7] ss:$9 sm:$0xff] %v86_v22 }
 0x5d6   :  { %v9078_v36 = vpop.eup %9077 }
 0x5d7   :  { %v3856_v45 = vmul.f32 32.0, %v9078_v36  ;;  %vm3860_vm13 = vweird.f32 %v9078_v36 }
 0x5d8   :  { %3735 = vrot.lane.b32.xlu1 %v3711_v44, %s12198_s30 }
 0x5d9   :  { %3747 = vrot.lane.b32.xlu2 %v3715_v0, %s12194_s4  ;;  %3723 = vrot.lane.b32.xlu0 %v3713_v29, %s12196_s28  ;;  %v3833_v15 = vld [vmem:[#allocation1] sm:$0xff]  ;;  %v3857_v58 = vsub.f32 1.0, %v3856_v45  ;;  %s12238_s4 = smov 24  }
 0x5da   :  { %3834 = vst [vmem:[#allocation1] ss:$9 sm:$0xff] %v12230_v7 }
 0x5db   :  { %3835 = vst [vmem:[#allocation1 + $0x1] ss:$9 sm:$0xff] %v9347_v24  ;;  %v3858_v53 = vmul.f32 %v9078_v36, %v3857_v58 }
 0x5e2   :  { %v3836_v11 = vld [vmem:[#allocation1] sm:$0xff] }
 0x62b   :  { %v8780_v48 = vpop.permute.xlu2 %8779 }
 0x62c   :  { %v8782_v46 = vunpack.i.h.bf16 %v8780_v48  ;;  %v8781_v39 = vunpack.i.l.bf16 %v8780_v48 }
 0x642   :  { %v8770_v5 = vpop.permute.xlu1 %8769 }
 0x643   :  { %v8772_v51 = vunpack.i.h.bf16 %v8770_v5  ;;  %v8771_v62 = vunpack.i.l.bf16 %v8770_v5  ;;  %v8775_v59 = vpop.permute.xlu0 %8774 }
 0x644   :  { %v8777_v41 = vunpack.i.h.bf16 %v8775_v59  ;;  %v8776_v35 = vunpack.i.l.bf16 %v8775_v59 }
 0x645   :  { %v3752_v6 = vsel %vm2562_vm3, %v10632_v12, %v8771_v62  ;;  %v3753_v49 = vsel %vm2562_vm3, %v3680_v55, %v8772_v51  ;;  %v3748_v12 = vpop.permute.xlu2 %3747  ;;  %v3859_v55 = vadd.f32 %v9078_v36, %v3858_v53 }
 0x646   :  { %v3756_v31 = vsel %vm3755_vm11, %v3752_v6, %v8776_v35  ;;  %v3757_v32 = vsel %vm3755_vm11, %v3753_v49, %v8777_v41  ;;  %v8543_v41 = vld [vmem:[%s12182_s12 + $0x8] sm:$0xff] }
 0x647   :  { %v3760_v27 = vsel %vm3759_vm12, %v3756_v31, %v8781_v39  ;;  %v3761_v25 = vsel %vm3759_vm12, %v3757_v32, %v8782_v46  ;;  %v10704_v60 = vsel %vm3860_vm13, %v9078_v36, %v3859_v55  ;;  %3965 = vmatpush.bf16.msra.mxu2 %v8543_v41  ;;  %v8542_v39 = vld [vmem:[%s12182_s12] sm:$0xff] }
 0x648   :  { %v3763_v54 = vpack.c.bf16 %v3761_v25, %v3760_v27 }
 0x64a   :  { %8358 = vmatmul.msk.bf16.vlgmr.msra.gmra.mxu1 %vm141_vm0, %v3763_v54  ;;  %v3736_v23 = vpop.permute.xlu1 %3735 }
 0x64b   :  { %v3724_v34 = vpop.permute.xlu0 %3723  ;;  %3966 = vmatpush.bf16.msra.mxu2 %v8542_v39 }
 0x64c   :  { %v3754_v50 = vsel %vm2562_vm3, %v3707_v57, %v3724_v34 }
 0x64d   :  { %v3758_v13 = vsel %vm3755_vm11, %v3754_v50, %v3736_v23 }
 0x64e   :  { %v3762_v63 = vsel %vm3759_vm12, %v3758_v13, %v3748_v12 }
 0x64f   :  { %v3764_v30 = vpack.c.bf16 %v3762_v63, %v3762_v63 }
 0x65a   :  { %8359 = vmatmul.msk.bf16.gmra.mxu1 %vm141_vm0, %v3764_v30 }
 0x6c7   :  { %v3800_v17 = vpop.f32.mrf.mxu1 }
 0x6c8   :  { %v3801_v19 = vadd.f32 %v8996_v16, %v3800_v17 }
 0x6ca   :  { %v3840_v28 = vadd.f32 %v3824_v3, %v3801_v19 }
 0x6cc   :  { %v3845_v20 = vsel %vm141_vm0, %v3840_v28, 0.0 }
 0x6cd   :  { %3846 = vadd.xlane.f32.xlu0 %v3845_v20 }
 0x6cf   :  { %v3802_v21 = vpop.f32.mrf.mxu1 }
 0x6d0   :  { %v3803_v40 = vadd.f32 %v8996_v16, %v3802_v21 }
 0x6d2   :  { %v3841_v4 = vadd.f32 %v3833_v15, %v3803_v40  ;;  %v8998_v40 = vld [vmem:[%s12180_s11] ss:$0 sm:$0xff] }
 0x6d4   :  { %v3848_v22 = vsel %vm141_vm0, %v3841_v4, 0.0 }
 0x6d5   :  { %3849 = vadd.xlane.f32.xlu1 %v3848_v22 }
 0x6d7   :  { %v3805_v14 = vpop.f32.mrf.mxu1 }
 0x6d8   :  { %v3806_v33 = vadd.f32 %v8996_v16, %v3805_v14  ;;  %v8997_v16 = vld [vmem:[%s12179_s10] ss:$0 sm:$0xff] }
 0x6da   :  { %v3842_v24 = vadd.f32 %v3836_v11, %v3806_v33 }
 0x6dc   :  { %v3852_v52 = vsel %vm3851_vm14, %v3842_v24, 0.0 }
 0x6dd   :  { %3853 = vadd.xlane.f32.xlu2 %v3852_v52 }
 0x6df   :  { %v3807_v61 = vpop.f32.mrf.mxu1 }
 0x740   :  { %v3847_v8 = vpop.xlane.xlu0 %3846 }
 0x741   :  { %v3862_v47 = vmul.f32 %v10704_v60, %v3847_v8  ;;  %v8547_v8 = vld [vmem:[%s12184_s14 + $0x18] sm:$0xff] }
 0x742   :  { %4029 = vmatpush.bf16.msrb.mxu3 %v8547_v8 }
 0x743   :  { %v3865_v18 = vsub.f32 %v3840_v28, %v3862_v47  ;;  %v8546_v47 = vld [vmem:[%s12184_s14 + $0x10] sm:$0xff] }
 0x745   :  { %v3868_v1 = vmul.f32 %v3865_v18, %v3865_v18 }
 0x746   :  { %4030 = vmatpush.bf16.msrb.mxu3 %v8546_v47 }
 0x747   :  { %v3871_v9 = vsel %vm141_vm0, %v3868_v1, 0.0  ;;  %v8544_v1 = vld [vmem:[%s12184_s14] sm:$0xff] }
 0x748   :  { %v3850_v44 = vpop.xlane.xlu1 %3849  ;;  %3872 = vadd.xlane.f32.xlu0 %v3871_v9 }
 0x749   :  { %v3863_v57 = vmul.f32 %v10704_v60, %v3850_v44  ;;  %v8999_v44 = vld [vmem:[%s12231_s2] ss:$0 sm:$0xff] }
 0x74b   :  { %v3866_v56 = vsub.f32 %v3841_v4, %v3863_v57 }
 0x74d   :  { %v3869_v43 = vmul.f32 %v3866_v56, %v3866_v56 }
 0x74f   :  { %v3874_v0 = vsel %vm141_vm0, %v3869_v43, 0.0 }
 0x750   :  { %3875 = vadd.xlane.f32.xlu1 %v3874_v0  ;;  %v3854_v29 = vpop.xlane.xlu2 %3853 }
 0x751   :  { %v3864_v26 = vmul.f32 %v10704_v60, %v3854_v29 }
 0x753   :  { %v3867_v42 = vsub.f32 %v3842_v24, %v3864_v26 }
 0x755   :  { %v3870_v48 = vmul.f32 %v3867_v42, %v3867_v42 }
 0x757   :  { %v3877_v5 = vsel %vm3851_vm14, %v3870_v48, 0.0 }
 0x758   :  { %3878 = vadd.xlane.f32.xlu2 %v3877_v5 }
 0x7bb   :  { %v3873_v51 = vpop.xlane.xlu0 %3872 }
 0x7bc   :  { %v3880_v62 = vmul.f32 %v3873_v51, %v10704_v60 }
 0x7be   :  { %v3883_v59 = vadd.f32 1e-05, %v3880_v62 }
 0x7c0   :  { %9079 = vrsqrt.f32 %v3883_v59  ;;  %vm3892_vm5 = vweird.f32 %v3883_v59 }
 0x7c3   :  { %v3876_v35 = vpop.xlane.xlu1 %3875 }
 0x7c4   :  { %v3881_v46 = vmul.f32 %v3876_v35, %v10704_v60 }
 0x7c6   :  { %v9080_v6 = vpop.eup %9079  ;;  %v3884_v49 = vadd.f32 1e-05, %v3881_v46 }
 0x7c7   :  { %v3887_v31 = vmul.f32 %v9080_v6, %v3883_v59  ;;  %vm3893_vm15 = vweird.f32 %v9080_v6  ;;  %v9000_v59 = vld [vmem:[%s12183_s15] ss:$0 sm:$0xff] }
 0x7c8   :  { %9081 = vrsqrt.f32 %v3884_v49  ;;  %vm3894_vm7 = vmor %vm3892_vm5, %vm3893_vm15  ;;  %vm3902_vm9 = vweird.f32 %v3884_v49 }
 0x7c9   :  { %v3888_v32 = vmul.f32 %v9080_v6, %v3887_v31 }
 0x7cb   :  { %v3889_v27 = vmul.f32 0.5, %v3888_v32  ;;  %v3879_v25 = vpop.xlane.xlu2 %3878 }
 0x7cc   :  { %v3882_v54 = vmul.f32 %v3879_v25, %v10704_v60 }
 0x7cd   :  { %v3890_v34 = vsub.f32 1.5, %v3889_v27 }
 0x7ce   :  { %v9082_v50 = vpop.eup %9081  ;;  %v3885_v23 = vadd.f32 1e-05, %v3882_v54 }
 0x7cf   :  { %v3891_v13 = vmul.f32 %v9080_v6, %v3890_v34  ;;  %v3897_v12 = vmul.f32 %v9082_v50, %v3884_v49  ;;  %vm3903_vm8 = vweird.f32 %v9082_v50 }
 0x7d0   :  { %9083 = vrsqrt.f32 %v3885_v23  ;;  %vm3904_vm10 = vmor %vm3902_vm9, %vm3903_vm8  ;;  %vm3912_vm15 = vweird.f32 %v3885_v23 }
 0x7d1   :  { %v3898_v63 = vmul.f32 %v9082_v50, %v3897_v12  ;;  %v3895_v30 = vsel %vm3894_vm7, %v9080_v6, %v3891_v13  ;;  %vm12202_vm7 = vcmask 523264  }
 0x7d2   :  { %v3916_v17 = vmul.f32 %v3895_v30, %v3865_v18  ;;  %v8545_v18 = vld [vmem:[%s12184_s14 + $0x8] sm:$0xff] }
 0x7d3   :  { %v3899_v3 = vmul.f32 0.5, %v3898_v63  ;;  %4031 = vmatpush.bf16.msrb.mxu3 %v8545_v18  ;;  %v9001_v18 = vld [vmem:[%s12185_s16] ss:$0 sm:$0xff] }
 0x7d4   :  { %v3922_v4 = vmul.f32 %v8997_v16, %v3916_v17 }
 0x7d5   :  { %v3900_v15 = vsub.f32 1.5, %v3899_v3 }
 0x7d6   :  { %v9084_v7 = vpop.eup %9083  ;;  %v3928_v24 = vadd.f32 %v8998_v40, %v3922_v4 }
 0x7d7   :  { %v3901_v19 = vmul.f32 %v9082_v50, %v3900_v15  ;;  %v3907_v28 = vmul.f32 %v9084_v7, %v3885_v23  ;;  %vm3913_vm13 = vweird.f32 %v9084_v7  ;;  %4032 = vmatpush.bf16.msrb.mxu3 %v8544_v1 }
 0x7d8   :  { %vm3914_vm5 = vmor %vm3912_vm15, %vm3913_vm13 }
 0x7d9   :  { %v3905_v20 = vsel %vm3904_vm10, %v9082_v50, %v3901_v19  ;;  %v3908_v21 = vmul.f32 %v9084_v7, %v3907_v28 }
 0x7da   :  { %v3917_v22 = vmul.f32 %v3905_v20, %v3866_v56 }
 0x7db   :  { %v3909_v14 = vmul.f32 0.5, %v3908_v21 }
 0x7dc   :  { %v3923_v11 = vmul.f32 %v8997_v16, %v3917_v22 }
 0x7dd   :  { %v3910_v33 = vsub.f32 1.5, %v3909_v14 }
 0x7de   :  { %v3929_v52 = vadd.f32 %v8998_v40, %v3923_v11 }
 0x7df   :  { %v3911_v61 = vmul.f32 %v9084_v7, %v3910_v33 }
 0x7e0   :  { %v3931_v38 = vpack.c.bf16 %v3929_v52, %v3928_v24 }
 0x7e1   :  { %v3915_v36 = vsel %vm3914_vm5, %v9084_v7, %v3911_v61 }
 0x7e2   :  { %8368 = vmatmul.msk.bf16.vlgmr.msra.gmra.mxu2 %vm141_vm0, %v3931_v38  ;;  %v3918_v45 = vmul.f32 %v3915_v36, %v3867_v42 }
 0x7e4   :  { %v3924_v58 = vmul.f32 %v8997_v16, %v3918_v45 }
 0x7e6   :  { %v3930_v53 = vadd.f32 %v8998_v40, %v3924_v58 }
 0x7e8   :  { %v3932_v55 = vpack.c.bf16 %v3930_v53, %v3930_v53 }
 0x7f2   :  { %8369 = vmatmul.msk.bf16.gmra.mxu2 %vm141_vm0, %v3932_v55 }
 0x865   :  { %v3968_v9 = vpop.f32.mrf.mxu2 }
 0x866   :  { %v3969_v57 = vadd.f32 %v8999_v44, %v3968_v9 }
 0x868   :  { %v3977_v0 = vmax.f32 %v3969_v57, 0.0 }
 0x86d   :  { %v3970_v56 = vpop.f32.mrf.mxu2 }
 0x86e   :  { %v3971_v43 = vadd.f32 %v8999_v44, %v3970_v56 }
 0x870   :  { %v3978_v29 = vmax.f32 %v3971_v43, 0.0 }
 0x872   :  { %v3980_v26 = vpack.c.bf16 %v3978_v29, %v3977_v0 }
 0x874   :  { %8386 = vmatmul.msk.bf16.vlgmr.msrb.gmra.mxu3 %vm12202_vm7, %v3980_v26 }
 0x875   :  { %v3973_v42 = vpop.f32.mrf.mxu2 }
 0x876   :  { %v3974_v48 = vadd.f32 %v8999_v44, %v3973_v42  ;;  %v9002_v44 = vld [vmem:[%s12186_s17] ss:$0 sm:$0xff] }
 0x878   :  { %v3979_v51 = vmax.f32 %v3974_v48, 0.0 }
 0x87a   :  { %v3981_v62 = vpack.c.bf16 %v3979_v51, %v3979_v51 }
 0x87d   :  { %v3975_v5 = vpop.f32.mrf.mxu2 }
 0x884   :  { %8387 = vmatmul.msk.bf16.gmra.mxu3 %vm12202_vm7, %v3981_v62 }
 0x8f7   :  { %v4034_v41 = vpop.f32.mrf.mxu3 }
 0x8f8   :  { %v4035_v35 = vadd.f32 %v9000_v59, %v4034_v41 }
 0x8fa   :  { %v4043_v46 = vadd.f32 %v4035_v35, %v3928_v24 }
 0x8fc   :  { %v4048_v39 = vsel %vm141_vm0, %v4043_v46, 0.0 }
 0x8fd   :  { %4049 = vadd.xlane.f32.xlu0 %v4048_v39 }
 0x8ff   :  { %v4036_v6 = vpop.f32.mrf.mxu3 }
 0x900   :  { %v4037_v49 = vadd.f32 %v9000_v59, %v4036_v6 }
 0x902   :  { %v4044_v31 = vadd.f32 %v4037_v49, %v3929_v52 }
 0x904   :  { %v4051_v32 = vsel %vm141_vm0, %v4044_v31, 0.0 }
 0x905   :  { %4052 = vadd.xlane.f32.xlu1 %v4051_v32 }
 0x907   :  { %v4039_v27 = vpop.f32.mrf.mxu3 }
 0x908   :  { %v4040_v25 = vadd.f32 %v9000_v59, %v4039_v27 }
 0x90a   :  { %v4045_v54 = vadd.f32 %v4040_v25, %v3930_v53 }
 0x90c   :  { %v4054_v34 = vsel %vm3851_vm14, %v4045_v54, 0.0 }
 0x90d   :  { %4055 = vadd.xlane.f32.xlu2 %v4054_v34 }
 0x90f   :  { %v4041_v50 = vpop.f32.mrf.mxu3 }
 0x970   :  { %v4050_v23 = vpop.xlane.xlu0 %4049 }
 0x971   :  { %v4057_v13 = vmul.f32 %v4050_v23, %v10704_v60 }
 0x973   :  { %v4060_v12 = vsub.f32 %v4043_v46, %v4057_v13 }
 0x975   :  { %v4063_v63 = vmul.f32 %v4060_v12, %v4060_v12 }
 0x977   :  { %v4066_v30 = vsel %vm141_vm0, %v4063_v63, 0.0 }
 0x978   :  { %v4053_v3 = vpop.xlane.xlu1 %4052  ;;  %4067 = vadd.xlane.f32.xlu0 %v4066_v30 }
 0x979   :  { %v4058_v15 = vmul.f32 %v4053_v3, %v10704_v60 }
 0x97b   :  { %v10755_v7 = vsub.f32 %v4044_v31, %v4058_v15 }
 0x97d   :  { %v4064_v16 = vmul.f32 %v10755_v7, %v10755_v7 }
 0x97f   :  { %v4069_v17 = vsel %vm141_vm0, %v4064_v16, 0.0 }
 0x980   :  { %v4056_v19 = vpop.xlane.xlu2 %4055  ;;  %4070 = vadd.xlane.f32.xlu1 %v4069_v17 }
 0x981   :  { %v4059_v28 = vmul.f32 %v4056_v19, %v10704_v60 }
 0x983   :  { %v10761_v20 = vsub.f32 %v4045_v54, %v4059_v28 }
 0x985   :  { %v4065_v21 = vmul.f32 %v10761_v20, %v10761_v20 }
 0x987   :  { %v4072_v40 = vsel %vm3851_vm14, %v4065_v21, 0.0 }
 0x988   :  { %4073 = vadd.xlane.f32.xlu2 %v4072_v40  ;;  %v8551_v40 = vld [vmem:[%s12208_s20 + $0x18] sm:$0xff] }
 0x989   :  { %4312 = vmatpush.bf16.msrb.mxu1 %v8551_v40 }
 0x9eb   :  { %v4068_v4 = vpop.xlane.xlu0 %4067 }
 0x9ec   :  { %v4075_v22 = vmul.f32 %v4068_v4, %v10704_v60  ;;  %v8388_v4 = vld [vmem:[%s12210_s23 + $0x20] sm:$0xff] }
 0x9ee   :  { %v4078_v14 = vadd.f32 1e-05, %v4075_v22  ;;  %v8550_v22 = vld [vmem:[%s12208_s20 + $0x10] sm:$0xff] }
 0x9ef   :  { %4313 = vmatpush.bf16.msrb.mxu1 %v8550_v22 }
 0x9f0   :  { %9085 = vrsqrt.f32 %v4078_v14  ;;  %vm4087_vm9 = vweird.f32 %v4078_v14 }
 0x9f3   :  { %v4071_v11 = vpop.xlane.xlu1 %4070 }
 0x9f4   :  { %v4076_v33 = vmul.f32 %v4071_v11, %v10704_v60  ;;  %v4192_v11 = vrot.slane %v8388_v4, 2 }
 0x9f6   :  { %v9086_v24 = vpop.eup %9085  ;;  %v4079_v52 = vadd.f32 1e-05, %v4076_v33  ;;  %v4193_v33 = vrot.slane %v8388_v4, 3 }
 0x9f7   :  { %v4082_v61 = vmul.f32 %v9086_v24, %v4078_v14  ;;  %vm4088_vm8 = vweird.f32 %v9086_v24  ;;  %v4191_v14 = vrot.slane %v8388_v4, 1 }
 0x9f8   :  { %9087 = vrsqrt.f32 %v4079_v52  ;;  %vm4089_vm10 = vmor %vm4087_vm9, %vm4088_vm8  ;;  %vm4097_vm15 = vweird.f32 %v4079_v52 }
 0x9f9   :  { %v4083_v38 = vmul.f32 %v9086_v24, %v4082_v61  ;;  %v4194_v61 = vrot.slane %v8388_v4, 4 }
 0x9fb   :  { %v4084_v36 = vmul.f32 0.5, %v4083_v38  ;;  %v4074_v45 = vpop.xlane.xlu2 %4073  ;;  %v4195_v38 = vrot.slane %v8388_v4, 5 }
 0x9fc   :  { %v4077_v58 = vmul.f32 %v4074_v45, %v10704_v60  ;;  %v4197_v45 = vrot.slane %v8388_v4, 7 }
 0x9fd   :  { %v4085_v53 = vsub.f32 1.5, %v4084_v36  ;;  %v4196_v36 = vrot.slane %v8388_v4, 6 }
 0x9fe   :  { %v4080_v55 = vadd.f32 1e-05, %v4077_v58  ;;  %v9088_v8 = vpop.eup %9087  ;;  %v8548_v58 = vld [vmem:[%s12211_s29 + $0x10] sm:$0xff] }
 0x9ff   :  { %v4086_v47 = vmul.f32 %v9086_v24, %v4085_v53  ;;  %v4092_v1 = vmul.f32 %v9088_v8, %v4079_v52  ;;  %vm4098_vm13 = vweird.f32 %v9088_v8  ;;  %v8549_v52 = vld [vmem:[%s12211_s29 + $0x18] sm:$0xff]  ;;  %v10811_v53 = vld [vmem:[%s12210_s23 + $0x30] sm:$0xff]  ;;  %s12237_s29 = smov 8  }
 0xa00   :  { %9089 = vrsqrt.f32 %v4080_v55  ;;  %vm4099_vm5 = vmor %vm4097_vm15, %vm4098_vm13  ;;  %vm4107_vm9 = vweird.f32 %v4080_v55  ;;  %4272 = vmatpush.bf16.msra.mxu0 %v8549_v52  ;;  %vm12201_vm13 = vcmask 253952  }
 0xa01   :  { %v4090_v9 = vsel %vm4089_vm10, %v9086_v24, %v4086_v47  ;;  %v4093_v56 = vmul.f32 %v9088_v8, %v4092_v1  ;;  %v4199_v47 = vrot.slane %v10811_v53, 2  ;;  %v4200_v1 = vrot.slane %v10811_v53, 3 }
 0xa02   :  { %v4111_v57 = vmul.f32 %v4090_v9, %v4060_v12  ;;  %v4201_v9 = vrot.slane %v10811_v53, 4 }
 0xa03   :  { %v4094_v0 = vmul.f32 0.5, %v4093_v56  ;;  %v12200_v56 = vrot.slane %v10811_v53, 7 }
 0xa04   :  { %v4117_v43 = vmul.f32 %v9001_v18, %v4111_v57  ;;  %4273 = vmatpush.bf16.msra.mxu0 %v8548_v58  ;;  %v4203_v57 = vrot.slane %v10811_v53, 6 }
 0xa05   :  { %v4095_v26 = vsub.f32 1.5, %v4094_v0 }
 0xa06   :  { %v4123_v29 = vadd.f32 %v9002_v44, %v4117_v43  ;;  %v9090_v42 = vpop.eup %9089  ;;  %v10842_v43 = vld [vmem:[%s12210_s23 + $0x38] sm:$0x1] }
 0xa07   :  { %v4096_v59 = vmul.f32 %v9088_v8, %v4095_v26  ;;  %v4102_v39 = vmul.f32 %v9090_v42, %v4080_v55  ;;  %vm4108_vm8 = vweird.f32 %v9090_v42  ;;  %v10816_v55 = vld [vmem:[%s12210_s23 + $0x28] sm:$0x1] }
 0xa08   :  { %v4129_v48 = vrot.slane %v4123_v29, 1  ;;  %v4130_v5 = vrot.slane %v4123_v29, 2  ;;  %v4131_v51 = vrot.slane %v4123_v29, 3  ;;  %4144 = vst [vmem:[#allocation1] ss:$9 sm:$0xff] %v4123_v29  ;;  %v4132_v62 = vrot.slane %v4123_v29, 4  ;;  %vm4109_vm10 = vmor %vm4107_vm9, %vm4108_vm8 }
 0xa09   :  { %v4133_v41 = vrot.slane %v4123_v29, 5  ;;  %v4134_v35 = vrot.slane %v4123_v29, 6  ;;  %v4100_v46 = vsel %vm4099_vm5, %v9088_v8, %v4096_v59  ;;  %v4135_v6 = vrot.slane %v4123_v29, 7 }
 0xa0a   :  { %4146 = vst [vmem:[#allocation1 + $0x1] ss:$9 sm:$0xff] %v4129_v48  ;;  %v4103_v49 = vmul.f32 %v9090_v42, %v4102_v39  ;;  %v4112_v31 = vmul.f32 %v4100_v46, %v10755_v7  ;;  %v4198_v8 = vrot.slane %v10811_v53, 1  ;;  %v9004_v46 = vld [vmem:[%s12174_s3 + $0x1] ss:$0 sm:$0xff] }
 0xa0b   :  { %4148 = vst [vmem:[#allocation1 + $0x2] ss:$9 sm:$0xff] %v4130_v5 }
 0xa0c   :  { %4150 = vst [vmem:[#allocation1 + $0x3] ss:$9 sm:$0xff] %v4131_v51  ;;  %v4104_v32 = vmul.f32 0.5, %v4103_v49  ;;  %v4118_v27 = vmul.f32 %v9001_v18, %v4112_v31  ;;  %v9003_v51 = vld [vmem:[%s12172_s5 + $0x1] ss:$0 sm:$0xff] }
 0xa0d   :  { %4152 = vst [vmem:[#allocation1 + $0x4] ss:$9 sm:$0xff] %v4132_v62 }
 0xa0e   :  { %4154 = vst [vmem:[#allocation1 + $0x5] ss:$9 sm:$0xff] %v4133_v41  ;;  %v4105_v25 = vsub.f32 1.5, %v4104_v32  ;;  %v4124_v54 = vadd.f32 %v9002_v44, %v4118_v27 }
 0xa0f   :  { %4156 = vst [vmem:[#allocation1 + $0x6] ss:$9 sm:$0xff] %v4134_v35 }
 0xa10   :  { %4158 = vst [vmem:[#allocation1 + $0x7] ss:$9 sm:$0xff] %v4135_v6  ;;  %v4106_v34 = vmul.f32 %v9090_v42, %v4105_v25  ;;  %v4136_v12 = vrot.slane %v4124_v54, 1  ;;  %v4137_v63 = vrot.slane %v4124_v54, 2  ;;  %v4138_v3 = vrot.slane %v4124_v54, 3 }
 0xa11   :  { %v4139_v15 = vrot.slane %v4124_v54, 4  ;;  %v4140_v16 = vrot.slane %v4124_v54, 5  ;;  %v4141_v17 = vrot.slane %v4124_v54, 6  ;;  %v4142_v19 = vrot.slane %v4124_v54, 7 }
 0xa12   :  { %v4110_v23 = vsel %vm4109_vm10, %v9090_v42, %v4106_v34 }
 0xa13   :  { %v4113_v13 = vmul.f32 %v4110_v23, %v10761_v20 }
 0xa15   :  { %v4119_v7 = vmul.f32 %v9001_v18, %v4113_v13 }
 0xa17   :  { %v4159_v50 = vld [vmem:[#allocation1] sm:$0xff]  ;;  %v4125_v28 = vadd.f32 %v9002_v44, %v4119_v7  ;;  %v4202_v44 = vrot.slane %v10811_v53, 5 }
 0xa18   :  { %4160 = vst [vmem:[#allocation1] ss:$9 sm:$0xff] %v4124_v54 }
 0xa19   :  { %4177 = vst.msk [vmem:[%s12187_s18] sm:$0xff] %vm141_vm0, %v4159_v50  ;;  %v4143_v21 = vrot.slane %v4125_v28, 1 }
 0xa1f   :  { %v4161_v30 = vld [vmem:[#allocation1] sm:$0xff] }
 0xa20   :  { %4162 = vst [vmem:[#allocation1] ss:$9 sm:$0xff] %v4136_v12 }
 0xa21   :  { %4163 = vst [vmem:[#allocation1 + $0x1] ss:$9 sm:$0xff] %v4137_v63 }
 0xa22   :  { %4164 = vst [vmem:[#allocation1 + $0x2] ss:$9 sm:$0xff] %v4138_v3 }
 0xa23   :  { %4165 = vst [vmem:[#allocation1 + $0x3] ss:$9 sm:$0xff] %v4139_v15 }
 0xa24   :  { %4166 = vst [vmem:[#allocation1 + $0x4] ss:$9 sm:$0xff] %v4140_v16 }
 0xa25   :  { %4167 = vst [vmem:[#allocation1 + $0x5] ss:$9 sm:$0xff] %v4141_v17 }
 0xa26   :  { %4168 = vst [vmem:[#allocation1 + $0x6] ss:$9 sm:$0xff] %v4142_v19 }
 0xa27   :  { %4169 = vst [vmem:[#allocation1 + $0x7] ss:$9 sm:$0xff] %v4125_v28 }
 0xa28   :  { %4179 = vst.msk [vmem:[%s12187_s18 + $0x8] sm:$0x1] %vm12201_vm13, %v4161_v30 }
 0xa2e   :  { %v4170_v20 = vld [vmem:[#allocation1] sm:$0xff] }
 0xa2f   :  { %4171 = vst [vmem:[#allocation1] ss:$9 sm:$0xff] %v4143_v21 }
 0xa30   :  { %4180 = vst.msk [vmem:[%s12187_s18 + $0x10] sm:$0xff] %vm141_vm0, %v4170_v20 }
 0xa36   :  { %v4172_v24 = vld [vmem:[#allocation1] sm:$0xff] }
 0xa37   :  { %4205 = vst [vmem:[#allocation1] ss:$9 sm:$0xff] %v8388_v4 }
 0xa38   :  { %4207 = vst [vmem:[#allocation1 + $0x1] ss:$9 sm:$0xff] %v4191_v14 }
 0xa39   :  { %4209 = vst [vmem:[#allocation1 + $0x2] ss:$9 sm:$0xff] %v4192_v11 }
 0xa3a   :  { %4211 = vst [vmem:[#allocation1 + $0x3] ss:$9 sm:$0xff] %v4193_v33 }
 0xa3b   :  { %4213 = vst [vmem:[#allocation1 + $0x4] ss:$9 sm:$0xff] %v4194_v61 }
 0xa3c   :  { %4215 = vst [vmem:[#allocation1 + $0x5] ss:$9 sm:$0xff] %v4195_v38 }
 0xa3d   :  { %4217 = vst [vmem:[#allocation1 + $0x6] ss:$9 sm:$0xff] %v4196_v36 }
 0xa3e   :  { %4219 = vst [vmem:[#allocation1 + $0x7] ss:$9 sm:$0xff] %v4197_v45 }
 0xa3f   :  { %4181 = vst.msk [vmem:[%s12187_s18 + $0x18] sm:$0x1] %vm12201_vm13, %v4172_v24 }
 0xa45   :  { %v4220_v18 = vld [vmem:[#allocation1] sm:$0xff] }
 0xa46   :  { %4221 = vst [vmem:[#allocation1] ss:$9 sm:$0xff] %v10816_v55 }
 0xa47   :  { %4222 = vst [vmem:[#allocation1 + $0x1] ss:$9 sm:$0xff] %v10811_v53 }
 0xa48   :  { %4223 = vst [vmem:[#allocation1 + $0x2] ss:$9 sm:$0xff] %v4198_v8 }
 0xa49   :  { %4224 = vst [vmem:[#allocation1 + $0x3] ss:$9 sm:$0xff] %v4199_v47 }
 0xa4a   :  { %4225 = vst [vmem:[#allocation1 + $0x4] ss:$9 sm:$0xff] %v4200_v1 }
 0xa4b   :  { %4226 = vst [vmem:[#allocation1 + $0x5] ss:$9 sm:$0xff] %v4201_v9 }
 0xa4c   :  { %4227 = vst [vmem:[#allocation1 + $0x6] ss:$9 sm:$0xff] %v4202_v44 }
 0xa4d   :  { %4228 = vst [vmem:[#allocation1 + $0x7] ss:$9 sm:$0xff] %v4203_v57 }
 0xa54   :  { %v4229_v0 = vld [vmem:[#allocation1] sm:$0xff] }
 0xa55   :  { %4230 = vst [vmem:[#allocation1] ss:$9 sm:$0xff] %v12200_v56  ;;  %v10846_v29 = vpack.c.bf16 %v4229_v0, %v4220_v18 }
 0xa56   :  { %4231 = vst [vmem:[#allocation1 + $0x1] ss:$9 sm:$0xff] %v10842_v43 }
 0xa57   :  { %8420 = vmatmul.msk.bf16.vlgmr.msrb.gmra.mxu1 %vm141_vm0, %v10846_v29  ;;  %8405 = vmatmul.msk.bf16.vlgmr.msra.gmra.mxu0 %vm141_vm0, %v10846_v29 }
 0xa5d   :  { %v4232_v26 = vld [vmem:[#allocation1] sm:$0xff] }
 0xa5e   :  { %7938 = vst [vmem:[#allocation1 + $0x7] ss:$9 sm:$0xff] %v4197_v45  ;;  %v10853_v42 = vpack.c.bf16 %v4232_v26, %v4232_v26 }
 0xa5f   :  { %7924 = vst [vmem:[#allocation1] ss:$9 sm:$0xff] %v8388_v4 }
 0xa60   :  { %7926 = vst [vmem:[#allocation1 + $0x1] ss:$9 sm:$0xff] %v4191_v14 }
 0xa61   :  { %7928 = vst [vmem:[#allocation1 + $0x2] ss:$9 sm:$0xff] %v4192_v11 }
 0xa62   :  { %7930 = vst [vmem:[#allocation1 + $0x3] ss:$9 sm:$0xff] %v4193_v33 }
 0xa63   :  { %7932 = vst [vmem:[#allocation1 + $0x4] ss:$9 sm:$0xff] %v4194_v61 }
 0xa64   :  { %7934 = vst [vmem:[#allocation1 + $0x5] ss:$9 sm:$0xff] %v4195_v38 }
 0xa65   :  { %7936 = vst [vmem:[#allocation1 + $0x6] ss:$9 sm:$0xff] %v4196_v36 }
 0xa67   :  { %8421 = vmatmul.msk.bf16.gmra.mxu1 %vm141_vm0, %v10853_v42  ;;  %8406 = vmatmul.msk.bf16.gmra.mxu0 %vm141_vm0, %v10853_v42 }
 0xad4   :  { %v4315_v48 = vpop.f32.mrf.mxu1  ;;  %v4275_v5 = vpop.f32.mrf.mxu0 }
 0xad5   :  { %v4316_v41 = vadd.f32 %v9003_v51, %v4315_v48  ;;  %v10868_v6 = vadd.f32 %v9004_v46, %v4275_v5 }
 0xad7   :  { %v4718_v15 = vrot.slane %v4316_v41, 4  ;;  %v4396_v45 = vrot.slane %v10868_v6, 4 }
 0xadc   :  { %v4317_v62 = vpop.f32.mrf.mxu1  ;;  %v4277_v59 = vpop.f32.mrf.mxu0 }
 0xadd   :  { %v4318_v35 = vadd.f32 %v9003_v51, %v4317_v62  ;;  %v10872_v27 = vadd.f32 %v9004_v46, %v4277_v59 }
 0xadf   :  { %v8793_v39 = vpack.i.bf16 %v4318_v35, %v4316_v41  ;;  %v4774_v16 = vrot.slane %v4318_v35, 4  ;;  %v4452_v58 = vrot.slane %v10872_v27, 4 }
 0xae1   :  { %8794 = vrot.lane.b32.xlu2 %v8793_v39, %s9173_s6  ;;  %8789 = vrot.lane.b32.xlu1 %v8793_v39, %s9172_s21 }
 0xae2   :  { %8784 = vrot.lane.b32.xlu0 %v8793_v39, %s9174_s22 }
 0xae4   :  { %v4320_v49 = vpop.f32.mrf.mxu1  ;;  %v4280_v31 = vpop.f32.mrf.mxu0 }
 0xae5   :  { %v10870_v32 = vadd.f32 %v9003_v51, %v4320_v49  ;;  %v10874_v25 = vadd.f32 %v9004_v46, %v4280_v31 }
 0xae7   :  { %v8803_v54 = vpack.i.bf16 %v10868_v6, %v10870_v32  ;;  %v8813_v34 = vpack.i.bf16 %v10874_v25, %v10872_v27 }
 0xae9   :  { %8804 = vrot.lane.b32.xlu1 %v8803_v54, %s9172_s21  ;;  %8814 = vrot.lane.b32.xlu2 %v8813_v34, %s9174_s22 }
 0xaea   :  { %8799 = vrot.lane.b32.xlu0 %v8803_v54, %s9174_s22 }
 0xaec   :  { %v4322_v50 = vpop.f32.mrf.mxu1  ;;  %v4282_v23 = vpop.f32.mrf.mxu0 }
 0xaf1   :  { %8824 = vrot.lane.b32.xlu1 %v8813_v34, %s9173_s6 }
 0xaf2   :  { %8809 = vrot.lane.b32.xlu0 %v8803_v54, %s9173_s6 }
 0xafa   :  { %8819 = vrot.lane.b32.xlu0 %v8813_v34, %s9172_s21 }
 0xb3b   :  { %v8795_v13 = vpop.permute.xlu2 %8794 }
 0xb3c   :  { %v8796_v12 = vunpack.i.l.bf16 %v8795_v13  ;;  %v8797_v63 = vunpack.i.h.bf16 %v8795_v13 }
 0xb3e   :  { %v4716_v30 = vrot.slane %v8796_v12, 4  ;;  %v4772_v3 = vrot.slane %v8797_v63, 4  ;;  %v4775_v4 = vsel %vm273_vm1, %v8797_v63, %v4774_v16  ;;  %v4719_v22 = vsel %vm273_vm1, %v8796_v12, %v4718_v15 }
 0xb3f   :  { %v10898_v0 = vperm.slane %v4775_v4, %v9418_v10  ;;  %v4727_v62 = vperm.slane %v4719_v22, %v9418_v10 }
 0xb40   :  { %v4717_v17 = vsel %vm273_vm1, %v4716_v30, %v4316_v41  ;;  %v4773_v33 = vsel %vm273_vm1, %v4772_v3, %v4318_v35 }
 0xb41   :  { %v4723_v24 = vperm.slane %v4717_v17, %v9418_v10  ;;  %v10906_v51 = vperm.slane %v4773_v33, %v9418_v10 }
 0xb43   :  { %v10895_v18 = vpop.permute.xlu2 %8814  ;;  %v4742_v35 = vrot.slane %v4723_v24, 4 }
 0xb44   :  { %v8817_v31 = vunpack.i.h.bf16 %v10895_v18  ;;  %v8816_v13 = vunpack.i.l.bf16 %v10895_v18 }
 0xb53   :  { %v8790_v7 = vpop.permute.xlu1 %8789 }
 0xb54   :  { %v8792_v19 = vunpack.i.h.bf16 %v8790_v7  ;;  %v8791_v28 = vunpack.i.l.bf16 %v8790_v7  ;;  %v8785_v21 = vpop.permute.xlu0 %8784 }
 0xb55   :  { %v8787_v20 = vunpack.i.h.bf16 %v8785_v21  ;;  %v8786_v40 = vunpack.i.l.bf16 %v8785_v21 }
 0xb56   :  { %v4786_v14 = vrot.slane %v8792_v19, 4  ;;  %v4730_v11 = vrot.slane %v8791_v28, 4 }
 0xb57   :  { %v4784_v52 = vrot.slane %v8787_v20, 4  ;;  %v4728_v61 = vrot.slane %v8786_v40, 4 }
 0xb58   :  { %v4787_v38 = vsel %vm273_vm1, %v8787_v20, %v4786_v14  ;;  %v4731_v36 = vsel %vm273_vm1, %v8786_v40, %v4730_v11  ;;  %v4754_v11 = vrot.slane %v4727_v62, 4 }
 0xb59   :  { %v4785_v26 = vsel %vm273_vm1, %v4784_v52, %v8792_v19  ;;  %v4729_v48 = vsel %vm273_vm1, %v4728_v61, %v8791_v28  ;;  %v10903_v5 = vperm.slane %v4731_v36, %v9418_v10  ;;  %v10914_v46 = vperm.slane %v4787_v38, %v9418_v10 }
 0xb5a   :  { %v10910_v59 = vperm.slane %v4785_v26, %v9418_v10  ;;  %v4735_v41 = vperm.slane %v4729_v48, %v9418_v10  ;;  %v4810_v26 = vrot.slane %v10898_v0, 4  ;;  %v4798_v48 = vrot.slane %v10906_v51, 4 }
 0xb5b   :  { %v4752_v39 = vrot.slane %v10903_v5, 4  ;;  %v8805_v49 = vpop.permute.xlu1 %8804  ;;  %v4808_v20 = vrot.slane %v10914_v46, 4 }
 0xb5c   :  { %v4796_v54 = vrot.slane %v10910_v59, 4  ;;  %v4740_v34 = vrot.slane %v4735_v41, 4  ;;  %v8807_v50 = vunpack.i.h.bf16 %v8805_v49  ;;  %v8800_v23 = vpop.permute.xlu0 %8799  ;;  %v4743_v30 = vsel %vm273_vm1, %v4735_v41, %v4742_v35 }
 0xb5d   :  { %v8802_v12 = vunpack.i.h.bf16 %v8800_v23  ;;  %v8801_v63 = vunpack.i.l.bf16 %v8800_v23  ;;  %v4753_v3 = vsel %vm273_vm1, %v4752_v39, %v4727_v62  ;;  %v4751_v7 = vperm.slane %v4743_v30, %v9430_v37 }
 0xb5e   :  { %v4408_v15 = vrot.slane %v8807_v50, 4  ;;  %v10924_v16 = vperm.slane %v4753_v3, %v9430_v37  ;;  %v4797_v17 = vsel %vm273_vm1, %v4796_v54, %v10906_v51  ;;  %v4741_v21 = vsel %vm273_vm1, %v4740_v34, %v4723_v24 }
 0xb5f   :  { %v4406_v19 = vrot.slane %v8802_v12, 4  ;;  %v4803_v28 = vperm.slane %v4797_v17, %v9430_v37  ;;  %v4766_v22 = vrot.slane %v4751_v7, 4  ;;  %v4747_v14 = vperm.slane %v4741_v21, %v9430_v37 }
 0xb60   :  { %v4409_v40 = vsel %vm273_vm1, %v8802_v12, %v4408_v15  ;;  %v8828_v4 = vpack.i.bf16 %v10924_v16, %v4751_v7  ;;  %v8806_v33 = vunpack.i.l.bf16 %v8805_v49  ;;  %v4834_v61 = vrot.slane %v8801_v63, 4 }
 0xb61   :  { %v4407_v52 = vsel %vm273_vm1, %v4406_v19, %v8807_v50  ;;  %v4417_v38 = vperm.slane %v4409_v40, %v9418_v10  ;;  %v4767_v36 = vsel %vm273_vm1, 0.0, %v4766_v22  ;;  %v4764_v24 = vrot.slane %v4747_v14, 4 }
 0xb62   :  { %8829 = vxpose.xlu1.b32.start.end [1/1] (short) (narrow) %v8828_v4, 8  ;;  %v8849_v35 = vpack.i.bf16 %v4767_v36, %v4803_v28  ;;  %v4809_v39 = vsel %vm273_vm1, %v4808_v20, %v10898_v0  ;;  %v4820_v62 = vrot.slane %v4803_v28, 4  ;;  %v4413_v49 = vperm.slane %v4407_v52, %v9418_v10 }
 0xb63   :  { %v8825_v41 = vpop.permute.xlu1 %8824  ;;  %v10944_v50 = vrot.slane %v8817_v31, 4  ;;  %v4462_v23 = vrot.slane %v8816_v13, 4  ;;  %v10949_v12 = vsel %vm273_vm1, %v4834_v61, %v8806_v33  ;;  %v4765_v63 = vsel %vm273_vm1, 0.0, %v4764_v24 }
 0xb64   :  { %v10942_v54 = vpop.permute.xlu0 %8809  ;;  %v8826_v34 = vunpack.i.l.bf16 %v8825_v41  ;;  %8850 = vxpose.xlu0.b32.start.end [1/1] (short) (narrow) %v8849_v35, 8  ;;  %v4821_v0 = vsel %vm273_vm1, 0.0, %v4820_v62  ;;  %v4430_v30 = vrot.slane %v4417_v38, 4  ;;  %v8835_v15 = vpack.i.bf16 %v4765_v63, %v4747_v14 }
 0xb65   :  { %v8812_v51 = vunpack.i.h.bf16 %v10942_v54  ;;  %v10955_v7 = vperm.slane %v4809_v39, %v9430_v37  ;;  %v8827_v19 = vunpack.i.h.bf16 %v8825_v41  ;;  %v4755_v28 = vsel %vm273_vm1, %v10903_v5, %v4754_v11 }
 0xb66   :  { %v4450_v3 = vrot.slane %v8826_v34, 4  ;;  %v4418_v21 = vrot.slane %v4413_v49, 4  ;;  %8836 = vxpose.xlu2.b32.start.end [1/1] (short) (narrow) %v8835_v15, 8  ;;  %v4839_v22 = vperm.slane %v10949_v12, %v9418_v10  ;;  %v10973_v5 = vsel %vm273_vm1, %v10914_v46, %v4810_v26 }
 0xb67   :  { %v4394_v31 = vrot.slane %v8812_v51, 4  ;;  %v4397_v17 = vsel %vm273_vm1, %v8812_v51, %v4396_v45  ;;  %v8870_v4 = vpack.i.bf16 %v10955_v7, %v4821_v0  ;;  %v8811_v45 = vunpack.i.l.bf16 %v10942_v54 }
 0xb68   :  { %v4405_v20 = vperm.slane %v4397_v17, %v9418_v10  ;;  %v4451_v40 = vsel %vm273_vm1, %v4450_v3, %v10872_v27  ;;  %v4453_v61 = vsel %vm273_vm1, %v8826_v34, %v4452_v58  ;;  %v4506_v24 = vrot.slane %v8827_v19, 4 }
 0xb69   :  { %v4395_v14 = vsel %vm273_vm1, %v4394_v31, %v10868_v6  ;;  %v4457_v6 = vperm.slane %v4451_v40, %v9418_v10  ;;  %v10983_v41 = vperm.slane %v4755_v28, %v9430_v37  ;;  %v4799_v39 = vsel %vm273_vm1, %v10910_v59, %v4798_v48 }
 0xb6a   :  { %v4401_v11 = vperm.slane %v4395_v14, %v9418_v10  ;;  %v4432_v33 = vrot.slane %v4405_v20, 4  ;;  %v4431_v52 = vsel %vm273_vm1, %v4430_v30, %v4405_v20  ;;  %8871 = vxpose.xlu1.b32.start.end [1/1] (short) (narrow) %v8870_v4, 8  ;;  %v4461_v54 = vperm.slane %v4453_v61, %v9418_v10 }
 0xb6b   :  { %v4437_v36 = vperm.slane %v4431_v52, %v9430_v37  ;;  %v4770_v34 = vrot.slane %v10983_v41, 4  ;;  %v10995_v0 = vperm.slane %v4799_v39, %v9430_v37  ;;  %v4476_v59 = vrot.slane %v4457_v6, 4 }
 0xb6c   :  { %v4420_v46 = vrot.slane %v4401_v11, 4  ;;  %v4419_v26 = vsel %vm273_vm1, %v4418_v21, %v4401_v11  ;;  %v4433_v35 = vsel %vm273_vm1, %v4417_v38, %v4432_v33  ;;  %v8820_v27 = vpop.permute.xlu0 %8819  ;;  %v4824_v12 = vrot.slane %v10955_v7, 4 }
 0xb6d   :  { %v4425_v58 = vperm.slane %v4419_v26, %v9430_v37  ;;  %v4441_v62 = vperm.slane %v4433_v35, %v9430_v37  ;;  %v4446_v63 = vrot.slane %v4437_v36, 4  ;;  %v8821_v30 = vunpack.i.l.bf16 %v8820_v27 }
 0xb6e   :  { %v4421_v51 = vsel %vm273_vm1, %v4413_v49, %v4420_v46  ;;  %v8822_v48 = vunpack.i.h.bf16 %v8820_v27  ;;  %v4771_v15 = vsel %vm273_vm1, 0.0, %v4770_v34  ;;  %v4822_v31 = vrot.slane %v10995_v0, 4 }
 0xb6f   :  { %v4429_v38 = vperm.slane %v4421_v51, %v9430_v37  ;;  %v4448_v3 = vrot.slane %v4441_v62, 4  ;;  %v4463_v17 = vsel %vm273_vm1, %v4462_v23, %v8821_v30  ;;  %v4464_v19 = vrot.slane %v8821_v30, 4 }
 0xb70   :  { %v4442_v28 = vrot.slane %v4425_v58, 4  ;;  %v4447_v40 = vsel %vm273_vm1, 0.0, %v4446_v63  ;;  %v4823_v14 = vsel %vm273_vm1, 0.0, %v4822_v31  ;;  %v4469_v61 = vperm.slane %v4463_v17, %v9418_v10 }
 0xb71   :  { %v4444_v21 = vrot.slane %v4429_v38, 4  ;;  %v4449_v49 = vsel %vm273_vm1, 0.0, %v4448_v3  ;;  %v4535_v20 = vsel %vm273_vm1, %v4448_v3, %v4437_v36  ;;  %v4465_v11 = vsel %vm273_vm1, %v8816_v13, %v4464_v19 }
 0xb72   :  { %v4540_v4 = vrot.slane %v4449_v49, 4  ;;  %v8863_v52 = vpack.i.bf16 %v4823_v14, %v4771_v15  ;;  %v4828_v36 = vrot.slane %v8811_v45, 4  ;;  %v4507_v35 = vsel %vm273_vm1, %v4506_v24, %v10874_v25  ;;  %v8553_v25 = vld [vmem:[%s12209_s13 + $0x18] sm:$0xff] }
 0xb73   :  { %v4445_v33 = vsel %vm273_vm1, 0.0, %v4444_v21  ;;  %v4524_v23 = vsel %vm273_vm1, %v4444_v21, %v4425_v58  ;;  %v4443_v39 = vsel %vm273_vm1, 0.0, %v4442_v28  ;;  %v4473_v18 = vperm.slane %v4465_v11, %v9418_v10  ;;  %4352 = vmatpush.bf16.msrb.mxu2 %v8553_v25 }
 0xb74   :  { %v4529_v46 = vrot.slane %v4445_v33, 4  ;;  %v4541_v26 = vsel %vm273_vm1, %v4540_v4, %v4447_v40  ;;  %8864 = vxpose.xlu0.b32.start.end [1/1] (short) (narrow) %v8863_v52, 8  ;;  %v4474_v13 = vrot.slane %v4469_v61, 4  ;;  %v4477_v27 = vsel %vm273_vm1, %v4469_v61, %v4476_v59 }
 0xb75   :  { %v4488_v62 = vrot.slane %v4461_v54, 4  ;;  %v4485_v34 = vperm.slane %v4477_v27, %v9430_v37  ;;  %v4513_v51 = vsel %vm273_vm1, %v10944_v50, %v8822_v48  ;;  %v4511_v24 = vperm.slane %v4507_v35, %v9418_v10  ;;  %v8552_v50 = vld [vmem:[%s12209_s13 + $0x10] sm:$0xff] }
 0xb76   :  { %v4530_v58 = vsel %vm273_vm1, %v4529_v46, %v4443_v39  ;;  %v4475_v63 = vsel %vm273_vm1, %v4474_v13, %v4457_v6  ;;  %v4486_v30 = vrot.slane %v4473_v18, 4  ;;  %v4517_v15 = vperm.slane %v4513_v51, %v9418_v10 }
 0xb77   :  { %v4534_v45 = vperm.slane %v4530_v58, %v9418_v10  ;;  %v11028_v38 = vperm.slane %v4475_v63, %v9430_v37  ;;  %v4489_v3 = vsel %vm273_vm1, %v4473_v18, %v4488_v62  ;;  %v4500_v59 = vrot.slane %v4485_v34, 4  ;;  %4353 = vmatpush.bf16.msrb.mxu2 %v8552_v50 }
 0xb78   :  { %v4545_v48 = vperm.slane %v4541_v26, %v9418_v10  ;;  %v4487_v31 = vsel %vm273_vm1, %v4486_v30, %v4461_v54  ;;  %v4497_v6 = vperm.slane %v4489_v3, %v9430_v37  ;;  %v4768_v17 = vrot.slane %v10924_v16, 4 }
 0xb79   :  { %v4493_v19 = vperm.slane %v4487_v31, %v9430_v37  ;;  %v4498_v28 = vrot.slane %v11028_v38, 4  ;;  %v4501_v21 = vsel %vm273_vm1, 0.0, %v4500_v59  ;;  %v4518_v49 = vrot.slane %v4517_v15, 4 }
 0xb7a   :  { %v4546_v40 = vrot.slane %v4534_v45, 4  ;;  %v4504_v4 = vrot.slane %v4497_v6, 4  ;;  %v4596_v14 = vrot.slane %v4501_v21, 4  ;;  %v4769_v11 = vsel %vm273_vm1, 0.0, %v4768_v17  ;;  %8435 = vmatmul.msk.bf16.vlgmr.msrb.gmra.mxu2 %vm141_vm0, %v10846_v29 }
 0xb7b   :  { %v4499_v33 = vsel %vm273_vm1, 0.0, %v4498_v28  ;;  %v4502_v52 = vrot.slane %v4493_v19, 4  ;;  %v4519_v54 = vsel %vm273_vm1, %v4518_v49, %v4511_v24  ;;  %v8842_v61 = vpack.i.bf16 %v10983_v41, %v4769_v11 }
 0xb7c   :  { %v4829_v16 = vsel %vm273_vm1, %v4828_v36, %v10870_v32  ;;  %v4505_v46 = vsel %vm273_vm1, 0.0, %v4504_v4  ;;  %v4523_v26 = vperm.slane %v4519_v54, %v9430_v37  ;;  %v4597_v35 = vsel %vm273_vm1, %v4596_v14, %v4499_v33 }
 0xb7d   :  { %v4528_v39 = vperm.slane %v4524_v23, %v9418_v10  ;;  %v4503_v18 = vsel %vm273_vm1, 0.0, %v4502_v52  ;;  %v4602_v13 = vsel %vm273_vm1, %v4502_v52, %v4485_v34  ;;  %v4607_v27 = vrot.slane %v4505_v46, 4  ;;  %8843 = vxpose.xlu2.b32.start.end [1/1] (short) (narrow) %v8842_v61, 8 }
 0xb7e   :  { %v4539_v41 = vperm.slane %v4535_v20, %v9418_v10  ;;  %v11055_v58 = vrot.slane %v4523_v26, 4  ;;  %v4558_v32 = vrot.slane %v4545_v48, 4  ;;  %v4819_v62 = vperm.slane %v10973_v5, %v9430_v37 }
 0xb7f   :  { %v4608_v36 = vsel %vm273_vm1, %v4607_v27, %v4503_v18  ;;  %v4547_v23 = vsel %vm273_vm1, %v4546_v40, %v4528_v39  ;;  %v4840_v34 = vrot.slane %v4839_v22, 4  ;;  %v4833_v51 = vperm.slane %v4829_v16, %v9418_v10 }
 0xb80   :  { %v4614_v20 = vsel %vm273_vm1, %v11055_v58, %v4497_v6  ;;  %v4548_v25 = vrot.slane %v4528_v39, 4  ;;  %v4606_v29 = vperm.slane %v4602_v13, %v9418_v10  ;;  %v4553_v63 = vperm.slane %v4547_v23, %v9430_v37 }
 0xb81   :  { %v4618_v24 = vperm.slane %v4614_v20, %v9418_v10  ;;  %v4560_v30 = vrot.slane %v4539_v41, 4  ;;  %v8856_v5 = vpack.i.bf16 %v4819_v62, %v10995_v0  ;;  %v4559_v3 = vsel %vm273_vm1, %v4558_v32, %v4539_v41 }
 0xb82   :  { %v4841_v22 = vsel %vm273_vm1, %v4840_v34, %v4833_v51  ;;  %v4565_v59 = vperm.slane %v4559_v3, %v9430_v37  ;;  %v4572_v15 = vrot.slane %v4553_v63, 4  ;;  %v4612_v50 = vperm.slane %v4608_v36, %v9418_v10 }
 0xb83   :  { %v4619_v31 = vrot.slane %v4606_v29, 4  ;;  %v4826_v6 = vrot.slane %v4819_v62, 4  ;;  %v4549_v17 = vsel %vm273_vm1, %v4534_v45, %v4548_v25  ;;  %v4631_v19 = vrot.slane %v4618_v24, 4 }
 0xb84   :  { %v4570_v28 = vrot.slane %v4565_v59, 4  ;;  %v11080_v0 = vsel %vm273_vm1, %v4565_v59, %v4572_v15  ;;  %v4557_v21 = vperm.slane %v4549_v17, %v9430_v37  ;;  %v4601_v7 = vperm.slane %v4597_v35, %v9418_v10 }
 0xb85   :  { %8857 = vxpose.xlu2.b32.start.end [1/1] (short) (narrow) %v8856_v5, 8  ;;  %v4825_v49 = vsel %vm273_vm1, 0.0, %v4824_v12  ;;  %v4845_v40 = vperm.slane %v4841_v22, %v9430_v37  ;;  %v4561_v14 = vsel %vm273_vm1, %v4545_v48, %v4560_v30  ;;  %v4827_v11 = vsel %vm273_vm1, 0.0, %v4826_v6 }
 0xb86   :  { %v11087_v4 = vsel %vm273_vm1, %v4570_v28, %v4553_v63  ;;  %v4569_v45 = vperm.slane %v4561_v14, %v9430_v37  ;;  %v4576_v33 = vrot.slane %v4557_v21, 4  ;;  %v4620_v52 = vsel %vm273_vm1, %v4619_v31, %v4601_v7 }
 0xb87   :  { %v4632_v54 = vsel %vm273_vm1, %v4631_v19, %v4612_v50  ;;  %v4621_v61 = vrot.slane %v4601_v7, 4  ;;  %v4633_v16 = vrot.slane %v4612_v50, 4  ;;  %v8877_v46 = vpack.i.bf16 %v4827_v11, %v4825_v49 }
 0xb88   :  { %v4574_v26 = vrot.slane %v4569_v45, 4  ;;  %v4846_v35 = vrot.slane %v4845_v40, 4  ;;  %v11095_v39 = vsel %vm273_vm1, %v4569_v45, %v4576_v33  ;;  %v4626_v18 = vperm.slane %v4620_v52, %v9430_v37 }
 0xb89   :  { %v4638_v13 = vperm.slane %v4632_v54, %v9430_v37  ;;  %v4622_v41 = vsel %vm273_vm1, %v4606_v29, %v4621_v61  ;;  %v4634_v32 = vsel %vm273_vm1, %v4618_v24, %v4633_v16 }
 0xb8a   :  { %v11099_v48 = vsel %vm273_vm1, %v4574_v26, %v4557_v21  ;;  %8436 = vmatmul.msk.bf16.gmra.mxu2 %vm141_vm0, %v10853_v42  ;;  %v4645_v27 = vrot.slane %v4626_v18, 4  ;;  %v4847_v36 = vsel %vm273_vm1, 0.0, %v4846_v35  ;;  %v4630_v23 = vperm.slane %v4622_v41, %v9430_v37 }
 0xb8b   :  { %v4642_v34 = vperm.slane %v4634_v32, %v9430_v37  ;;  %v4643_v51 = vrot.slane %v4638_v13, 4  ;;  %v8884_v20 = vpack.i.bf16 %v4847_v36, %v4845_v40 }
 0xb8c   :  { %v11108_v62 = vsel %vm273_vm1, %v4638_v13, %v4645_v27  ;;  %v4649_v42 = vrot.slane %v4630_v23, 4 }
 0xb8d   :  { %8878 = vxpose.xlu2.b32.start.end [1/1] (short) (narrow) %v8877_v46, 8  ;;  %v4647_v25 = vrot.slane %v4642_v34, 4  ;;  %v11113_v63 = vsel %vm273_vm1, %v4643_v51, %v4626_v18 }
 0xb8e   :  { %v11119_v24 = vsel %vm273_vm1, %v4642_v34, %v4649_v42 }
 0xb8f   :  { %v11116_v29 = vsel %vm273_vm1, %v4647_v25, %v4630_v23 }
 0xb95   :  { %8885 = vxpose.xlu2.b32.start.end [1/1] (short) (narrow) %v8884_v20, 8 }
 0xbff   :  { %v8837_v30 = vpop.trf.xlu2 }
 0xc00   :  { %v8841_v5 = vunpack.i.h.bf16 %v8837_v30  ;;  %v8838_v3 = vunpack.i.l.bf16 %v8837_v30 }
 0xc02   :  { %v5438_v59 = vrot.slane %v8841_v5, 4  ;;  %v5426_v15 = vrot.slane %v8838_v3, 4 }
 0xc06   :  { %v8830_v12 = vpop.trf.xlu1 }
 0xc07   :  { %v8831_v22 = vunpack.i.l.bf16 %v8830_v12  ;;  %v8834_v54 = vunpack.i.h.bf16 %v8830_v12 }
 0xc08   :  { %v8851_v50 = vpop.trf.xlu0 }
 0xc09   :  { %v5424_v31 = vrot.slane %v8831_v22, 4  ;;  %v8855_v6 = vunpack.i.h.bf16 %v8851_v50  ;;  %v8852_v17 = vunpack.i.l.bf16 %v8851_v50  ;;  %v5427_v7 = vsel %vm273_vm1, %v8831_v22, %v5426_v15 }
 0xc0a   :  { %v5435_v33 = vperm.slane %v5427_v7, %v9418_v10  ;;  %v5450_v32 = vrot.slane %v8834_v54, 4 }
 0xc0b   :  { %v5439_v19 = vsel %vm273_vm1, %v8855_v6, %v5438_v59  ;;  %v5425_v21 = vsel %vm273_vm1, %v5424_v31, %v8838_v3  ;;  %v5436_v49 = vrot.slane %v8855_v6, 4  ;;  %v5536_v40 = vrot.slane %v8852_v17, 4 }
 0xc0c   :  { %v5447_v28 = vperm.slane %v5439_v19, %v9418_v10  ;;  %v5431_v11 = vperm.slane %v5425_v21, %v9418_v10  ;;  %v11130_v52 = vperm.slane %v8852_v17, %v9418_v10  ;;  %v5486_v27 = vrot.slane %v5435_v33, 4 }
 0xc0d   :  { %v5437_v61 = vsel %vm273_vm1, %v5436_v49, %v8841_v5  ;;  %v5537_v16 = vsel %vm273_vm1, 0.0, %v5536_v40 }
 0xc0e   :  { %v11125_v14 = vpop.trf.xlu1  ;;  %v5484_v45 = vrot.slane %v5447_v28, 4  ;;  %v5443_v18 = vperm.slane %v5437_v61, %v9418_v10  ;;  %v5546_v13 = vrot.slane %v11130_v52, 4  ;;  %v5474_v41 = vrot.slane %v5431_v11, 4 }
 0xc0f   :  { %v8876_v46 = vunpack.i.h.bf16 %v11125_v14  ;;  %v8873_v26 = vunpack.i.l.bf16 %v11125_v14  ;;  %v5545_v36 = vperm.slane %v5537_v16, %v9418_v10  ;;  %v5487_v5 = vsel %vm273_vm1, %v5447_v28, %v5486_v27 }
 0xc10   :  { %v5485_v35 = vsel %vm273_vm1, %v5484_v45, %v5435_v33  ;;  %v5475_v3 = vsel %vm273_vm1, %v5443_v18, %v5474_v41  ;;  %v5472_v12 = vrot.slane %v5443_v18, 4  ;;  %v5547_v22 = vsel %vm273_vm1, 0.0, %v5546_v13 }
 0xc11   :  { %v5586_v34 = vrot.slane %v8876_v46, 4  ;;  %v11142_v51 = vrot.slane %v8873_v26, 4  ;;  %v11145_v20 = vperm.slane %v5485_v35, %v9430_v37  ;;  %v5556_v31 = vrot.slane %v5545_v36, 4 }
 0xc12   :  { %v5495_v28 = vperm.slane %v5487_v5, %v9430_v37  ;;  %v11159_v7 = vperm.slane %v5475_v3, %v9430_v37  ;;  %v11166_v35 = vperm.slane %v5545_v36, %v9430_v37 }
 0xc13   :  { %v5530_v33 = vrot.slane %v11145_v20, 4  ;;  %v5557_v16 = vsel %vm273_vm1, 0.0, %v5556_v31 }
 0xc14   :  { %v5565_v3 = vperm.slane %v5557_v16, %v9430_v37 }
 0xc16   :  { %v8844_v23 = vpop.trf.xlu2 }
 0xc17   :  { %v8848_v25 = vunpack.i.h.bf16 %v8844_v23  ;;  %v8845_v42 = vunpack.i.l.bf16 %v8844_v23 }
 0xc18   :  { %v11147_v30 = vpop.trf.xlu0 }
 0xc19   :  { %v5448_v59 = vrot.slane %v8848_v25, 4  ;;  %v5451_v15 = vsel %vm273_vm1, %v8848_v25, %v5450_v32  ;;  %v5462_v50 = vrot.slane %v8845_v42, 4  ;;  %v8866_v17 = vunpack.i.l.bf16 %v11147_v30 }
 0xc1a   :  { %v5459_v6 = vperm.slane %v5451_v15, %v9418_v10  ;;  %v8869_v21 = vunpack.i.h.bf16 %v11147_v30  ;;  %v5473_v32 = vsel %vm273_vm1, %v5472_v12, %v5431_v11  ;;  %v5526_v25 = vrot.slane %v11159_v7, 4 }
 0xc1b   :  { %v5449_v19 = vsel %vm273_vm1, %v5448_v59, %v8834_v54  ;;  %v5460_v45 = vrot.slane %v8866_v17, 4  ;;  %v5463_v61 = vsel %vm273_vm1, %v8866_v17, %v5462_v50  ;;  %v11169_v54 = vperm.slane %v5547_v22, %v9430_v37 }
 0xc1c   :  { %v5455_v49 = vperm.slane %v5449_v19, %v9418_v10  ;;  %v5510_v40 = vrot.slane %v5459_v6, 4  ;;  %v5471_v27 = vperm.slane %v5463_v61, %v9418_v10  ;;  %v5574_v23 = vrot.slane %v8869_v21, 4 }
 0xc1d   :  { %v5461_v13 = vsel %vm273_vm1, %v5460_v45, %v8845_v42  ;;  %v5534_v59 = vrot.slane %v5495_v28, 4  ;;  %v11182_v42 = vperm.slane %v5473_v32, %v9430_v37  ;;  %v5570_v15 = vrot.slane %v11166_v35, 4 }
 0xc1e   :  { %v11171_v18 = vpop.trf.xlu2  ;;  %v5498_v41 = vrot.slane %v5455_v49, 4  ;;  %v5508_v30 = vrot.slane %v5471_v27, 4  ;;  %v5511_v5 = vsel %vm273_vm1, %v5471_v27, %v5510_v40  ;;  %v5467_v36 = vperm.slane %v5461_v13, %v9418_v10 }
 0xc1f   :  { %v5519_v22 = vperm.slane %v5511_v5, %v9430_v37  ;;  %v5568_v31 = vrot.slane %v11169_v54, 4  ;;  %v5575_v17 = vsel %vm273_vm1, %v5574_v23, %v8873_v26  ;;  %v8859_v61 = vunpack.i.l.bf16 %v11171_v18 }
 0xc20   :  { %v5509_v11 = vsel %vm273_vm1, %v5508_v30, %v5459_v6  ;;  %v5499_v12 = vsel %vm273_vm1, %v5467_v36, %v5498_v41  ;;  %v5496_v50 = vrot.slane %v5467_v36, 4  ;;  %v5572_v27 = vrot.slane %v5565_v3, 4 }
 0xc21   :  { %v5515_v19 = vperm.slane %v5509_v11, %v9430_v37  ;;  %v5532_v40 = vrot.slane %v5519_v22, 4  ;;  %v5507_v45 = vperm.slane %v5499_v12, %v9430_v37  ;;  %v5535_v16 = vsel %vm273_vm1, %v5519_v22, %v5534_v59 }
 0xc22   :  { %v5497_v13 = vsel %vm273_vm1, %v5496_v50, %v5455_v49  ;;  %v5587_v23 = vsel %vm273_vm1, %v5586_v34, %v8859_v61  ;;  %v8862_v22 = vunpack.i.h.bf16 %v11171_v18  ;;  %v5577_v49 = vsel %vm273_vm1, %v8869_v21, %v11142_v51 }
 0xc23   :  { %v5531_v6 = vsel %vm273_vm1, %v5515_v19, %v5530_v33  ;;  %v5533_v41 = vsel %vm273_vm1, %v5532_v40, %v5495_v28  ;;  %v5527_v32 = vsel %vm273_vm1, %v5507_v45, %v5526_v25  ;;  %v5503_v26 = vperm.slane %v5497_v13, %v9430_v37 }
 0xc24   :  { %v8900_v5 = vpack.i.bf16 %v5533_v41, %v5531_v6  ;;  %v8891_v36 = vpack.i.bf16 %v5527_v32, %v5535_v16  ;;  %v5528_v11 = vrot.slane %v5515_v19, 4  ;;  %v5571_v33 = vsel %vm273_vm1, 0.0, %v5570_v15 }
 0xc25   :  { %v5520_v28 = vrot.slane %v5503_v26, 4  ;;  %v5588_v25 = vrot.slane %v8859_v61, 4  ;;  %v5593_v59 = vperm.slane %v5587_v23, %v9418_v10  ;;  %v5581_v40 = vperm.slane %v5575_v17, %v9418_v10 }
 0xc26   :  { %v8879_v30 = vpop.trf.xlu2  ;;  %8901 = vxpose.xlu1.b32.start [1/2] (short) (narrow) %v8900_v5, 8  ;;  %8892 = vxpose.xlu0.b32.start [1/2] (short) (narrow) %v8891_v36, 8  ;;  %v5529_v18 = vsel %vm273_vm1, %v5528_v11, %v11145_v20  ;;  %v5551_v51 = vperm.slane %v11130_v52, %v9430_v37  ;;  %v5573_v16 = vsel %vm273_vm1, 0.0, %v5572_v27  ;;  %v11215_v13 = vperm.slane %v5577_v49, %v9418_v10 }
 0xc27   :  { %v8883_v12 = vunpack.i.h.bf16 %v8879_v30  ;;  %v8880_v56 = vunpack.i.l.bf16 %v8879_v30  ;;  %v5521_v19 = vsel %vm273_vm1, %v5520_v28, %v11182_v42  ;;  %v8902_v17 = vpack.i.bf16 %v5565_v3, %v5571_v33 }
 0xc28   :  { %v8918_v61 = vpack.i.bf16 %v5521_v19, %v5529_v18  ;;  %v5569_v6 = vsel %vm273_vm1, 0.0, %v5568_v31  ;;  %v5524_v41 = vrot.slane %v5507_v45, 4  ;;  %v5612_v32 = vrot.slane %v8862_v22, 4 }
 0xc29   :  { %v5598_v34 = vrot.slane %v8883_v12, 4  ;;  %v5600_v50 = vrot.slane %v8880_v56, 4  ;;  %v5589_v20 = vsel %vm273_vm1, %v8876_v46, %v5588_v25  ;;  %v5622_v52 = vrot.slane %v5593_v59, 4 }
 0xc2a   :  { %8919 = vxpose.xlu2.b32.start [1/2] (short) (narrow) %v8918_v61, 8  ;;  %v8893_v5 = vpack.i.bf16 %v5569_v6, %v5573_v16  ;;  %v5624_v36 = vrot.slane %v5581_v40, 4  ;;  %v8920_v31 = vpack.i.bf16 %v5551_v51, %v11166_v35  ;;  %v5525_v46 = vsel %vm273_vm1, %v5524_v41, %v11159_v7 }
 0xc2b   :  { %v5599_v21 = vsel %vm273_vm1, %v5598_v34, %v8880_v56  ;;  %v5601_v15 = vsel %vm273_vm1, %v8883_v12, %v5600_v50  ;;  %v5522_v56 = vrot.slane %v11182_v42, 4  ;;  %v5636_v49 = vrot.slane %v11215_v13, 4 }
 0xc2c   :  { %v5605_v23 = vperm.slane %v5599_v21, %v9418_v10  ;;  %v5609_v27 = vperm.slane %v5601_v15, %v9418_v10  ;;  %v5623_v28 = vsel %vm273_vm1, %v5622_v52, %v5581_v40  ;;  %v5625_v33 = vsel %vm273_vm1, %v5593_v59, %v5624_v36 }
 0xc2d   :  { %v5523_v14 = vsel %vm273_vm1, %v5503_v26, %v5522_v56  ;;  %v5597_v34 = vperm.slane %v5589_v20, %v9418_v10  ;;  %v5566_v21 = vrot.slane %v5551_v51, 4  ;;  %v5629_v15 = vperm.slane %v5623_v28, %v9430_v37 }
 0xc2e   :  { %v8886_v30 = vpop.trf.xlu2  ;;  %8903 = vxpose.xlu1.b32.end [2/2] (short) (narrow) %v8902_v17, 8  ;;  %8894 = vxpose.xlu0.b32.end [2/2] (short) (narrow) %v8893_v5, 8  ;;  %v5648_v25 = vrot.slane %v5605_v23, 4  ;;  %v5660_v35 = vrot.slane %v5609_v27, 4  ;;  %v8909_v19 = vpack.i.bf16 %v5525_v46, %v5523_v14  ;;  %v5633_v40 = vperm.slane %v5625_v33, %v9430_v37 }
 0xc2f   :  { %v8890_v3 = vunpack.i.h.bf16 %v8886_v30  ;;  %v8887_v11 = vunpack.i.l.bf16 %v8886_v30  ;;  %v5637_v61 = vsel %vm273_vm1, %v5597_v34, %v5636_v49  ;;  %v5672_v30 = vrot.slane %v5629_v15, 4 }
 0xc30   :  { %v5645_v52 = vperm.slane %v5637_v61, %v9430_v37  ;;  %v5676_v5 = vrot.slane %v5633_v40, 4  ;;  %v5567_v36 = vsel %vm273_vm1, 0.0, %v5566_v21 }
 0xc31   :  { %v5691_v42 = vperm.slane %v8890_v3, %v9418_v10  ;;  %v5610_v45 = vrot.slane %v8887_v11, 4  ;;  %v5613_v12 = vsel %vm273_vm1, %v8887_v11, %v5612_v32  ;;  %v5686_v16 = vrot.slane %v8890_v3, 4 }
 0xc32   :  { %v5621_v7 = vperm.slane %v5613_v12, %v9418_v10  ;;  %8921 = vxpose.xlu2.b32.end [2/2] (short) (narrow) %v8920_v31, 8  ;;  %v5684_v49 = vrot.slane %v5645_v52, 4 }
 0xc33   :  { %v5696_v50 = vrot.slane %v5691_v42, 4  ;;  %v5611_v26 = vsel %vm273_vm1, %v5610_v45, %v8862_v22  ;;  %v11243_v22 = vperm.slane %v5691_v42, %v9430_v37  ;;  %v5687_v3 = vsel %vm273_vm1, 0.0, %v5686_v16 }
 0xc34   :  { %v5617_v18 = vperm.slane %v5611_v26, %v9418_v10  ;;  %v5661_v32 = vsel %vm273_vm1, %v5621_v7, %v5660_v35  ;;  %v5658_v14 = vrot.slane %v5621_v7, 4  ;;  %v5695_v28 = vperm.slane %v5687_v3, %v9418_v10 }
 0xc35   :  { %v5697_v59 = vsel %vm273_vm1, 0.0, %v5696_v50  ;;  %v5716_v11 = vrot.slane %v11243_v22, 4  ;;  %v5669_v31 = vperm.slane %v5661_v32, %v9430_v37  ;;  %v5634_v35 = vrot.slane %v5597_v34, 4 }
 0xc36   :  { %v5646_v17 = vrot.slane %v5617_v18, 4  ;;  %v5649_v6 = vsel %vm273_vm1, %v5617_v18, %v5648_v25  ;;  %v5705_v51 = vperm.slane %v5697_v59, %v9430_v37  ;;  %8910 = vxpose.xlu0.b32.start [1/2] (short) (narrow) %v8909_v19, 8  ;;  %v8911_v25 = vpack.i.bf16 %v11169_v54, %v5567_v36 }
 0xc37   :  { %v5657_v41 = vperm.slane %v5649_v6, %v9430_v37  ;;  %v5659_v50 = vsel %vm273_vm1, %v5658_v14, %v5609_v27  ;;  %v5685_v26 = vsel %vm273_vm1, %v5669_v31, %v5684_v49  ;;  %v5717_v7 = vsel %vm273_vm1, 0.0, %v5716_v11  ;;  %v11279_v14 = vld [vmem:[%s12173_s7 + $0x1] ss:$0 sm:$0xff] }
 0xc38   :  { %v5647_v20 = vsel %vm273_vm1, %v5646_v17, %v5605_v23  ;;  %v5718_v45 = vrot.slane %v5705_v51, 4  ;;  %v5682_v59 = vrot.slane %v5669_v31, 4  ;;  %v5665_v61 = vperm.slane %v5659_v50, %v9430_v37  ;;  %v4355_v31 = vpop.f32.mrf.mxu2 }
 0xc39   :  { %v5653_v56 = vperm.slane %v5647_v20, %v9430_v37  ;;  %v5677_v23 = vsel %vm273_vm1, %v5657_v41, %v5676_v5  ;;  %v5674_v18 = vrot.slane %v5657_v41, 4  ;;  %v5706_v16 = vrot.slane %v5695_v28, 4 }
 0xc3a   :  { %v5719_v19 = vsel %vm273_vm1, 0.0, %v5718_v45  ;;  %v5635_v54 = vsel %vm273_vm1, %v5634_v35, %v11215_v13  ;;  %v5683_v27 = vsel %vm273_vm1, %v5682_v59, %v5645_v52  ;;  %v5678_v6 = vrot.slane %v5665_v61, 4 }
 0xc3b   :  { %v5670_v46 = vrot.slane %v5653_v56, 4  ;;  %v5673_v42 = vsel %vm273_vm1, %v5653_v56, %v5672_v30  ;;  %v5675_v34 = vsel %vm273_vm1, %v5674_v18, %v5633_v40  ;;  %v5641_v17 = vperm.slane %v5635_v54, %v9430_v37 }
 0xc3c   :  { %v8927_v12 = vpack.i.bf16 %v5673_v42, %v5677_v23  ;;  %v5707_v32 = vsel %vm273_vm1, 0.0, %v5706_v16  ;;  %v8936_v41 = vpack.i.bf16 %v5683_v27, %v5675_v34  ;;  %v5711_v20 = vperm.slane %v5695_v28, %v9430_v37 }
 0xc3d   :  { %v5671_v33 = vsel %vm273_vm1, %v5670_v46, %v5629_v15  ;;  %v8929_v15 = vpack.i.bf16 %v5717_v7, %v5719_v19  ;;  %v5715_v56 = vperm.slane %v5707_v32, %v9430_v37  ;;  %v5679_v30 = vsel %vm273_vm1, %v5678_v6, %v5641_v17 }
 0xc3e   :  { %8928 = vxpose.xlu1.b32.start [1/2] (short) (narrow) %v8927_v12, 8  ;;  %8912 = vxpose.xlu0.b32.end [2/2] (short) (narrow) %v8911_v25, 8  ;;  %v8969_v21 = vpack.i.bf16 %v5671_v33, %v5685_v26  ;;  %v5680_v5 = vrot.slane %v5641_v17, 4  ;;  %v5720_v40 = vrot.slane %v5711_v20, 4  ;;  %v11282_v42 = vadd.f32 %v11279_v14, %v4355_v31 }
 0xc3f   :  { %v8938_v52 = vpack.i.bf16 %v5715_v56, %v5705_v51  ;;  %v5722_v45 = vrot.slane %v5715_v56, 4 }
 0xc40   :  { %v5681_v13 = vsel %vm273_vm1, %v5665_v61, %v5680_v5  ;;  %v5721_v3 = vsel %vm273_vm1, 0.0, %v5720_v40  ;;  %v4357_v46 = vpop.f32.mrf.mxu2 }
 0xc41   :  { %v8955_v36 = vpack.i.bf16 %v5681_v13, %v5679_v30  ;;  %v8957_v11 = vpack.i.bf16 %v5721_v3, %v5711_v20  ;;  %v11285_v23 = vadd.f32 %v11279_v14, %v4357_v46  ;;  %v5723_v49 = vsel %vm273_vm1, 0.0, %v5722_v45 }
 0xc42   :  { %v8971_v28 = vpack.i.bf16 %v11243_v22, %v5723_v49 }
 0xc43   :  { %v8950_v51 = vpack.i.bf16 %v11285_v23, %v11282_v42 }
 0xc46   :  { %8930 = vxpose.xlu1.b32.end [2/2] (short) (narrow) %v8929_v15, 8  ;;  %8937 = vxpose.xlu0.b32.start [1/2] (short) (narrow) %v8936_v41, 8  ;;  %v4581_v15 = vperm.slane %v11028_v38, %v9418_v10 }
 0xc48   :  { %v4587_v41 = vperm.slane %v4581_v15, %v9430_v37 }
 0xc4e   :  { %8956 = vxpose.xlu1.b32.start [1/2] (short) (narrow) %v8955_v36, 8  ;;  %8939 = vxpose.xlu0.b32.end [2/2] (short) (narrow) %v8938_v52, 8  ;;  %v4592_v36 = vrot.slane %v4587_v41, 4 }
 0xc56   :  { %8958 = vxpose.xlu1.b32.end [2/2] (short) (narrow) %v8957_v11, 8 }
 0xc9b   :  { %8951 = vrot.lane.b32.xlu2 %v8950_v51, %s9174_s22 }
 0xcb0   :  { %8965 = vrot.lane.b32.xlu1 %v8950_v51, %s9172_s21 }
 0xcbc   :  { %8946 = vrot.lane.b32.xlu0 %v8950_v51, %s9173_s6  ;;  %v4582_v51 = vrot.slane %v4581_v15, 4 }
 0xcc1   :  { %8970 = vxpose.xlu2.b32.start [1/2] (short) (narrow) %v8969_v21, 8 }
 0xcc3   :  { %v8922_v12 = vpop.trf.xlu2 }
 0xcc4   :  { %v8923_v59 = vunpack.i.l.bf16 %v8922_v12  ;;  %v8926_v6 = vunpack.i.h.bf16 %v8922_v12 }
 0xcc9   :  { %8972 = vxpose.xlu2.b32.end [2/2] (short) (narrow) %v8971_v28, 8  ;;  %v4670_v28 = vpack.c.bf16 %v11087_v4, %v11087_v4  ;;  %v4583_v4 = vsel %vm273_vm1, 0.0, %v4582_v51 }
 0xcca   :  { %v8895_v33 = vpop.trf.xlu0  ;;  %v8904_v25 = vpop.trf.xlu1 }
 0xccb   :  { %v8896_v35 = vunpack.i.l.bf16 %v8895_v33  ;;  %v8908_v50 = vunpack.i.h.bf16 %v8904_v25  ;;  %v8905_v26 = vunpack.i.l.bf16 %v8904_v25  ;;  %v8899_v16 = vunpack.i.h.bf16 %v8895_v33 }
 0xccc   :  { %v4593_v33 = vsel %vm273_vm1, 0.0, %v4592_v36 }
 0xccd   :  { %v6254_v7 = vrot.slane %v8896_v35, 4  ;;  %v6248_v19 = vrot.slane %v8908_v50, 4  ;;  %v6242_v27 = vrot.slane %v8899_v16, 4  ;;  %v4671_v35 = vpack.c.bf16 %v4587_v41, %v4587_v41 }
 0xcce   :  { %v6680_v16 = vunpack.c.l.b16 %v4670_v28 }
 0xccf   :  { %v6255_v18 = vsel %vm273_vm1, %v6254_v7, %v8905_v26  ;;  %v6249_v21 = vsel %vm273_vm1, %v6248_v19, %v8923_v59  ;;  %v4672_v26 = vpack.c.bf16 %v11080_v0, %v11080_v0  ;;  %v4673_v59 = vpack.c.bf16 %v4593_v33, %v4593_v33 }
 0xcd0   :  { %v6259_v61 = vperm.slane %v6255_v18, %v9418_v10  ;;  %v6253_v54 = vperm.slane %v6249_v21, %v9418_v10 }
 0xcd2   :  { %v6272_v22 = vrot.slane %v6259_v61, 4  ;;  %v6274_v34 = vrot.slane %v6253_v54, 4 }
 0xcd4   :  { %v6273_v32 = vsel %vm273_vm1, %v6272_v22, %v6253_v54  ;;  %v6275_v30 = vsel %vm273_vm1, %v6259_v61, %v6274_v34  ;;  %v6681_v22 = vunpack.c.l.b16 %v4671_v35 }
 0xcd5   :  { %v6279_v38 = vperm.slane %v6273_v32, %v9430_v37  ;;  %v6283_v3 = vperm.slane %v6275_v30, %v9430_v37  ;;  %v6706_v32 = vunpack.c.l.b16 %v4673_v59 }
 0xcd6   :  { %v6682_v30 = vpack.c.b16 %v6681_v22, %v6680_v16 }
 0xcd7   :  { %v6284_v45 = vrot.slane %v6279_v38, 4  ;;  %v6288_v50 = vrot.slane %v6283_v3, 4 }
 0xcda   :  { %v8913_v17 = vpop.trf.xlu0 }
 0xcdb   :  { %v8917_v20 = vunpack.i.h.bf16 %v8913_v17  ;;  %v8914_v56 = vunpack.i.l.bf16 %v8913_v17  ;;  %v6705_v17 = vunpack.c.l.b16 %v4672_v26 }
 0xcdd   :  { %v6236_v5 = vrot.slane %v8917_v20, 4  ;;  %v6243_v13 = vsel %vm273_vm1, %v6242_v27, %v8914_v56  ;;  %v4591_v20 = vperm.slane %v4583_v4, %v9430_v37  ;;  %v4360_v4 = vpop.f32.mrf.mxu2 }
 0xcde   :  { %v6247_v40 = vperm.slane %v6243_v13, %v9418_v10  ;;  %v11350_v22 = vadd.f32 %v11279_v14, %v4360_v4 }
 0xcdf   :  { %v6237_v52 = vsel %vm273_vm1, %v6236_v5, %v8926_v6  ;;  %v4594_v36 = vrot.slane %v4591_v20, 4 }
 0xce0   :  { %v6260_v11 = vrot.slane %v6247_v40, 4  ;;  %v6241_v31 = vperm.slane %v6237_v52, %v9418_v10  ;;  %6381 = vrot.lane.b32.xlu0 %v11350_v22, %s9174_s22 }
 0xce2   :  { %v11309_v46 = vpop.trf.xlu1  ;;  %v6262_v12 = vrot.slane %v6241_v31, 4  ;;  %v6261_v49 = vsel %vm273_vm1, %v6260_v11, %v6241_v31  ;;  %v4674_v11 = vpack.c.bf16 %v11099_v48, %v11099_v48  ;;  %v4675_v31 = vpack.c.bf16 %v4591_v20, %v4591_v20 }
 0xce3   :  { %v6267_v25 = vperm.slane %v6261_v49, %v9430_v37  ;;  %v4676_v49 = vpack.c.bf16 %v11095_v39, %v11095_v39  ;;  %v6444_v20 = vrot.slane %v11285_v23, 4 }
 0xce4   :  { %v6263_v7 = vsel %vm273_vm1, %v6247_v40, %v6262_v12  ;;  %v6731_v12 = vunpack.c.l.b16 %v4675_v31 }
 0xce5   :  { %v6285_v19 = vsel %vm273_vm1, %v6284_v45, %v6267_v25  ;;  %v6286_v18 = vrot.slane %v6267_v25, 4  ;;  %v6271_v61 = vperm.slane %v6263_v7, %v9430_v37  ;;  %v6730_v45 = vunpack.c.l.b16 %v4674_v11 }
 0xce6   :  { %v6348_v21 = vpack.c.bf16 %v6285_v19, %v6285_v19  ;;  %v6755_v25 = vunpack.c.l.b16 %v4676_v49 }
 0xce7   :  { %v6287_v15 = vsel %vm273_vm1, %v6279_v38, %v6286_v18  ;;  %v6289_v54 = vsel %vm273_vm1, %v6288_v50, %v6271_v61  ;;  %v6290_v34 = vrot.slane %v6271_v61, 4  ;;  %v6707_v38 = vpack.c.b16 %v6706_v32, %v6705_v17 }
 0xce8   :  { %v6687_v0 = vsel %vm2566_vm2, %v6348_v21, 0  ;;  %v6349_v27 = vpack.c.bf16 %v6287_v15, %v6287_v15  ;;  %v6350_v6 = vpack.c.bf16 %v6289_v54, %v6289_v54  ;;  %v6732_v33 = vpack.c.b16 %v6731_v12, %v6730_v45 }
 0xce9   :  { %6696 = vmatpush.bf16.msra.mxu3 %v6687_v0  ;;  %v6291_v41 = vsel %vm273_vm1, %v6283_v3, %v6290_v34  ;;  %v4595_v3 = vsel %vm273_vm1, 0.0, %v4594_v36 }
 0xcea   :  { %v6712_v56 = vsel %vm2566_vm2, %v6349_v27, 0  ;;  %v6737_v5 = vsel %vm2566_vm2, %v6350_v6, 0  ;;  %v6351_v13 = vpack.c.bf16 %v6291_v41, %v6291_v41  ;;  %v4677_v51 = vpack.c.bf16 %v4595_v3, %v4595_v3  ;;  %v11341_v50 = vpop.trf.xlu0  ;;  %v4362_v6 = vpop.f32.mrf.mxu2 }
 0xceb   :  { %6721 = vmatpush.bf16.msrb.mxu0 %v6712_v56  ;;  %v8944_v48 = vunpack.i.h.bf16 %v11341_v50  ;;  %v6388_v41 = vrot.slane %v11282_v42, 4 }
 0xcec   :  { %8437 = vmatmul.msk.bf16.vlgmr.msra.gmra.mxu3 %vm2562_vm3, %v6682_v30  ;;  %v6762_v40 = vsel %vm2566_vm2, %v6351_v13, 0  ;;  %v6756_v28 = vunpack.c.l.b16 %v4677_v51 }
 0xced   :  { %6746 = vmatpush.bf16.msrb.mxu3 %v6737_v5  ;;  %v6304_v7 = vrot.slane %v8944_v48, 4 }
 0xcee   :  { %8438 = vmatmul.msk.bf16.vlgmr.msrb.gmra.mxu0 %vm2562_vm3, %v6707_v38  ;;  %v6757_v35 = vpack.c.b16 %v6756_v28, %v6755_v25 }
 0xcef   :  { %6771 = vmatpush.bf16.msra.mxu0 %v6762_v40 }
 0xcf2   :  { %v11332_v52 = vpop.trf.xlu1 }
 0xcf3   :  { %v8960_v26 = vunpack.i.l.bf16 %v11332_v52 }
 0xcf5   :  { %v11346_v19 = vsel %vm273_vm1, %v6304_v7, %v8960_v26  ;;  %v8952_v18 = vpop.permute.xlu2 %8951 }
 0xcf6   :  { %v8954_v61 = vunpack.i.h.bf16 %v8952_v18  ;;  %v8953_v15 = vunpack.i.l.bf16 %v8952_v18 }
 0xcf8   :  { %v6398_v34 = vrot.slane %v8953_v15, 4  ;;  %v6454_v0 = vrot.slane %v8954_v61, 4 }
 0xcfc   :  { %8439 = vmatmul.msk.bf16.vlgmr.msrb.gmra.mxu3 %vm2562_vm3, %v6732_v33 }
 0xcfe   :  { %8440 = vmatmul.msk.bf16.vlgmr.msra.gmra.mxu0 %vm2562_vm3, %v6757_v35 }
 0xd22   :  { %v8966_v39 = vpop.permute.xlu1 %8965 }
 0xd23   :  { %v8968_v59 = vunpack.i.h.bf16 %v8966_v39  ;;  %v8967_v54 = vunpack.i.l.bf16 %v8966_v39 }
 0xd25   :  { %v6456_v21 = vrot.slane %v8968_v59, 4  ;;  %v6399_v27 = vsel %vm273_vm1, %v6398_v34, %v8967_v54  ;;  %v6455_v17 = vsel %vm273_vm1, %v6454_v0, %v8968_v59  ;;  %v6400_v32 = vrot.slane %v8967_v54, 4 }
 0xd26   :  { %v6405_v14 = vperm.slane %v6399_v27, %v9418_v10  ;;  %v6461_v38 = vperm.slane %v6455_v17, %v9418_v10 }
 0xd27   :  { %v6457_v16 = vsel %vm273_vm1, %v8954_v61, %v6456_v21  ;;  %v6401_v31 = vsel %vm273_vm1, %v8953_v15, %v6400_v32 }
 0xd28   :  { %v6465_v30 = vperm.slane %v6457_v16, %v9418_v10  ;;  %v6410_v12 = vrot.slane %v6405_v14, 4  ;;  %v6466_v25 = vrot.slane %v6461_v38, 4  ;;  %v6409_v7 = vperm.slane %v6401_v31, %v9418_v10 }
 0xd2a   :  { %v6478_v49 = vrot.slane %v6465_v30, 4  ;;  %v6422_v0 = vrot.slane %v6409_v7, 4 }
 0xd2e   :  { %v8947_v56 = vpop.permute.xlu0 %8946 }
 0xd2f   :  { %v8949_v5 = vunpack.i.h.bf16 %v8947_v56  ;;  %v8948_v13 = vunpack.i.l.bf16 %v8947_v56 }
 0xd31   :  { %v6442_v40 = vrot.slane %v8949_v5, 4  ;;  %v6445_v36 = vsel %vm273_vm1, %v8949_v5, %v6444_v20  ;;  %v6386_v3 = vrot.slane %v8948_v13, 4  ;;  %v6389_v11 = vsel %vm273_vm1, %v8948_v13, %v6388_v41 }
 0xd32   :  { %v6453_v51 = vperm.slane %v6445_v36, %v9418_v10  ;;  %v6397_v45 = vperm.slane %v6389_v11, %v9418_v10 }
 0xd33   :  { %v6443_v28 = vsel %vm273_vm1, %v6442_v40, %v11285_v23  ;;  %v6387_v33 = vsel %vm273_vm1, %v6386_v3, %v11282_v42 }
 0xd34   :  { %v6449_v35 = vperm.slane %v6443_v28, %v9418_v10  ;;  %v6480_v26 = vrot.slane %v6453_v51, 4  ;;  %v6393_v48 = vperm.slane %v6387_v33, %v9418_v10  ;;  %v6424_v18 = vrot.slane %v6397_v45, 4 }
 0xd35   :  { %v6479_v39 = vsel %vm273_vm1, %v6478_v49, %v6453_v51  ;;  %v6423_v20 = vsel %vm273_vm1, %v6422_v0, %v6397_v45 }
 0xd36   :  { %v6468_v59 = vrot.slane %v6449_v35, 4  ;;  %v6411_v61 = vsel %vm273_vm1, %v6410_v12, %v6393_v48  ;;  %v6412_v21 = vrot.slane %v6393_v48, 4  ;;  %v6467_v23 = vsel %vm273_vm1, %v6466_v25, %v6449_v35 }
 0xd37   :  { %v6425_v16 = vsel %vm273_vm1, %v6409_v7, %v6424_v18  ;;  %v6473_v42 = vperm.slane %v6467_v23, %v9430_v37  ;;  %v6481_v34 = vsel %vm273_vm1, %v6465_v30, %v6480_v26  ;;  %v6417_v27 = vperm.slane %v6411_v61, %v9430_v37 }
 0xd38   :  { %v6413_v4 = vsel %vm273_vm1, %v6405_v14, %v6412_v21  ;;  %v6433_v15 = vperm.slane %v6425_v16, %v9430_v37  ;;  %v6469_v54 = vsel %vm273_vm1, %v6461_v38, %v6468_v59  ;;  %v6485_v32 = vperm.slane %v6479_v39, %v9430_v37 }
 0xd39   :  { %v6421_v17 = vperm.slane %v6413_v4, %v9430_v37  ;;  %v6477_v6 = vperm.slane %v6469_v54, %v9430_v37  ;;  %v11387_v41 = vperm.slane %v6481_v34, %v9430_v37  ;;  %v6490_v13 = vrot.slane %v6473_v42, 4 }
 0xd3a   :  { %v6440_v5 = vrot.slane %v6433_v15, 4  ;;  %v6434_v38 = vrot.slane %v6417_v27, 4  ;;  %v6494_v3 = vrot.slane %v6485_v32, 4  ;;  %v6429_v11 = vperm.slane %v6423_v20, %v9430_v37 }
 0xd3b   :  { %v6436_v56 = vrot.slane %v6421_v17, 4  ;;  %v6492_v14 = vrot.slane %v6477_v6, 4  ;;  %v6496_v30 = vrot.slane %v11387_v41, 4  ;;  %v6491_v28 = vsel %vm273_vm1, 0.0, %v6490_v13 }
 0xd3c   :  { %v6594_v45 = vsel %vm273_vm1, %v6494_v3, %v6477_v6  ;;  %v6441_v49 = vsel %vm273_vm1, 0.0, %v6440_v5  ;;  %v4651_v25 = vsel %vm273_vm1, 0.0, %v11055_v58  ;;  %v6435_v35 = vsel %vm273_vm1, 0.0, %v6434_v38 }
 0xd3d   :  { %v6437_v40 = vsel %vm273_vm1, 0.0, %v6436_v56  ;;  %v6493_v36 = vsel %vm273_vm1, 0.0, %v6492_v14  ;;  %v6497_v31 = vsel %vm273_vm1, 0.0, %v6496_v30  ;;  %v6495_v26 = vsel %vm273_vm1, 0.0, %v6494_v3 }
 0xd3e   :  { %v6521_v51 = vrot.slane %v6437_v40, 4  ;;  %v6588_v12 = vrot.slane %v6493_v36, 4  ;;  %v6599_v33 = vrot.slane %v6497_v31, 4  ;;  %v6438_v7 = vrot.slane %v6429_v11, 4 }
 0xd3f   :  { %v6532_v59 = vrot.slane %v6441_v49, 4  ;;  %v6598_v61 = vperm.slane %v6594_v45, %v9418_v10  ;;  %v4655_v21 = vperm.slane %v4651_v25, %v9418_v10  ;;  %v6516_v23 = vsel %vm273_vm1, %v6436_v56, %v6417_v27 }
 0xd40   :  { %v6589_v48 = vsel %vm273_vm1, %v6588_v12, %v6491_v28  ;;  %v6522_v18 = vsel %vm273_vm1, %v6521_v51, %v6435_v35  ;;  %v11405_v39 = vsel %vm273_vm1, %v6599_v33, %v6495_v26  ;;  %v6527_v16 = vsel %vm273_vm1, %v6440_v5, %v6429_v11 }
 0xd41   :  { %v6526_v58 = vperm.slane %v6522_v18, %v9418_v10  ;;  %v6593_v4 = vperm.slane %v6589_v48, %v9418_v10  ;;  %v6439_v15 = vsel %vm273_vm1, 0.0, %v6438_v7  ;;  %v6611_v34 = vrot.slane %v6598_v61, 4 }
 0xd42   :  { %v6533_v54 = vsel %vm273_vm1, %v6532_v59, %v6439_v15  ;;  %v6520_v0 = vperm.slane %v6516_v23, %v9418_v10  ;;  %v6531_v17 = vperm.slane %v6527_v16, %v9418_v10  ;;  %v11418_v32 = vperm.slane %v4655_v21, %v9430_v37 }
 0xd43   :  { %v6538_v6 = vrot.slane %v6526_v58, 4  ;;  %v11421_v27 = vsel %vm273_vm1, %v6611_v34, %v6593_v4  ;;  %v4656_v20 = vrot.slane %v4655_v21, 4  ;;  %v6537_v56 = vperm.slane %v6533_v54, %v9418_v10 }
 0xd44   :  { %v6613_v14 = vrot.slane %v6593_v4, 4  ;;  %v6573_v5 = vperm.slane %v6473_v42, %v9418_v10  ;;  %v6552_v13 = vrot.slane %v6531_v17, 4  ;;  %v6540_v30 = vrot.slane %v6520_v0, 4 }
 0xd45   :  { %v6539_v38 = vsel %vm273_vm1, %v6538_v6, %v6520_v0  ;;  %v4666_v40 = vrot.slane %v11418_v32, 4  ;;  %v8932_v36 = vunpack.i.l.bf16 %v11309_v46  ;;  %v6550_v3 = vrot.slane %v6537_v56, 4 }
 0xd46   :  { %v4657_v11 = vsel %vm273_vm1, 0.0, %v4656_v20  ;;  %v11430_v31 = vsel %vm273_vm1, %v6598_v61, %v6613_v14  ;;  %v6574_v51 = vrot.slane %v6573_v5, 4  ;;  %v6545_v12 = vperm.slane %v6539_v38, %v9430_v37 }
 0xd47   :  { %v6541_v45 = vsel %vm273_vm1, %v6526_v58, %v6540_v30  ;;  %v6553_v42 = vsel %vm273_vm1, %v6537_v56, %v6552_v13  ;;  %v4667_v49 = vsel %vm273_vm1, 0.0, %v4666_v40  ;;  %v4665_v28 = vperm.slane %v4657_v11, %v9430_v37 }
 0xd48   :  { %v8935_v33 = vunpack.i.h.bf16 %v11309_v46  ;;  %v6298_v25 = vrot.slane %v8932_v36, 4  ;;  %v6551_v35 = vsel %vm273_vm1, %v6550_v3, %v6531_v17  ;;  %v11440_v26 = vperm.slane %v6573_v5, %v9430_v37 }
 0xd49   :  { %v6549_v48 = vperm.slane %v6541_v45, %v9430_v37  ;;  %v6561_v7 = vperm.slane %v6553_v42, %v9430_v37  ;;  %v6575_v18 = vsel %vm273_vm1, 0.0, %v6574_v51  ;;  %v4680_v59 = vpack.c.bf16 %v11108_v62, %v11108_v62 }
 0xd4a   :  { %v6564_v61 = vrot.slane %v6545_v12, 4  ;;  %v4681_v21 = vpack.c.bf16 %v4667_v49, %v4667_v49  ;;  %v6557_v23 = vperm.slane %v6551_v35, %v9430_v37  ;;  %v4683_v46 = vpack.c.bf16 %v4665_v28, %v4665_v28 }
 0xd4b   :  { %v6299_v58 = vsel %vm273_vm1, %v6298_v25, %v8935_v33  ;;  %v8941_v16 = vunpack.i.l.bf16 %v11341_v50  ;;  %v6584_v4 = vrot.slane %v11440_v26, 4  ;;  %v6583_v15 = vperm.slane %v6575_v18, %v9430_v37 }
 0xd4c   :  { %v6566_v54 = vrot.slane %v6561_v7, 4  ;;  %v6568_v34 = vrot.slane %v6549_v48, 4  ;;  %v11452_v0 = vunpack.c.l.b16 %v4680_v59  ;;  %v4668_v17 = vrot.slane %v4665_v28, 4 }
 0xd4d   :  { %v6565_v62 = vsel %vm273_vm1, %v6557_v23, %v6564_v61  ;;  %v11455_v6 = vunpack.c.l.b16 %v4681_v21  ;;  %v4678_v20 = vpack.c.bf16 %v11113_v63, %v11113_v63  ;;  %v4679_v56 = vpack.c.bf16 %v11418_v32, %v11418_v32 }
 0xd4e   :  { %v6303_v50 = vperm.slane %v6299_v58, %v9418_v10  ;;  %v4682_v14 = vpack.c.bf16 %v11116_v29, %v11116_v29  ;;  %v11464_v5 = vunpack.c.l.b16 %v4683_v46  ;;  %v6562_v13 = vrot.slane %v6557_v23, 4 }
 0xd4f   :  { %v8963_v30 = vunpack.i.h.bf16 %v11332_v52  ;;  %v6292_v38 = vrot.slane %v8941_v16, 4  ;;  %v6585_v40 = vsel %vm273_vm1, 0.0, %v6584_v4  ;;  %v6586_v36 = vrot.slane %v6583_v15, 4 }
 0xd50   :  { %v6309_v3 = vperm.slane %v11346_v19, %v9418_v10  ;;  %v6664_v51 = vpack.c.bf16 %v6565_v62, %v6565_v62  ;;  %v6567_v45 = vsel %vm273_vm1, %v6566_v54, %v6549_v48  ;;  %v6569_v42 = vsel %vm273_vm1, %v6561_v7, %v6568_v34 }
 0xd51   :  { %v6665_v28 = vpack.c.bf16 %v6585_v40, %v6585_v40  ;;  %v4669_v33 = vsel %vm273_vm1, 0.0, %v4668_v17  ;;  %v4684_v52 = vpack.c.bf16 %v11119_v24, %v11119_v24  ;;  %v6563_v25 = vsel %vm273_vm1, %v6562_v13, %v6545_v12 }
 0xd52   :  { %v6587_v19 = vsel %vm273_vm1, 0.0, %v6586_v36  ;;  %v6668_v59 = vpack.c.bf16 %v6569_v42, %v6569_v42  ;;  %v6316_v61 = vrot.slane %v6303_v50, 4  ;;  %v6330_v48 = vrot.slane %v6309_v3, 4 }
 0xd53   :  { %v6666_v21 = vpack.c.bf16 %v6567_v45, %v6567_v45  ;;  %v7348_v46 = vunpack.c.l.b16 %v6664_v51  ;;  %v6667_v58 = vpack.c.bf16 %v6583_v15, %v6583_v15  ;;  %v6662_v16 = vpack.c.bf16 %v6563_v25, %v6563_v25 }
 0xd54   :  { %v6669_v54 = vpack.c.bf16 %v6587_v19, %v6587_v19  ;;  %v7349_v17 = vunpack.c.l.b16 %v6665_v28  ;;  %v7408_v62 = vunpack.c.l.b16 %v6668_v59  ;;  %v6663_v13 = vpack.c.bf16 %v11440_v26, %v11440_v26 }
 0xd55   :  { %v7378_v15 = vunpack.c.l.b16 %v6666_v21  ;;  %v7379_v51 = vunpack.c.l.b16 %v6667_v58  ;;  %v4685_v45 = vpack.c.bf16 %v4669_v33, %v4669_v33  ;;  %v7318_v28 = vunpack.c.l.b16 %v6662_v16 }
 0xd56   :  { %v6830_v59 = vunpack.c.l.b16 %v4682_v14  ;;  %v6855_v58 = vunpack.c.l.b16 %v4684_v52  ;;  %v6781_v63 = vunpack.c.l.b16 %v4679_v56 }
 0xd5a   :  { %v8973_v11 = vpop.trf.xlu2 }
 0xd5b   :  { %v8977_v49 = vunpack.i.h.bf16 %v8973_v11  ;;  %v8974_v29 = vunpack.i.l.bf16 %v8973_v11 }
 0xd5d   :  { %v6293_v35 = vsel %vm273_vm1, %v6292_v38, %v8977_v49  ;;  %v6310_v18 = vrot.slane %v8974_v29, 4  ;;  %v7350_v49 = vpack.c.b16 %v7349_v17, %v7348_v46  ;;  %v7409_v29 = vunpack.c.l.b16 %v6669_v54 }
 0xd5e   :  { %v6297_v7 = vperm.slane %v6293_v35, %v9418_v10 }
 0xd5f   :  { %v6311_v23 = vsel %vm273_vm1, %v6310_v18, %v8963_v30  ;;  %v7410_v19 = vpack.c.b16 %v7409_v29, %v7408_v62  ;;  %v7355_v16 = vand.u32 %v7350_v49, %v10013_v2 }
 0xd60   :  { %v6318_v4 = vrot.slane %v6297_v7, 4  ;;  %v6315_v24 = vperm.slane %v6311_v23, %v9418_v10  ;;  %v6317_v12 = vsel %vm273_vm1, %v6316_v61, %v6297_v7  ;;  %v7319_v61 = vunpack.c.l.b16 %v6663_v13 }
 0xd61   :  { %v6323_v34 = vperm.slane %v6317_v12, %v9430_v37 }
 0xd62   :  { %v6328_v38 = vrot.slane %v6315_v24, 4  ;;  %v6319_v40 = vsel %vm273_vm1, %v6303_v50, %v6318_v4  ;;  %v6331_v30 = vsel %vm273_vm1, %v6315_v24, %v6330_v48  ;;  %v7380_v50 = vpack.c.b16 %v7379_v51, %v7378_v15 }
 0xd63   :  { %v6327_v36 = vperm.slane %v6319_v40, %v9430_v37  ;;  %v6339_v11 = vperm.slane %v6331_v30, %v9430_v37  ;;  %v6342_v26 = vrot.slane %v6323_v34, 4  ;;  %v6856_v24 = vunpack.c.l.b16 %v4685_v45 }
 0xd64   :  { %v6329_v42 = vsel %vm273_vm1, %v6328_v38, %v6309_v3  ;;  %v7320_v12 = vpack.c.b16 %v7319_v61, %v7318_v28  ;;  %v11502_v38 = vld [vmem:[%s12175_s1] sm:$0xff]  ;;  %v7415_v40 = vand.u32 %v7410_v19, %v10013_v2  ;;  %v6780_v30 = vunpack.c.l.b16 %v4678_v20  ;;  %v11545_v61 = vpop.permute.xlu0 %6381 }
 0xd65   :  { %v6335_v25 = vperm.slane %v6329_v42, %v9430_v37  ;;  %v6344_v35 = vrot.slane %v6339_v11, 4  ;;  %v6346_v18 = vrot.slane %v6327_v36, 4  ;;  %v6857_v51 = vpack.c.b16 %v6856_v24, %v6855_v58 }
 0xd66   :  { %v7325_v20 = vand.u32 %v7320_v12, %v10013_v2 }
 0xd67   :  { %v6343_v48 = vsel %vm273_vm1, %v6335_v25, %v6342_v26  ;;  %v6345_v7 = vsel %vm273_vm1, %v6344_v35, %v6327_v36  ;;  %v6347_v33 = vsel %vm273_vm1, %v6339_v11, %v6346_v18  ;;  %v6340_v21 = vrot.slane %v6335_v25, 4 }
 0xd68   :  { %v6353_v3 = vpack.c.bf16 %v6343_v48, %v6343_v48  ;;  %v6354_v23 = vpack.c.bf16 %v6345_v7, %v6345_v7  ;;  %v6355_v46 = vpack.c.bf16 %v6347_v33, %v6347_v33  ;;  %v6807_v36 = vpack.c.b16 %v11455_v6, %v11452_v0 }
 0xd69   :  { %v6341_v4 = vsel %vm273_vm1, %v6340_v21, %v6323_v34  ;;  %v7385_v34 = vand.u32 %v7380_v50, %v10013_v2  ;;  %v6832_v11 = vpack.c.b16 %v11464_v5, %v6830_v59  ;;  %v6782_v6 = vpack.c.b16 %v6781_v63, %v6780_v30  ;;  %v11534_v5 = vld [vmem:[%s12175_s1 + $0x8] sm:$0x1]  ;;  %v9170_v21 = vld [vmem:[%s12175_s1 + $0x10] sm:$0xff] }
 0xd6a   :  { %v6812_v14 = vsel %vm2566_vm2, %v6353_v3, 0  ;;  %v6837_v17 = vsel %vm2566_vm2, %v6354_v23, 0  ;;  %v6862_v62 = vsel %vm2566_vm2, %v6355_v46, 0  ;;  %v6352_v13 = vpack.c.bf16 %v6341_v4, %v6341_v4 }
 0xd6b   :  { %v6723_v54 = vpop.f32.mrf.mxu0  ;;  %6821 = vmatpush.bf16.msra.mxu2 %v6812_v14  ;;  %6846 = vmatpush.bf16.msra.mxu3 %v6837_v17 }
 0xd6c   :  { %v11505_v52 = vadd.f32 %v11502_v38, %v6723_v54  ;;  %6871 = vmatpush.bf16.msrb.mxu0 %v6862_v62  ;;  %v6787_v15 = vsel %vm2566_vm2, %v6352_v13, 0  ;;  %v9171_v62 = vld [vmem:[%s12175_s1 + $0x18] sm:$0x1] }
 0xd6d   :  { %6796 = vmatpush.bf16.msra.mxu1 %v6787_v15 }
 0xd6e   :  { %v6900_v45 = vsel %vm2775_vm4, %v11505_v52, -inf  ;;  %8442 = vmatmul.msk.bf16.vlgmr.msra.gmra.mxu2 %vm2562_vm3, %v6807_v36  ;;  %8443 = vmatmul.msk.bf16.vlgmr.msra.gmra.mxu3 %vm2562_vm3, %v6832_v11 }
 0xd6f   :  { %7364 = vmatpush.bf16.msrb.mxu2 %v7355_v16  ;;  %7394 = vmatpush.bf16.msrb.mxu3 %v7385_v34  ;;  %v6698_v42 = vpop.f32.mrf.mxu3 }
 0xd70   :  { %7424 = vmatpush.bf16.msra.mxu0 %v7415_v40  ;;  %v11526_v0 = vadd.f32 %v11502_v38, %v6698_v42  ;;  %6901 = vmax.xlane.f32.xlu0 %v6900_v45 }
 0xd71   :  { %8444 = vmatmul.msk.bf16.vlgmr.msrb.gmra.mxu0 %vm2562_vm3, %v6857_v51  ;;  %7334 = vmatpush.bf16.msrb.mxu1 %v7325_v20 }
 0xd72   :  { %8441 = vmatmul.msk.bf16.vlgmr.msra.gmra.mxu1 %vm2562_vm3, %v6782_v6  ;;  %v6894_v32 = vsel %vm2775_vm4, %v11526_v0, -inf }
 0xd73   :  { %6895 = vmax.xlane.f32.xlu1 %v6894_v32  ;;  %v6725_v56 = vpop.f32.mrf.mxu0 }
 0xd74   :  { %v6881_v49 = vadd.f32 %v11534_v5, %v6725_v56 }
 0xd76   :  { %v6903_v29 = vsel %vm2779_vm6, %v6881_v49, -inf }
 0xd77   :  { %v6700_v28 = vpop.f32.mrf.mxu3  ;;  %6904 = vmax.xlane.f32.xlu2 %v6903_v29 }
 0xd78   :  { %v6879_v25 = vadd.f32 %v11534_v5, %v6700_v28 }
 0xd7a   :  { %v6897_v26 = vsel %vm2779_vm6, %v6879_v25, -inf }
 0xd7b   :  { %6898 = vmax.xlane.f32.xlu0 %v6897_v26  ;;  %v6773_v35 = vpop.f32.mrf.mxu0 }
 0xd7c   :  { %v11541_v18 = vadd.f32 %v11502_v38, %v6773_v35 }
 0xd7e   :  { %v6912_v50 = vsel %vm2775_vm4, %v11541_v18, -inf }
 0xd7f   :  { %v6748_v19 = vpop.f32.mrf.mxu3 }
 0xd80   :  { %v11575_v15 = vadd.f32 %v11502_v38, %v6748_v19 }
 0xd82   :  { %v6906_v20 = vsel %vm2775_vm4, %v11575_v15, -inf }
 0xd83   :  { %6913 = vmax.xlane.f32.xlu0 %v6912_v50  ;;  %v6775_v59 = vpop.f32.mrf.mxu0 }
 0xd84   :  { %v11578_v36 = vadd.f32 %v11534_v5, %v6775_v59 }
 0xd86   :  { %v6915_v63 = vsel %vm2779_vm6, %v11578_v36, -inf }
 0xd87   :  { %v6750_v48 = vpop.f32.mrf.mxu3 }
 0xde3   :  { %v6902_v23 = vpop.xlane.xlu0 %6901 }
 0xde4   :  { %v6944_v24 = vsub.f32 %v11505_v52, %v6902_v23 }
 0xde6   :  { %v6962_v34 = vmul.f32 1.442695, %v6944_v24  ;;  %v6896_v19 = vpop.xlane.xlu1 %6895 }
 0xde8   :  { %9091 = vpow2.f32 %v6962_v34 }
 0xdea   :  { %v6905_v11 = vpop.xlane.xlu2 %6904 }
 0xdeb   :  { %v6945_v45 = vsub.f32 %v6881_v49, %v6905_v11 }
 0xded   :  { %v6964_v56 = vmul.f32 1.442695, %v6945_v45 }
 0xdee   :  { %v11547_v7 = vpop.f32.mrf.mxu0  ;;  %v11586_v42 = vpop.eup %9091 }
 0xdef   :  { %v6798_v33 = vpop.f32.mrf.mxu1  ;;  %v6899_v32 = vpop.xlane.xlu0 %6898  ;;  %v6996_v49 = vsel %vm2775_vm4, %v11586_v42, 0.0  ;;  %9093 = vpow2.f32 %v6964_v56 }
 0xdf0   :  { %v11552_v3 = vadd.f32 %v9170_v21, %v6798_v33  ;;  %v6943_v26 = vsub.f32 %v6879_v25, %v6899_v32  ;;  %v11599_v33 = vadd.f32 %v11534_v5, %v6750_v48  ;;  %v11610_v5 = vadd.f32 %v9170_v21, %v11547_v7 }
 0xdf1   :  { %v6823_v58 = vpop.f32.mrf.mxu2  ;;  %v6848_v16 = vpop.f32.mrf.mxu3 }
 0xdf2   :  { %v6918_v46 = vsel %vm2775_vm4, %v11552_v3, -inf  ;;  %v11556_v4 = vadd.f32 %v9170_v21, %v6848_v16  ;;  %v11559_v12 = vadd.f32 %v9170_v21, %v6823_v58  ;;  %v6960_v59 = vmul.f32 1.442695, %v6943_v26 }
 0xdf3   :  { %6919 = vmax.xlane.f32.xlu2 %v6918_v46  ;;  %v6942_v58 = vsub.f32 %v11526_v0, %v6896_v19  ;;  %v6909_v24 = vsel %vm2779_vm6, %v11599_v33, -inf }
 0xdf4   :  { %v6930_v54 = vsel %vm2775_vm4, %v11556_v4, -inf  ;;  %v6924_v52 = vsel %vm2775_vm4, %v11559_v12, -inf  ;;  %9095 = vpow2.f32 %v6960_v59 }
 0xdf5   :  { %6931 = vmax.xlane.f32.xlu0 %v6930_v54  ;;  %v11601_v46 = vpop.eup %9093  ;;  %v6958_v54 = vmul.f32 1.442695, %v6942_v58 }
 0xdf6   :  { %v6875_v14 = vpop.f32.mrf.mxu0  ;;  %v6999_v16 = vsel %vm2779_vm6, %v11601_v46, 0.0 }
 0xdf7   :  { %v6800_v17 = vpop.f32.mrf.mxu1  ;;  %v11568_v40 = vadd.f32 %v9171_v62, %v6875_v14  ;;  %v6914_v23 = vpop.xlane.xlu0 %6913  ;;  %9097 = vpow2.f32 %v6958_v54 }
 0xdf8   :  { %v11566_v13 = vadd.f32 %v9171_v62, %v6800_v17  ;;  %v6948_v25 = vsub.f32 %v11541_v18, %v6914_v23  ;;  %v6936_v18 = vsel %vm2775_vm4, %v11610_v5, -inf }
 0xdf9   :  { %v6939_v51 = vsel %vm2779_vm6, %v11568_v40, -inf  ;;  %v6825_v6 = vpop.f32.mrf.mxu2  ;;  %v6850_v38 = vpop.f32.mrf.mxu3 }
 0xdfa   :  { %v6921_v30 = vsel %vm2779_vm6, %v11566_v13, -inf  ;;  %v11588_v29 = vadd.f32 %v9171_v62, %v6825_v6  ;;  %v11590_v28 = vadd.f32 %v9171_v62, %v6850_v38  ;;  %v6970_v14 = vmul.f32 1.442695, %v6948_v25  ;;  %v11612_v48 = vpop.eup %9095 }
 0xdfb   :  { %6925 = vmax.xlane.f32.xlu2 %v6924_v52  ;;  %6922 = vmax.xlane.f32.xlu1 %v6921_v30  ;;  %v6993_v0 = vsel %vm2779_vm6, %v11612_v48, 0.0 }
 0xdfc   :  { %v6933_v35 = vsel %vm2779_vm6, %v11590_v28, -inf  ;;  %v6927_v50 = vsel %vm2779_vm6, %v11588_v29, -inf  ;;  %9099 = vpow2.f32 %v6970_v14 }
 0xdfd   :  { %6940 = vmax.xlane.f32.xlu0 %v6939_v51  ;;  %v11618_v17 = vpop.eup %9097 }
 0xdfe   :  { %v6990_v21 = vsel %vm2775_vm4, %v11618_v17, 0.0 }
 0xe02   :  { %v11620_v62 = vpop.eup %9099 }
 0xe03   :  { %6916 = vmax.xlane.f32.xlu2 %v6915_v63  ;;  %6907 = vmax.xlane.f32.xlu1 %v6906_v20  ;;  %v7008_v7 = vsel %vm2775_vm4, %v11620_v62, 0.0 }
 0xe05   :  { %6997 = vadd.xlane.f32.xlu0 %v6996_v49 }
 0xe0b   :  { %6934 = vmax.xlane.f32.xlu2 %v6933_v35  ;;  %6928 = vmax.xlane.f32.xlu1 %v6927_v50 }
 0xe13   :  { %7000 = vadd.xlane.f32.xlu2 %v6999_v16  ;;  %6910 = vmax.xlane.f32.xlu1 %v6909_v24 }
 0xe1b   :  { %6994 = vadd.xlane.f32.xlu2 %v6993_v0  ;;  %6937 = vmax.xlane.f32.xlu1 %v6936_v18 }
 0xe23   :  { %7009 = vadd.xlane.f32.xlu2 %v7008_v7  ;;  %6991 = vadd.xlane.f32.xlu1 %v6990_v21 }
 0xe3b   :  { %6372 = vrot.lane.b32.xlu2 %v11350_v22, %s9173_s6 }
 0xe66   :  { %v6920_v34 = vpop.xlane.xlu2 %6919 }
 0xe67   :  { %v6950_v11 = vsub.f32 %v11552_v3, %v6920_v34 }
 0xe68   :  { %v6932_v52 = vpop.xlane.xlu0 %6931 }
 0xe69   :  { %v6954_v30 = vsub.f32 %v11556_v4, %v6932_v52  ;;  %v6974_v6 = vmul.f32 1.442695, %v6950_v11 }
 0xe6b   :  { %v6982_v51 = vmul.f32 1.442695, %v6954_v30 }
 0xe6d   :  { %9101 = vpow2.f32 %v6982_v51 }
 0xe6e   :  { %v6926_v45 = vpop.xlane.xlu2 %6925  ;;  %v11630_v63 = vpop.xlane.xlu1 %6922 }
 0xe6f   :  { %v6952_v20 = vsub.f32 %v11559_v12, %v6926_v45 }
 0xe70   :  { %v11633_v32 = vpop.xlane.xlu0 %6940 }
 0xe71   :  { %v6978_v38 = vmul.f32 1.442695, %v6952_v20 }
 0xe73   :  { %9103 = vpow2.f32 %v6978_v38  ;;  %v11635_v56 = vpop.eup %9101 }
 0xe74   :  { %9105 = vpow2.f32 %v6974_v6  ;;  %v7026_v3 = vsel %vm2775_vm4, %v11635_v56, 0.0 }
 0xe75   :  { %7027 = vadd.xlane.f32.xlu2 %v7026_v3 }
 0xe76   :  { %v6917_v49 = vpop.xlane.xlu2 %6916  ;;  %v6908_v26 = vpop.xlane.xlu1 %6907 }
 0xe77   :  { %v6949_v4 = vsub.f32 %v11578_v36, %v6917_v49  ;;  %v6946_v35 = vsub.f32 %v11575_v15, %v6908_v26 }
 0xe78   :  { %v6998_v59 = vpop.xlane.xlu0 %6997 }
 0xe79   :  { %v11641_v50 = vpop.eup %9103  ;;  %v6972_v12 = vmul.f32 1.442695, %v6949_v4  ;;  %v6966_v19 = vmul.f32 1.442695, %v6946_v35  ;;  %v7079_v52 = vand.u32 2147483648, %v6998_v59  ;;  %vm7073_vm15 = vweird.f32 %v6998_v59 }
 0xe7a   :  { %v7020_v23 = vsel %vm2775_vm4, %v11641_v50, 0.0  ;;  %v11645_v58 = vpop.eup %9105  ;;  %v7077_v11 = vand.u32 2147483647, %v6998_v59 }
 0xe7b   :  { %9107 = vpow2.f32 %v6972_v12  ;;  %7021 = vadd.xlane.f32.xlu0 %v7020_v23  ;;  %v7014_v15 = vsel %vm2775_vm4, %v11645_v58, 0.0  ;;  %v7080_v6 = vor.u32 1.1754944e-38, %v7079_v52 }
 0xe7c   :  { %9109 = vpow2.f32 %v6966_v19  ;;  %vm7078_vm8 = vcmp.eq.f32.partialorder %v7077_v11, 8.507059e+37 }
 0xe7d   :  { %9111 = vrcp.f32 %v6998_v59  ;;  %7015 = vadd.xlane.f32.xlu2 %v7014_v15 }
 0xe7e   :  { %v6935_v25 = vpop.xlane.xlu2 %6934  ;;  %v11647_v16 = vpop.xlane.xlu1 %6928 }
 0xe81   :  { %v11651_v36 = vpop.eup %9107 }
 0xe82   :  { %v11653_v24 = vpop.eup %9109  ;;  %v7011_v54 = vsel %vm2779_vm6, %v11651_v36, 0.0 }
 0xe83   :  { %v9112_v14 = vpop.eup %9111  ;;  %7012 = vadd.xlane.f32.xlu0 %v7011_v54  ;;  %v7002_v0 = vsel %vm2775_vm4, %v11653_v24, 0.0 }
 0xe84   :  { %v7069_v18 = vmul.f32 %v9112_v14, %v6998_v59  ;;  %7003 = vadd.xlane.f32.xlu1 %v7002_v0  ;;  %vm7074_vm2 = vweird.f32 %v9112_v14  ;;  %v6955_v59 = vsub.f32 %v11590_v28, %v6935_v25 }
 0xe85   :  { %vm7075_vm5 = vmor %vm7073_vm15, %vm7074_vm2 }
 0xe86   :  { %v7070_v7 = vsub.f32 1.0, %v7069_v18  ;;  %v7001_v21 = vpop.xlane.xlu2 %7000  ;;  %v6911_v34 = vpop.xlane.xlu1 %6910 }
 0xe87   :  { %9113 = vrcp.f32 %v7001_v21  ;;  %v6947_v51 = vsub.f32 %v11599_v33, %v6911_v34  ;;  %v7094_v23 = vand.u32 2147483648, %v7001_v21  ;;  %vm7088_vm10 = vweird.f32 %v7001_v21 }
 0xe88   :  { %v7071_v30 = vmul.f32 %v9112_v14, %v7070_v7  ;;  %v6984_v34 = vmul.f32 1.442695, %v6955_v59 }
 0xe89   :  { %v6968_v20 = vmul.f32 1.442695, %v6947_v51 }
 0xe8a   :  { %v7072_v45 = vadd.f32 %v9112_v14, %v7071_v30 }
 0xe8b   :  { %9115 = vpow2.f32 %v6968_v20 }
 0xe8c   :  { %v7076_v38 = vsel %vm7075_vm5, %v9112_v14, %v7072_v45 }
 0xe8d   :  { %v9114_v49 = vpop.eup %9113  ;;  %v7081_v26 = vsel %vm7078_vm8, %v7080_v6, %v7076_v38 }
 0xe8e   :  { %v7082_v3 = vmul.f32 %v11586_v42, %v7081_v26  ;;  %v7084_v4 = vmul.f32 %v9114_v49, %v7001_v21  ;;  %v6995_v35 = vpop.xlane.xlu2 %6994  ;;  %v6938_v12 = vpop.xlane.xlu1 %6937  ;;  %vm7089_vm9 = vweird.f32 %v9114_v49  ;;  %v7092_v42 = vand.u32 2147483647, %v7001_v21 }
 0xe8f   :  { %9117 = vrcp.f32 %v6995_v35  ;;  %v6956_v19 = vsub.f32 %v11610_v5, %v6938_v12  ;;  %vm7090_vm2 = vmor %vm7088_vm10, %vm7089_vm9  ;;  %v7095_v5 = vor.u32 1.1754944e-38, %v7094_v23  ;;  %v6951_v21 = vsub.f32 %v11566_v13, %v11630_v63 }
 0xe90   :  { %8447 = vst.msk [vmem:[%s12176_s19 + $0x90] sm:$0xff] %vm2775_vm4, %v7082_v3  ;;  %v7085_v33 = vsub.f32 1.0, %v7084_v4  ;;  %vm7093_vm15 = vcmp.eq.f32.partialorder %v7092_v42, 8.507059e+37  ;;  %v7297_v51 = vpack.c.bf16 %v7082_v3, %v7082_v3  ;;  %v7064_v6 = vand.u32 2147483648, %v6995_v35 }
 0xe91   :  { %v11667_v15 = vpop.eup %9115  ;;  %v6986_v14 = vmul.f32 1.442695, %v6956_v19  ;;  %v7062_v3 = vand.u32 2147483647, %v6995_v35  ;;  %vm7058_vm8 = vweird.f32 %v6995_v35 }
 0xe92   :  { %v7086_v54 = vmul.f32 %v9114_v49, %v7085_v33  ;;  %v7005_v0 = vsel %vm2779_vm6, %v11667_v15, 0.0  ;;  %v7343_v13 = vunpack.c.l.b16 %v7297_v51  ;;  %v6976_v33 = vmul.f32 1.442695, %v6951_v21 }
 0xe93   :  { %9119 = vpow2.f32 %v6986_v14  ;;  %7006 = vadd.xlane.f32.xlu0 %v7005_v0  ;;  %v7065_v19 = vor.u32 1.1754944e-38, %v7064_v6  ;;  %vm7063_vm10 = vcmp.eq.f32.partialorder %v7062_v3, 8.507059e+37 }
 0xe94   :  { %v7087_v18 = vadd.f32 %v9114_v49, %v7086_v54 }
 0xe95   :  { %v9118_v7 = vpop.eup %9117 }
 0xe96   :  { %v7091_v52 = vsel %vm7090_vm2, %v9114_v49, %v7087_v18  ;;  %v7054_v28 = vmul.f32 %v9118_v7, %v6995_v35  ;;  %v7010_v25 = vpop.xlane.xlu2 %7009  ;;  %v11671_v30 = vpop.xlane.xlu1 %6991  ;;  %vm7059_vm5 = vweird.f32 %v9118_v7 }
 0xe97   :  { %v7096_v11 = vsel %vm7093_vm15, %v7095_v5, %v7091_v52  ;;  %9121 = vrcp.f32 %v7010_v25  ;;  %vm7060_vm9 = vmor %vm7058_vm8, %vm7059_vm5  ;;  %v7139_v5 = vand.u32 2147483648, %v7010_v25  ;;  %vm7133_vm5 = vweird.f32 %v7010_v25 }
 0xe98   :  { %v7097_v45 = vmul.f32 %v11601_v46, %v7096_v11  ;;  %v7055_v20 = vsub.f32 1.0, %v7054_v28  ;;  %9123 = vrcp.f32 %v11671_v30  ;;  %v7137_v28 = vand.u32 2147483647, %v7010_v25 }
 0xe99   :  { %9125 = vpow2.f32 %v6984_v34  ;;  %v11677_v38 = vpop.eup %9119  ;;  %v7049_v11 = vand.u32 2147483648, %v11671_v30  ;;  %v7140_v21 = vor.u32 1.1754944e-38, %v7139_v5 }
 0xe9a   :  { %8448 = vst.msk [vmem:[%s12176_s19 + $0x98] sm:$0x1] %vm2779_vm6, %v7097_v45  ;;  %v7298_v49 = vpack.c.bf16 %v7097_v45, %v7097_v45  ;;  %v7056_v26 = vmul.f32 %v9118_v7, %v7055_v20  ;;  %v7032_v46 = vsel %vm2775_vm4, %v11677_v38, 0.0  ;;  %9127 = vpow2.f32 %v6976_v33 }
 0xe9b   :  { %7033 = vadd.xlane.f32.xlu0 %v7032_v46 }
 0xe9c   :  { %v7057_v4 = vadd.f32 %v9118_v7, %v7056_v26  ;;  %v7344_v63 = vunpack.c.l.b16 %v7298_v49  ;;  %v7050_v26 = vor.u32 1.1754944e-38, %v7049_v11 }
 0xe9d   :  { %v9122_v12 = vpop.eup %9121  ;;  %6363 = vrot.lane.b32.xlu1 %v11350_v22, %s9172_s21 }
 0xe9e   :  { %v9124_v59 = vpop.eup %9123  ;;  %v7061_v23 = vsel %vm7060_vm9, %v9118_v7, %v7057_v4  ;;  %v7129_v54 = vmul.f32 %v9122_v12, %v7010_v25  ;;  %v7345_v42 = vpack.c.b16 %v7344_v63, %v7343_v13  ;;  %vm7134_vm2 = vweird.f32 %v9122_v12 }
 0xe9f   :  { %v11687_v14 = vpop.eup %9125  ;;  %v7066_v0 = vsel %vm7063_vm10, %v7065_v19, %v7061_v23  ;;  %v7039_v35 = vmul.f32 %v9124_v59, %v11671_v30  ;;  %vm7044_vm15 = vweird.f32 %v9124_v59  ;;  %vm7135_vm8 = vmor %vm7133_vm5, %vm7134_vm2  ;;  %vm7043_vm9 = vweird.f32 %v11671_v30 }
 0xea0   :  { %v7067_v18 = vmul.f32 %v11612_v48, %v7066_v0  ;;  %v7130_v34 = vsub.f32 1.0, %v7129_v54  ;;  %8462 = vmatmul.msk.bf16.vlgmr.msrb.gmra.mxu2 %vm2775_vm4, %v7345_v42  ;;  %v7047_v48 = vand.u32 2147483647, %v11671_v30  ;;  %v7029_v45 = vsel %vm2779_vm6, %v11687_v14, 0.0  ;;  %vm7045_vm13 = vmor %vm7043_vm9, %vm7044_vm15  ;;  %v11701_v3 = vpop.eup %9127 }
 0xea1   :  { %v7040_v52 = vsub.f32 1.0, %v7039_v35  ;;  %vm7138_vm10 = vcmp.eq.f32.partialorder %v7137_v28, 8.507059e+37  ;;  %v6957_v54 = vsub.f32 %v11568_v40, %v11633_v32 }
 0xea2   :  { %8446 = vst.msk [vmem:[%s12176_s19 + $0x88] sm:$0x1] %vm2779_vm6, %v7067_v18  ;;  %v7131_v7 = vmul.f32 %v9122_v12, %v7130_v34  ;;  %vm7048_vm7 = vcmp.eq.f32.partialorder %v7047_v48, 8.507059e+37  ;;  %v7296_v25 = vpack.c.bf16 %v7067_v18, %v7067_v18 }
 0xea3   :  { %v7041_v51 = vmul.f32 %v9124_v59, %v7040_v52  ;;  %7030 = vadd.xlane.f32.xlu0 %v7029_v45  ;;  %v6988_v42 = vmul.f32 1.442695, %v6957_v54 }
 0xea4   :  { %v7132_v20 = vadd.f32 %v9122_v12, %v7131_v7  ;;  %v7314_v19 = vunpack.c.l.b16 %v7296_v25 }
 0xea5   :  { %v7042_v6 = vadd.f32 %v9124_v59, %v7041_v51 }
 0xea6   :  { %v7136_v49 = vsel %vm7135_vm8, %v9122_v12, %v7132_v20 }
 0xea7   :  { %v7141_v46 = vsel %vm7138_vm10, %v7140_v21, %v7136_v49  ;;  %v7046_v4 = vsel %vm7045_vm13, %v9124_v59, %v7042_v6 }
 0xea8   :  { %v11704_v13 = vmul.f32 %v11620_v62, %v7141_v46  ;;  %v7051_v63 = vsel %vm7048_vm7, %v7050_v26, %v7046_v4  ;;  %v7017_v62 = vsel %vm2779_vm6, %v11701_v3, 0.0 }
 0xea9   :  { %v7052_v33 = vmul.f32 %v11618_v17, %v7051_v63  ;;  %v6953_v17 = vsub.f32 %v11588_v29, %v11647_v16  ;;  %v11731_v29 = vpop.permute.xlu2 %6372 }
 0xeaa   :  { %8451 = vst.msk [vmem:[%s12176_s19 + $0xb0] sm:$0xff] %vm2775_vm4, %v11704_v13 }
 0xeab   :  { %8445 = vst.msk [vmem:[%s12176_s19 + $0x80] sm:$0xff] %vm2775_vm4, %v7052_v33  ;;  %v7295_v30 = vpack.c.bf16 %v7052_v33, %v7052_v33  ;;  %7018 = vadd.xlane.f32.xlu0 %v7017_v62  ;;  %v6980_v23 = vmul.f32 1.442695, %v6953_v17 }
 0xead   :  { %v7313_v12 = vunpack.c.l.b16 %v7295_v30  ;;  %9129 = vpow2.f32 %v6980_v23 }
 0xeae   :  { %9131 = vpow2.f32 %v6988_v42 }
 0xeaf   :  { %v7315_v59 = vpack.c.b16 %v7314_v19, %v7313_v12 }
 0xeb1   :  { %8461 = vmatmul.msk.bf16.vlgmr.msrb.gmra.mxu1 %vm2775_vm4, %v7315_v59 }
 0xeb3   :  { %v11723_v0 = vpop.eup %9129 }
 0xeb4   :  { %v7023_v35 = vsel %vm2779_vm6, %v11723_v0, 0.0  ;;  %v11727_v18 = vpop.eup %9131 }
 0xeb5   :  { %v7035_v34 = vsel %vm2779_vm6, %v11727_v18, 0.0 }
 0xec7   :  { %7024 = vadd.xlane.f32.xlu1 %v7023_v35 }
 0xecf   :  { %7036 = vadd.xlane.f32.xlu1 %v7035_v34 }
 0xee8   :  { %v7028_v16 = vpop.xlane.xlu2 %7027 }
 0xee9   :  { %9133 = vrcp.f32 %v7028_v16  ;;  %v7227_v11 = vand.u32 2147483647, %v7028_v16  ;;  %v7229_v51 = vand.u32 2147483648, %v7028_v16  ;;  %vm7223_vm13 = vweird.f32 %v7028_v16 }
 0xeeb   :  { %vm7228_vm15 = vcmp.eq.f32.partialorder %v7227_v11, 8.507059e+37  ;;  %v7230_v46 = vor.u32 1.1754944e-38, %v7229_v51 }
 0xeee   :  { %v7022_v40 = vpop.xlane.xlu0 %7021 }
 0xeef   :  { %9135 = vrcp.f32 %v7022_v40  ;;  %v9134_v32 = vpop.eup %9133  ;;  %v7197_v4 = vand.u32 2147483647, %v7022_v40  ;;  %v7199_v63 = vand.u32 2147483648, %v7022_v40  ;;  %vm7193_vm8 = vweird.f32 %v7022_v40 }
 0xef0   :  { %v7219_v5 = vmul.f32 %v9134_v32, %v7028_v16  ;;  %v7016_v52 = vpop.xlane.xlu2 %7015  ;;  %vm7224_vm7 = vweird.f32 %v9134_v32 }
 0xef1   :  { %9137 = vrcp.f32 %v7016_v52  ;;  %vm7225_vm2 = vmor %vm7223_vm13, %vm7224_vm7  ;;  %v7167_v17 = vand.u32 2147483647, %v7016_v52  ;;  %vm7198_vm10 = vcmp.eq.f32.partialorder %v7197_v4, 8.507059e+37  ;;  %v7200_v54 = vor.u32 1.1754944e-38, %v7199_v63 }
 0xef2   :  { %v7220_v7 = vsub.f32 1.0, %v7219_v5  ;;  %v7169_v42 = vand.u32 2147483648, %v7016_v52  ;;  %vm7163_vm13 = vweird.f32 %v7016_v52 }
 0xef4   :  { %v7221_v48 = vmul.f32 %v9134_v32, %v7220_v7  ;;  %v7170_v51 = vor.u32 1.1754944e-38, %v7169_v42 }
 0xef5   :  { %v9136_v28 = vpop.eup %9135 }
 0xef6   :  { %v7189_v45 = vmul.f32 %v9136_v28, %v7022_v40  ;;  %v11733_v20 = vpop.xlane.xlu0 %7012  ;;  %v7222_v6 = vadd.f32 %v9134_v32, %v7221_v48  ;;  %vm7194_vm5 = vweird.f32 %v9136_v28 }
 0xef7   :  { %9139 = vrcp.f32 %v11733_v20  ;;  %v11736_v21 = vpop.xlane.xlu1 %7003  ;;  %v9138_v26 = vpop.eup %9137  ;;  %vm7195_vm9 = vmor %vm7193_vm8, %vm7194_vm5  ;;  %v7152_v48 = vand.u32 2147483647, %v11733_v20 }
 0xef8   :  { %v7190_v49 = vsub.f32 1.0, %v7189_v45  ;;  %9141 = vrcp.f32 %v11736_v21  ;;  %v7226_v25 = vsel %vm7225_vm2, %v9134_v32, %v7222_v6  ;;  %v7159_v30 = vmul.f32 %v9138_v26, %v7016_v52 }
 0xef9   :  { %v7231_v62 = vsel %vm7228_vm15, %v7230_v46, %v7226_v25  ;;  %vm7164_vm7 = vweird.f32 %v9138_v26  ;;  %vm7168_vm2 = vcmp.eq.f32.partialorder %v7167_v17, 8.507059e+37  ;;  %v7107_v4 = vand.u32 2147483647, %v11736_v21 }
 0xefa   :  { %v7191_v33 = vmul.f32 %v9136_v28, %v7190_v49  ;;  %v11740_v12 = vmul.f32 %v11635_v56, %v7231_v62  ;;  %v7160_v59 = vsub.f32 1.0, %v7159_v30  ;;  %vm7165_vm15 = vmor %vm7163_vm13, %vm7164_vm7  ;;  %vm7103_vm7 = vweird.f32 %v11736_v21 }
 0xefb   :  { %vm7153_vm13 = vcmp.eq.f32.partialorder %v7152_v48, 8.507059e+37 }
 0xefc   :  { %v7192_v19 = vadd.f32 %v9136_v28, %v7191_v33  ;;  %8457 = vst.msk [vmem:[%s12176_s19 + $0xe0] sm:$0xff] %vm2775_vm4, %v11740_v12  ;;  %v7161_v16 = vmul.f32 %v9138_v26, %v7160_v59 }
 0xefd   :  { %v9140_v23 = vpop.eup %9139 }
 0xefe   :  { %v9142_v35 = vpop.eup %9141  ;;  %v7196_v34 = vsel %vm7195_vm9, %v9136_v28, %v7192_v19  ;;  %v7144_v56 = vmul.f32 %v9140_v23, %v11733_v20  ;;  %v7162_v7 = vadd.f32 %v9138_v26, %v7161_v16  ;;  %v7154_v28 = vand.u32 2147483648, %v11733_v20 }
 0xeff   :  { %v7201_v40 = vsel %vm7198_vm10, %v7200_v54, %v7196_v34  ;;  %v7099_v32 = vmul.f32 %v9142_v35, %v11736_v21  ;;  %vm7149_vm5 = vweird.f32 %v9140_v23  ;;  %vm7104_vm8 = vweird.f32 %v9142_v35 }
 0xf00   :  { %v11750_v5 = vmul.f32 %v11641_v50, %v7201_v40  ;;  %v7145_v11 = vsub.f32 1.0, %v7144_v56  ;;  %v7166_v52 = vsel %vm7165_vm15, %v9138_v26, %v7162_v7  ;;  %v7109_v50 = vand.u32 2147483648, %v11736_v21 }
 0xf01   :  { %v7100_v45 = vsub.f32 1.0, %v7099_v32  ;;  %v7171_v49 = vsel %vm7168_vm2, %v7170_v51, %v7166_v52  ;;  %vm7148_vm9 = vweird.f32 %v11733_v20  ;;  %v7155_v33 = vor.u32 1.1754944e-38, %v7154_v28  ;;  %vm7105_vm2 = vmor %vm7103_vm7, %vm7104_vm8 }
 0xf02   :  { %8455 = vst.msk [vmem:[%s12176_s19 + $0xd0] sm:$0xff] %vm2775_vm4, %v11750_v5  ;;  %v7146_v6 = vmul.f32 %v9140_v23, %v7145_v11  ;;  %v11762_v63 = vmul.f32 %v11645_v58, %v7171_v49  ;;  %vm7150_vm10 = vmor %vm7148_vm9, %vm7149_vm5  ;;  %v7110_v62 = vor.u32 1.1754944e-38, %v7109_v50  ;;  %vm7108_vm15 = vcmp.eq.f32.partialorder %v7107_v4, 8.507059e+37 }
 0xf03   :  { %v7101_v46 = vmul.f32 %v9142_v35, %v7100_v45  ;;  %v7301_v20 = vpack.c.bf16 %v11704_v13, %v11704_v13  ;;  %v6498_v13 = vrot.slane %v11731_v29, 4  ;;  %v6504_v16 = vrot.slane %v11545_v61, 4 }
 0xf04   :  { %v7147_v25 = vadd.f32 %v9140_v23, %v7146_v6  ;;  %8453 = vst.msk [vmem:[%s12176_s19 + $0xc0] sm:$0xff] %vm2775_vm4, %v11762_v63  ;;  %v11791_v51 = vperm.slane %v11405_v39, %v9418_v10  ;;  %v11797_v6 = vperm.slane %v11421_v27, %v9430_v37 }
 0xf05   :  { %v7102_v30 = vadd.f32 %v9142_v35, %v7101_v46  ;;  %v7403_v42 = vunpack.c.l.b16 %v7301_v20  ;;  %v6499_v32 = vsel %vm273_vm1, %v6498_v13, %v11350_v22 }
 0xf06   :  { %v7151_v26 = vsel %vm7150_vm10, %v9140_v23, %v7147_v25  ;;  %v7007_v59 = vpop.xlane.xlu0 %7006  ;;  %v6503_v45 = vperm.slane %v6499_v32, %v9418_v10  ;;  %v6625_v49 = vrot.slane %v11791_v51, 4 }
 0xf07   :  { %v7156_v58 = vsel %vm7153_vm13, %v7155_v33, %v7151_v26  ;;  %v7106_v19 = vsel %vm7105_vm2, %v9142_v35, %v7102_v30  ;;  %9143 = vrcp.f32 %v7007_v59  ;;  %v7124_v29 = vand.u32 2147483648, %v7007_v59 }
 0xf08   :  { %v7157_v17 = vmul.f32 %v11651_v36, %v7156_v58  ;;  %v7111_v21 = vsel %vm7108_vm15, %v7110_v62, %v7106_v19  ;;  %v7122_v28 = vand.u32 2147483647, %v7007_v59  ;;  %vm7118_vm8 = vweird.f32 %v7007_v59 }
 0xf09   :  { %v7112_v54 = vmul.f32 %v11653_v24, %v7111_v21  ;;  %v7125_v46 = vor.u32 1.1754944e-38, %v7124_v29  ;;  %v6637_v58 = vrot.slane %v11797_v6, 4  ;;  %v7307_v21 = vpack.c.bf16 %v11740_v12, %v11740_v12 }
 0xf0a   :  { %8452 = vst.msk [vmem:[%s12176_s19 + $0xb8] sm:$0x1] %vm2779_vm6, %v7157_v17  ;;  %v7302_v23 = vpack.c.bf16 %v7157_v17, %v7157_v17  ;;  %vm7123_vm10 = vcmp.eq.f32.partialorder %v7122_v28, 8.507059e+37 }
 0xf0b   :  { %8449 = vst.msk [vmem:[%s12176_s19 + $0xa0] sm:$0xff] %vm2775_vm4, %v7112_v54  ;;  %v7299_v39 = vpack.c.bf16 %v7112_v54, %v7112_v54 }
 0xf0c   :  { %v7404_v35 = vunpack.c.l.b16 %v7302_v23  ;;  %v11811_v23 = vperm.slane %v11430_v31, %v9430_v37 }
 0xf0d   :  { %v9144_v36 = vpop.eup %9143  ;;  %v7373_v54 = vunpack.c.l.b16 %v7299_v39  ;;  %v11838_v39 = vunpack.c.l.b16 %v7307_v21 }
 0xf0e   :  { %v7405_v34 = vpack.c.b16 %v7404_v35, %v7403_v42  ;;  %v7114_v24 = vmul.f32 %v9144_v36, %v7007_v59  ;;  %v7034_v56 = vpop.xlane.xlu0 %7033  ;;  %vm7119_vm5 = vweird.f32 %v9144_v36 }
 0xf0f   :  { %v6364_v40 = vpop.permute.xlu1 %6363  ;;  %9145 = vrcp.f32 %v7034_v56  ;;  %vm7120_vm9 = vmor %vm7118_vm8, %vm7119_vm5  ;;  %v7257_v27 = vand.u32 2147483647, %v7034_v56  ;;  %v7259_v20 = vand.u32 2147483648, %v7034_v56  ;;  %vm7253_vm13 = vweird.f32 %v7034_v56 }
 0xf10   :  { %8464 = vmatmul.msk.bf16.vlgmr.msra.gmra.mxu0 %vm2775_vm4, %v7405_v34  ;;  %v7115_v7 = vsub.f32 1.0, %v7114_v24  ;;  %v6505_v11 = vsel %vm273_vm1, %v6504_v16, %v6364_v40 }
 0xf11   :  { %v6509_v48 = vperm.slane %v6505_v11, %v9418_v10  ;;  %vm11820_vm2 = vcmp.eq.f32.partialorder %v7257_v27, 8.507059e+37  ;;  %v7260_v16 = vor.u32 1.1754944e-38, %v7259_v20 }
 0xf12   :  { %v7116_v61 = vmul.f32 %v9144_v36, %v7115_v7 }
 0xf13   :  { %v6510_v52 = vrot.slane %v6509_v48, 4 }
 0xf14   :  { %v7117_v22 = vadd.f32 %v9144_v36, %v7116_v61 }
 0xf15   :  { %v9146_v50 = vpop.eup %9145  ;;  %v6511_v4 = vsel %vm273_vm1, %v6510_v52, %v6503_v45 }
 0xf16   :  { %v7121_v25 = vsel %vm7120_vm9, %v9144_v36, %v7117_v22  ;;  %v7249_v33 = vmul.f32 %v9146_v50, %v7034_v56  ;;  %v6515_v30 = vperm.slane %v6511_v4, %v9430_v37  ;;  %v11802_v26 = vpop.xlane.xlu0 %7030  ;;  %vm7254_vm7 = vweird.f32 %v9146_v50 }
 0xf17   :  { %v7126_v62 = vsel %vm7123_vm10, %v7125_v46, %v7121_v25  ;;  %9147 = vrcp.f32 %v11802_v26  ;;  %v7242_v24 = vand.u32 2147483647, %v11802_v26  ;;  %vm7255_vm15 = vmor %vm7253_vm13, %vm7254_vm7  ;;  %v7244_v11 = vand.u32 2147483648, %v11802_v26 }
 0xf18   :  { %v7127_v19 = vmul.f32 %v11667_v15, %v7126_v62  ;;  %v7250_v59 = vsub.f32 1.0, %v7249_v33  ;;  %v6605_v17 = vrot.slane %v6515_v30, 4  ;;  %v6641_v22 = vrot.slane %v11811_v23, 4 }
 0xf19   :  { %vm7238_vm5 = vweird.f32 %v11802_v26  ;;  %vm11847_vm8 = vcmp.eq.f32.partialorder %v7242_v24, 8.507059e+37  ;;  %v7245_v62 = vor.u32 1.1754944e-38, %v7244_v11 }
 0xf1a   :  { %8450 = vst.msk [vmem:[%s12176_s19 + $0xa8] sm:$0x1] %vm2779_vm6, %v7127_v19  ;;  %v7300_v42 = vpack.c.bf16 %v7127_v19, %v7127_v19  ;;  %v7251_v35 = vmul.f32 %v9146_v50, %v7250_v59  ;;  %v6606_v15 = vsel %vm273_vm1, %v6605_v17, %v11387_v41  ;;  %v6643_v13 = vsel %vm273_vm1, 0.0, %v6605_v17 }
 0xf1b   :  { %v6610_v31 = vperm.slane %v6606_v15, %v9418_v10  ;;  %v6647_v36 = vperm.slane %v6643_v13, %v9418_v10 }
 0xf1c   :  { %v7252_v34 = vadd.f32 %v9146_v50, %v7251_v35  ;;  %v7374_v40 = vunpack.c.l.b16 %v7300_v42 }
 0xf1d   :  { %v9148_v32 = vpop.eup %9147  ;;  %v6623_v41 = vrot.slane %v6610_v31, 4  ;;  %v6626_v7 = vsel %vm273_vm1, %v6610_v31, %v6625_v49  ;;  %v6653_v56 = vperm.slane %v6647_v36, %v9430_v37  ;;  %v6648_v48 = vrot.slane %v6647_v36, 4 }
 0xf1e   :  { %v7256_v29 = vsel %vm7255_vm15, %v9146_v50, %v7252_v34  ;;  %v7234_v61 = vmul.f32 %v9148_v32, %v11802_v26  ;;  %v11832_v28 = vpop.xlane.xlu0 %7018  ;;  %v7375_v45 = vpack.c.b16 %v7374_v40, %v7373_v54  ;;  %v6634_v30 = vperm.slane %v6626_v7, %v9430_v37 }
 0xf1f   :  { %v7261_v52 = vsel %vm11820_vm2, %v7260_v16, %v7256_v29  ;;  %9149 = vrcp.f32 %v11832_v28  ;;  %v6624_v50 = vsel %vm273_vm1, %v6623_v41, %v11791_v51  ;;  %v6658_v33 = vrot.slane %v6653_v56, 4 }
 0xf20   :  { %v11841_v49 = vmul.f32 %v11677_v38, %v7261_v52  ;;  %v7235_v46 = vsub.f32 1.0, %v7234_v61  ;;  %8463 = vmatmul.msk.bf16.vlgmr.msrb.gmra.mxu3 %vm2775_vm4, %v7375_v45  ;;  %v6630_v25 = vperm.slane %v6624_v50, %v9430_v37  ;;  %vm7239_vm9 = vweird.f32 %v9148_v32 }
 0xf21   :  { %v6649_v51 = vsel %vm273_vm1, 0.0, %v6648_v48  ;;  %v7182_v27 = vand.u32 2147483647, %v11832_v28  ;;  %v6659_v59 = vsel %vm273_vm1, 0.0, %v6658_v33  ;;  %v6639_v20 = vrot.slane %v6634_v30, 4  ;;  %vm7240_vm10 = vmor %vm7238_vm5, %vm7239_vm9 }
 0xf22   :  { %8459 = vst.msk [vmem:[%s12176_s19 + $0xf0] sm:$0xff] %vm2775_vm4, %v11841_v49  ;;  %v7236_v38 = vmul.f32 %v9148_v32, %v7235_v46  ;;  %v6638_v19 = vsel %vm273_vm1, %v6630_v25, %v6637_v58  ;;  %v7184_v21 = vand.u32 2147483648, %v11832_v28  ;;  %v6673_v42 = vpack.c.bf16 %v6659_v59, %v6659_v59 }
 0xf23   :  { %v6672_v54 = vpack.c.bf16 %v6638_v19, %v6638_v19  ;;  %v6640_v15 = vsel %vm273_vm1, %v6639_v20, %v11811_v23  ;;  %v6657_v13 = vperm.slane %v6649_v51, %v9430_v37  ;;  %v6635_v12 = vrot.slane %v6630_v25, 4 }
 0xf24   :  { %v7237_v17 = vadd.f32 %v9148_v32, %v7236_v38  ;;  %v6671_v31 = vpack.c.bf16 %v6653_v56, %v6653_v56  ;;  %v7469_v24 = vunpack.c.l.b16 %v6673_v42  ;;  %v6674_v40 = vpack.c.bf16 %v6640_v15, %v6640_v15 }
 0xf25   :  { %v9150_v35 = vpop.eup %9149  ;;  %v7468_v34 = vunpack.c.l.b16 %v6672_v54  ;;  %v6675_v41 = vpack.c.bf16 %v6657_v13, %v6657_v13  ;;  %v6636_v23 = vsel %vm273_vm1, %v6635_v12, %v11797_v6  ;;  %v6642_v52 = vsel %vm273_vm1, %v6634_v30, %v6641_v22 }
 0xf26   :  { %v7241_v58 = vsel %vm7240_vm10, %v9148_v32, %v7237_v17  ;;  %v7174_v36 = vmul.f32 %v9150_v35, %v11832_v28  ;;  %vm7179_vm7 = vweird.f32 %v9150_v35  ;;  %v7439_v11 = vunpack.c.l.b16 %v6671_v31 }
 0xf27   :  { %v7246_v16 = vsel %vm11847_vm8, %v7245_v62, %v7241_v58  ;;  %v7470_v29 = vpack.c.b16 %v7469_v24, %v7468_v34  ;;  %v7498_v56 = vunpack.c.l.b16 %v6674_v40  ;;  %v7499_v32 = vunpack.c.l.b16 %v6675_v41 }
 0xf28   :  { %v7247_v26 = vmul.f32 %v11687_v14, %v7246_v16  ;;  %v7175_v7 = vsub.f32 1.0, %v7174_v36  ;;  %v6670_v48 = vpack.c.bf16 %v6636_v23, %v6636_v23  ;;  %v6660_v46 = vrot.slane %v6657_v13, 4 }
 0xf29   :  { %v7475_v14 = vand.u32 %v7470_v29, %v10013_v2  ;;  %v7500_v50 = vpack.c.b16 %v7499_v32, %v7498_v56  ;;  %v6676_v6 = vpack.c.bf16 %v6642_v52, %v6642_v52  ;;  %vm7178_vm13 = vweird.f32 %v11832_v28 }
 0xf2a   :  { %8458 = vst.msk [vmem:[%s12176_s19 + $0xe8] sm:$0x1] %vm2779_vm6, %v7247_v26  ;;  %v7308_v61 = vpack.c.bf16 %v7247_v26, %v7247_v26  ;;  %v7176_v45 = vmul.f32 %v9150_v35, %v7175_v7  ;;  %v7438_v4 = vunpack.c.l.b16 %v6670_v48  ;;  %v6661_v33 = vsel %vm273_vm1, 0.0, %v6660_v46  ;;  %vm7180_vm2 = vmor %vm7178_vm13, %vm7179_vm7 }
 0xf2b   :  { %v7185_v62 = vor.u32 1.1754944e-38, %v7184_v21  ;;  %7484 = vmatpush.bf16.msra.mxu2 %v7475_v14  ;;  %v7505_v51 = vand.u32 %v7500_v50, %v10013_v2  ;;  %v6677_v22 = vpack.c.bf16 %v6661_v33, %v6661_v33  ;;  %vm7183_vm15 = vcmp.eq.f32.partialorder %v7182_v27, 8.507059e+37 }
 0xf2c   :  { %v7177_v25 = vadd.f32 %v9150_v35, %v7176_v45  ;;  %v7494_v38 = vunpack.c.l.b16 %v7308_v61  ;;  %v7440_v19 = vpack.c.b16 %v7439_v11, %v7438_v4  ;;  %v7528_v28 = vunpack.c.l.b16 %v6676_v6 }
 0xf2d   :  { %7514 = vmatpush.bf16.msra.mxu3 %v7505_v51  ;;  %v7529_v54 = vunpack.c.l.b16 %v6677_v22  ;;  %v7303_v42 = vpack.c.bf16 %v11762_v63, %v11762_v63  ;;  %v7305_v11 = vpack.c.bf16 %v11750_v5, %v11750_v5  ;;  %v7309_v6 = vpack.c.bf16 %v11841_v49, %v11841_v49 }
 0xf2e   :  { %v7181_v30 = vsel %vm7180_vm2, %v9150_v35, %v7177_v25  ;;  %v7495_v59 = vpack.c.b16 %v7494_v38, %v11838_v39  ;;  %v7445_v17 = vand.u32 %v7440_v19, %v10013_v2  ;;  %v7366_v19 = vpop.f32.mrf.mxu2 }
 0xf2f   :  { %v7186_v20 = vsel %vm7183_vm15, %v7185_v62, %v7181_v30  ;;  %v7530_v15 = vpack.c.b16 %v7529_v54, %v7528_v28  ;;  %v7433_v35 = vunpack.c.l.b16 %v7303_v42  ;;  %v7463_v46 = vunpack.c.l.b16 %v7305_v11 }
 0xf30   :  { %v7187_v21 = vmul.f32 %v11701_v3, %v7186_v20  ;;  %7454 = vmatpush.bf16.msra.mxu1 %v7445_v17  ;;  %8467 = vmatmul.msk.bf16.vlgmr.msra.gmra.mxu3 %vm2775_vm4, %v7495_v59  ;;  %v7523_v38 = vunpack.c.l.b16 %v7309_v6  ;;  %v7565_v30 = vrot.slane %v7366_v19, 4 }
 0xf31   :  { %v7535_v39 = vand.u32 %v7530_v15, %v10013_v2 }
 0xf32   :  { %8454 = vst.msk [vmem:[%s12176_s19 + $0xc8] sm:$0x1] %vm2779_vm6, %v7187_v21  ;;  %v7304_v27 = vpack.c.bf16 %v7187_v21, %v7187_v21 }
 0xf33   :  { %7544 = vmatpush.bf16.msrb.mxu0 %v7535_v39 }
 0xf34   :  { %v7434_v13 = vunpack.c.l.b16 %v7304_v27 }
 0xf36   :  { %v7435_v12 = vpack.c.b16 %v7434_v13, %v7433_v35 }
 0xf38   :  { %8465 = vmatmul.msk.bf16.vlgmr.msra.gmra.mxu1 %vm2775_vm4, %v7435_v12 }
 0xf3a   :  { %v7025_v63 = vpop.xlane.xlu1 %7024 }
 0xf3b   :  { %9151 = vrcp.f32 %v7025_v63  ;;  %v7214_v34 = vand.u32 2147483648, %v7025_v63  ;;  %v7212_v24 = vand.u32 2147483647, %v7025_v63  ;;  %vm7208_vm8 = vweird.f32 %v7025_v63 }
 0xf3d   :  { %v7215_v41 = vor.u32 1.1754944e-38, %v7214_v34  ;;  %vm7213_vm10 = vcmp.eq.f32.partialorder %v7212_v24, 8.507059e+37 }
 0xf41   :  { %v9152_v3 = vpop.eup %9151 }
 0xf42   :  { %v7204_v31 = vmul.f32 %v9152_v3, %v7025_v63  ;;  %v7037_v58 = vpop.xlane.xlu1 %7036  ;;  %vm7209_vm5 = vweird.f32 %v9152_v3 }
 0xf43   :  { %9153 = vrcp.f32 %v7037_v58  ;;  %vm7210_vm9 = vmor %vm7208_vm8, %vm7209_vm5  ;;  %v7274_v32 = vand.u32 2147483648, %v7037_v58  ;;  %v7272_v45 = vand.u32 2147483647, %v7037_v58  ;;  %vm7268_vm13 = vweird.f32 %v7037_v58 }
 0xf44   :  { %v7205_v36 = vsub.f32 1.0, %v7204_v31 }
 0xf45   :  { %v7275_v50 = vor.u32 1.1754944e-38, %v7274_v32  ;;  %vm7273_vm15 = vcmp.eq.f32.partialorder %v7272_v45, 8.507059e+37 }
 0xf46   :  { %v7206_v16 = vmul.f32 %v9152_v3, %v7205_v36 }
 0xf48   :  { %v7207_v40 = vadd.f32 %v9152_v3, %v7206_v16 }
 0xf49   :  { %v9154_v2 = vpop.eup %9153 }
 0xf4a   :  { %v7211_v26 = vsel %vm7210_vm9, %v9152_v3, %v7207_v40  ;;  %v7264_v7 = vmul.f32 %v9154_v2, %v7037_v58  ;;  %vm7269_vm7 = vweird.f32 %v9154_v2 }
 0xf4b   :  { %v7216_v23 = vsel %vm7213_vm10, %v7215_v41, %v7211_v26  ;;  %vm7270_vm2 = vmor %vm7268_vm13, %vm7269_vm7  ;;  %vm12240_vm10 = vcmask 523264  }
 0xf4c   :  { %v7217_v29 = vmul.f32 %v11723_v0, %v7216_v23  ;;  %v7265_v56 = vsub.f32 1.0, %v7264_v7  ;;  %vm12241_vm7 = vmmov %vm12240_vm10 }
 0xf4e   :  { %8456 = vst.msk [vmem:[%s12176_s19 + $0xd8] sm:$0x1] %vm2779_vm6, %v7217_v29  ;;  %v7306_v48 = vpack.c.bf16 %v7217_v29, %v7217_v29  ;;  %v7266_v61 = vmul.f32 %v9154_v2, %v7265_v56 }
 0xf50   :  { %v7267_v52 = vadd.f32 %v9154_v2, %v7266_v61  ;;  %v7464_v14 = vunpack.c.l.b16 %v7306_v48 }
 0xf52   :  { %v7271_v5 = vsel %vm7270_vm2, %v9154_v2, %v7267_v52  ;;  %v7465_v0 = vpack.c.b16 %v7464_v14, %v7463_v46 }
 0xf53   :  { %v7276_v4 = vsel %vm7273_vm15, %v7275_v50, %v7271_v5 }
 0xf54   :  { %v7277_v25 = vmul.f32 %v11727_v18, %v7276_v4  ;;  %8466 = vmatmul.msk.bf16.vlgmr.msra.gmra.mxu2 %vm2775_vm4, %v7465_v0  ;;  %v7336_v18 = vpop.f32.mrf.mxu1 }
 0xf55   :  { %v7553_v28 = vrot.slane %v7336_v18, 4 }
 0xf56   :  { %8460 = vst.msk [vmem:[%s12176_s19 + $0xf8] sm:$0x1] %vm2779_vm6, %v7277_v25  ;;  %v7310_v33 = vpack.c.bf16 %v7277_v25, %v7277_v25  ;;  %s12236_s19 = smov 16  }
 0xf58   :  { %v7524_v62 = vunpack.c.l.b16 %v7310_v33 }
 0xf5a   :  { %v7525_v51 = vpack.c.b16 %v7524_v62, %v7523_v38 }
 0xf5c   :  { %8468 = vmatmul.msk.bf16.vlgmr.msrb.gmra.mxu0 %vm2775_vm4, %v7525_v51 }
 0xf8d   :  { %v7426_v22 = vpop.f32.mrf.mxu0 }
 0xf8e   :  { %v7563_v59 = vrot.slane %v7426_v22, 4  ;;  %v7566_v49 = vsel %vm273_vm1, %v7426_v22, %v7565_v30  ;;  %v7338_v30 = vpop.f32.mrf.mxu1 }
 0xf8f   :  { %v7574_v17 = vperm.slane %v7566_v49, %v9418_v10 }
 0xf90   :  { %v7564_v20 = vsel %vm273_vm1, %v7563_v59, %v7366_v19 }
 0xf91   :  { %v7570_v54 = vperm.slane %v7564_v20, %v9418_v10  ;;  %v7587_v27 = vrot.slane %v7574_v17, 4 }
 0xf93   :  { %v7575_v13 = vrot.slane %v7570_v54, 4 }
 0xfa3   :  { %v7396_v42 = vpop.f32.mrf.mxu3 }
 0xfa4   :  { %v7551_v21 = vrot.slane %v7396_v42, 4  ;;  %v7554_v15 = vsel %vm273_vm1, %v7396_v42, %v7553_v28  ;;  %v7428_v28 = vpop.f32.mrf.mxu0 }
 0xfa5   :  { %v7562_v39 = vperm.slane %v7554_v15, %v9418_v10 }
 0xfa6   :  { %v7552_v35 = vsel %vm273_vm1, %v7551_v21, %v7336_v18  ;;  %v7368_v18 = vpop.f32.mrf.mxu2  ;;  %v7613_v21 = vrot.slane %v7428_v28, 4 }
 0xfa7   :  { %v7558_v12 = vperm.slane %v7552_v35, %v9418_v10  ;;  %v7588_v63 = vsel %vm273_vm1, %v7587_v27, %v7562_v39  ;;  %v7589_v3 = vrot.slane %v7562_v39, 4 }
 0xfa8   :  { %v7594_v31 = vperm.slane %v7588_v63, %v9430_v37 }
 0xfa9   :  { %v7576_v58 = vsel %vm273_vm1, %v7575_v13, %v7558_v12  ;;  %v7577_v36 = vrot.slane %v7558_v12, 4  ;;  %v7590_v34 = vsel %vm273_vm1, %v7574_v17, %v7589_v3  ;;  %v7614_v12 = vsel %vm273_vm1, %v7613_v21, %v7368_v18 }
 0xfaa   :  { %v7582_v16 = vperm.slane %v7576_v58, %v9430_v37  ;;  %v7598_v24 = vperm.slane %v7590_v34, %v9430_v37  ;;  %v7603_v41 = vrot.slane %v7594_v31, 4 }
 0xfab   :  { %v7578_v40 = vsel %vm273_vm1, %v7570_v54, %v7577_v36  ;;  %v7398_v59 = vpop.f32.mrf.mxu3 }
 0xfac   :  { %v7586_v2 = vperm.slane %v7578_v40, %v9430_v37  ;;  %v7605_v26 = vrot.slane %v7598_v24, 4  ;;  %v7599_v7 = vrot.slane %v7582_v16, 4  ;;  %v7604_v32 = vsel %vm273_vm1, 0.0, %v7603_v41 }
 0xfad   :  { %v7607_v27 = vrot.slane %v7398_v59, 4  ;;  %v7618_v24 = vperm.slane %v7614_v12, %v9418_v10 }
 0xfae   :  { %v7601_v23 = vrot.slane %v7586_v2, 4  ;;  %v7606_v11 = vsel %vm273_vm1, 0.0, %v7605_v26  ;;  %v7600_v45 = vsel %vm273_vm1, 0.0, %v7599_v7  ;;  %v7704_v52 = vsel %vm273_vm1, %v7605_v26, %v7594_v31 }
 0xfaf   :  { %v7709_v29 = vrot.slane %v7606_v11, 4  ;;  %v7708_v4 = vperm.slane %v7704_v52, %v9418_v10  ;;  %v7608_v36 = vsel %vm273_vm1, %v7607_v27, %v7338_v30 }
 0xfb0   :  { %v7602_v56 = vsel %vm273_vm1, 0.0, %v7601_v23  ;;  %v7693_v14 = vsel %vm273_vm1, %v7601_v23, %v7582_v16  ;;  %v7612_v23 = vperm.slane %v7608_v36, %v9418_v10 }
 0xfb1   :  { %v7698_v48 = vrot.slane %v7602_v56, 4  ;;  %v7710_v61 = vsel %vm273_vm1, %v7709_v29, %v7604_v32  ;;  %v11945_v6 = vperm.slane %v7693_v14, %v9418_v10  ;;  %v7729_v56 = vrot.slane %v7708_v4, 4 }
 0xfb2   :  { %v11935_v46 = vperm.slane %v7710_v61, %v9418_v10 }
 0xfb3   :  { %v7699_v50 = vsel %vm273_vm1, %v7698_v48, %v7600_v45  ;;  %v7516_v20 = vpop.f32.mrf.mxu3 }
 0xfb4   :  { %v11940_v5 = vperm.slane %v7699_v50, %v9418_v10  ;;  %v7727_v0 = vrot.slane %v11935_v46, 4  ;;  %v7625_v54 = vrot.slane %v7516_v20, 4  ;;  %v7619_v50 = vrot.slane %v7618_v24, 4 }
 0xfb5   :  { %v7456_v49 = vpop.f32.mrf.mxu1 }
 0xfb6   :  { %v7715_v25 = vrot.slane %v11940_v5, 4  ;;  %v7728_v33 = vsel %vm273_vm1, %v7727_v0, %v7708_v4  ;;  %v7627_v17 = vrot.slane %v7456_v49, 4  ;;  %v7626_v15 = vsel %vm273_vm1, %v7625_v54, %v7456_v49 }
 0xfb7   :  { %v11952_v62 = vperm.slane %v7728_v33, %v9430_v37  ;;  %v7632_v63 = vperm.slane %v7626_v15, %v9418_v10  ;;  %v7620_v18 = vsel %vm273_vm1, %v7619_v50, %v7612_v23 }
 0xfb8   :  { %v7716_v38 = vsel %vm273_vm1, %v7715_v25, %v11945_v6  ;;  %v7628_v42 = vsel %vm273_vm1, %v7516_v20, %v7627_v17  ;;  %v7730_v17 = vsel %vm273_vm1, %v11935_v46, %v7729_v56 }
 0xfb9   :  { %v11955_v51 = vperm.slane %v7716_v38, %v9430_v37  ;;  %v7739_v19 = vrot.slane %v11952_v62, 4  ;;  %v7636_v39 = vperm.slane %v7628_v42, %v9418_v10  ;;  %v7651_v2 = vrot.slane %v7632_v63, 4 }
 0xfba   :  { %v7717_v38 = vrot.slane %v11945_v6, 4  ;;  %v7738_v36 = vperm.slane %v7730_v17, %v9430_v37 }
 0xfbb   :  { %v11960_v22 = vsel %vm273_vm1, %v7739_v19, %v11955_v51  ;;  %v7663_v34 = vrot.slane %v7636_v39, 4  ;;  %v7518_v11 = vpop.f32.mrf.mxu3 }
 0xfbc   :  { %v7679_v0 = vrot.slane %v7518_v11, 4 }
 0xfbd   :  { %v7458_v19 = vpop.f32.mrf.mxu1 }
 0xfbe   :  { %v7680_v15 = vsel %vm273_vm1, %v7679_v0, %v7458_v19 }
 0xfd7   :  { %v7486_v35 = vpop.f32.mrf.mxu2 }
 0xfd8   :  { %v7639_v13 = vrot.slane %v7486_v35, 4 }
 0xfd9   :  { %v7546_v3 = vpop.f32.mrf.mxu0 }
 0xfda   :  { %v7637_v31 = vrot.slane %v7546_v3, 4  ;;  %v7640_v58 = vsel %vm273_vm1, %v7546_v3, %v7639_v13  ;;  %v7624_v3 = vperm.slane %v7620_v18, %v9430_v37 }
 0xfdb   :  { %v7648_v16 = vperm.slane %v7640_v58, %v9418_v10 }
 0xfdc   :  { %v7638_v40 = vsel %vm273_vm1, %v7637_v31, %v7486_v35 }
 0xfdd   :  { %v7644_v41 = vperm.slane %v7638_v40, %v9418_v10  ;;  %v7661_v26 = vrot.slane %v7648_v16, 4  ;;  %v7664_v7 = vsel %vm273_vm1, %v7648_v16, %v7663_v34  ;;  %v7684_v34 = vperm.slane %v7680_v15, %v9418_v10 }
 0xfde   :  { %v7672_v29 = vperm.slane %v7664_v7, %v9430_v37 }
 0xfdf   :  { %v7649_v32 = vrot.slane %v7644_v41, 4  ;;  %v7652_v48 = vsel %vm273_vm1, %v7644_v41, %v7651_v2  ;;  %v7662_v61 = vsel %vm273_vm1, %v7661_v26, %v7636_v39  ;;  %v7488_v21 = vpop.f32.mrf.mxu2 }
 0xfe0   :  { %v7660_v45 = vperm.slane %v7652_v48, %v9430_v37  ;;  %v7668_v52 = vperm.slane %v7662_v61, %v9430_v37  ;;  %v7764_v14 = vrot.slane %v7672_v29, 4  ;;  %v7741_v48 = vrot.slane %v11955_v51, 4 }
 0xfe1   :  { %v7650_v25 = vsel %vm273_vm1, %v7649_v32, %v7632_v63  ;;  %v7548_v33 = vpop.f32.mrf.mxu0  ;;  %v7718_v63 = vsel %vm273_vm1, %v11940_v5, %v7717_v38  ;;  %v7743_v32 = vrot.slane %v7738_v36, 4 }
 0xfe2   :  { %v7656_v4 = vperm.slane %v7650_v25, %v9430_v37  ;;  %v7675_v30 = vrot.slane %v7660_v45, 4  ;;  %v7677_v59 = vrot.slane %v7668_v52, 4  ;;  %v7765_v49 = vsel %vm273_vm1, %v7764_v14, %v7668_v52 }
 0xfe3   :  { %v7685_v20 = vrot.slane %v7548_v33, 4  ;;  %v7769_v6 = vperm.slane %v7765_v49, %v9418_v10  ;;  %v7802_v2 = vsel %vm273_vm1, 0.0, %v7764_v14  ;;  %v7726_v41 = vperm.slane %v7718_v63, %v9430_v37 }
 0xfe4   :  { %v7673_v28 = vrot.slane %v7656_v4, 4  ;;  %v7678_v54 = vsel %vm273_vm1, 0.0, %v7677_v59  ;;  %v7753_v42 = vsel %vm273_vm1, %v7675_v30, %v7656_v4  ;;  %v7676_v12 = vsel %vm273_vm1, 0.0, %v7675_v30 }
 0xfe5   :  { %v7758_v27 = vrot.slane %v7678_v54, 4  ;;  %v7686_v39 = vsel %vm273_vm1, %v7685_v20, %v7488_v21  ;;  %v7757_v35 = vperm.slane %v7753_v42, %v9418_v10  ;;  %v7782_v40 = vrot.slane %v7769_v6, 4 }
 0xfe6   :  { %v7674_v13 = vsel %vm273_vm1, 0.0, %v7673_v28  ;;  %v7690_v46 = vperm.slane %v7686_v39, %v9418_v10  ;;  %v7806_v45 = vperm.slane %v7802_v2, %v9418_v10  ;;  %v7745_v59 = vrot.slane %v7726_v41, 4 }
 0xfe7   :  { %v7747_v31 = vrot.slane %v7674_v13, 4  ;;  %v7759_v58 = vsel %vm273_vm1, %v7758_v27, %v7676_v12  ;;  %v7770_v5 = vrot.slane %v7757_v35, 4  ;;  %v7744_v49 = vsel %vm273_vm1, %v7743_v32, %v7726_v41 }
 0xfe8   :  { %v7763_v16 = vperm.slane %v7759_v58, %v9418_v10  ;;  %v7691_v24 = vrot.slane %v7690_v46, 4  ;;  %v7817_v18 = vrot.slane %v7806_v45, 4  ;;  %v7742_v54 = vsel %vm273_vm1, %v11952_v62, %v7741_v48  ;;  %v8555_v58 = vld [vmem:[%s12178_s8 + $0x18] sm:$0xff] }
 0xfe9   :  { %v7748_v26 = vsel %vm273_vm1, %v7747_v31, %v7624_v3  ;;  %v7746_v39 = vsel %vm273_vm1, %v7738_v36, %v7745_v59  ;;  %7912 = vmatpush.bf16.msrb.mxu1 %v8555_v58 }
 0xfea   :  { %v7692_v7 = vsel %vm273_vm1, %v7691_v24, %v7684_v34  ;;  %v7752_v23 = vperm.slane %v7748_v26, %v9418_v10  ;;  %v7784_v11 = vrot.slane %v7763_v16, 4  ;;  %v7783_v29 = vsel %vm273_vm1, %v7782_v40, %v7763_v16 }
 0xfeb   :  { %v7810_v56 = vperm.slane %v7692_v7, %v9430_v37  ;;  %v7789_v61 = vperm.slane %v7783_v29, %v9430_v37 }
 0xfec   :  { %v7772_v52 = vrot.slane %v7752_v23, 4  ;;  %v7785_v14 = vsel %vm273_vm1, %v7769_v6, %v7784_v11  ;;  %v7771_v50 = vsel %vm273_vm1, %v7770_v5, %v7752_v23 }
 0xfed   :  { %v7793_v0 = vperm.slane %v7785_v14, %v9430_v37  ;;  %v7777_v25 = vperm.slane %v7771_v50, %v9430_v37  ;;  %v7794_v33 = vrot.slane %v7789_v61, 4  ;;  %v7814_v38 = vperm.slane %v7810_v56, %v9418_v10 }
 0xfee   :  { %v7773_v19 = vsel %vm273_vm1, %v7757_v35, %v7772_v52 }
 0xfef   :  { %v7781_v51 = vperm.slane %v7773_v19, %v9430_v37  ;;  %v7798_v4 = vrot.slane %v7793_v0, 4  ;;  %v7796_v30 = vrot.slane %v7777_v25, 4  ;;  %v7815_v20 = vrot.slane %v7814_v38, 4 }
 0xff0   :  { %v7795_v17 = vsel %vm273_vm1, %v7794_v33, %v7777_v25  ;;  %v7818_v15 = vsel %vm273_vm1, %v7814_v38, %v7817_v18  ;;  %v7939_v25 = vld [vmem:[#allocation1] sm:$0xff]  ;;  %v12239_v33 = vrot.slane %v10811_v53, 7 }
 0xff1   :  { %v7799_v28 = vsel %vm273_vm1, %v7798_v4, %v7781_v51  ;;  %v7797_v10 = vsel %vm273_vm1, %v7789_v61, %v7796_v30  ;;  %v7800_v42 = vrot.slane %v7781_v51, 4  ;;  %v7816_v27 = vsel %vm273_vm1, %v7815_v20, %v7806_v45  ;;  %7940 = vst [vmem:[#allocation1] ss:$9 sm:$0xff] %v10816_v55 }
 0xff2   :  { %v8983_v6 = vpack.i.bf16 %v7799_v28, %v7744_v49  ;;  %v8978_v21 = vpack.i.bf16 %v7797_v10, %v7742_v54  ;;  %v7822_v13 = vperm.slane %v7816_v27, %v9430_v37  ;;  %v7826_v12 = vperm.slane %v7818_v15, %v9430_v37  ;;  %v8554_v37 = vld [vmem:[%s12178_s8 + $0x10] sm:$0xff]  ;;  %7941 = vst [vmem:[#allocation1 + $0x1] ss:$9 sm:$0xff] %v10811_v53 }
 0xff3   :  { %v7801_v35 = vsel %vm273_vm1, %v7793_v0, %v7800_v42  ;;  %7913 = vmatpush.bf16.msrb.mxu1 %v8554_v37  ;;  %7942 = vst [vmem:[#allocation1 + $0x2] ss:$9 sm:$0xff] %v4198_v8  ;;  %v9006_v8 = vld [vmem:[%s12177_s9 + $0x1] ss:$0 sm:$0xff]  ;;  %v8556_v37 = vld [vmem:[%s12182_s12 + $0x10] sm:$0xff] }
 0xff4   :  { %8984 = vrot.lane.b32.xlu2 %v8983_v6, %s12236_s19  ;;  %8979 = vrot.lane.b32.xlu1 %v8978_v21, %s12237_s29  ;;  %v8988_v62 = vpack.i.bf16 %v7801_v35, %v7746_v39  ;;  %v7827_v46 = vrot.slane %v7822_v13, 4  ;;  %v7829_v63 = vrot.slane %v7826_v12, 4  ;;  %7943 = vst [vmem:[#allocation1 + $0x3] ss:$9 sm:$0xff] %v4199_v47 }
 0xff5   :  { %7944 = vst [vmem:[#allocation1 + $0x4] ss:$9 sm:$0xff] %v4200_v1 }
 0xff6   :  { %8989 = vrot.lane.b32.xlu0 %v8988_v62, %s12238_s4  ;;  %v7828_v3 = vsel %vm273_vm1, 0.0, %v7827_v46  ;;  %v7830_v31 = vsel %vm273_vm1, 0.0, %v7829_v63  ;;  %7945 = vst [vmem:[#allocation1 + $0x5] ss:$9 sm:$0xff] %v4201_v9 }
 0xff7   :  { %7946 = vst [vmem:[#allocation1 + $0x6] ss:$9 sm:$0xff] %v4202_v44 }
 0xff8   :  { %7947 = vst [vmem:[#allocation1 + $0x7] ss:$9 sm:$0xff] %v4203_v57 }
 0xffc   :  { %7850 = vrot.lane.b32.xlu2 %v7826_v12, %s12236_s19  ;;  %7838 = vrot.lane.b32.xlu1 %v7828_v3, %s12237_s29  ;;  %v8557_v3 = vld [vmem:[%s12182_s12 + $0x18] sm:$0xff] }
 0xffd   :  { %8076 = vmatpush.bf16.msrb.mxu2 %v8557_v3 }
 0xffe   :  { %7862 = vrot.lane.b32.xlu0 %v7830_v31, %s12238_s4 }
 0xfff   :  { %v7948_v55 = vld [vmem:[#allocation1] sm:$0xff] }
0x1000   :  { %7949 = vst [vmem:[#allocation1] ss:$9 sm:$0xff] %v12239_v33 }
0x1001   :  { %7950 = vst [vmem:[#allocation1 + $0x1] ss:$9 sm:$0xff] %v10842_v43  ;;  %8077 = vmatpush.bf16.msrb.mxu2 %v8556_v37 }
0x1008   :  { %v7951_v4 = vld [vmem:[#allocation1] sm:$0xff] }
0x104e   :  { %v8985_v36 = vpop.permute.xlu2 %8984 }
0x104f   :  { %v8987_v40 = vunpack.i.h.bf16 %v8985_v36  ;;  %v8986_v2 = vunpack.i.l.bf16 %v8985_v36 }
0x1056   :  { %v7851_v52 = vpop.permute.xlu2 %7850 }
0x1066   :  { %v8980_v34 = vpop.permute.xlu1 %8979 }
0x1067   :  { %v8982_v16 = vunpack.i.h.bf16 %v8980_v34  ;;  %v8981_v24 = vunpack.i.l.bf16 %v8980_v34 }
0x1068   :  { %v8990_v41 = vpop.permute.xlu0 %8989 }
0x1069   :  { %v7867_v26 = vsel %vm2562_vm3, %v11960_v22, %v8981_v24  ;;  %v7868_v5 = vsel %vm2562_vm3, %v7795_v17, %v8982_v16  ;;  %v8992_v7 = vunpack.i.h.bf16 %v8990_v41  ;;  %v8991_v23 = vunpack.i.l.bf16 %v8990_v41 }
0x106a   :  { %v7870_v11 = vsel %vm3755_vm11, %v7867_v26, %v8986_v2  ;;  %v7871_v29 = vsel %vm3755_vm11, %v7868_v5, %v8987_v40 }
0x106b   :  { %v7873_v56 = vsel %vm3759_vm12, %v7870_v11, %v8991_v23  ;;  %v7874_v32 = vsel %vm3759_vm12, %v7871_v29, %v8992_v7 }
0x106c   :  { %v7876_v48 = vpack.c.bf16 %v7874_v32, %v7873_v56 }
0x106e   :  { %8482 = vmatmul.msk.bf16.vlgmr.msrb.gmra.mxu1 %vm141_vm0, %v7876_v48  ;;  %v7839_v61 = vpop.permute.xlu1 %7838 }
0x106f   :  { %v7869_v45 = vsel %vm2562_vm3, %v7822_v13, %v7839_v61 }
0x1070   :  { %v7863_v22 = vpop.permute.xlu0 %7862  ;;  %v7872_v14 = vsel %vm3755_vm11, %v7869_v45, %v7851_v52  ;;  %v9007_v45 = vld [vmem:[%s12179_s10 + $0x1] ss:$0 sm:$0xff] }
0x1071   :  { %v7875_v50 = vsel %vm3759_vm12, %v7872_v14, %v7863_v22 }
0x1072   :  { %v7877_v0 = vpack.c.bf16 %v7875_v50, %v7875_v50 }
0x107e   :  { %8483 = vmatmul.msk.bf16.gmra.mxu1 %vm141_vm0, %v7877_v0 }
0x10eb   :  { %v7915_v47 = vpop.f32.mrf.mxu1 }
0x10ec   :  { %v7916_v1 = vadd.f32 %v9006_v8, %v7915_v47 }
0x10ee   :  { %v7955_v38 = vadd.f32 %v7939_v25, %v7916_v1  ;;  %v9008_v25 = vld [vmem:[%s12180_s11 + $0x1] ss:$0 sm:$0xff] }
0x10f0   :  { %v7962_v9 = vsel %vm141_vm0, %v7955_v38, 0.0 }
0x10f1   :  { %7963 = vadd.xlane.f32.xlu1 %v7962_v9 }
0x10f3   :  { %v7917_v44 = vpop.f32.mrf.mxu1 }
0x10f4   :  { %v7918_v19 = vadd.f32 %v9006_v8, %v7917_v44 }
0x10f6   :  { %v7956_v51 = vadd.f32 %v7948_v55, %v7918_v19 }
0x10f8   :  { %v7965_v57 = vsel %vm141_vm0, %v7956_v51, 0.0 }
0x10f9   :  { %7966 = vadd.xlane.f32.xlu2 %v7965_v57 }
0x10fb   :  { %v7920_v53 = vpop.f32.mrf.mxu1 }
0x10fc   :  { %v7921_v30 = vadd.f32 %v9006_v8, %v7920_v53 }
0x10fe   :  { %v7957_v43 = vadd.f32 %v7951_v4, %v7921_v30 }
0x1100   :  { %v7968_v59 = vsel %vm3851_vm14, %v7957_v43, 0.0 }
0x1101   :  { %7969 = vadd.xlane.f32.xlu0 %v7968_v59  ;;  %v8560_v59 = vld [vmem:[%s12184_s14 + $0x30] sm:$0xff] }
0x1103   :  { %v7922_v49 = vpop.f32.mrf.mxu1 }
0x1104   :  { %v8559_v49 = vld [vmem:[%s12184_s14 + $0x28] sm:$0xff] }
0x1164   :  { %v7964_v18 = vpop.xlane.xlu1 %7963 }
0x1165   :  { %v7971_v20 = vmul.f32 %v7964_v18, %v10704_v60  ;;  %v8558_v18 = vld [vmem:[%s12184_s14 + $0x20] sm:$0xff] }
0x1167   :  { %v7974_v17 = vsub.f32 %v7955_v38, %v7971_v20 }
0x1169   :  { %v7977_v28 = vmul.f32 %v7974_v17, %v7974_v17 }
0x116b   :  { %v7980_v54 = vsel %vm141_vm0, %v7977_v28, 0.0 }
0x116c   :  { %v7967_v10 = vpop.xlane.xlu2 %7966  ;;  %7981 = vadd.xlane.f32.xlu2 %v7980_v54 }
0x116d   :  { %v7972_v42 = vmul.f32 %v7967_v10, %v10704_v60 }
0x116f   :  { %v7975_v6 = vsub.f32 %v7956_v51, %v7972_v42 }
0x1171   :  { %v7978_v21 = vmul.f32 %v7975_v6, %v7975_v6 }
0x1173   :  { %v7983_v15 = vsel %vm141_vm0, %v7978_v21, 0.0 }
0x1174   :  { %7984 = vadd.xlane.f32.xlu1 %v7983_v15  ;;  %v7970_v27 = vpop.xlane.xlu0 %7969 }
0x1175   :  { %v7973_v39 = vmul.f32 %v7970_v27, %v10704_v60 }
0x1177   :  { %v7976_v35 = vsub.f32 %v7957_v43, %v7973_v39  ;;  %v8561_v43 = vld [vmem:[%s12184_s14 + $0x38] sm:$0xff] }
0x1178   :  { %8141 = vmatpush.bf16.msrb.mxu3 %v8561_v43  ;;  %v9011_v43 = vld [vmem:[%s12185_s16 + $0x1] ss:$0 sm:$0xff] }
0x1179   :  { %v7979_v13 = vmul.f32 %v7976_v35, %v7976_v35 }
0x117b   :  { %v7986_v62 = vsel %vm3851_vm14, %v7979_v13, 0.0 }
0x117c   :  { %7987 = vadd.xlane.f32.xlu0 %v7986_v62  ;;  %8142 = vmatpush.bf16.msrb.mxu3 %v8560_v59  ;;  %v9010_v62 = vld [vmem:[%s12183_s15 + $0x1] ss:$0 sm:$0xff] }
0x1180   :  { %8143 = vmatpush.bf16.msrb.mxu3 %v8559_v49 }
0x1184   :  { %8144 = vmatpush.bf16.msrb.mxu3 %v8558_v18  ;;  %v9012_v18 = vld [vmem:[%s12186_s17 + $0x1] ss:$0 sm:$0xff] }
0x11df   :  { %v7982_v12 = vpop.xlane.xlu2 %7981 }
0x11e0   :  { %v7989_v46 = vmul.f32 %v7982_v12, %v10704_v60 }
0x11e2   :  { %v7992_v63 = vadd.f32 1e-05, %v7989_v46 }
0x11e4   :  { %9155 = vrsqrt.f32 %v7992_v63  ;;  %vm8001_vm3 = vweird.f32 %v7992_v63 }
0x11e7   :  { %v7985_v31 = vpop.xlane.xlu1 %7984 }
0x11e8   :  { %v7990_v58 = vmul.f32 %v7985_v31, %v10704_v60 }
0x11ea   :  { %v9156_v36 = vpop.eup %9155  ;;  %v7993_v34 = vadd.f32 1e-05, %v7990_v58 }
0x11eb   :  { %v7996_v16 = vmul.f32 %v9156_v36, %v7992_v63  ;;  %vm8002_vm1 = vweird.f32 %v9156_v36 }
0x11ec   :  { %9157 = vrsqrt.f32 %v7993_v34  ;;  %vm8003_vm4 = vmor %vm8001_vm3, %vm8002_vm1  ;;  %vm8011_vm11 = vweird.f32 %v7993_v34 }
0x11ed   :  { %v7997_v24 = vmul.f32 %v9156_v36, %v7996_v16 }
0x11ef   :  { %v7998_v40 = vmul.f32 0.5, %v7997_v24  ;;  %v7988_v2 = vpop.xlane.xlu0 %7987 }
0x11f0   :  { %v7991_v41 = vmul.f32 %v7988_v2, %v10704_v60 }
0x11f1   :  { %v7999_v26 = vsub.f32 1.5, %v7998_v40 }
0x11f2   :  { %v9158_v5 = vpop.eup %9157  ;;  %v7994_v7 = vadd.f32 1e-05, %v7991_v41 }
0x11f3   :  { %v8000_v23 = vmul.f32 %v9156_v36, %v7999_v26  ;;  %v8006_v11 = vmul.f32 %v9158_v5, %v7993_v34  ;;  %vm8012_vm6 = vweird.f32 %v9158_v5 }
0x11f4   :  { %9159 = vrsqrt.f32 %v7994_v7  ;;  %vm8013_vm12 = vmor %vm8011_vm11, %vm8012_vm6  ;;  %vm8021_vm8 = vweird.f32 %v7994_v7 }
0x11f5   :  { %v8007_v29 = vmul.f32 %v9158_v5, %v8006_v11  ;;  %v8004_v56 = vsel %vm8003_vm4, %v9156_v36, %v8000_v23 }
0x11f6   :  { %v8025_v52 = vmul.f32 %v8004_v56, %v7974_v17  ;;  %v9009_v17 = vld [vmem:[%s12231_s2 + $0x1] ss:$0 sm:$0xff] }
0x11f7   :  { %v8008_v32 = vmul.f32 0.5, %v8007_v29 }
0x11f8   :  { %v8031_v55 = vmul.f32 %v9007_v45, %v8025_v52 }
0x11f9   :  { %v8009_v48 = vsub.f32 1.5, %v8008_v32 }
0x11fa   :  { %v9160_v61 = vpop.eup %9159  ;;  %v8037_v38 = vadd.f32 %v9008_v25, %v8031_v55 }
0x11fb   :  { %v8010_v22 = vmul.f32 %v9158_v5, %v8009_v48  ;;  %v8016_v14 = vmul.f32 %v9160_v61, %v7994_v7  ;;  %vm8022_vm5 = vweird.f32 %v9160_v61 }
0x11fc   :  { %vm8023_vm9 = vmor %vm8021_vm8, %vm8022_vm5 }
0x11fd   :  { %v8014_v50 = vsel %vm8013_vm12, %v9158_v5, %v8010_v22  ;;  %v8017_v0 = vmul.f32 %v9160_v61, %v8016_v14  ;;  %vm12242_vm12 = vcmask 253952  }
0x11fe   :  { %v8026_v33 = vmul.f32 %v8014_v50, %v7975_v6  ;;  %vm12243_vm5 = vmmov %vm12242_vm12 }
0x11ff   :  { %v8018_v8 = vmul.f32 0.5, %v8017_v0 }
0x1200   :  { %v8032_v47 = vmul.f32 %v9007_v45, %v8026_v33 }
0x1201   :  { %v8019_v1 = vsub.f32 1.5, %v8018_v8 }
0x1202   :  { %v8038_v9 = vadd.f32 %v9008_v25, %v8032_v47 }
0x1203   :  { %v8020_v44 = vmul.f32 %v9160_v61, %v8019_v1 }
0x1204   :  { %v8040_v19 = vpack.c.bf16 %v8038_v9, %v8037_v38 }
0x1205   :  { %v8024_v51 = vsel %vm8023_vm9, %v9160_v61, %v8020_v44 }
0x1206   :  { %8499 = vmatmul.msk.bf16.vlgmr.msrb.gmra.mxu2 %vm141_vm0, %v8040_v19  ;;  %v8027_v57 = vmul.f32 %v8024_v51, %v7976_v35 }
0x1208   :  { %v8033_v53 = vmul.f32 %v9007_v45, %v8027_v57 }
0x120a   :  { %v8039_v4 = vadd.f32 %v9008_v25, %v8033_v53 }
0x120c   :  { %v8041_v30 = vpack.c.bf16 %v8039_v4, %v8039_v4 }
0x1216   :  { %8500 = vmatmul.msk.bf16.gmra.mxu2 %vm141_vm0, %v8041_v30 }
0x1289   :  { %v8079_v20 = vpop.f32.mrf.mxu2 }
0x128a   :  { %v8080_v28 = vadd.f32 %v9009_v17, %v8079_v20 }
0x128c   :  { %v8088_v42 = vmax.f32 %v8080_v28, 0.0 }
0x1291   :  { %v8081_v54 = vpop.f32.mrf.mxu2 }
0x1292   :  { %v8082_v10 = vadd.f32 %v9009_v17, %v8081_v54 }
0x1294   :  { %v8089_v6 = vmax.f32 %v8082_v10, 0.0 }
0x1296   :  { %v8091_v21 = vpack.c.bf16 %v8089_v6, %v8088_v42 }
0x1298   :  { %8526 = vmatmul.msk.bf16.vlgmr.msrb.gmra.mxu3 %vm12240_vm10, %v8091_v21 }
0x1299   :  { %v8084_v15 = vpop.f32.mrf.mxu2 }
0x129a   :  { %v8085_v27 = vadd.f32 %v9009_v17, %v8084_v15 }
0x129c   :  { %v8090_v35 = vmax.f32 %v8085_v27, 0.0 }
0x129e   :  { %v8092_v13 = vpack.c.bf16 %v8090_v35, %v8090_v35 }
0x12a1   :  { %v8086_v39 = vpop.f32.mrf.mxu2 }
0x12a8   :  { %8527 = vmatmul.msk.bf16.gmra.mxu3 %vm12241_vm7, %v8092_v13 }
0x131b   :  { %v8146_v12 = vpop.f32.mrf.mxu3 }
0x131c   :  { %v8147_v46 = vadd.f32 %v9010_v62, %v8146_v12 }
0x131e   :  { %v8155_v63 = vadd.f32 %v8147_v46, %v8037_v38 }
0x1320   :  { %v8162_v3 = vsel %vm141_vm0, %v8155_v63, 0.0 }
0x1321   :  { %8163 = vadd.xlane.f32.xlu2 %v8162_v3 }
0x1323   :  { %v8148_v31 = vpop.f32.mrf.mxu3 }
0x1324   :  { %v8149_v58 = vadd.f32 %v9010_v62, %v8148_v31 }
0x1326   :  { %v8156_v37 = vadd.f32 %v8149_v58, %v8038_v9 }
0x1328   :  { %v8165_v36 = vsel %vm141_vm0, %v8156_v37, 0.0 }
0x1329   :  { %8166 = vadd.xlane.f32.xlu1 %v8165_v36 }
0x132b   :  { %v8151_v34 = vpop.f32.mrf.mxu3 }
0x132c   :  { %v8152_v16 = vadd.f32 %v9010_v62, %v8151_v34 }
0x132e   :  { %v8157_v24 = vadd.f32 %v8152_v16, %v8039_v4 }
0x1330   :  { %v8168_v40 = vsel %vm3851_vm14, %v8157_v24, 0.0 }
0x1331   :  { %8169 = vadd.xlane.f32.xlu0 %v8168_v40 }
0x1333   :  { %v8153_v2 = vpop.f32.mrf.mxu3 }
0x1394   :  { %v8164_v41 = vpop.xlane.xlu2 %8163 }
0x1395   :  { %v8171_v26 = vmul.f32 %v8164_v41, %v10704_v60 }
0x1397   :  { %v8174_v5 = vsub.f32 %v8155_v63, %v8171_v26 }
0x1399   :  { %v8177_v7 = vmul.f32 %v8174_v5, %v8174_v5 }
0x139b   :  { %v8180_v23 = vsel %vm141_vm0, %v8177_v7, 0.0 }
0x139c   :  { %v8167_v11 = vpop.xlane.xlu1 %8166  ;;  %8181 = vadd.xlane.f32.xlu2 %v8180_v23 }
0x139d   :  { %v8172_v29 = vmul.f32 %v8167_v11, %v10704_v60 }
0x139f   :  { %v12130_v56 = vsub.f32 %v8156_v37, %v8172_v29 }
0x13a1   :  { %v8178_v32 = vmul.f32 %v12130_v56, %v12130_v56 }
0x13a3   :  { %v8183_v48 = vsel %vm141_vm0, %v8178_v32, 0.0 }
0x13a4   :  { %v8170_v61 = vpop.xlane.xlu0 %8169  ;;  %8184 = vadd.xlane.f32.xlu1 %v8183_v48 }
0x13a5   :  { %v8173_v45 = vmul.f32 %v8170_v61, %v10704_v60 }
0x13a7   :  { %v12136_v52 = vsub.f32 %v8157_v24, %v8173_v45 }
0x13a9   :  { %v8179_v22 = vmul.f32 %v12136_v52, %v12136_v52 }
0x13ab   :  { %v8186_v14 = vsel %vm3851_vm14, %v8179_v22, 0.0 }
0x13ac   :  { %8187 = vadd.xlane.f32.xlu0 %v8186_v14 }
0x140f   :  { %v8182_v50 = vpop.xlane.xlu2 %8181 }
0x1410   :  { %v8189_v0 = vmul.f32 %v8182_v50, %v10704_v60 }
0x1412   :  { %v8192_v25 = vadd.f32 1e-05, %v8189_v0 }
0x1414   :  { %9161 = vrsqrt.f32 %v8192_v25  ;;  %vm8201_vm13 = vweird.f32 %v8192_v25 }
0x1417   :  { %v8185_v55 = vpop.xlane.xlu1 %8184 }
0x1418   :  { %v8190_v33 = vmul.f32 %v8185_v55, %v10704_v60 }
0x141a   :  { %v9162_v8 = vpop.eup %9161  ;;  %v8193_v47 = vadd.f32 1e-05, %v8190_v33 }
0x141b   :  { %v8196_v1 = vmul.f32 %v9162_v8, %v8192_v25  ;;  %vm8202_vm14 = vweird.f32 %v9162_v8 }
0x141c   :  { %9163 = vrsqrt.f32 %v8193_v47  ;;  %vm8203_vm2 = vmor %vm8201_vm13, %vm8202_vm14  ;;  %vm8211_vm1 = vweird.f32 %v8193_v47 }
0x141d   :  { %v8197_v38 = vmul.f32 %v9162_v8, %v8196_v1 }
0x141f   :  { %v8198_v9 = vmul.f32 0.5, %v8197_v38  ;;  %v8188_v44 = vpop.xlane.xlu0 %8187 }
0x1420   :  { %v8191_v19 = vmul.f32 %v8188_v44, %v10704_v60 }
0x1421   :  { %v8199_v51 = vsub.f32 1.5, %v8198_v9 }
0x1422   :  { %v9164_v57 = vpop.eup %9163  ;;  %v8194_v53 = vadd.f32 1e-05, %v8191_v19 }
0x1423   :  { %v8200_v4 = vmul.f32 %v9162_v8, %v8199_v51  ;;  %v8206_v30 = vmul.f32 %v9164_v57, %v8193_v47  ;;  %vm8212_vm15 = vweird.f32 %v9164_v57 }
0x1424   :  { %9165 = vrsqrt.f32 %v8194_v53  ;;  %vm8213_vm3 = vmor %vm8211_vm1, %vm8212_vm15  ;;  %vm8221_vm6 = vweird.f32 %v8194_v53 }
0x1425   :  { %v8204_v59 = vsel %vm8203_vm2, %v9162_v8, %v8200_v4  ;;  %v8207_v49 = vmul.f32 %v9164_v57, %v8206_v30 }
0x1426   :  { %v8225_v60 = vmul.f32 %v8204_v59, %v8174_v5 }
0x1427   :  { %v8208_v20 = vmul.f32 0.5, %v8207_v49 }
0x1428   :  { %v8231_v17 = vmul.f32 %v9011_v43, %v8225_v60 }
0x1429   :  { %v8209_v28 = vsub.f32 1.5, %v8208_v20 }
0x142a   :  { %v9166_v54 = vpop.eup %9165  ;;  %v8237_v10 = vadd.f32 %v9012_v18, %v8231_v17 }
0x142b   :  { %v8210_v42 = vmul.f32 %v9164_v57, %v8209_v28  ;;  %v8216_v27 = vmul.f32 %v9166_v54, %v8194_v53  ;;  %vm8222_vm4 = vweird.f32 %v9166_v54 }
0x142c   :  { %v8243_v6 = vrot.slane %v8237_v10, 1  ;;  %v8244_v21 = vrot.slane %v8237_v10, 2  ;;  %v8245_v15 = vrot.slane %v8237_v10, 3  ;;  %8258 = vst [vmem:[#allocation1] ss:$9 sm:$0xff] %v8237_v10  ;;  %v8246_v39 = vrot.slane %v8237_v10, 4  ;;  %vm8223_vm11 = vmor %vm8221_vm6, %vm8222_vm4 }
0x142d   :  { %v8247_v35 = vrot.slane %v8237_v10, 5  ;;  %v8248_v13 = vrot.slane %v8237_v10, 6  ;;  %v8249_v62 = vrot.slane %v8237_v10, 7  ;;  %v8214_v12 = vsel %vm8213_vm3, %v9164_v57, %v8210_v42 }
0x142e   :  { %8260 = vst [vmem:[#allocation1 + $0x1] ss:$9 sm:$0xff] %v8243_v6  ;;  %v8217_v46 = vmul.f32 %v9166_v54, %v8216_v27  ;;  %v8226_v63 = vmul.f32 %v8214_v12, %v12130_v56 }
0x142f   :  { %8262 = vst [vmem:[#allocation1 + $0x2] ss:$9 sm:$0xff] %v8244_v21 }
0x1430   :  { %8264 = vst [vmem:[#allocation1 + $0x3] ss:$9 sm:$0xff] %v8245_v15  ;;  %v8218_v3 = vmul.f32 0.5, %v8217_v46  ;;  %v8232_v31 = vmul.f32 %v9011_v43, %v8226_v63 }
0x1431   :  { %8266 = vst [vmem:[#allocation1 + $0x4] ss:$9 sm:$0xff] %v8246_v39 }
0x1432   :  { %8268 = vst [vmem:[#allocation1 + $0x5] ss:$9 sm:$0xff] %v8247_v35  ;;  %v8219_v58 = vsub.f32 1.5, %v8218_v3  ;;  %v8238_v36 = vadd.f32 %v9012_v18, %v8232_v31 }
0x1433   :  { %8270 = vst [vmem:[#allocation1 + $0x6] ss:$9 sm:$0xff] %v8248_v13 }
0x1434   :  { %8272 = vst [vmem:[#allocation1 + $0x7] ss:$9 sm:$0xff] %v8249_v62  ;;  %v8220_v34 = vmul.f32 %v9166_v54, %v8219_v58  ;;  %v8250_v24 = vrot.slane %v8238_v36, 1  ;;  %v8251_v2 = vrot.slane %v8238_v36, 2  ;;  %v8252_v26 = vrot.slane %v8238_v36, 3 }
0x1435   :  { %v8253_v5 = vrot.slane %v8238_v36, 4  ;;  %v8254_v7 = vrot.slane %v8238_v36, 5  ;;  %v8255_v11 = vrot.slane %v8238_v36, 6  ;;  %v8256_v29 = vrot.slane %v8238_v36, 7 }
0x1436   :  { %v8224_v16 = vsel %vm8223_vm11, %v9166_v54, %v8220_v34 }
0x1437   :  { %v8227_v40 = vmul.f32 %v8224_v16, %v12136_v52 }
0x1439   :  { %v8233_v23 = vmul.f32 %v9011_v43, %v8227_v40 }
0x143b   :  { %v8273_v37 = vld [vmem:[#allocation1] sm:$0xff]  ;;  %v8239_v56 = vadd.f32 %v9012_v18, %v8233_v23 }
0x143c   :  { %8530 = vst.msk [vmem:[%s12187_s18 + $0x20] sm:$0xff] %vm141_vm0, %v8273_v37 }
0x143d   :  { %8274 = vst [vmem:[#allocation1] ss:$9 sm:$0xff] %v8238_v36  ;;  %v8257_v32 = vrot.slane %v8239_v56, 1 }
0x1444   :  { %v8275_v41 = vld [vmem:[#allocation1] sm:$0xff] }
0x1445   :  { %8276 = vst [vmem:[#allocation1] ss:$9 sm:$0xff] %v8250_v24 }
0x1446   :  { %8277 = vst [vmem:[#allocation1 + $0x1] ss:$9 sm:$0xff] %v8251_v2 }
0x1447   :  { %8278 = vst [vmem:[#allocation1 + $0x2] ss:$9 sm:$0xff] %v8252_v26 }
0x1448   :  { %8279 = vst [vmem:[#allocation1 + $0x3] ss:$9 sm:$0xff] %v8253_v5 }
0x1449   :  { %8280 = vst [vmem:[#allocation1 + $0x4] ss:$9 sm:$0xff] %v8254_v7 }
0x144a   :  { %8281 = vst [vmem:[#allocation1 + $0x5] ss:$9 sm:$0xff] %v8255_v11 }
0x144b   :  { %8282 = vst [vmem:[#allocation1 + $0x6] ss:$9 sm:$0xff] %v8256_v29 }
0x144c   :  { %8531 = vst.msk [vmem:[%s12187_s18 + $0x28] sm:$0x1] %vm12242_vm12, %v8275_v41 }
0x144d   :  { %8283 = vst [vmem:[#allocation1 + $0x7] ss:$9 sm:$0xff] %v8239_v56 }
0x1454   :  { %v8284_v48 = vld [vmem:[#allocation1] sm:$0xff] }
0x1455   :  { %8285 = vst [vmem:[#allocation1] ss:$9 sm:$0xff] %v8257_v32 }
0x1456   :  { %8532 = vst.msk [vmem:[%s12187_s18 + $0x30] sm:$0xff] %vm141_vm0, %v8284_v48 }
0x145c   :  { %v8286_v61 = vld [vmem:[#allocation1] sm:$0xff] }
0x145d   :  { %8533 = vst.msk [vmem:[%s12187_s18 + $0x38] sm:$0x1] %vm12243_vm5, %v8286_v61 }

</bundles_post_ra>
